<compile_context>
chip_gen: v5e
topology: v5e:2x2
jax: 0.10.0
libtpu: 0.0.40
codegen_flags: <defaults>
</compile_context>

<pallas_src>
import functools

import jax
import jax.numpy as jnp
from jax import lax
from jax.experimental import pallas as pl
from jax.experimental.pallas import tpu as pltpu

LN_EPS = 1e-5
BN_EPS = 1e-5
_VMEM_LIMIT = 48 * 1024 * 1024  # explicit scoped-VMEM budget (safe on v5e/v6e/v7x)


def _ln(x, g, b):
    mu = jnp.mean(x, axis=-1, keepdims=True)
    var = jnp.mean((x - mu) ** 2, axis=-1, keepdims=True)
    return (x - mu) * lax.rsqrt(var + LN_EPS) * g + b


def _swish(x):
    return x * jax.nn.sigmoid(x)


def _bf(x):
    return x.astype(jnp.bfloat16)


# ----------------------------------------------------------------------------
# Stage 1 kernel: ff1 + causal MHA + conv-module front half + BN partial sums
# ----------------------------------------------------------------------------
def _stage1_kernel(x_ref,
                   f1g_ref, f1b_ref, f1w1_ref, f1b1_ref, f1w2_ref, f1b2_ref,
                   ag_ref, ab_ref, wqkv_ref, wo_ref,
                   cg_ref, cb_ref, cw1_ref, cb1_ref, wdw_ref, bdw_ref,
                   x1_ref, dw_ref, s1_ref, s2_ref,
                   *, heads, dim_head, kernel_size, pad_left):
    x = x_ref[0]                                              # (N, D) f32
    N, D = x.shape

    # ---- ff1: x_ff1 = x + 0.5 * FF(LN(x)) ----
    h = _ln(x, f1g_ref[...], f1b_ref[...])
    h = jnp.dot(_bf(h), f1w1_ref[...],
                preferred_element_type=jnp.float32) + f1b1_ref[...]
    h = _swish(h)
    h = jnp.dot(_bf(h), f1w2_ref[...],
                preferred_element_type=jnp.float32) + f1b2_ref[...]
    x_ff1 = x + 0.5 * h

    # ---- causal multi-head attention on the ORIGINAL x (matches the spec) ----
    a = _ln(x, ag_ref[...], ab_ref[...])
    qkv = jnp.dot(_bf(a), wqkv_ref[...],
                  preferred_element_type=jnp.float32)         # (N, 3*H*Dh) f32
    hd = heads * dim_head
    scale = dim_head ** -0.5

    row = lax.broadcasted_iota(jnp.int32, (N, N), 0)
    col = lax.broadcasted_iota(jnp.int32, (N, N), 1)
    causal = col <= row

    attn_out = jnp.zeros((N, D), jnp.float32)
    for hh in range(heads):
        lo = hh * dim_head
        qh = _bf(qkv[:, lo:lo + dim_head])
        kh = _bf(qkv[:, hd + lo: hd + lo + dim_head])
        vh = _bf(qkv[:, 2 * hd + lo: 2 * hd + lo + dim_head])
        # q @ k^T without an explicit transpose (contract on the last dims).
        s = lax.dot_general(qh, kh, (((1,), (1,)), ((), ())),
                            preferred_element_type=jnp.float32) * scale
        s = jnp.where(causal, s, -1e30)
        s = s - jnp.max(s, axis=-1, keepdims=True)
        p = jnp.exp(s)
        p = p * pl.reciprocal(jnp.sum(p, axis=-1, keepdims=True), approx=True)
        oh = jnp.dot(_bf(p), vh, preferred_element_type=jnp.float32)
        # Accumulate the output projection per head (no concatenate).
        attn_out = attn_out + jnp.dot(_bf(oh), wo_ref[hh],
                                      preferred_element_type=jnp.float32)

    x1 = attn_out + x_ff1
    x1_ref[0] = x1.astype(x1_ref.dtype)

    # ---- conv module front half: LN -> 1x1 conv -> GLU -> depthwise conv ----
    c = _ln(x1, cg_ref[...], cb_ref[...])
    pw = jnp.dot(_bf(c), cw1_ref[...],
                 preferred_element_type=jnp.float32) + cb1_ref[...]   # (N, 2C)
    C = pw.shape[-1] // 2
    glu = pw[:, :C] * jax.nn.sigmoid(pw[:, C:])

    # Depthwise conv along time via sublane rolls (XLU) + edge masks:
    #   out[n] = sum_k w[k] * glu[n + k - pad_left]   (zero outside [0, N))
    wdw = wdw_ref[...]                                        # (K, C) f32
    rix = lax.broadcasted_iota(jnp.int32, (N, C), 0)
    acc = jnp.zeros((N, C), jnp.float32)
    for k in range(kernel_size):
        shift = pad_left - k
        rolled = glu if shift == 0 else pltpu.roll(glu, shift=shift % N, axis=0)
        valid = (rix >= shift) & (rix < N + shift)
        rolled = jnp.where(valid, rolled, 0.0)
        acc = acc + rolled * wdw[k:k + 1, :]
    acc = acc + bdw_ref[...]

    dw_ref[0] = acc
    # Per-sequence partial statistics for the two-phase BatchNorm.
    s1_ref[0] = jnp.sum(acc, axis=0, keepdims=True)
    s2_ref[0] = jnp.sum(acc * acc, axis=0, keepdims=True)


def _stage1(x, p, heads, dim_head, kernel_size):
    B, N, D = x.shape
    f1, a, c = p["ff1"], p["attn"], p["conv"]
    hd = heads * dim_head
    Dh = f1["w1"].shape[1]
    C = c["wdw"].shape[1]
    pad_left = kernel_size // 2
    assert max(pad_left, kernel_size - 1 - pad_left) < N, \
        "sequence length must exceed the depthwise-conv half-width"

    kern = functools.partial(_stage1_kernel, heads=heads, dim_head=dim_head,
                             kernel_size=kernel_size, pad_left=pad_left)
    rep2 = lambda shp: pl.BlockSpec(shp, lambda b: (0, 0))

    return pl.pallas_call(
        kern,
        out_shape=(
            jax.ShapeDtypeStruct((B, N, D), jnp.float32),     # x1 (residual)
            jax.ShapeDtypeStruct((B, N, C), jnp.float32),     # depthwise output
            jax.ShapeDtypeStruct((B, 1, C), jnp.float32),     # BN partial sum
            jax.ShapeDtypeStruct((B, 1, C), jnp.float32),     # BN partial sum sq
        ),
        grid=(B,),
        in_specs=[
            pl.BlockSpec((1, N, D), lambda b: (b, 0, 0)),             # x
            rep2((1, D)), rep2((1, D)),                               # ff1 LN
            rep2((D, Dh)), rep2((1, Dh)),                             # ff1 w1,b1
            rep2((Dh, D)), rep2((1, D)),                              # ff1 w2,b2
            rep2((1, D)), rep2((1, D)),                               # attn LN
            rep2((D, 3 * hd)),                                        # wqkv
            pl.BlockSpec((heads, dim_head, D), lambda b: (0, 0, 0)),  # wo (H,Dh,D)
            rep2((1, D)), rep2((1, D)),                               # conv LN
            rep2((D, 2 * C)), rep2((1, 2 * C)),                       # conv pw1
            rep2((kernel_size, C)), rep2((1, C)),                     # depthwise
        ],
        out_specs=(
            pl.BlockSpec((1, N, D), lambda b: (b, 0, 0)),
            pl.BlockSpec((1, N, C), lambda b: (b, 0, 0)),
            pl.BlockSpec((1, 1, C), lambda b: (b, 0, 0)),
            pl.BlockSpec((1, 1, C), lambda b: (b, 0, 0)),
        ),
        compiler_params=pltpu.CompilerParams(
            dimension_semantics=("parallel",),
            vmem_limit_bytes=_VMEM_LIMIT),
    )(x,
      f1["g"], f1["b"], _bf(f1["w1"]), f1["b1"], _bf(f1["w2"]), f1["b2"],
      a["g"], a["b"], _bf(a["wqkv"]),
      _bf(a["wo"]).reshape(heads, dim_head, D),
      c["g"], c["b"], _bf(c["w1"]), c["b1"], c["wdw"], c["bdw"])


# ----------------------------------------------------------------------------
# Stage 2 kernel: BN finalize -> Swish -> 1x1 conv -> +x1 -> ff2 -> post-LN
# ----------------------------------------------------------------------------
def _stage2_kernel(x1_ref, dw_ref, s1_ref, s2_ref,
                   bng_ref, bnb_ref, cw2_ref, cb2_ref,
                   f2g_ref, f2b_ref, f2w1_ref, f2b1_ref, f2w2_ref, f2b2_ref,
                   pg_ref, pb_ref, o_ref, *, count):
    x1 = x1_ref[...]                                          # (TM, D)
    dw = dw_ref[...]                                          # (TM, C)

    inv = 1.0 / count
    mu = jnp.sum(s1_ref[...], axis=0) * inv                   # (1, C)
    ex2 = jnp.sum(s2_ref[...], axis=0) * inv
    var = ex2 - mu * mu

    y = (dw - mu) * lax.rsqrt(var + BN_EPS) * bng_ref[...] + bnb_ref[...]
    y = _swish(y)
    x2 = jnp.dot(_bf(y), cw2_ref[...],
                 preferred_element_type=jnp.float32) + cb2_ref[...] + x1

    # ff2 (Scale 0.5 PreNorm FeedForward) + residual
    h = _ln(x2, f2g_ref[...], f2b_ref[...])
    h = jnp.dot(_bf(h), f2w1_ref[...],
                preferred_element_type=jnp.float32) + f2b1_ref[...]
    h = _swish(h)
    h = jnp.dot(_bf(h), f2w2_ref[...],
                preferred_element_type=jnp.float32) + f2b2_ref[...]
    x3 = x2 + 0.5 * h

    o_ref[...] = _ln(x3, pg_ref[...], pb_ref[...]).astype(o_ref.dtype)


def _row_tile(rows, cap=512):
    """Largest row tile <= cap that divides rows (multiple of 8 when tiled)."""
    if rows <= cap:
        return rows
    t = (cap // 8) * 8
    while t >= 8:
        if rows % t == 0:
            return t
        t -= 8
    return rows  # fallback: single step covering all rows


def _stage2(x1, dw, s1, s2, p, count):
    rows, D = x1.shape
    C = dw.shape[1]
    B = s1.shape[0]
    c, f2, post = p["conv"], p["ff2"], p["post"]
    Dh = f2["w1"].shape[1]
    TM = _row_tile(rows)

    kern = functools.partial(_stage2_kernel, count=float(count))
    rep = lambda shp: pl.BlockSpec(shp, lambda i, n=len(shp): (0,) * n)

    return pl.pallas_call(
        kern,
        out_shape=jax.ShapeDtypeStruct((rows, D), jnp.float32),
        grid=(rows // TM,),
        in_specs=[
            pl.BlockSpec((TM, D), lambda i: (i, 0)),          # x1 residual
            pl.BlockSpec((TM, C), lambda i: (i, 0)),          # depthwise output
            rep((B, 1, C)), rep((B, 1, C)),                   # BN partial sums
            rep((1, C)), rep((1, C)),                         # BN gamma/beta
            rep((C, D)), rep((1, D)),                         # conv pw2 w,b
            rep((1, D)), rep((1, D)),                         # ff2 LN g,b
            rep((D, Dh)), rep((1, Dh)),                       # ff2 w1,b1
            rep((Dh, D)), rep((1, D)),                        # ff2 w2,b2
            rep((1, D)), rep((1, D)),                         # post LN g,b
        ],
        out_specs=pl.BlockSpec((TM, D), lambda i: (i, 0)),
        compiler_params=pltpu.CompilerParams(
            dimension_semantics=("parallel",),
            vmem_limit_bytes=_VMEM_LIMIT),
    )(x1, dw, s1, s2,
      c["bng"], c["bnb"], _bf(c["w2"]), c["b2"],
      f2["g"], f2["b"], _bf(f2["w1"]), f2["b1"], _bf(f2["w2"]), f2["b2"],
      post["g"], post["b"])


# ----------------------------------------------------------------------------
# Full ConformerBlock forward
# ----------------------------------------------------------------------------
def conformer_block(x, p, *, heads, dim_head, kernel_size):
    B, N, D = x.shape
    x1, dw, s1, s2 = _stage1(x, p, heads, dim_head, kernel_size)
    out = _stage2(x1.reshape(B * N, D), dw.reshape(B * N, -1),
                  s1, s2, p, B * N)
    return out.reshape(B, N, D)


# ----------------------------------------------------------------------------
# Deterministic parameter init (weights stored (in, out); LN/BN params (1, d))
# ----------------------------------------------------------------------------
def init_params(key, dim, heads, dim_head, ff_mult, conv_expansion, kernel_size):
    ks = jax.random.split(key, 16)
    s = 0.05
    hd = heads * dim_head
    inner = dim * conv_expansion

    def nrm(k, shape):
        return jax.random.normal(k, shape, jnp.float32) * s

    ones = lambda n: jnp.ones((1, n), jnp.float32)
    zeros = lambda n: jnp.zeros((1, n), jnp.float32)

    return {
        "ff1": dict(g=ones(dim), b=zeros(dim),
                    w1=nrm(ks[0], (dim, dim * ff_mult)), b1=nrm(ks[1], (1, dim * ff_mult)),
                    w2=nrm(ks[2], (dim * ff_mult, dim)), b2=nrm(ks[3], (1, dim))),
        "attn": dict(g=ones(dim), b=zeros(dim),
                     wqkv=nrm(ks[4], (dim, 3 * hd)), wo=nrm(ks[5], (hd, dim))),
        "conv": dict(g=ones(dim), b=zeros(dim),
                     w1=nrm(ks[6], (dim, 2 * inner)), b1=nrm(ks[7], (1, 2 * inner)),
                     wdw=nrm(ks[8], (kernel_size, inner)), bdw=nrm(ks[9], (1, inner)),
                     bng=ones(inner), bnb=zeros(inner),
                     w2=nrm(ks[10], (inner, dim)), b2=nrm(ks[11], (1, dim))),
        "ff2": dict(g=ones(dim), b=zeros(dim),
                    w1=nrm(ks[12], (dim, dim * ff_mult)), b1=nrm(ks[13], (1, dim * ff_mult)),
                    w2=nrm(ks[14], (dim * ff_mult, dim)), b2=nrm(ks[15], (1, dim))),
        "post": dict(g=ones(dim), b=zeros(dim)),
    }


# ----------------------------------------------------------------------------
# Pure-JAX f32 reference (ground truth for the numerical check)
# ----------------------------------------------------------------------------
def _reference(x, p, *, heads, dim_head, kernel_size):
    hp = lax.Precision.HIGHEST

    def ln(v, g, b):
        mu = v.mean(-1, keepdims=True)
        var = ((v - mu) ** 2).mean(-1, keepdims=True)
        return (v - mu) / jnp.sqrt(var + LN_EPS) * g[0] + b[0]

    def swish(v):
        return v * jax.nn.sigmoid(v)

    def ff(v, q):
        h = jnp.dot(v, q["w1"], precision=hp) + q["b1"][0]
        h = swish(h)
        return jnp.dot(h, q["w2"], precision=hp) + q["b2"][0]

    B, N, D = x.shape
    x_ff1 = x + 0.5 * ff(ln(x, p["ff1"]["g"], p["ff1"]["b"]), p["ff1"])

    a = p["attn"]
    h = ln(x, a["g"], a["b"])
    qkv = jnp.dot(h, a["wqkv"], precision=hp)
    hd = heads * dim_head
    qh = qkv[..., :hd].reshape(B, N, heads, dim_head)
    kh = qkv[..., hd:2 * hd].reshape(B, N, heads, dim_head)
    vh = qkv[..., 2 * hd:].reshape(B, N, heads, dim_head)
    s = jnp.einsum("bnhd,bmhd->bhnm", qh, kh, precision=hp) * dim_head ** -0.5
    mask = jnp.tril(jnp.ones((N, N), bool))
    s = jnp.where(mask, s, -1e30)
    att = jax.nn.softmax(s, axis=-1)
    o = jnp.einsum("bhnm,bmhd->bnhd", att, vh, precision=hp).reshape(B, N, hd)
    x1 = jnp.dot(o, a["wo"], precision=hp) + x_ff1

    c = p["conv"]
    hh = ln(x1, c["g"], c["b"])
    pw1 = jnp.dot(hh, c["w1"], precision=hp) + c["b1"][0]
    Cn = c["wdw"].shape[1]
    glu = pw1[..., :Cn] * jax.nn.sigmoid(pw1[..., Cn:])
    pad_l = kernel_size // 2
    pad_r = pad_l - (kernel_size + 1) % 2
    xp = jnp.pad(glu, ((0, 0), (pad_l, pad_r), (0, 0)))
    dw = sum(xp[:, k:k + N, :] * c["wdw"][k] for k in range(kernel_size)) + c["bdw"][0]
    mu = dw.mean(axis=(0, 1), keepdims=True)
    var = ((dw - mu) ** 2).mean(axis=(0, 1), keepdims=True)
    y = (dw - mu) / jnp.sqrt(var + BN_EPS) * c["bng"][0] + c["bnb"][0]
    y = swish(y)
    x2 = jnp.dot(y, c["w2"], precision=hp) + c["b2"][0] + x1

    x3 = x2 + 0.5 * ff(ln(x2, p["ff2"]["g"], p["ff2"]["b"]), p["ff2"])
    return ln(x3, p["post"]["g"], p["post"]["b"])


if __name__ == "__main__":
    B, N, DIM = 2, 64, 64
    HEADS, DIM_HEAD = 4, 16
    FF_MULT, CONV_EXP, KSIZE = 4, 2, 31

    key = jax.random.PRNGKey(0)
    kx, kp = jax.random.split(key)
    x = jax.random.normal(kx, (B, N, DIM), jnp.float32)
    params = init_params(kp, DIM, HEADS, DIM_HEAD, FF_MULT, CONV_EXP, KSIZE)

    fwd = jax.jit(functools.partial(conformer_block, heads=HEADS,
                                    dim_head=DIM_HEAD, kernel_size=KSIZE))
    out = jax.block_until_ready(fwd(x, params))

    ref = _reference(x, params, heads=HEADS, dim_head=DIM_HEAD, kernel_size=KSIZE)
    assert out.shape == (B, N, DIM)
    assert bool(jnp.all(jnp.isfinite(out)))
    max_diff = float(jnp.max(jnp.abs(out - ref)))
    assert max_diff < 5e-2, f"mismatch vs reference: {max_diff}"

    print("KERNEL_OK")
</pallas_src>

<mosaic_0001>
module attributes {stable_mosaic.version = 11 : i64} {
  func.func @_stage2_kernel(%arg0: i32, %arg1: memref<128x64xf32, #tpu.memory_space<vmem>>, %arg2: memref<128x128xf32, #tpu.memory_space<vmem>>, %arg3: memref<2x1x128xf32, #tpu.memory_space<vmem>>, %arg4: memref<2x1x128xf32, #tpu.memory_space<vmem>>, %arg5: memref<1x128xf32, #tpu.memory_space<vmem>>, %arg6: memref<1x128xf32, #tpu.memory_space<vmem>>, %arg7: memref<128x64xbf16, #tpu.memory_space<vmem>>, %arg8: memref<1x64xf32, #tpu.memory_space<vmem>>, %arg9: memref<1x64xf32, #tpu.memory_space<vmem>>, %arg10: memref<1x64xf32, #tpu.memory_space<vmem>>, %arg11: memref<64x256xbf16, #tpu.memory_space<vmem>>, %arg12: memref<1x256xf32, #tpu.memory_space<vmem>>, %arg13: memref<256x64xbf16, #tpu.memory_space<vmem>>, %arg14: memref<1x64xf32, #tpu.memory_space<vmem>>, %arg15: memref<1x64xf32, #tpu.memory_space<vmem>>, %arg16: memref<1x64xf32, #tpu.memory_space<vmem>>, %arg17: memref<128x64xf32, #tpu.memory_space<vmem>>) attributes {dimension_semantics = [#tpu.dimension_semantics<parallel>], iteration_bounds = array<i64: 1>, scalar_prefetch = 0 : i64, scratch_operands = 0 : i64, tpu.core_type = #tpu.core_type<tc>, window_params = [{transform_indices = @transform_0, window_bounds = array<i64: 128, 64>}, {transform_indices = @transform_1, window_bounds = array<i64: 128, 128>}, {pipeline_mode = #tpu.pipeline_mode<synchronous>, transform_indices = @transform_2, window_bounds = array<i64: 2, 1, 128>}, {pipeline_mode = #tpu.pipeline_mode<synchronous>, transform_indices = @transform_3, window_bounds = array<i64: 2, 1, 128>}, {pipeline_mode = #tpu.pipeline_mode<synchronous>, transform_indices = @transform_4, window_bounds = array<i64: 1, 128>}, {pipeline_mode = #tpu.pipeline_mode<synchronous>, transform_indices = @transform_5, window_bounds = array<i64: 1, 128>}, {pipeline_mode = #tpu.pipeline_mode<synchronous>, transform_indices = @transform_6, window_bounds = array<i64: 128, 64>}, {pipeline_mode = #tpu.pipeline_mode<synchronous>, transform_indices = @transform_7, window_bounds = array<i64: 1, 64>}, {pipeline_mode = #tpu.pipeline_mode<synchronous>, transform_indices = @transform_8, window_bounds = array<i64: 1, 64>}, {pipeline_mode = #tpu.pipeline_mode<synchronous>, transform_indices = @transform_9, window_bounds = array<i64: 1, 64>}, {pipeline_mode = #tpu.pipeline_mode<synchronous>, transform_indices = @transform_10, window_bounds = array<i64: 64, 256>}, {pipeline_mode = #tpu.pipeline_mode<synchronous>, transform_indices = @transform_11, window_bounds = array<i64: 1, 256>}, {pipeline_mode = #tpu.pipeline_mode<synchronous>, transform_indices = @transform_12, window_bounds = array<i64: 256, 64>}, {pipeline_mode = #tpu.pipeline_mode<synchronous>, transform_indices = @transform_13, window_bounds = array<i64: 1, 64>}, {pipeline_mode = #tpu.pipeline_mode<synchronous>, transform_indices = @transform_14, window_bounds = array<i64: 1, 64>}, {pipeline_mode = #tpu.pipeline_mode<synchronous>, transform_indices = @transform_15, window_bounds = array<i64: 1, 64>}, {transform_indices = @transform_16, window_bounds = array<i64: 128, 64>}]} {
    %c0 = arith.constant 0 : index
    %c0_0 = arith.constant 0 : index
    %0 = vector.load %arg1[%c0, %c0_0] : memref<128x64xf32, #tpu.memory_space<vmem>>, vector<128x64xf32>
    %c0_1 = arith.constant 0 : index
    %c0_2 = arith.constant 0 : index
    %1 = vector.load %arg2[%c0_1, %c0_2] : memref<128x128xf32, #tpu.memory_space<vmem>>, vector<128x128xf32>
    %c0_3 = arith.constant 0 : index
    %c0_4 = arith.constant 0 : index
    %c0_5 = arith.constant 0 : index
    %2 = vector.load %arg3[%c0_3, %c0_4, %c0_5] : memref<2x1x128xf32, #tpu.memory_space<vmem>>, vector<2x1x128xf32>
    %cst = arith.constant dense<0.000000e+00> : vector<1x128xf32>
    %3 = vector.multi_reduction <add>, %2, %cst [0] : vector<2x1x128xf32> to vector<1x128xf32>
    %cst_6 = arith.constant 7.812500e-03 : f32
    %4 = vector.broadcast %cst_6 : f32 to vector<1x128xf32>
    %5 = arith.mulf %3, %4 : vector<1x128xf32>
    %c0_7 = arith.constant 0 : index
    %c0_8 = arith.constant 0 : index
    %c0_9 = arith.constant 0 : index
    %6 = vector.load %arg4[%c0_7, %c0_8, %c0_9] : memref<2x1x128xf32, #tpu.memory_space<vmem>>, vector<2x1x128xf32>
    %cst_10 = arith.constant dense<0.000000e+00> : vector<1x128xf32>
    %7 = vector.multi_reduction <add>, %6, %cst_10 [0] : vector<2x1x128xf32> to vector<1x128xf32>
    %cst_11 = arith.constant 7.812500e-03 : f32
    %8 = vector.broadcast %cst_11 : f32 to vector<1x128xf32>
    %9 = arith.mulf %7, %8 : vector<1x128xf32>
    %10 = arith.mulf %5, %5 : vector<1x128xf32>
    %11 = arith.subf %9, %10 : vector<1x128xf32>
    %12 = vector.broadcast %5 : vector<1x128xf32> to vector<128x128xf32>
    %13 = arith.subf %1, %12 : vector<128x128xf32>
    %cst_12 = arith.constant 9.99999974E-6 : f32
    %14 = vector.broadcast %cst_12 : f32 to vector<1x128xf32>
    %15 = arith.addf %11, %14 : vector<1x128xf32>
    %16 = math.rsqrt %15 : vector<1x128xf32>
    %17 = vector.broadcast %16 : vector<1x128xf32> to vector<128x128xf32>
    %18 = arith.mulf %13, %17 : vector<128x128xf32>
    %c0_13 = arith.constant 0 : index
    %c0_14 = arith.constant 0 : index
    %19 = vector.load %arg5[%c0_13, %c0_14] : memref<1x128xf32, #tpu.memory_space<vmem>>, vector<1x128xf32>
    %20 = vector.broadcast %19 : vector<1x128xf32> to vector<128x128xf32>
    %21 = arith.mulf %18, %20 : vector<128x128xf32>
    %c0_15 = arith.constant 0 : index
    %c0_16 = arith.constant 0 : index
    %22 = vector.load %arg6[%c0_15, %c0_16] : memref<1x128xf32, #tpu.memory_space<vmem>>, vector<1x128xf32>
    %23 = vector.broadcast %22 : vector<1x128xf32> to vector<128x128xf32>
    %24 = arith.addf %21, %23 : vector<128x128xf32>
    %25 = arith.negf %24 : vector<128x128xf32>
    %26 = math.exp %25 : vector<128x128xf32>
    %cst_17 = arith.constant 1.000000e+00 : f32
    %27 = vector.broadcast %cst_17 : f32 to vector<128x128xf32>
    %28 = arith.addf %27, %26 : vector<128x128xf32>
    %29 = arith.divf %27, %28 : vector<128x128xf32>
    %30 = arith.mulf %24, %29 : vector<128x128xf32>
    %31 = arith.truncf %30 : vector<128x128xf32> to vector<128x128xbf16>
    %c0_18 = arith.constant 0 : index
    %c0_19 = arith.constant 0 : index
    %32 = vector.load %arg7[%c0_18, %c0_19] : memref<128x64xbf16, #tpu.memory_space<vmem>>, vector<128x64xbf16>
    %cst_20 = arith.constant dense<0.000000e+00> : vector<128x64xf32>
    %33 = tpu.matmul %31, %32, %cst_20 {dimension_numbers = #tpu.dot_dimension_numbers<[1], [0], [0], [1], [0, 0, 1, 1], [], []>} : vector<128x128xbf16>, vector<128x64xbf16>, vector<128x64xf32> -> vector<128x64xf32>
    %c0_21 = arith.constant 0 : index
    %c0_22 = arith.constant 0 : index
    %34 = vector.load %arg8[%c0_21, %c0_22] : memref<1x64xf32, #tpu.memory_space<vmem>>, vector<1x64xf32>
    %35 = vector.broadcast %34 : vector<1x64xf32> to vector<128x64xf32>
    %36 = arith.addf %33, %35 : vector<128x64xf32>
    %37 = arith.addf %36, %0 : vector<128x64xf32>
    %c0_23 = arith.constant 0 : index
    %c0_24 = arith.constant 0 : index
    %38 = vector.load %arg9[%c0_23, %c0_24] : memref<1x64xf32, #tpu.memory_space<vmem>>, vector<1x64xf32>
    %c0_25 = arith.constant 0 : index
    %c0_26 = arith.constant 0 : index
    %39 = vector.load %arg10[%c0_25, %c0_26] : memref<1x64xf32, #tpu.memory_space<vmem>>, vector<1x64xf32>
    %cst_27 = arith.constant dense<0.000000e+00> : vector<128xf32>
    %40 = vector.multi_reduction <add>, %37, %cst_27 [1] : vector<128x64xf32> to vector<128xf32>
    %41 = vector.shape_cast %40 : vector<128xf32> to vector<128x1xf32>
    %cst_28 = arith.constant 6.400000e+01 : f32
    %42 = vector.broadcast %cst_28 : f32 to vector<128x1xf32>
    %43 = arith.divf %41, %42 : vector<128x1xf32>
    %44 = vector.broadcast %43 : vector<128x1xf32> to vector<128x64xf32>
    %45 = arith.subf %37, %44 : vector<128x64xf32>
    %46 = arith.mulf %45, %45 : vector<128x64xf32>
    %cst_29 = arith.constant dense<0.000000e+00> : vector<128xf32>
    %47 = vector.multi_reduction <add>, %46, %cst_29 [1] : vector<128x64xf32> to vector<128xf32>
    %48 = vector.shape_cast %47 : vector<128xf32> to vector<128x1xf32>
    %cst_30 = arith.constant 6.400000e+01 : f32
    %49 = vector.broadcast %cst_30 : f32 to vector<128x1xf32>
    %50 = arith.divf %48, %49 : vector<128x1xf32>
    %51 = vector.broadcast %43 : vector<128x1xf32> to vector<128x64xf32>
    %52 = arith.subf %37, %51 : vector<128x64xf32>
    %cst_31 = arith.constant 9.99999974E-6 : f32
    %53 = vector.broadcast %cst_31 : f32 to vector<128x1xf32>
    %54 = arith.addf %50, %53 : vector<128x1xf32>
    %55 = math.rsqrt %54 : vector<128x1xf32>
    %56 = vector.broadcast %55 : vector<128x1xf32> to vector<128x64xf32>
    %57 = arith.mulf %52, %56 : vector<128x64xf32>
    %58 = vector.broadcast %38 : vector<1x64xf32> to vector<128x64xf32>
    %59 = arith.mulf %57, %58 : vector<128x64xf32>
    %60 = vector.broadcast %39 : vector<1x64xf32> to vector<128x64xf32>
    %61 = arith.addf %59, %60 : vector<128x64xf32>
    %62 = arith.truncf %61 : vector<128x64xf32> to vector<128x64xbf16>
    %c0_32 = arith.constant 0 : index
    %c0_33 = arith.constant 0 : index
    %63 = vector.load %arg11[%c0_32, %c0_33] : memref<64x256xbf16, #tpu.memory_space<vmem>>, vector<64x256xbf16>
    %cst_34 = arith.constant dense<0.000000e+00> : vector<128x256xf32>
    %64 = tpu.matmul %62, %63, %cst_34 {dimension_numbers = #tpu.dot_dimension_numbers<[1], [0], [0], [1], [0, 0, 1, 1], [], []>} : vector<128x64xbf16>, vector<64x256xbf16>, vector<128x256xf32> -> vector<128x256xf32>
    %c0_35 = arith.constant 0 : index
    %c0_36 = arith.constant 0 : index
    %65 = vector.load %arg12[%c0_35, %c0_36] : memref<1x256xf32, #tpu.memory_space<vmem>>, vector<1x256xf32>
    %66 = vector.broadcast %65 : vector<1x256xf32> to vector<128x256xf32>
    %67 = arith.addf %64, %66 : vector<128x256xf32>
    %68 = arith.negf %67 : vector<128x256xf32>
    %69 = math.exp %68 : vector<128x256xf32>
    %cst_37 = arith.constant 1.000000e+00 : f32
    %70 = vector.broadcast %cst_37 : f32 to vector<128x256xf32>
    %71 = arith.addf %70, %69 : vector<128x256xf32>
    %72 = arith.divf %70, %71 : vector<128x256xf32>
    %73 = arith.mulf %67, %72 : vector<128x256xf32>
    %74 = arith.truncf %73 : vector<128x256xf32> to vector<128x256xbf16>
    %c0_38 = arith.constant 0 : index
    %c0_39 = arith.constant 0 : index
    %75 = vector.load %arg13[%c0_38, %c0_39] : memref<256x64xbf16, #tpu.memory_space<vmem>>, vector<256x64xbf16>
    %cst_40 = arith.constant dense<0.000000e+00> : vector<128x64xf32>
    %76 = tpu.matmul %74, %75, %cst_40 {dimension_numbers = #tpu.dot_dimension_numbers<[1], [0], [0], [1], [0, 0, 1, 1], [], []>} : vector<128x256xbf16>, vector<256x64xbf16>, vector<128x64xf32> -> vector<128x64xf32>
    %c0_41 = arith.constant 0 : index
    %c0_42 = arith.constant 0 : index
    %77 = vector.load %arg14[%c0_41, %c0_42] : memref<1x64xf32, #tpu.memory_space<vmem>>, vector<1x64xf32>
    %78 = vector.broadcast %77 : vector<1x64xf32> to vector<128x64xf32>
    %79 = arith.addf %76, %78 : vector<128x64xf32>
    %cst_43 = arith.constant 5.000000e-01 : f32
    %80 = vector.broadcast %cst_43 : f32 to vector<128x64xf32>
    %81 = arith.mulf %80, %79 : vector<128x64xf32>
    %82 = arith.addf %37, %81 : vector<128x64xf32>
    %c0_44 = arith.constant 0 : index
    %c0_45 = arith.constant 0 : index
    %83 = vector.load %arg15[%c0_44, %c0_45] : memref<1x64xf32, #tpu.memory_space<vmem>>, vector<1x64xf32>
    %c0_46 = arith.constant 0 : index
    %c0_47 = arith.constant 0 : index
    %84 = vector.load %arg16[%c0_46, %c0_47] : memref<1x64xf32, #tpu.memory_space<vmem>>, vector<1x64xf32>
    %cst_48 = arith.constant dense<0.000000e+00> : vector<128xf32>
    %85 = vector.multi_reduction <add>, %82, %cst_48 [1] : vector<128x64xf32> to vector<128xf32>
    %86 = vector.shape_cast %85 : vector<128xf32> to vector<128x1xf32>
    %cst_49 = arith.constant 6.400000e+01 : f32
    %87 = vector.broadcast %cst_49 : f32 to vector<128x1xf32>
    %88 = arith.divf %86, %87 : vector<128x1xf32>
    %89 = vector.broadcast %88 : vector<128x1xf32> to vector<128x64xf32>
    %90 = arith.subf %82, %89 : vector<128x64xf32>
    %91 = arith.mulf %90, %90 : vector<128x64xf32>
    %cst_50 = arith.constant dense<0.000000e+00> : vector<128xf32>
    %92 = vector.multi_reduction <add>, %91, %cst_50 [1] : vector<128x64xf32> to vector<128xf32>
    %93 = vector.shape_cast %92 : vector<128xf32> to vector<128x1xf32>
    %cst_51 = arith.constant 6.400000e+01 : f32
    %94 = vector.broadcast %cst_51 : f32 to vector<128x1xf32>
    %95 = arith.divf %93, %94 : vector<128x1xf32>
    %96 = vector.broadcast %88 : vector<128x1xf32> to vector<128x64xf32>
    %97 = arith.subf %82, %96 : vector<128x64xf32>
    %cst_52 = arith.constant 9.99999974E-6 : f32
    %98 = vector.broadcast %cst_52 : f32 to vector<128x1xf32>
    %99 = arith.addf %95, %98 : vector<128x1xf32>
    %100 = math.rsqrt %99 : vector<128x1xf32>
    %101 = vector.broadcast %100 : vector<128x1xf32> to vector<128x64xf32>
    %102 = arith.mulf %97, %101 : vector<128x64xf32>
    %103 = vector.broadcast %83 : vector<1x64xf32> to vector<128x64xf32>
    %104 = arith.mulf %102, %103 : vector<128x64xf32>
    %105 = vector.broadcast %84 : vector<1x64xf32> to vector<128x64xf32>
    %106 = arith.addf %104, %105 : vector<128x64xf32>
    %c0_53 = arith.constant 0 : index
    %c0_54 = arith.constant 0 : index
    %107 = vector.load %arg17[%c0_53, %c0_54] : memref<128x64xf32, #tpu.memory_space<vmem>>, vector<128x64xf32>
    tpu.vector_store %arg17[%c0_53, %c0_54], %106 {strides = array<i32>} : memref<128x64xf32, #tpu.memory_space<vmem>>, vector<128x64xf32>,
    return
  }
  func.func @transform_0(%arg0: i32) -> (i32, i32) {
    %c0_i32 = arith.constant 0 : i32
    %c0_i32_0 = arith.constant 0 : i32
    return %arg0, %c0_i32 : i32, i32
  }
  func.func @transform_1(%arg0: i32) -> (i32, i32) {
    %c0_i32 = arith.constant 0 : i32
    %c0_i32_0 = arith.constant 0 : i32
    return %arg0, %c0_i32 : i32, i32
  }
  func.func @transform_2(%arg0: i32) -> (i32, i32, i32) {
    %c0_i32 = arith.constant 0 : i32
    %c0_i32_0 = arith.constant 0 : i32
    %c0_i32_1 = arith.constant 0 : i32
    %c0_i32_2 = arith.constant 0 : i32
    return %c0_i32, %c0_i32_0, %c0_i32_1 : i32, i32, i32
  }
  func.func @transform_3(%arg0: i32) -> (i32, i32, i32) {
    %c0_i32 = arith.constant 0 : i32
    %c0_i32_0 = arith.constant 0 : i32
    %c0_i32_1 = arith.constant 0 : i32
    %c0_i32_2 = arith.constant 0 : i32
    return %c0_i32, %c0_i32_0, %c0_i32_1 : i32, i32, i32
  }
  func.func @transform_4(%arg0: i32) -> (i32, i32) {
    %c0_i32 = arith.constant 0 : i32
    %c0_i32_0 = arith.constant 0 : i32
    %c0_i32_1 = arith.constant 0 : i32
    return %c0_i32, %c0_i32_0 : i32, i32
  }
  func.func @transform_5(%arg0: i32) -> (i32, i32) {
    %c0_i32 = arith.constant 0 : i32
    %c0_i32_0 = arith.constant 0 : i32
    %c0_i32_1 = arith.constant 0 : i32
    return %c0_i32, %c0_i32_0 : i32, i32
  }
  func.func @transform_6(%arg0: i32) -> (i32, i32) {
    %c0_i32 = arith.constant 0 : i32
    %c0_i32_0 = arith.constant 0 : i32
    %c0_i32_1 = arith.constant 0 : i32
    return %c0_i32, %c0_i32_0 : i32, i32
  }
  func.func @transform_7(%arg0: i32) -> (i32, i32) {
    %c0_i32 = arith.constant 0 : i32
    %c0_i32_0 = arith.constant 0 : i32
    %c0_i32_1 = arith.constant 0 : i32
    return %c0_i32, %c0_i32_0 : i32, i32
  }
  func.func @transform_8(%arg0: i32) -> (i32, i32) {
    %c0_i32 = arith.constant 0 : i32
    %c0_i32_0 = arith.constant 0 : i32
    %c0_i32_1 = arith.constant 0 : i32
    return %c0_i32, %c0_i32_0 : i32, i32
  }
  func.func @transform_9(%arg0: i32) -> (i32, i32) {
    %c0_i32 = arith.constant 0 : i32
    %c0_i32_0 = arith.constant 0 : i32
    %c0_i32_1 = arith.constant 0 : i32
    return %c0_i32, %c0_i32_0 : i32, i32
  }
  func.func @transform_10(%arg0: i32) -> (i32, i32) {
    %c0_i32 = arith.constant 0 : i32
    %c0_i32_0 = arith.constant 0 : i32
    %c0_i32_1 = arith.constant 0 : i32
    return %c0_i32, %c0_i32_0 : i32, i32
  }
  func.func @transform_11(%arg0: i32) -> (i32, i32) {
    %c0_i32 = arith.constant 0 : i32
    %c0_i32_0 = arith.constant 0 : i32
    %c0_i32_1 = arith.constant 0 : i32
    return %c0_i32, %c0_i32_0 : i32, i32
  }
  func.func @transform_12(%arg0: i32) -> (i32, i32) {
    %c0_i32 = arith.constant 0 : i32
    %c0_i32_0 = arith.constant 0 : i32
    %c0_i32_1 = arith.constant 0 : i32
    return %c0_i32, %c0_i32_0 : i32, i32
  }
  func.func @transform_13(%arg0: i32) -> (i32, i32) {
    %c0_i32 = arith.constant 0 : i32
    %c0_i32_0 = arith.constant 0 : i32
    %c0_i32_1 = arith.constant 0 : i32
    return %c0_i32, %c0_i32_0 : i32, i32
  }
  func.func @transform_14(%arg0: i32) -> (i32, i32) {
    %c0_i32 = arith.constant 0 : i32
    %c0_i32_0 = arith.constant 0 : i32
    %c0_i32_1 = arith.constant 0 : i32
    return %c0_i32, %c0_i32_0 : i32, i32
  }
  func.func @transform_15(%arg0: i32) -> (i32, i32) {
    %c0_i32 = arith.constant 0 : i32
    %c0_i32_0 = arith.constant 0 : i32
    %c0_i32_1 = arith.constant 0 : i32
    return %c0_i32, %c0_i32_0 : i32, i32
  }
  func.func @transform_16(%arg0: i32) -> (i32, i32) {
    %c0_i32 = arith.constant 0 : i32
    %c0_i32_0 = arith.constant 0 : i32
    return %arg0, %c0_i32 : i32, i32
  }
}

module attributes {stable_mosaic.version = 11 : i64} {
  func.func @_stage1_kernel(%arg0: i32, %arg1: memref<1x64x64xf32, #tpu.memory_space<vmem>>, %arg2: memref<1x64xf32, #tpu.memory_space<vmem>>, %arg3: memref<1x64xf32, #tpu.memory_space<vmem>>, %arg4: memref<64x256xbf16, #tpu.memory_space<vmem>>, %arg5: memref<1x256xf32, #tpu.memory_space<vmem>>, %arg6: memref<256x64xbf16, #tpu.memory_space<vmem>>, %arg7: memref<1x64xf32, #tpu.memory_space<vmem>>, %arg8: memref<1x64xf32, #tpu.memory_space<vmem>>, %arg9: memref<1x64xf32, #tpu.memory_space<vmem>>, %arg10: memref<64x192xbf16, #tpu.memory_space<vmem>>, %arg11: memref<4x16x64xbf16, #tpu.memory_space<vmem>>, %arg12: memref<1x64xf32, #tpu.memory_space<vmem>>, %arg13: memref<1x64xf32, #tpu.memory_space<vmem>>, %arg14: memref<64x256xbf16, #tpu.memory_space<vmem>>, %arg15: memref<1x256xf32, #tpu.memory_space<vmem>>, %arg16: memref<31x128xf32, #tpu.memory_space<vmem>>, %arg17: memref<1x128xf32, #tpu.memory_space<vmem>>, %arg18: memref<1x64x64xf32, #tpu.memory_space<vmem>>, %arg19: memref<1x64x128xf32, #tpu.memory_space<vmem>>, %arg20: memref<1x1x128xf32, #tpu.memory_space<vmem>>, %arg21: memref<1x1x128xf32, #tpu.memory_space<vmem>>) attributes {dimension_semantics = [#tpu.dimension_semantics<parallel>], iteration_bounds = array<i64: 2>, scalar_prefetch = 0 : i64, scratch_operands = 0 : i64, tpu.core_type = #tpu.core_type<tc>, window_params = [{transform_indices = @transform_0, window_bounds = array<i64: 1, 64, 64>}, {pipeline_mode = #tpu.pipeline_mode<synchronous>, transform_indices = @transform_1, window_bounds = array<i64: 1, 64>}, {pipeline_mode = #tpu.pipeline_mode<synchronous>, transform_indices = @transform_2, window_bounds = array<i64: 1, 64>}, {pipeline_mode = #tpu.pipeline_mode<synchronous>, transform_indices = @transform_3, window_bounds = array<i64: 64, 256>}, {pipeline_mode = #tpu.pipeline_mode<synchronous>, transform_indices = @transform_4, window_bounds = array<i64: 1, 256>}, {pipeline_mode = #tpu.pipeline_mode<synchronous>, transform_indices = @transform_5, window_bounds = array<i64: 256, 64>}, {pipeline_mode = #tpu.pipeline_mode<synchronous>, transform_indices = @transform_6, window_bounds = array<i64: 1, 64>}, {pipeline_mode = #tpu.pipeline_mode<synchronous>, transform_indices = @transform_7, window_bounds = array<i64: 1, 64>}, {pipeline_mode = #tpu.pipeline_mode<synchronous>, transform_indices = @transform_8, window_bounds = array<i64: 1, 64>}, {pipeline_mode = #tpu.pipeline_mode<synchronous>, transform_indices = @transform_9, window_bounds = array<i64: 64, 192>}, {pipeline_mode = #tpu.pipeline_mode<synchronous>, transform_indices = @transform_10, window_bounds = array<i64: 4, 16, 64>}, {pipeline_mode = #tpu.pipeline_mode<synchronous>, transform_indices = @transform_11, window_bounds = array<i64: 1, 64>}, {pipeline_mode = #tpu.pipeline_mode<synchronous>, transform_indices = @transform_12, window_bounds = array<i64: 1, 64>}, {pipeline_mode = #tpu.pipeline_mode<synchronous>, transform_indices = @transform_13, window_bounds = array<i64: 64, 256>}, {pipeline_mode = #tpu.pipeline_mode<synchronous>, transform_indices = @transform_14, window_bounds = array<i64: 1, 256>}, {pipeline_mode = #tpu.pipeline_mode<synchronous>, transform_indices = @transform_15, window_bounds = array<i64: 31, 128>}, {pipeline_mode = #tpu.pipeline_mode<synchronous>, transform_indices = @transform_16, window_bounds = array<i64: 1, 128>}, {transform_indices = @transform_17, window_bounds = array<i64: 1, 64, 64>}, {transform_indices = @transform_18, window_bounds = array<i64: 1, 64, 128>}, {transform_indices = @transform_19, window_bounds = array<i64: 1, 1, 128>}, {transform_indices = @transform_20, window_bounds = array<i64: 1, 1, 128>}]} {
    %c0 = arith.constant 0 : index
    %c0_0 = arith.constant 0 : index
    %c0_1 = arith.constant 0 : index
    %0 = vector.load %arg1[%c0, %c0_0, %c0_1] : memref<1x64x64xf32, #tpu.memory_space<vmem>>, vector<1x64x64xf32>
    %1 = vector.shape_cast %0 : vector<1x64x64xf32> to vector<64x64xf32>
    %c0_2 = arith.constant 0 : index
    %c0_3 = arith.constant 0 : index
    %2 = vector.load %arg2[%c0_2, %c0_3] : memref<1x64xf32, #tpu.memory_space<vmem>>, vector<1x64xf32>
    %c0_4 = arith.constant 0 : index
    %c0_5 = arith.constant 0 : index
    %3 = vector.load %arg3[%c0_4, %c0_5] : memref<1x64xf32, #tpu.memory_space<vmem>>, vector<1x64xf32>
    %cst = arith.constant dense<0.000000e+00> : vector<64xf32>
    %4 = vector.multi_reduction <add>, %1, %cst [1] : vector<64x64xf32> to vector<64xf32>
    %5 = vector.shape_cast %4 : vector<64xf32> to vector<64x1xf32>
    %cst_6 = arith.constant 6.400000e+01 : f32
    %6 = vector.broadcast %cst_6 : f32 to vector<64x1xf32>
    %7 = arith.divf %5, %6 : vector<64x1xf32>
    %8 = vector.broadcast %7 : vector<64x1xf32> to vector<64x64xf32>
    %9 = arith.subf %1, %8 : vector<64x64xf32>
    %10 = arith.mulf %9, %9 : vector<64x64xf32>
    %cst_7 = arith.constant dense<0.000000e+00> : vector<64xf32>
    %11 = vector.multi_reduction <add>, %10, %cst_7 [1] : vector<64x64xf32> to vector<64xf32>
    %12 = vector.shape_cast %11 : vector<64xf32> to vector<64x1xf32>
    %cst_8 = arith.constant 6.400000e+01 : f32
    %13 = vector.broadcast %cst_8 : f32 to vector<64x1xf32>
    %14 = arith.divf %12, %13 : vector<64x1xf32>
    %15 = vector.broadcast %7 : vector<64x1xf32> to vector<64x64xf32>
    %16 = arith.subf %1, %15 : vector<64x64xf32>
    %cst_9 = arith.constant 9.99999974E-6 : f32
    %17 = vector.broadcast %cst_9 : f32 to vector<64x1xf32>
    %18 = arith.addf %14, %17 : vector<64x1xf32>
    %19 = math.rsqrt %18 : vector<64x1xf32>
    %20 = vector.broadcast %19 : vector<64x1xf32> to vector<64x64xf32>
    %21 = arith.mulf %16, %20 : vector<64x64xf32>
    %22 = vector.broadcast %2 : vector<1x64xf32> to vector<64x64xf32>
    %23 = arith.mulf %21, %22 : vector<64x64xf32>
    %24 = vector.broadcast %3 : vector<1x64xf32> to vector<64x64xf32>
    %25 = arith.addf %23, %24 : vector<64x64xf32>
    %26 = arith.truncf %25 : vector<64x64xf32> to vector<64x64xbf16>
    %c0_10 = arith.constant 0 : index
    %c0_11 = arith.constant 0 : index
    %27 = vector.load %arg4[%c0_10, %c0_11] : memref<64x256xbf16, #tpu.memory_space<vmem>>, vector<64x256xbf16>
    %cst_12 = arith.constant dense<0.000000e+00> : vector<64x256xf32>
    %28 = tpu.matmul %26, %27, %cst_12 {dimension_numbers = #tpu.dot_dimension_numbers<[1], [0], [0], [1], [0, 0, 1, 1], [], []>} : vector<64x64xbf16>, vector<64x256xbf16>, vector<64x256xf32> -> vector<64x256xf32>
    %c0_13 = arith.constant 0 : index
    %c0_14 = arith.constant 0 : index
    %29 = vector.load %arg5[%c0_13, %c0_14] : memref<1x256xf32, #tpu.memory_space<vmem>>, vector<1x256xf32>
    %30 = vector.broadcast %29 : vector<1x256xf32> to vector<64x256xf32>
    %31 = arith.addf %28, %30 : vector<64x256xf32>
    %32 = arith.negf %31 : vector<64x256xf32>
    %33 = math.exp %32 : vector<64x256xf32>
    %cst_15 = arith.constant 1.000000e+00 : f32
    %34 = vector.broadcast %cst_15 : f32 to vector<64x256xf32>
    %35 = arith.addf %34, %33 : vector<64x256xf32>
    %36 = arith.divf %34, %35 : vector<64x256xf32>
    %37 = arith.mulf %31, %36 : vector<64x256xf32>
    %38 = arith.truncf %37 : vector<64x256xf32> to vector<64x256xbf16>
    %c0_16 = arith.constant 0 : index
    %c0_17 = arith.constant 0 : index
    %39 = vector.load %arg6[%c0_16, %c0_17] : memref<256x64xbf16, #tpu.memory_space<vmem>>, vector<256x64xbf16>
    %cst_18 = arith.constant dense<0.000000e+00> : vector<64x64xf32>
    %40 = tpu.matmul %38, %39, %cst_18 {dimension_numbers = #tpu.dot_dimension_numbers<[1], [0], [0], [1], [0, 0, 1, 1], [], []>} : vector<64x256xbf16>, vector<256x64xbf16>, vector<64x64xf32> -> vector<64x64xf32>
    %c0_19 = arith.constant 0 : index
    %c0_20 = arith.constant 0 : index
    %41 = vector.load %arg7[%c0_19, %c0_20] : memref<1x64xf32, #tpu.memory_space<vmem>>, vector<1x64xf32>
    %42 = vector.broadcast %41 : vector<1x64xf32> to vector<64x64xf32>
    %43 = arith.addf %40, %42 : vector<64x64xf32>
    %cst_21 = arith.constant 5.000000e-01 : f32
    %44 = vector.broadcast %cst_21 : f32 to vector<64x64xf32>
    %45 = arith.mulf %44, %43 : vector<64x64xf32>
    %46 = arith.addf %1, %45 : vector<64x64xf32>
    %c0_22 = arith.constant 0 : index
    %c0_23 = arith.constant 0 : index
    %47 = vector.load %arg8[%c0_22, %c0_23] : memref<1x64xf32, #tpu.memory_space<vmem>>, vector<1x64xf32>
    %c0_24 = arith.constant 0 : index
    %c0_25 = arith.constant 0 : index
    %48 = vector.load %arg9[%c0_24, %c0_25] : memref<1x64xf32, #tpu.memory_space<vmem>>, vector<1x64xf32>
    %cst_26 = arith.constant dense<0.000000e+00> : vector<64xf32>
    %49 = vector.multi_reduction <add>, %1, %cst_26 [1] : vector<64x64xf32> to vector<64xf32>
    %50 = vector.shape_cast %49 : vector<64xf32> to vector<64x1xf32>
    %cst_27 = arith.constant 6.400000e+01 : f32
    %51 = vector.broadcast %cst_27 : f32 to vector<64x1xf32>
    %52 = arith.divf %50, %51 : vector<64x1xf32>
    %53 = vector.broadcast %52 : vector<64x1xf32> to vector<64x64xf32>
    %54 = arith.subf %1, %53 : vector<64x64xf32>
    %55 = arith.mulf %54, %54 : vector<64x64xf32>
    %cst_28 = arith.constant dense<0.000000e+00> : vector<64xf32>
    %56 = vector.multi_reduction <add>, %55, %cst_28 [1] : vector<64x64xf32> to vector<64xf32>
    %57 = vector.shape_cast %56 : vector<64xf32> to vector<64x1xf32>
    %cst_29 = arith.constant 6.400000e+01 : f32
    %58 = vector.broadcast %cst_29 : f32 to vector<64x1xf32>
    %59 = arith.divf %57, %58 : vector<64x1xf32>
    %60 = vector.broadcast %52 : vector<64x1xf32> to vector<64x64xf32>
    %61 = arith.subf %1, %60 : vector<64x64xf32>
    %cst_30 = arith.constant 9.99999974E-6 : f32
    %62 = vector.broadcast %cst_30 : f32 to vector<64x1xf32>
    %63 = arith.addf %59, %62 : vector<64x1xf32>
    %64 = math.rsqrt %63 : vector<64x1xf32>
    %65 = vector.broadcast %64 : vector<64x1xf32> to vector<64x64xf32>
    %66 = arith.mulf %61, %65 : vector<64x64xf32>
    %67 = vector.broadcast %47 : vector<1x64xf32> to vector<64x64xf32>
    %68 = arith.mulf %66, %67 : vector<64x64xf32>
    %69 = vector.broadcast %48 : vector<1x64xf32> to vector<64x64xf32>
    %70 = arith.addf %68, %69 : vector<64x64xf32>
    %71 = arith.truncf %70 : vector<64x64xf32> to vector<64x64xbf16>
    %c0_31 = arith.constant 0 : index
    %c0_32 = arith.constant 0 : index
    %72 = vector.load %arg10[%c0_31, %c0_32] : memref<64x192xbf16, #tpu.memory_space<vmem>>, vector<64x192xbf16>
    %cst_33 = arith.constant dense<0.000000e+00> : vector<64x192xf32>
    %73 = tpu.matmul %71, %72, %cst_33 {dimension_numbers = #tpu.dot_dimension_numbers<[1], [0], [0], [1], [0, 0, 1, 1], [], []>} : vector<64x64xbf16>, vector<64x192xbf16>, vector<64x192xf32> -> vector<64x192xf32>
    %74 = tpu.iota {dimensions = array<i32: 0>} : vector<64x64xi32>
    %75 = tpu.iota {dimensions = array<i32: 1>} : vector<64x64xi32>
    %76 = arith.cmpi sle, %75, %74 : vector<64x64xi32>
    %cst_34 = arith.constant 0.000000e+00 : f32
    %77 = vector.broadcast %cst_34 : f32 to vector<64x64xf32>
    %78 = vector.extract_strided_slice %73 {offsets = [0, 0], sizes = [64, 16], strides = [1, 1]} : vector<64x192xf32> to vector<64x16xf32>
    %79 = arith.truncf %78 : vector<64x16xf32> to vector<64x16xbf16>
    %80 = vector.extract_strided_slice %73 {offsets = [0, 64], sizes = [64, 16], strides = [1, 1]} : vector<64x192xf32> to vector<64x16xf32>
    %81 = arith.truncf %80 : vector<64x16xf32> to vector<64x16xbf16>
    %82 = vector.extract_strided_slice %73 {offsets = [0, 128], sizes = [64, 16], strides = [1, 1]} : vector<64x192xf32> to vector<64x16xf32>
    %83 = arith.truncf %82 : vector<64x16xf32> to vector<64x16xbf16>
    %cst_35 = arith.constant dense<0.000000e+00> : vector<64x64xf32>
    %84 = tpu.matmul %79, %81, %cst_35 {dimension_numbers = #tpu.dot_dimension_numbers<[1], [1], [0], [0], [0, 0, 1, 0], [], []>} : vector<64x16xbf16>, vector<64x16xbf16>, vector<64x64xf32> -> vector<64x64xf32>
    %cst_36 = arith.constant 2.500000e-01 : f32
    %85 = vector.broadcast %cst_36 : f32 to vector<64x64xf32>
    %86 = arith.mulf %84, %85 : vector<64x64xf32>
    %cst_37 = arith.constant -1.000000e+30 : f32
    %87 = vector.broadcast %cst_37 : f32 to vector<64x64xf32>
    %88 = arith.select %76, %86, %87 : vector<64x64xi1>, vector<64x64xf32>
    %cst_38 = arith.constant dense<0xFF800000> : vector<64xf32>
    %89 = vector.multi_reduction <maximumf>, %88, %cst_38 [1] : vector<64x64xf32> to vector<64xf32>
    %90 = vector.shape_cast %89 : vector<64xf32> to vector<64x1xf32>
    %91 = vector.broadcast %90 : vector<64x1xf32> to vector<64x64xf32>
    %92 = arith.subf %88, %91 : vector<64x64xf32>
    %93 = math.exp %92 : vector<64x64xf32>
    %cst_39 = arith.constant dense<0.000000e+00> : vector<64xf32>
    %94 = vector.multi_reduction <add>, %93, %cst_39 [1] : vector<64x64xf32> to vector<64xf32>
    %95 = vector.shape_cast %94 : vector<64xf32> to vector<64x1xf32>
    %96 = tpu.reciprocal %95 {approx = true} : vector<64x1xf32> -> vector<64x1xf32>
    %97 = vector.broadcast %96 : vector<64x1xf32> to vector<64x64xf32>
    %98 = arith.mulf %93, %97 : vector<64x64xf32>
    %99 = arith.truncf %98 : vector<64x64xf32> to vector<64x64xbf16>
    %cst_40 = arith.constant dense<0.000000e+00> : vector<64x16xf32>
    %100 = tpu.matmul %99, %83, %cst_40 {dimension_numbers = #tpu.dot_dimension_numbers<[1], [0], [0], [1], [0, 0, 1, 1], [], []>} : vector<64x64xbf16>, vector<64x16xbf16>, vector<64x16xf32> -> vector<64x16xf32>
    %101 = arith.truncf %100 : vector<64x16xf32> to vector<64x16xbf16>
    %c0_41 = arith.constant 0 : index
    %c0_42 = arith.constant 0 : index
    %c0_43 = arith.constant 0 : index
    %102 = vector.load %arg11[%c0_41, %c0_42, %c0_43] : memref<4x16x64xbf16, #tpu.memory_space<vmem>>, vector<1x16x64xbf16>
    %103 = vector.shape_cast %102 : vector<1x16x64xbf16> to vector<16x64xbf16>
    %cst_44 = arith.constant dense<0.000000e+00> : vector<64x64xf32>
    %104 = tpu.matmul %101, %103, %cst_44 {dimension_numbers = #tpu.dot_dimension_numbers<[1], [0], [0], [1], [0, 0, 1, 1], [], []>} : vector<64x16xbf16>, vector<16x64xbf16>, vector<64x64xf32> -> vector<64x64xf32>
    %105 = arith.addf %77, %104 : vector<64x64xf32>
    %106 = vector.extract_strided_slice %73 {offsets = [0, 16], sizes = [64, 16], strides = [1, 1]} : vector<64x192xf32> to vector<64x16xf32>
    %107 = arith.truncf %106 : vector<64x16xf32> to vector<64x16xbf16>
    %108 = vector.extract_strided_slice %73 {offsets = [0, 80], sizes = [64, 16], strides = [1, 1]} : vector<64x192xf32> to vector<64x16xf32>
    %109 = arith.truncf %108 : vector<64x16xf32> to vector<64x16xbf16>
    %110 = vector.extract_strided_slice %73 {offsets = [0, 144], sizes = [64, 16], strides = [1, 1]} : vector<64x192xf32> to vector<64x16xf32>
    %111 = arith.truncf %110 : vector<64x16xf32> to vector<64x16xbf16>
    %cst_45 = arith.constant dense<0.000000e+00> : vector<64x64xf32>
    %112 = tpu.matmul %107, %109, %cst_45 {dimension_numbers = #tpu.dot_dimension_numbers<[1], [1], [0], [0], [0, 0, 1, 0], [], []>} : vector<64x16xbf16>, vector<64x16xbf16>, vector<64x64xf32> -> vector<64x64xf32>
    %cst_46 = arith.constant 2.500000e-01 : f32
    %113 = vector.broadcast %cst_46 : f32 to vector<64x64xf32>
    %114 = arith.mulf %112, %113 : vector<64x64xf32>
    %cst_47 = arith.constant -1.000000e+30 : f32
    %115 = vector.broadcast %cst_47 : f32 to vector<64x64xf32>
    %116 = arith.select %76, %114, %115 : vector<64x64xi1>, vector<64x64xf32>
    %cst_48 = arith.constant dense<0xFF800000> : vector<64xf32>
    %117 = vector.multi_reduction <maximumf>, %116, %cst_48 [1] : vector<64x64xf32> to vector<64xf32>
    %118 = vector.shape_cast %117 : vector<64xf32> to vector<64x1xf32>
    %119 = vector.broadcast %118 : vector<64x1xf32> to vector<64x64xf32>
    %120 = arith.subf %116, %119 : vector<64x64xf32>
    %121 = math.exp %120 : vector<64x64xf32>
    %cst_49 = arith.constant dense<0.000000e+00> : vector<64xf32>
    %122 = vector.multi_reduction <add>, %121, %cst_49 [1] : vector<64x64xf32> to vector<64xf32>
    %123 = vector.shape_cast %122 : vector<64xf32> to vector<64x1xf32>
    %124 = tpu.reciprocal %123 {approx = true} : vector<64x1xf32> -> vector<64x1xf32>
    %125 = vector.broadcast %124 : vector<64x1xf32> to vector<64x64xf32>
    %126 = arith.mulf %121, %125 : vector<64x64xf32>
    %127 = arith.truncf %126 : vector<64x64xf32> to vector<64x64xbf16>
    %cst_50 = arith.constant dense<0.000000e+00> : vector<64x16xf32>
    %128 = tpu.matmul %127, %111, %cst_50 {dimension_numbers = #tpu.dot_dimension_numbers<[1], [0], [0], [1], [0, 0, 1, 1], [], []>} : vector<64x64xbf16>, vector<64x16xbf16>, vector<64x16xf32> -> vector<64x16xf32>
    %129 = arith.truncf %128 : vector<64x16xf32> to vector<64x16xbf16>
    %c1 = arith.constant 1 : index
    %c0_51 = arith.constant 0 : index
    %c0_52 = arith.constant 0 : index
    %130 = vector.load %arg11[%c1, %c0_51, %c0_52] : memref<4x16x64xbf16, #tpu.memory_space<vmem>>, vector<1x16x64xbf16>
    %131 = vector.shape_cast %130 : vector<1x16x64xbf16> to vector<16x64xbf16>
    %cst_53 = arith.constant dense<0.000000e+00> : vector<64x64xf32>
    %132 = tpu.matmul %129, %131, %cst_53 {dimension_numbers = #tpu.dot_dimension_numbers<[1], [0], [0], [1], [0, 0, 1, 1], [], []>} : vector<64x16xbf16>, vector<16x64xbf16>, vector<64x64xf32> -> vector<64x64xf32>
    %133 = arith.addf %105, %132 : vector<64x64xf32>
    %134 = vector.extract_strided_slice %73 {offsets = [0, 32], sizes = [64, 16], strides = [1, 1]} : vector<64x192xf32> to vector<64x16xf32>
    %135 = arith.truncf %134 : vector<64x16xf32> to vector<64x16xbf16>
    %136 = vector.extract_strided_slice %73 {offsets = [0, 96], sizes = [64, 16], strides = [1, 1]} : vector<64x192xf32> to vector<64x16xf32>
    %137 = arith.truncf %136 : vector<64x16xf32> to vector<64x16xbf16>
    %138 = vector.extract_strided_slice %73 {offsets = [0, 160], sizes = [64, 16], strides = [1, 1]} : vector<64x192xf32> to vector<64x16xf32>
    %139 = arith.truncf %138 : vector<64x16xf32> to vector<64x16xbf16>
    %cst_54 = arith.constant dense<0.000000e+00> : vector<64x64xf32>
    %140 = tpu.matmul %135, %137, %cst_54 {dimension_numbers = #tpu.dot_dimension_numbers<[1], [1], [0], [0], [0, 0, 1, 0], [], []>} : vector<64x16xbf16>, vector<64x16xbf16>, vector<64x64xf32> -> vector<64x64xf32>
    %cst_55 = arith.constant 2.500000e-01 : f32
    %141 = vector.broadcast %cst_55 : f32 to vector<64x64xf32>
    %142 = arith.mulf %140, %141 : vector<64x64xf32>
    %cst_56 = arith.constant -1.000000e+30 : f32
    %143 = vector.broadcast %cst_56 : f32 to vector<64x64xf32>
    %144 = arith.select %76, %142, %143 : vector<64x64xi1>, vector<64x64xf32>
    %cst_57 = arith.constant dense<0xFF800000> : vector<64xf32>
    %145 = vector.multi_reduction <maximumf>, %144, %cst_57 [1] : vector<64x64xf32> to vector<64xf32>
    %146 = vector.shape_cast %145 : vector<64xf32> to vector<64x1xf32>
    %147 = vector.broadcast %146 : vector<64x1xf32> to vector<64x64xf32>
    %148 = arith.subf %144, %147 : vector<64x64xf32>
    %149 = math.exp %148 : vector<64x64xf32>
    %cst_58 = arith.constant dense<0.000000e+00> : vector<64xf32>
    %150 = vector.multi_reduction <add>, %149, %cst_58 [1] : vector<64x64xf32> to vector<64xf32>
    %151 = vector.shape_cast %150 : vector<64xf32> to vector<64x1xf32>
    %152 = tpu.reciprocal %151 {approx = true} : vector<64x1xf32> -> vector<64x1xf32>
    %153 = vector.broadcast %152 : vector<64x1xf32> to vector<64x64xf32>
    %154 = arith.mulf %149, %153 : vector<64x64xf32>
    %155 = arith.truncf %154 : vector<64x64xf32> to vector<64x64xbf16>
    %cst_59 = arith.constant dense<0.000000e+00> : vector<64x16xf32>
    %156 = tpu.matmul %155, %139, %cst_59 {dimension_numbers = #tpu.dot_dimension_numbers<[1], [0], [0], [1], [0, 0, 1, 1], [], []>} : vector<64x64xbf16>, vector<64x16xbf16>, vector<64x16xf32> -> vector<64x16xf32>
    %157 = arith.truncf %156 : vector<64x16xf32> to vector<64x16xbf16>
    %c2 = arith.constant 2 : index
    %c0_60 = arith.constant 0 : index
    %c0_61 = arith.constant 0 : index
    %158 = vector.load %arg11[%c2, %c0_60, %c0_61] : memref<4x16x64xbf16, #tpu.memory_space<vmem>>, vector<1x16x64xbf16>
    %159 = vector.shape_cast %158 : vector<1x16x64xbf16> to vector<16x64xbf16>
    %cst_62 = arith.constant dense<0.000000e+00> : vector<64x64xf32>
    %160 = tpu.matmul %157, %159, %cst_62 {dimension_numbers = #tpu.dot_dimension_numbers<[1], [0], [0], [1], [0, 0, 1, 1], [], []>} : vector<64x16xbf16>, vector<16x64xbf16>, vector<64x64xf32> -> vector<64x64xf32>
    %161 = arith.addf %133, %160 : vector<64x64xf32>
    %162 = vector.extract_strided_slice %73 {offsets = [0, 48], sizes = [64, 16], strides = [1, 1]} : vector<64x192xf32> to vector<64x16xf32>
    %163 = arith.truncf %162 : vector<64x16xf32> to vector<64x16xbf16>
    %164 = vector.extract_strided_slice %73 {offsets = [0, 112], sizes = [64, 16], strides = [1, 1]} : vector<64x192xf32> to vector<64x16xf32>
    %165 = arith.truncf %164 : vector<64x16xf32> to vector<64x16xbf16>
    %166 = vector.extract_strided_slice %73 {offsets = [0, 176], sizes = [64, 16], strides = [1, 1]} : vector<64x192xf32> to vector<64x16xf32>
    %167 = arith.truncf %166 : vector<64x16xf32> to vector<64x16xbf16>
    %cst_63 = arith.constant dense<0.000000e+00> : vector<64x64xf32>
    %168 = tpu.matmul %163, %165, %cst_63 {dimension_numbers = #tpu.dot_dimension_numbers<[1], [1], [0], [0], [0, 0, 1, 0], [], []>} : vector<64x16xbf16>, vector<64x16xbf16>, vector<64x64xf32> -> vector<64x64xf32>
    %cst_64 = arith.constant 2.500000e-01 : f32
    %169 = vector.broadcast %cst_64 : f32 to vector<64x64xf32>
    %170 = arith.mulf %168, %169 : vector<64x64xf32>
    %cst_65 = arith.constant -1.000000e+30 : f32
    %171 = vector.broadcast %cst_65 : f32 to vector<64x64xf32>
    %172 = arith.select %76, %170, %171 : vector<64x64xi1>, vector<64x64xf32>
    %cst_66 = arith.constant dense<0xFF800000> : vector<64xf32>
    %173 = vector.multi_reduction <maximumf>, %172, %cst_66 [1] : vector<64x64xf32> to vector<64xf32>
    %174 = vector.shape_cast %173 : vector<64xf32> to vector<64x1xf32>
    %175 = vector.broadcast %174 : vector<64x1xf32> to vector<64x64xf32>
    %176 = arith.subf %172, %175 : vector<64x64xf32>
    %177 = math.exp %176 : vector<64x64xf32>
    %cst_67 = arith.constant dense<0.000000e+00> : vector<64xf32>
    %178 = vector.multi_reduction <add>, %177, %cst_67 [1] : vector<64x64xf32> to vector<64xf32>
    %179 = vector.shape_cast %178 : vector<64xf32> to vector<64x1xf32>
    %180 = tpu.reciprocal %179 {approx = true} : vector<64x1xf32> -> vector<64x1xf32>
    %181 = vector.broadcast %180 : vector<64x1xf32> to vector<64x64xf32>
    %182 = arith.mulf %177, %181 : vector<64x64xf32>
    %183 = arith.truncf %182 : vector<64x64xf32> to vector<64x64xbf16>
    %cst_68 = arith.constant dense<0.000000e+00> : vector<64x16xf32>
    %184 = tpu.matmul %183, %167, %cst_68 {dimension_numbers = #tpu.dot_dimension_numbers<[1], [0], [0], [1], [0, 0, 1, 1], [], []>} : vector<64x64xbf16>, vector<64x16xbf16>, vector<64x16xf32> -> vector<64x16xf32>
    %185 = arith.truncf %184 : vector<64x16xf32> to vector<64x16xbf16>
    %c3 = arith.constant 3 : index
    %c0_69 = arith.constant 0 : index
    %c0_70 = arith.constant 0 : index
    %186 = vector.load %arg11[%c3, %c0_69, %c0_70] : memref<4x16x64xbf16, #tpu.memory_space<vmem>>, vector<1x16x64xbf16>
    %187 = vector.shape_cast %186 : vector<1x16x64xbf16> to vector<16x64xbf16>
    %cst_71 = arith.constant dense<0.000000e+00> : vector<64x64xf32>
    %188 = tpu.matmul %185, %187, %cst_71 {dimension_numbers = #tpu.dot_dimension_numbers<[1], [0], [0], [1], [0, 0, 1, 1], [], []>} : vector<64x16xbf16>, vector<16x64xbf16>, vector<64x64xf32> -> vector<64x64xf32>
    %189 = arith.addf %161, %188 : vector<64x64xf32>
    %190 = arith.addf %189, %46 : vector<64x64xf32>
    %c0_72 = arith.constant 0 : index
    %c0_73 = arith.constant 0 : index
    %c0_74 = arith.constant 0 : index
    %191 = vector.load %arg18[%c0_72, %c0_73, %c0_74] : memref<1x64x64xf32, #tpu.memory_space<vmem>>, vector<1x64x64xf32>
    %192 = vector.shape_cast %191 : vector<1x64x64xf32> to vector<64x64xf32>
    %193 = vector.shape_cast %190 : vector<64x64xf32> to vector<1x64x64xf32>
    tpu.vector_store %arg18[%c0_72, %c0_73, %c0_74], %193 {strides = array<i32>} : memref<1x64x64xf32, #tpu.memory_space<vmem>>, vector<1x64x64xf32>,
    %c0_75 = arith.constant 0 : index
    %c0_76 = arith.constant 0 : index
    %194 = vector.load %arg12[%c0_75, %c0_76] : memref<1x64xf32, #tpu.memory_space<vmem>>, vector<1x64xf32>
    %c0_77 = arith.constant 0 : index
    %c0_78 = arith.constant 0 : index
    %195 = vector.load %arg13[%c0_77, %c0_78] : memref<1x64xf32, #tpu.memory_space<vmem>>, vector<1x64xf32>
    %cst_79 = arith.constant dense<0.000000e+00> : vector<64xf32>
    %196 = vector.multi_reduction <add>, %190, %cst_79 [1] : vector<64x64xf32> to vector<64xf32>
    %197 = vector.shape_cast %196 : vector<64xf32> to vector<64x1xf32>
    %cst_80 = arith.constant 6.400000e+01 : f32
    %198 = vector.broadcast %cst_80 : f32 to vector<64x1xf32>
    %199 = arith.divf %197, %198 : vector<64x1xf32>
    %200 = vector.broadcast %199 : vector<64x1xf32> to vector<64x64xf32>
    %201 = arith.subf %190, %200 : vector<64x64xf32>
    %202 = arith.mulf %201, %201 : vector<64x64xf32>
    %cst_81 = arith.constant dense<0.000000e+00> : vector<64xf32>
    %203 = vector.multi_reduction <add>, %202, %cst_81 [1] : vector<64x64xf32> to vector<64xf32>
    %204 = vector.shape_cast %203 : vector<64xf32> to vector<64x1xf32>
    %cst_82 = arith.constant 6.400000e+01 : f32
    %205 = vector.broadcast %cst_82 : f32 to vector<64x1xf32>
    %206 = arith.divf %204, %205 : vector<64x1xf32>
    %207 = vector.broadcast %199 : vector<64x1xf32> to vector<64x64xf32>
    %208 = arith.subf %190, %207 : vector<64x64xf32>
    %cst_83 = arith.constant 9.99999974E-6 : f32
    %209 = vector.broadcast %cst_83 : f32 to vector<64x1xf32>
    %210 = arith.addf %206, %209 : vector<64x1xf32>
    %211 = math.rsqrt %210 : vector<64x1xf32>
    %212 = vector.broadcast %211 : vector<64x1xf32> to vector<64x64xf32>
    %213 = arith.mulf %208, %212 : vector<64x64xf32>
    %214 = vector.broadcast %194 : vector<1x64xf32> to vector<64x64xf32>
    %215 = arith.mulf %213, %214 : vector<64x64xf32>
    %216 = vector.broadcast %195 : vector<1x64xf32> to vector<64x64xf32>
    %217 = arith.addf %215, %216 : vector<64x64xf32>
    %218 = arith.truncf %217 : vector<64x64xf32> to vector<64x64xbf16>
    %c0_84 = arith.constant 0 : index
    %c0_85 = arith.constant 0 : index
    %219 = vector.load %arg14[%c0_84, %c0_85] : memref<64x256xbf16, #tpu.memory_space<vmem>>, vector<64x256xbf16>
    %cst_86 = arith.constant dense<0.000000e+00> : vector<64x256xf32>
    %220 = tpu.matmul %218, %219, %cst_86 {dimension_numbers = #tpu.dot_dimension_numbers<[1], [0], [0], [1], [0, 0, 1, 1], [], []>} : vector<64x64xbf16>, vector<64x256xbf16>, vector<64x256xf32> -> vector<64x256xf32>
    %c0_87 = arith.constant 0 : index
    %c0_88 = arith.constant 0 : index
    %221 = vector.load %arg15[%c0_87, %c0_88] : memref<1x256xf32, #tpu.memory_space<vmem>>, vector<1x256xf32>
    %222 = vector.broadcast %221 : vector<1x256xf32> to vector<64x256xf32>
    %223 = arith.addf %220, %222 : vector<64x256xf32>
    %224 = vector.extract_strided_slice %223 {offsets = [0, 0], sizes = [64, 128], strides = [1, 1]} : vector<64x256xf32> to vector<64x128xf32>
    %225 = vector.extract_strided_slice %223 {offsets = [0, 128], sizes = [64, 128], strides = [1, 1]} : vector<64x256xf32> to vector<64x128xf32>
    %226 = arith.negf %225 : vector<64x128xf32>
    %227 = math.exp %226 : vector<64x128xf32>
    %cst_89 = arith.constant 1.000000e+00 : f32
    %228 = vector.broadcast %cst_89 : f32 to vector<64x128xf32>
    %229 = arith.addf %228, %227 : vector<64x128xf32>
    %230 = arith.divf %228, %229 : vector<64x128xf32>
    %231 = arith.mulf %224, %230 : vector<64x128xf32>
    %c0_90 = arith.constant 0 : index
    %c0_91 = arith.constant 0 : index
    %232 = vector.load %arg16[%c0_90, %c0_91] : memref<31x128xf32, #tpu.memory_space<vmem>>, vector<31x128xf32>
    %233 = tpu.iota {dimensions = array<i32: 0>} : vector<64x128xi32>
    %cst_92 = arith.constant 0.000000e+00 : f32
    %234 = vector.broadcast %cst_92 : f32 to vector<64x128xf32>
    %c15_i32 = arith.constant 15 : i32
    %235 = tpu.dynamic_rotate %231 by %c15_i32 dim 0 : vector<64x128xf32>, i32 -> vector<64x128xf32>
    %c15_i32_93 = arith.constant 15 : i32
    %236 = vector.broadcast %c15_i32_93 : i32 to vector<64x128xi32>
    %237 = arith.cmpi sge, %233, %236 : vector<64x128xi32>
    %c79_i32 = arith.constant 79 : i32
    %238 = vector.broadcast %c79_i32 : i32 to vector<64x128xi32>
    %239 = arith.cmpi slt, %233, %238 : vector<64x128xi32>
    %240 = arith.andi %237, %239 : vector<64x128xi1>
    %cst_94 = arith.constant 0.000000e+00 : f32
    %241 = vector.broadcast %cst_94 : f32 to vector<64x128xf32>
    %242 = arith.select %240, %235, %241 : vector<64x128xi1>, vector<64x128xf32>
    %243 = vector.extract_strided_slice %232 {offsets = [0, 0], sizes = [1, 128], strides = [1, 1]} : vector<31x128xf32> to vector<1x128xf32>
    %244 = vector.broadcast %243 : vector<1x128xf32> to vector<64x128xf32>
    %245 = arith.mulf %242, %244 : vector<64x128xf32>
    %246 = arith.addf %234, %245 : vector<64x128xf32>
    %c14_i32 = arith.constant 14 : i32
    %247 = tpu.dynamic_rotate %231 by %c14_i32 dim 0 : vector<64x128xf32>, i32 -> vector<64x128xf32>
    %c14_i32_95 = arith.constant 14 : i32
    %248 = vector.broadcast %c14_i32_95 : i32 to vector<64x128xi32>
    %249 = arith.cmpi sge, %233, %248 : vector<64x128xi32>
    %c78_i32 = arith.constant 78 : i32
    %250 = vector.broadcast %c78_i32 : i32 to vector<64x128xi32>
    %251 = arith.cmpi slt, %233, %250 : vector<64x128xi32>
    %252 = arith.andi %249, %251 : vector<64x128xi1>
    %cst_96 = arith.constant 0.000000e+00 : f32
    %253 = vector.broadcast %cst_96 : f32 to vector<64x128xf32>
    %254 = arith.select %252, %247, %253 : vector<64x128xi1>, vector<64x128xf32>
    %255 = vector.extract_strided_slice %232 {offsets = [1, 0], sizes = [1, 128], strides = [1, 1]} : vector<31x128xf32> to vector<1x128xf32>
    %256 = vector.broadcast %255 : vector<1x128xf32> to vector<64x128xf32>
    %257 = arith.mulf %254, %256 : vector<64x128xf32>
    %258 = arith.addf %246, %257 : vector<64x128xf32>
    %c13_i32 = arith.constant 13 : i32
    %259 = tpu.dynamic_rotate %231 by %c13_i32 dim 0 : vector<64x128xf32>, i32 -> vector<64x128xf32>
    %c13_i32_97 = arith.constant 13 : i32
    %260 = vector.broadcast %c13_i32_97 : i32 to vector<64x128xi32>
    %261 = arith.cmpi sge, %233, %260 : vector<64x128xi32>
    %c77_i32 = arith.constant 77 : i32
    %262 = vector.broadcast %c77_i32 : i32 to vector<64x128xi32>
    %263 = arith.cmpi slt, %233, %262 : vector<64x128xi32>
    %264 = arith.andi %261, %263 : vector<64x128xi1>
    %cst_98 = arith.constant 0.000000e+00 : f32
    %265 = vector.broadcast %cst_98 : f32 to vector<64x128xf32>
    %266 = arith.select %264, %259, %265 : vector<64x128xi1>, vector<64x128xf32>
    %267 = vector.extract_strided_slice %232 {offsets = [2, 0], sizes = [1, 128], strides = [1, 1]} : vector<31x128xf32> to vector<1x128xf32>
    %268 = vector.broadcast %267 : vector<1x128xf32> to vector<64x128xf32>
    %269 = arith.mulf %266, %268 : vector<64x128xf32>
    %270 = arith.addf %258, %269 : vector<64x128xf32>
    %c12_i32 = arith.constant 12 : i32
    %271 = tpu.dynamic_rotate %231 by %c12_i32 dim 0 : vector<64x128xf32>, i32 -> vector<64x128xf32>
    %c12_i32_99 = arith.constant 12 : i32
    %272 = vector.broadcast %c12_i32_99 : i32 to vector<64x128xi32>
    %273 = arith.cmpi sge, %233, %272 : vector<64x128xi32>
    %c76_i32 = arith.constant 76 : i32
    %274 = vector.broadcast %c76_i32 : i32 to vector<64x128xi32>
    %275 = arith.cmpi slt, %233, %274 : vector<64x128xi32>
    %276 = arith.andi %273, %275 : vector<64x128xi1>
    %cst_100 = arith.constant 0.000000e+00 : f32
    %277 = vector.broadcast %cst_100 : f32 to vector<64x128xf32>
    %278 = arith.select %276, %271, %277 : vector<64x128xi1>, vector<64x128xf32>
    %279 = vector.extract_strided_slice %232 {offsets = [3, 0], sizes = [1, 128], strides = [1, 1]} : vector<31x128xf32> to vector<1x128xf32>
    %280 = vector.broadcast %279 : vector<1x128xf32> to vector<64x128xf32>
    %281 = arith.mulf %278, %280 : vector<64x128xf32>
    %282 = arith.addf %270, %281 : vector<64x128xf32>
    %c11_i32 = arith.constant 11 : i32
    %283 = tpu.dynamic_rotate %231 by %c11_i32 dim 0 : vector<64x128xf32>, i32 -> vector<64x128xf32>
    %c11_i32_101 = arith.constant 11 : i32
    %284 = vector.broadcast %c11_i32_101 : i32 to vector<64x128xi32>
    %285 = arith.cmpi sge, %233, %284 : vector<64x128xi32>
    %c75_i32 = arith.constant 75 : i32
    %286 = vector.broadcast %c75_i32 : i32 to vector<64x128xi32>
    %287 = arith.cmpi slt, %233, %286 : vector<64x128xi32>
    %288 = arith.andi %285, %287 : vector<64x128xi1>
    %cst_102 = arith.constant 0.000000e+00 : f32
    %289 = vector.broadcast %cst_102 : f32 to vector<64x128xf32>
    %290 = arith.select %288, %283, %289 : vector<64x128xi1>, vector<64x128xf32>
    %291 = vector.extract_strided_slice %232 {offsets = [4, 0], sizes = [1, 128], strides = [1, 1]} : vector<31x128xf32> to vector<1x128xf32>
    %292 = vector.broadcast %291 : vector<1x128xf32> to vector<64x128xf32>
    %293 = arith.mulf %290, %292 : vector<64x128xf32>
    %294 = arith.addf %282, %293 : vector<64x128xf32>
    %c10_i32 = arith.constant 10 : i32
    %295 = tpu.dynamic_rotate %231 by %c10_i32 dim 0 : vector<64x128xf32>, i32 -> vector<64x128xf32>
    %c10_i32_103 = arith.constant 10 : i32
    %296 = vector.broadcast %c10_i32_103 : i32 to vector<64x128xi32>
    %297 = arith.cmpi sge, %233, %296 : vector<64x128xi32>
    %c74_i32 = arith.constant 74 : i32
    %298 = vector.broadcast %c74_i32 : i32 to vector<64x128xi32>
    %299 = arith.cmpi slt, %233, %298 : vector<64x128xi32>
    %300 = arith.andi %297, %299 : vector<64x128xi1>
    %cst_104 = arith.constant 0.000000e+00 : f32
    %301 = vector.broadcast %cst_104 : f32 to vector<64x128xf32>
    %302 = arith.select %300, %295, %301 : vector<64x128xi1>, vector<64x128xf32>
    %303 = vector.extract_strided_slice %232 {offsets = [5, 0], sizes = [1, 128], strides = [1, 1]} : vector<31x128xf32> to vector<1x128xf32>
    %304 = vector.broadcast %303 : vector<1x128xf32> to vector<64x128xf32>
    %305 = arith.mulf %302, %304 : vector<64x128xf32>
    %306 = arith.addf %294, %305 : vector<64x128xf32>
    %c9_i32 = arith.constant 9 : i32
    %307 = tpu.dynamic_rotate %231 by %c9_i32 dim 0 : vector<64x128xf32>, i32 -> vector<64x128xf32>
    %c9_i32_105 = arith.constant 9 : i32
    %308 = vector.broadcast %c9_i32_105 : i32 to vector<64x128xi32>
    %309 = arith.cmpi sge, %233, %308 : vector<64x128xi32>
    %c73_i32 = arith.constant 73 : i32
    %310 = vector.broadcast %c73_i32 : i32 to vector<64x128xi32>
    %311 = arith.cmpi slt, %233, %310 : vector<64x128xi32>
    %312 = arith.andi %309, %311 : vector<64x128xi1>
    %cst_106 = arith.constant 0.000000e+00 : f32
    %313 = vector.broadcast %cst_106 : f32 to vector<64x128xf32>
    %314 = arith.select %312, %307, %313 : vector<64x128xi1>, vector<64x128xf32>
    %315 = vector.extract_strided_slice %232 {offsets = [6, 0], sizes = [1, 128], strides = [1, 1]} : vector<31x128xf32> to vector<1x128xf32>
    %316 = vector.broadcast %315 : vector<1x128xf32> to vector<64x128xf32>
    %317 = arith.mulf %314, %316 : vector<64x128xf32>
    %318 = arith.addf %306, %317 : vector<64x128xf32>
    %c8_i32 = arith.constant 8 : i32
    %319 = tpu.dynamic_rotate %231 by %c8_i32 dim 0 : vector<64x128xf32>, i32 -> vector<64x128xf32>
    %c8_i32_107 = arith.constant 8 : i32
    %320 = vector.broadcast %c8_i32_107 : i32 to vector<64x128xi32>
    %321 = arith.cmpi sge, %233, %320 : vector<64x128xi32>
    %c72_i32 = arith.constant 72 : i32
    %322 = vector.broadcast %c72_i32 : i32 to vector<64x128xi32>
    %323 = arith.cmpi slt, %233, %322 : vector<64x128xi32>
    %324 = arith.andi %321, %323 : vector<64x128xi1>
    %cst_108 = arith.constant 0.000000e+00 : f32
    %325 = vector.broadcast %cst_108 : f32 to vector<64x128xf32>
    %326 = arith.select %324, %319, %325 : vector<64x128xi1>, vector<64x128xf32>
    %327 = vector.extract_strided_slice %232 {offsets = [7, 0], sizes = [1, 128], strides = [1, 1]} : vector<31x128xf32> to vector<1x128xf32>
    %328 = vector.broadcast %327 : vector<1x128xf32> to vector<64x128xf32>
    %329 = arith.mulf %326, %328 : vector<64x128xf32>
    %330 = arith.addf %318, %329 : vector<64x128xf32>
    %c7_i32 = arith.constant 7 : i32
    %331 = tpu.dynamic_rotate %231 by %c7_i32 dim 0 : vector<64x128xf32>, i32 -> vector<64x128xf32>
    %c7_i32_109 = arith.constant 7 : i32
    %332 = vector.broadcast %c7_i32_109 : i32 to vector<64x128xi32>
    %333 = arith.cmpi sge, %233, %332 : vector<64x128xi32>
    %c71_i32 = arith.constant 71 : i32
    %334 = vector.broadcast %c71_i32 : i32 to vector<64x128xi32>
    %335 = arith.cmpi slt, %233, %334 : vector<64x128xi32>
    %336 = arith.andi %333, %335 : vector<64x128xi1>
    %cst_110 = arith.constant 0.000000e+00 : f32
    %337 = vector.broadcast %cst_110 : f32 to vector<64x128xf32>
    %338 = arith.select %336, %331, %337 : vector<64x128xi1>, vector<64x128xf32>
    %339 = vector.extract_strided_slice %232 {offsets = [8, 0], sizes = [1, 128], strides = [1, 1]} : vector<31x128xf32> to vector<1x128xf32>
    %340 = vector.broadcast %339 : vector<1x128xf32> to vector<64x128xf32>
    %341 = arith.mulf %338, %340 : vector<64x128xf32>
    %342 = arith.addf %330, %341 : vector<64x128xf32>
    %c6_i32 = arith.constant 6 : i32
    %343 = tpu.dynamic_rotate %231 by %c6_i32 dim 0 : vector<64x128xf32>, i32 -> vector<64x128xf32>
    %c6_i32_111 = arith.constant 6 : i32
    %344 = vector.broadcast %c6_i32_111 : i32 to vector<64x128xi32>
    %345 = arith.cmpi sge, %233, %344 : vector<64x128xi32>
    %c70_i32 = arith.constant 70 : i32
    %346 = vector.broadcast %c70_i32 : i32 to vector<64x128xi32>
    %347 = arith.cmpi slt, %233, %346 : vector<64x128xi32>
    %348 = arith.andi %345, %347 : vector<64x128xi1>
    %cst_112 = arith.constant 0.000000e+00 : f32
    %349 = vector.broadcast %cst_112 : f32 to vector<64x128xf32>
    %350 = arith.select %348, %343, %349 : vector<64x128xi1>, vector<64x128xf32>
    %351 = vector.extract_strided_slice %232 {offsets = [9, 0], sizes = [1, 128], strides = [1, 1]} : vector<31x128xf32> to vector<1x128xf32>
    %352 = vector.broadcast %351 : vector<1x128xf32> to vector<64x128xf32>
    %353 = arith.mulf %350, %352 : vector<64x128xf32>
    %354 = arith.addf %342, %353 : vector<64x128xf32>
    %c5_i32 = arith.constant 5 : i32
    %355 = tpu.dynamic_rotate %231 by %c5_i32 dim 0 : vector<64x128xf32>, i32 -> vector<64x128xf32>
    %c5_i32_113 = arith.constant 5 : i32
    %356 = vector.broadcast %c5_i32_113 : i32 to vector<64x128xi32>
    %357 = arith.cmpi sge, %233, %356 : vector<64x128xi32>
    %c69_i32 = arith.constant 69 : i32
    %358 = vector.broadcast %c69_i32 : i32 to vector<64x128xi32>
    %359 = arith.cmpi slt, %233, %358 : vector<64x128xi32>
    %360 = arith.andi %357, %359 : vector<64x128xi1>
    %cst_114 = arith.constant 0.000000e+00 : f32
    %361 = vector.broadcast %cst_114 : f32 to vector<64x128xf32>
    %362 = arith.select %360, %355, %361 : vector<64x128xi1>, vector<64x128xf32>
    %363 = vector.extract_strided_slice %232 {offsets = [10, 0], sizes = [1, 128], strides = [1, 1]} : vector<31x128xf32> to vector<1x128xf32>
    %364 = vector.broadcast %363 : vector<1x128xf32> to vector<64x128xf32>
    %365 = arith.mulf %362, %364 : vector<64x128xf32>
    %366 = arith.addf %354, %365 : vector<64x128xf32>
    %c4_i32 = arith.constant 4 : i32
    %367 = tpu.dynamic_rotate %231 by %c4_i32 dim 0 : vector<64x128xf32>, i32 -> vector<64x128xf32>
    %c4_i32_115 = arith.constant 4 : i32
    %368 = vector.broadcast %c4_i32_115 : i32 to vector<64x128xi32>
    %369 = arith.cmpi sge, %233, %368 : vector<64x128xi32>
    %c68_i32 = arith.constant 68 : i32
    %370 = vector.broadcast %c68_i32 : i32 to vector<64x128xi32>
    %371 = arith.cmpi slt, %233, %370 : vector<64x128xi32>
    %372 = arith.andi %369, %371 : vector<64x128xi1>
    %cst_116 = arith.constant 0.000000e+00 : f32
    %373 = vector.broadcast %cst_116 : f32 to vector<64x128xf32>
    %374 = arith.select %372, %367, %373 : vector<64x128xi1>, vector<64x128xf32>
    %375 = vector.extract_strided_slice %232 {offsets = [11, 0], sizes = [1, 128], strides = [1, 1]} : vector<31x128xf32> to vector<1x128xf32>
    %376 = vector.broadcast %375 : vector<1x128xf32> to vector<64x128xf32>
    %377 = arith.mulf %374, %376 : vector<64x128xf32>
    %378 = arith.addf %366, %377 : vector<64x128xf32>
    %c3_i32 = arith.constant 3 : i32
    %379 = tpu.dynamic_rotate %231 by %c3_i32 dim 0 : vector<64x128xf32>, i32 -> vector<64x128xf32>
    %c3_i32_117 = arith.constant 3 : i32
    %380 = vector.broadcast %c3_i32_117 : i32 to vector<64x128xi32>
    %381 = arith.cmpi sge, %233, %380 : vector<64x128xi32>
    %c67_i32 = arith.constant 67 : i32
    %382 = vector.broadcast %c67_i32 : i32 to vector<64x128xi32>
    %383 = arith.cmpi slt, %233, %382 : vector<64x128xi32>
    %384 = arith.andi %381, %383 : vector<64x128xi1>
    %cst_118 = arith.constant 0.000000e+00 : f32
    %385 = vector.broadcast %cst_118 : f32 to vector<64x128xf32>
    %386 = arith.select %384, %379, %385 : vector<64x128xi1>, vector<64x128xf32>
    %387 = vector.extract_strided_slice %232 {offsets = [12, 0], sizes = [1, 128], strides = [1, 1]} : vector<31x128xf32> to vector<1x128xf32>
    %388 = vector.broadcast %387 : vector<1x128xf32> to vector<64x128xf32>
    %389 = arith.mulf %386, %388 : vector<64x128xf32>
    %390 = arith.addf %378, %389 : vector<64x128xf32>
    %c2_i32 = arith.constant 2 : i32
    %391 = tpu.dynamic_rotate %231 by %c2_i32 dim 0 : vector<64x128xf32>, i32 -> vector<64x128xf32>
    %c2_i32_119 = arith.constant 2 : i32
    %392 = vector.broadcast %c2_i32_119 : i32 to vector<64x128xi32>
    %393 = arith.cmpi sge, %233, %392 : vector<64x128xi32>
    %c66_i32 = arith.constant 66 : i32
    %394 = vector.broadcast %c66_i32 : i32 to vector<64x128xi32>
    %395 = arith.cmpi slt, %233, %394 : vector<64x128xi32>
    %396 = arith.andi %393, %395 : vector<64x128xi1>
    %cst_120 = arith.constant 0.000000e+00 : f32
    %397 = vector.broadcast %cst_120 : f32 to vector<64x128xf32>
    %398 = arith.select %396, %391, %397 : vector<64x128xi1>, vector<64x128xf32>
    %399 = vector.extract_strided_slice %232 {offsets = [13, 0], sizes = [1, 128], strides = [1, 1]} : vector<31x128xf32> to vector<1x128xf32>
    %400 = vector.broadcast %399 : vector<1x128xf32> to vector<64x128xf32>
    %401 = arith.mulf %398, %400 : vector<64x128xf32>
    %402 = arith.addf %390, %401 : vector<64x128xf32>
    %c1_i32 = arith.constant 1 : i32
    %403 = tpu.dynamic_rotate %231 by %c1_i32 dim 0 : vector<64x128xf32>, i32 -> vector<64x128xf32>
    %c1_i32_121 = arith.constant 1 : i32
    %404 = vector.broadcast %c1_i32_121 : i32 to vector<64x128xi32>
    %405 = arith.cmpi sge, %233, %404 : vector<64x128xi32>
    %c65_i32 = arith.constant 65 : i32
    %406 = vector.broadcast %c65_i32 : i32 to vector<64x128xi32>
    %407 = arith.cmpi slt, %233, %406 : vector<64x128xi32>
    %408 = arith.andi %405, %407 : vector<64x128xi1>
    %cst_122 = arith.constant 0.000000e+00 : f32
    %409 = vector.broadcast %cst_122 : f32 to vector<64x128xf32>
    %410 = arith.select %408, %403, %409 : vector<64x128xi1>, vector<64x128xf32>
    %411 = vector.extract_strided_slice %232 {offsets = [14, 0], sizes = [1, 128], strides = [1, 1]} : vector<31x128xf32> to vector<1x128xf32>
    %412 = vector.broadcast %411 : vector<1x128xf32> to vector<64x128xf32>
    %413 = arith.mulf %410, %412 : vector<64x128xf32>
    %414 = arith.addf %402, %413 : vector<64x128xf32>
    %c0_i32 = arith.constant 0 : i32
    %415 = vector.broadcast %c0_i32 : i32 to vector<64x128xi32>
    %416 = arith.cmpi sge, %233, %415 : vector<64x128xi32>
    %c64_i32 = arith.constant 64 : i32
    %417 = vector.broadcast %c64_i32 : i32 to vector<64x128xi32>
    %418 = arith.cmpi slt, %233, %417 : vector<64x128xi32>
    %419 = arith.andi %416, %418 : vector<64x128xi1>
    %cst_123 = arith.constant 0.000000e+00 : f32
    %420 = vector.broadcast %cst_123 : f32 to vector<64x128xf32>
    %421 = arith.select %419, %231, %420 : vector<64x128xi1>, vector<64x128xf32>
    %422 = vector.extract_strided_slice %232 {offsets = [15, 0], sizes = [1, 128], strides = [1, 1]} : vector<31x128xf32> to vector<1x128xf32>
    %423 = vector.broadcast %422 : vector<1x128xf32> to vector<64x128xf32>
    %424 = arith.mulf %421, %423 : vector<64x128xf32>
    %425 = arith.addf %414, %424 : vector<64x128xf32>
    %c63_i32 = arith.constant 63 : i32
    %426 = tpu.dynamic_rotate %231 by %c63_i32 dim 0 : vector<64x128xf32>, i32 -> vector<64x128xf32>
    %c-1_i32 = arith.constant -1 : i32
    %427 = vector.broadcast %c-1_i32 : i32 to vector<64x128xi32>
    %428 = arith.cmpi sge, %233, %427 : vector<64x128xi32>
    %c63_i32_124 = arith.constant 63 : i32
    %429 = vector.broadcast %c63_i32_124 : i32 to vector<64x128xi32>
    %430 = arith.cmpi slt, %233, %429 : vector<64x128xi32>
    %431 = arith.andi %428, %430 : vector<64x128xi1>
    %cst_125 = arith.constant 0.000000e+00 : f32
    %432 = vector.broadcast %cst_125 : f32 to vector<64x128xf32>
    %433 = arith.select %431, %426, %432 : vector<64x128xi1>, vector<64x128xf32>
    %434 = vector.extract_strided_slice %232 {offsets = [16, 0], sizes = [1, 128], strides = [1, 1]} : vector<31x128xf32> to vector<1x128xf32>
    %435 = vector.broadcast %434 : vector<1x128xf32> to vector<64x128xf32>
    %436 = arith.mulf %433, %435 : vector<64x128xf32>
    %437 = arith.addf %425, %436 : vector<64x128xf32>
    %c62_i32 = arith.constant 62 : i32
    %438 = tpu.dynamic_rotate %231 by %c62_i32 dim 0 : vector<64x128xf32>, i32 -> vector<64x128xf32>
    %c-2_i32 = arith.constant -2 : i32
    %439 = vector.broadcast %c-2_i32 : i32 to vector<64x128xi32>
    %440 = arith.cmpi sge, %233, %439 : vector<64x128xi32>
    %c62_i32_126 = arith.constant 62 : i32
    %441 = vector.broadcast %c62_i32_126 : i32 to vector<64x128xi32>
    %442 = arith.cmpi slt, %233, %441 : vector<64x128xi32>
    %443 = arith.andi %440, %442 : vector<64x128xi1>
    %cst_127 = arith.constant 0.000000e+00 : f32
    %444 = vector.broadcast %cst_127 : f32 to vector<64x128xf32>
    %445 = arith.select %443, %438, %444 : vector<64x128xi1>, vector<64x128xf32>
    %446 = vector.extract_strided_slice %232 {offsets = [17, 0], sizes = [1, 128], strides = [1, 1]} : vector<31x128xf32> to vector<1x128xf32>
    %447 = vector.broadcast %446 : vector<1x128xf32> to vector<64x128xf32>
    %448 = arith.mulf %445, %447 : vector<64x128xf32>
    %449 = arith.addf %437, %448 : vector<64x128xf32>
    %c61_i32 = arith.constant 61 : i32
    %450 = tpu.dynamic_rotate %231 by %c61_i32 dim 0 : vector<64x128xf32>, i32 -> vector<64x128xf32>
    %c-3_i32 = arith.constant -3 : i32
    %451 = vector.broadcast %c-3_i32 : i32 to vector<64x128xi32>
    %452 = arith.cmpi sge, %233, %451 : vector<64x128xi32>
    %c61_i32_128 = arith.constant 61 : i32
    %453 = vector.broadcast %c61_i32_128 : i32 to vector<64x128xi32>
    %454 = arith.cmpi slt, %233, %453 : vector<64x128xi32>
    %455 = arith.andi %452, %454 : vector<64x128xi1>
    %cst_129 = arith.constant 0.000000e+00 : f32
    %456 = vector.broadcast %cst_129 : f32 to vector<64x128xf32>
    %457 = arith.select %455, %450, %456 : vector<64x128xi1>, vector<64x128xf32>
    %458 = vector.extract_strided_slice %232 {offsets = [18, 0], sizes = [1, 128], strides = [1, 1]} : vector<31x128xf32> to vector<1x128xf32>
    %459 = vector.broadcast %458 : vector<1x128xf32> to vector<64x128xf32>
    %460 = arith.mulf %457, %459 : vector<64x128xf32>
    %461 = arith.addf %449, %460 : vector<64x128xf32>
    %c60_i32 = arith.constant 60 : i32
    %462 = tpu.dynamic_rotate %231 by %c60_i32 dim 0 : vector<64x128xf32>, i32 -> vector<64x128xf32>
    %c-4_i32 = arith.constant -4 : i32
    %463 = vector.broadcast %c-4_i32 : i32 to vector<64x128xi32>
    %464 = arith.cmpi sge, %233, %463 : vector<64x128xi32>
    %c60_i32_130 = arith.constant 60 : i32
    %465 = vector.broadcast %c60_i32_130 : i32 to vector<64x128xi32>
    %466 = arith.cmpi slt, %233, %465 : vector<64x128xi32>
    %467 = arith.andi %464, %466 : vector<64x128xi1>
    %cst_131 = arith.constant 0.000000e+00 : f32
    %468 = vector.broadcast %cst_131 : f32 to vector<64x128xf32>
    %469 = arith.select %467, %462, %468 : vector<64x128xi1>, vector<64x128xf32>
    %470 = vector.extract_strided_slice %232 {offsets = [19, 0], sizes = [1, 128], strides = [1, 1]} : vector<31x128xf32> to vector<1x128xf32>
    %471 = vector.broadcast %470 : vector<1x128xf32> to vector<64x128xf32>
    %472 = arith.mulf %469, %471 : vector<64x128xf32>
    %473 = arith.addf %461, %472 : vector<64x128xf32>
    %c59_i32 = arith.constant 59 : i32
    %474 = tpu.dynamic_rotate %231 by %c59_i32 dim 0 : vector<64x128xf32>, i32 -> vector<64x128xf32>
    %c-5_i32 = arith.constant -5 : i32
    %475 = vector.broadcast %c-5_i32 : i32 to vector<64x128xi32>
    %476 = arith.cmpi sge, %233, %475 : vector<64x128xi32>
    %c59_i32_132 = arith.constant 59 : i32
    %477 = vector.broadcast %c59_i32_132 : i32 to vector<64x128xi32>
    %478 = arith.cmpi slt, %233, %477 : vector<64x128xi32>
    %479 = arith.andi %476, %478 : vector<64x128xi1>
    %cst_133 = arith.constant 0.000000e+00 : f32
    %480 = vector.broadcast %cst_133 : f32 to vector<64x128xf32>
    %481 = arith.select %479, %474, %480 : vector<64x128xi1>, vector<64x128xf32>
    %482 = vector.extract_strided_slice %232 {offsets = [20, 0], sizes = [1, 128], strides = [1, 1]} : vector<31x128xf32> to vector<1x128xf32>
    %483 = vector.broadcast %482 : vector<1x128xf32> to vector<64x128xf32>
    %484 = arith.mulf %481, %483 : vector<64x128xf32>
    %485 = arith.addf %473, %484 : vector<64x128xf32>
    %c58_i32 = arith.constant 58 : i32
    %486 = tpu.dynamic_rotate %231 by %c58_i32 dim 0 : vector<64x128xf32>, i32 -> vector<64x128xf32>
    %c-6_i32 = arith.constant -6 : i32
    %487 = vector.broadcast %c-6_i32 : i32 to vector<64x128xi32>
    %488 = arith.cmpi sge, %233, %487 : vector<64x128xi32>
    %c58_i32_134 = arith.constant 58 : i32
    %489 = vector.broadcast %c58_i32_134 : i32 to vector<64x128xi32>
    %490 = arith.cmpi slt, %233, %489 : vector<64x128xi32>
    %491 = arith.andi %488, %490 : vector<64x128xi1>
    %cst_135 = arith.constant 0.000000e+00 : f32
    %492 = vector.broadcast %cst_135 : f32 to vector<64x128xf32>
    %493 = arith.select %491, %486, %492 : vector<64x128xi1>, vector<64x128xf32>
    %494 = vector.extract_strided_slice %232 {offsets = [21, 0], sizes = [1, 128], strides = [1, 1]} : vector<31x128xf32> to vector<1x128xf32>
    %495 = vector.broadcast %494 : vector<1x128xf32> to vector<64x128xf32>
    %496 = arith.mulf %493, %495 : vector<64x128xf32>
    %497 = arith.addf %485, %496 : vector<64x128xf32>
    %c57_i32 = arith.constant 57 : i32
    %498 = tpu.dynamic_rotate %231 by %c57_i32 dim 0 : vector<64x128xf32>, i32 -> vector<64x128xf32>
    %c-7_i32 = arith.constant -7 : i32
    %499 = vector.broadcast %c-7_i32 : i32 to vector<64x128xi32>
    %500 = arith.cmpi sge, %233, %499 : vector<64x128xi32>
    %c57_i32_136 = arith.constant 57 : i32
    %501 = vector.broadcast %c57_i32_136 : i32 to vector<64x128xi32>
    %502 = arith.cmpi slt, %233, %501 : vector<64x128xi32>
    %503 = arith.andi %500, %502 : vector<64x128xi1>
    %cst_137 = arith.constant 0.000000e+00 : f32
    %504 = vector.broadcast %cst_137 : f32 to vector<64x128xf32>
    %505 = arith.select %503, %498, %504 : vector<64x128xi1>, vector<64x128xf32>
    %506 = vector.extract_strided_slice %232 {offsets = [22, 0], sizes = [1, 128], strides = [1, 1]} : vector<31x128xf32> to vector<1x128xf32>
    %507 = vector.broadcast %506 : vector<1x128xf32> to vector<64x128xf32>
    %508 = arith.mulf %505, %507 : vector<64x128xf32>
    %509 = arith.addf %497, %508 : vector<64x128xf32>
    %c56_i32 = arith.constant 56 : i32
    %510 = tpu.dynamic_rotate %231 by %c56_i32 dim 0 : vector<64x128xf32>, i32 -> vector<64x128xf32>
    %c-8_i32 = arith.constant -8 : i32
    %511 = vector.broadcast %c-8_i32 : i32 to vector<64x128xi32>
    %512 = arith.cmpi sge, %233, %511 : vector<64x128xi32>
    %c56_i32_138 = arith.constant 56 : i32
    %513 = vector.broadcast %c56_i32_138 : i32 to vector<64x128xi32>
    %514 = arith.cmpi slt, %233, %513 : vector<64x128xi32>
    %515 = arith.andi %512, %514 : vector<64x128xi1>
    %cst_139 = arith.constant 0.000000e+00 : f32
    %516 = vector.broadcast %cst_139 : f32 to vector<64x128xf32>
    %517 = arith.select %515, %510, %516 : vector<64x128xi1>, vector<64x128xf32>
    %518 = vector.extract_strided_slice %232 {offsets = [23, 0], sizes = [1, 128], strides = [1, 1]} : vector<31x128xf32> to vector<1x128xf32>
    %519 = vector.broadcast %518 : vector<1x128xf32> to vector<64x128xf32>
    %520 = arith.mulf %517, %519 : vector<64x128xf32>
    %521 = arith.addf %509, %520 : vector<64x128xf32>
    %c55_i32 = arith.constant 55 : i32
    %522 = tpu.dynamic_rotate %231 by %c55_i32 dim 0 : vector<64x128xf32>, i32 -> vector<64x128xf32>
    %c-9_i32 = arith.constant -9 : i32
    %523 = vector.broadcast %c-9_i32 : i32 to vector<64x128xi32>
    %524 = arith.cmpi sge, %233, %523 : vector<64x128xi32>
    %c55_i32_140 = arith.constant 55 : i32
    %525 = vector.broadcast %c55_i32_140 : i32 to vector<64x128xi32>
    %526 = arith.cmpi slt, %233, %525 : vector<64x128xi32>
    %527 = arith.andi %524, %526 : vector<64x128xi1>
    %cst_141 = arith.constant 0.000000e+00 : f32
    %528 = vector.broadcast %cst_141 : f32 to vector<64x128xf32>
    %529 = arith.select %527, %522, %528 : vector<64x128xi1>, vector<64x128xf32>
    %530 = vector.extract_strided_slice %232 {offsets = [24, 0], sizes = [1, 128], strides = [1, 1]} : vector<31x128xf32> to vector<1x128xf32>
    %531 = vector.broadcast %530 : vector<1x128xf32> to vector<64x128xf32>
    %532 = arith.mulf %529, %531 : vector<64x128xf32>
    %533 = arith.addf %521, %532 : vector<64x128xf32>
    %c54_i32 = arith.constant 54 : i32
    %534 = tpu.dynamic_rotate %231 by %c54_i32 dim 0 : vector<64x128xf32>, i32 -> vector<64x128xf32>
    %c-10_i32 = arith.constant -10 : i32
    %535 = vector.broadcast %c-10_i32 : i32 to vector<64x128xi32>
    %536 = arith.cmpi sge, %233, %535 : vector<64x128xi32>
    %c54_i32_142 = arith.constant 54 : i32
    %537 = vector.broadcast %c54_i32_142 : i32 to vector<64x128xi32>
    %538 = arith.cmpi slt, %233, %537 : vector<64x128xi32>
    %539 = arith.andi %536, %538 : vector<64x128xi1>
    %cst_143 = arith.constant 0.000000e+00 : f32
    %540 = vector.broadcast %cst_143 : f32 to vector<64x128xf32>
    %541 = arith.select %539, %534, %540 : vector<64x128xi1>, vector<64x128xf32>
    %542 = vector.extract_strided_slice %232 {offsets = [25, 0], sizes = [1, 128], strides = [1, 1]} : vector<31x128xf32> to vector<1x128xf32>
    %543 = vector.broadcast %542 : vector<1x128xf32> to vector<64x128xf32>
    %544 = arith.mulf %541, %543 : vector<64x128xf32>
    %545 = arith.addf %533, %544 : vector<64x128xf32>
    %c53_i32 = arith.constant 53 : i32
    %546 = tpu.dynamic_rotate %231 by %c53_i32 dim 0 : vector<64x128xf32>, i32 -> vector<64x128xf32>
    %c-11_i32 = arith.constant -11 : i32
    %547 = vector.broadcast %c-11_i32 : i32 to vector<64x128xi32>
    %548 = arith.cmpi sge, %233, %547 : vector<64x128xi32>
    %c53_i32_144 = arith.constant 53 : i32
    %549 = vector.broadcast %c53_i32_144 : i32 to vector<64x128xi32>
    %550 = arith.cmpi slt, %233, %549 : vector<64x128xi32>
    %551 = arith.andi %548, %550 : vector<64x128xi1>
    %cst_145 = arith.constant 0.000000e+00 : f32
    %552 = vector.broadcast %cst_145 : f32 to vector<64x128xf32>
    %553 = arith.select %551, %546, %552 : vector<64x128xi1>, vector<64x128xf32>
    %554 = vector.extract_strided_slice %232 {offsets = [26, 0], sizes = [1, 128], strides = [1, 1]} : vector<31x128xf32> to vector<1x128xf32>
    %555 = vector.broadcast %554 : vector<1x128xf32> to vector<64x128xf32>
    %556 = arith.mulf %553, %555 : vector<64x128xf32>
    %557 = arith.addf %545, %556 : vector<64x128xf32>
    %c52_i32 = arith.constant 52 : i32
    %558 = tpu.dynamic_rotate %231 by %c52_i32 dim 0 : vector<64x128xf32>, i32 -> vector<64x128xf32>
    %c-12_i32 = arith.constant -12 : i32
    %559 = vector.broadcast %c-12_i32 : i32 to vector<64x128xi32>
    %560 = arith.cmpi sge, %233, %559 : vector<64x128xi32>
    %c52_i32_146 = arith.constant 52 : i32
    %561 = vector.broadcast %c52_i32_146 : i32 to vector<64x128xi32>
    %562 = arith.cmpi slt, %233, %561 : vector<64x128xi32>
    %563 = arith.andi %560, %562 : vector<64x128xi1>
    %cst_147 = arith.constant 0.000000e+00 : f32
    %564 = vector.broadcast %cst_147 : f32 to vector<64x128xf32>
    %565 = arith.select %563, %558, %564 : vector<64x128xi1>, vector<64x128xf32>
    %566 = vector.extract_strided_slice %232 {offsets = [27, 0], sizes = [1, 128], strides = [1, 1]} : vector<31x128xf32> to vector<1x128xf32>
    %567 = vector.broadcast %566 : vector<1x128xf32> to vector<64x128xf32>
    %568 = arith.mulf %565, %567 : vector<64x128xf32>
    %569 = arith.addf %557, %568 : vector<64x128xf32>
    %c51_i32 = arith.constant 51 : i32
    %570 = tpu.dynamic_rotate %231 by %c51_i32 dim 0 : vector<64x128xf32>, i32 -> vector<64x128xf32>
    %c-13_i32 = arith.constant -13 : i32
    %571 = vector.broadcast %c-13_i32 : i32 to vector<64x128xi32>
    %572 = arith.cmpi sge, %233, %571 : vector<64x128xi32>
    %c51_i32_148 = arith.constant 51 : i32
    %573 = vector.broadcast %c51_i32_148 : i32 to vector<64x128xi32>
    %574 = arith.cmpi slt, %233, %573 : vector<64x128xi32>
    %575 = arith.andi %572, %574 : vector<64x128xi1>
    %cst_149 = arith.constant 0.000000e+00 : f32
    %576 = vector.broadcast %cst_149 : f32 to vector<64x128xf32>
    %577 = arith.select %575, %570, %576 : vector<64x128xi1>, vector<64x128xf32>
    %578 = vector.extract_strided_slice %232 {offsets = [28, 0], sizes = [1, 128], strides = [1, 1]} : vector<31x128xf32> to vector<1x128xf32>
    %579 = vector.broadcast %578 : vector<1x128xf32> to vector<64x128xf32>
    %580 = arith.mulf %577, %579 : vector<64x128xf32>
    %581 = arith.addf %569, %580 : vector<64x128xf32>
    %c50_i32 = arith.constant 50 : i32
    %582 = tpu.dynamic_rotate %231 by %c50_i32 dim 0 : vector<64x128xf32>, i32 -> vector<64x128xf32>
    %c-14_i32 = arith.constant -14 : i32
    %583 = vector.broadcast %c-14_i32 : i32 to vector<64x128xi32>
    %584 = arith.cmpi sge, %233, %583 : vector<64x128xi32>
    %c50_i32_150 = arith.constant 50 : i32
    %585 = vector.broadcast %c50_i32_150 : i32 to vector<64x128xi32>
    %586 = arith.cmpi slt, %233, %585 : vector<64x128xi32>
    %587 = arith.andi %584, %586 : vector<64x128xi1>
    %cst_151 = arith.constant 0.000000e+00 : f32
    %588 = vector.broadcast %cst_151 : f32 to vector<64x128xf32>
    %589 = arith.select %587, %582, %588 : vector<64x128xi1>, vector<64x128xf32>
    %590 = vector.extract_strided_slice %232 {offsets = [29, 0], sizes = [1, 128], strides = [1, 1]} : vector<31x128xf32> to vector<1x128xf32>
    %591 = vector.broadcast %590 : vector<1x128xf32> to vector<64x128xf32>
    %592 = arith.mulf %589, %591 : vector<64x128xf32>
    %593 = arith.addf %581, %592 : vector<64x128xf32>
    %c49_i32 = arith.constant 49 : i32
    %594 = tpu.dynamic_rotate %231 by %c49_i32 dim 0 : vector<64x128xf32>, i32 -> vector<64x128xf32>
    %c-15_i32 = arith.constant -15 : i32
    %595 = vector.broadcast %c-15_i32 : i32 to vector<64x128xi32>
    %596 = arith.cmpi sge, %233, %595 : vector<64x128xi32>
    %c49_i32_152 = arith.constant 49 : i32
    %597 = vector.broadcast %c49_i32_152 : i32 to vector<64x128xi32>
    %598 = arith.cmpi slt, %233, %597 : vector<64x128xi32>
    %599 = arith.andi %596, %598 : vector<64x128xi1>
    %cst_153 = arith.constant 0.000000e+00 : f32
    %600 = vector.broadcast %cst_153 : f32 to vector<64x128xf32>
    %601 = arith.select %599, %594, %600 : vector<64x128xi1>, vector<64x128xf32>
    %602 = vector.extract_strided_slice %232 {offsets = [30, 0], sizes = [1, 128], strides = [1, 1]} : vector<31x128xf32> to vector<1x128xf32>
    %603 = vector.broadcast %602 : vector<1x128xf32> to vector<64x128xf32>
    %604 = arith.mulf %601, %603 : vector<64x128xf32>
    %605 = arith.addf %593, %604 : vector<64x128xf32>
    %c0_154 = arith.constant 0 : index
    %c0_155 = arith.constant 0 : index
    %606 = vector.load %arg17[%c0_154, %c0_155] : memref<1x128xf32, #tpu.memory_space<vmem>>, vector<1x128xf32>
    %607 = vector.broadcast %606 : vector<1x128xf32> to vector<64x128xf32>
    %608 = arith.addf %605, %607 : vector<64x128xf32>
    %c0_156 = arith.constant 0 : index
    %c0_157 = arith.constant 0 : index
    %c0_158 = arith.constant 0 : index
    %609 = vector.load %arg19[%c0_156, %c0_157, %c0_158] : memref<1x64x128xf32, #tpu.memory_space<vmem>>, vector<1x64x128xf32>
    %610 = vector.shape_cast %609 : vector<1x64x128xf32> to vector<64x128xf32>
    %611 = vector.shape_cast %608 : vector<64x128xf32> to vector<1x64x128xf32>
    tpu.vector_store %arg19[%c0_156, %c0_157, %c0_158], %611 {strides = array<i32>} : memref<1x64x128xf32, #tpu.memory_space<vmem>>, vector<1x64x128xf32>,
    %cst_159 = arith.constant dense<0.000000e+00> : vector<128xf32>
    %612 = vector.multi_reduction <add>, %608, %cst_159 [0] : vector<64x128xf32> to vector<128xf32>
    %613 = vector.shape_cast %612 : vector<128xf32> to vector<1x128xf32>
    %c0_160 = arith.constant 0 : index
    %c0_161 = arith.constant 0 : index
    %c0_162 = arith.constant 0 : index
    %614 = vector.load %arg20[%c0_160, %c0_161, %c0_162] : memref<1x1x128xf32, #tpu.memory_space<vmem>>, vector<1x1x128xf32>
    %615 = vector.shape_cast %614 : vector<1x1x128xf32> to vector<1x128xf32>
    %616 = vector.shape_cast %613 : vector<1x128xf32> to vector<1x1x128xf32>
    tpu.vector_store %arg20[%c0_160, %c0_161, %c0_162], %616 {strides = array<i32>} : memref<1x1x128xf32, #tpu.memory_space<vmem>>, vector<1x1x128xf32>,
    %617 = arith.mulf %608, %608 : vector<64x128xf32>
    %cst_163 = arith.constant dense<0.000000e+00> : vector<128xf32>
    %618 = vector.multi_reduction <add>, %617, %cst_163 [0] : vector<64x128xf32> to vector<128xf32>
    %619 = vector.shape_cast %618 : vector<128xf32> to vector<1x128xf32>
    %c0_164 = arith.constant 0 : index
    %c0_165 = arith.constant 0 : index
    %c0_166 = arith.constant 0 : index
    %620 = vector.load %arg21[%c0_164, %c0_165, %c0_166] : memref<1x1x128xf32, #tpu.memory_space<vmem>>, vector<1x1x128xf32>
    %621 = vector.shape_cast %620 : vector<1x1x128xf32> to vector<1x128xf32>
    %622 = vector.shape_cast %619 : vector<1x128xf32> to vector<1x1x128xf32>
    tpu.vector_store %arg21[%c0_164, %c0_165, %c0_166], %622 {strides = array<i32>} : memref<1x1x128xf32, #tpu.memory_space<vmem>>, vector<1x1x128xf32>,
    return
  }
  func.func @transform_0(%arg0: i32) -> (i32, i32, i32) {
    %c0_i32 = arith.constant 0 : i32
    %c0_i32_0 = arith.constant 0 : i32
    %c0_i32_1 = arith.constant 0 : i32
    return %arg0, %c0_i32, %c0_i32_0 : i32, i32, i32
  }
  func.func @transform_1(%arg0: i32) -> (i32, i32) {
    %c0_i32 = arith.constant 0 : i32
    %c0_i32_0 = arith.constant 0 : i32
    %c0_i32_1 = arith.constant 0 : i32
    return %c0_i32, %c0_i32_0 : i32, i32
  }
  func.func @transform_2(%arg0: i32) -> (i32, i32) {
    %c0_i32 = arith.constant 0 : i32
    %c0_i32_0 = arith.constant 0 : i32
    %c0_i32_1 = arith.constant 0 : i32
    return %c0_i32, %c0_i32_0 : i32, i32
  }
  func.func @transform_3(%arg0: i32) -> (i32, i32) {
    %c0_i32 = arith.constant 0 : i32
    %c0_i32_0 = arith.constant 0 : i32
    %c0_i32_1 = arith.constant 0 : i32
    return %c0_i32, %c0_i32_0 : i32, i32
  }
  func.func @transform_4(%arg0: i32) -> (i32, i32) {
    %c0_i32 = arith.constant 0 : i32
    %c0_i32_0 = arith.constant 0 : i32
    %c0_i32_1 = arith.constant 0 : i32
    return %c0_i32, %c0_i32_0 : i32, i32
  }
  func.func @transform_5(%arg0: i32) -> (i32, i32) {
    %c0_i32 = arith.constant 0 : i32
    %c0_i32_0 = arith.constant 0 : i32
    %c0_i32_1 = arith.constant 0 : i32
    return %c0_i32, %c0_i32_0 : i32, i32
  }
  func.func @transform_6(%arg0: i32) -> (i32, i32) {
    %c0_i32 = arith.constant 0 : i32
    %c0_i32_0 = arith.constant 0 : i32
    %c0_i32_1 = arith.constant 0 : i32
    return %c0_i32, %c0_i32_0 : i32, i32
  }
  func.func @transform_7(%arg0: i32) -> (i32, i32) {
    %c0_i32 = arith.constant 0 : i32
    %c0_i32_0 = arith.constant 0 : i32
    %c0_i32_1 = arith.constant 0 : i32
    return %c0_i32, %c0_i32_0 : i32, i32
  }
  func.func @transform_8(%arg0: i32) -> (i32, i32) {
    %c0_i32 = arith.constant 0 : i32
    %c0_i32_0 = arith.constant 0 : i32
    %c0_i32_1 = arith.constant 0 : i32
    return %c0_i32, %c0_i32_0 : i32, i32
  }
  func.func @transform_9(%arg0: i32) -> (i32, i32) {
    %c0_i32 = arith.constant 0 : i32
    %c0_i32_0 = arith.constant 0 : i32
    %c0_i32_1 = arith.constant 0 : i32
    return %c0_i32, %c0_i32_0 : i32, i32
  }
  func.func @transform_10(%arg0: i32) -> (i32, i32, i32) {
    %c0_i32 = arith.constant 0 : i32
    %c0_i32_0 = arith.constant 0 : i32
    %c0_i32_1 = arith.constant 0 : i32
    %c0_i32_2 = arith.constant 0 : i32
    return %c0_i32, %c0_i32_0, %c0_i32_1 : i32, i32, i32
  }
  func.func @transform_11(%arg0: i32) -> (i32, i32) {
    %c0_i32 = arith.constant 0 : i32
    %c0_i32_0 = arith.constant 0 : i32
    %c0_i32_1 = arith.constant 0 : i32
    return %c0_i32, %c0_i32_0 : i32, i32
  }
  func.func @transform_12(%arg0: i32) -> (i32, i32) {
    %c0_i32 = arith.constant 0 : i32
    %c0_i32_0 = arith.constant 0 : i32
    %c0_i32_1 = arith.constant 0 : i32
    return %c0_i32, %c0_i32_0 : i32, i32
  }
  func.func @transform_13(%arg0: i32) -> (i32, i32) {
    %c0_i32 = arith.constant 0 : i32
    %c0_i32_0 = arith.constant 0 : i32
    %c0_i32_1 = arith.constant 0 : i32
    return %c0_i32, %c0_i32_0 : i32, i32
  }
  func.func @transform_14(%arg0: i32) -> (i32, i32) {
    %c0_i32 = arith.constant 0 : i32
    %c0_i32_0 = arith.constant 0 : i32
    %c0_i32_1 = arith.constant 0 : i32
    return %c0_i32, %c0_i32_0 : i32, i32
  }
  func.func @transform_15(%arg0: i32) -> (i32, i32) {
    %c0_i32 = arith.constant 0 : i32
    %c0_i32_0 = arith.constant 0 : i32
    %c0_i32_1 = arith.constant 0 : i32
    return %c0_i32, %c0_i32_0 : i32, i32
  }
  func.func @transform_16(%arg0: i32) -> (i32, i32) {
    %c0_i32 = arith.constant 0 : i32
    %c0_i32_0 = arith.constant 0 : i32
    %c0_i32_1 = arith.constant 0 : i32
    return %c0_i32, %c0_i32_0 : i32, i32
  }
  func.func @transform_17(%arg0: i32) -> (i32, i32, i32) {
    %c0_i32 = arith.constant 0 : i32
    %c0_i32_0 = arith.constant 0 : i32
    %c0_i32_1 = arith.constant 0 : i32
    return %arg0, %c0_i32, %c0_i32_0 : i32, i32, i32
  }
  func.func @transform_18(%arg0: i32) -> (i32, i32, i32) {
    %c0_i32 = arith.constant 0 : i32
    %c0_i32_0 = arith.constant 0 : i32
    %c0_i32_1 = arith.constant 0 : i32
    return %arg0, %c0_i32, %c0_i32_0 : i32, i32, i32
  }
  func.func @transform_19(%arg0: i32) -> (i32, i32, i32) {
    %c0_i32 = arith.constant 0 : i32
    %c0_i32_0 = arith.constant 0 : i32
    %c0_i32_1 = arith.constant 0 : i32
    return %arg0, %c0_i32, %c0_i32_0 : i32, i32, i32
  }
  func.func @transform_20(%arg0: i32) -> (i32, i32, i32) {
    %c0_i32 = arith.constant 0 : i32
    %c0_i32_0 = arith.constant 0 : i32
    %c0_i32_1 = arith.constant 0 : i32
    return %arg0, %c0_i32, %c0_i32_0 : i32, i32, i32
  }
}

</mosaic_0001>

<bundles_post_ra>
// kernel: conformer_block.3
= control target key start
LH: loop header
LB: loop body
LE: loop exit
PB: predicated region body
PF: predicated region fallthrough
CT: control target
= control target key end

     0   :  { %s5051_s0 = inlined_call_operand.vmem [shape: f32[128,64], index: 0, kind: input, shape index: {}]   ;;  %s5052_s1 = inlined_call_operand.vmem [shape: f32[128,128], index: 1, kind: input, shape index: {}]   ;;  %s5053_s2 = inlined_call_operand.vmem [shape: f32[2,1,128], index: 2, kind: input, shape index: {}]   ;;  %s5054_s3 = inlined_call_operand.vmem [shape: f32[2,1,128], index: 3, kind: input, shape index: {}]   ;;  %s5055_s4 = inlined_call_operand.vmem [shape: f32[1,128], index: 4, kind: input, shape index: {}]   ;;  %s5056_s5 = inlined_call_operand.vmem [shape: f32[1,128], index: 5, kind: input, shape index: {}]   ;;  %s5057_s6 = inlined_call_operand.vmem [shape: bf16[128,64], index: 6, kind: input, shape index: {}]   ;;  %s5058_s7 = inlined_call_operand.vmem [shape: f32[1,64], index: 7, kind: input, shape index: {}]   ;;  %s5059_s8 = inlined_call_operand.vmem [shape: f32[1,64], index: 8, kind: input, shape index: {}]   ;;  %s5060_s9 = inlined_call_operand.vmem [shape: f32[1,64], index: 9, kind: input, shape index: {}]   ;;  %s5061_s10 = inlined_call_operand.vmem [shape: bf16[64,256], index: 10, kind: input, shape index: {}]   ;;  %s5062_s11 = inlined_call_operand.vmem [shape: f32[1,256], index: 11, kind: input, shape index: {}]   ;;  %s5063_s12 = inlined_call_operand.vmem [shape: bf16[256,64], index: 12, kind: input, shape index: {}]   ;;  %s5064_s13 = inlined_call_operand.vmem [shape: f32[1,64], index: 13, kind: input, shape index: {}]   ;;  %s5065_s14 = inlined_call_operand.vmem [shape: f32[1,64], index: 14, kind: input, shape index: {}]   ;;  %s5066_s15 = inlined_call_operand.vmem [shape: f32[1,64], index: 15, kind: input, shape index: {}]   ;;  %s5067_s16 = inlined_call_operand.hbm [shape: f32[128,64], index: 16, kind: output, shape index: {}]  }
   0x1   :  { %5069 = sst [smem:[#allocation5_spill]] %s5051_s0 }
   0x2   :  { %v2775_v0 = vld [vmem:[%s5057_s6 + $0x38] sm:$0xff]  ;;  %vm89_vm0 = vcmask 1040384   ;;  %v2774_v1 = vld [vmem:[%s5057_s6 + $0x30] sm:$0xff]  ;;  %v87_v2 = vld [vmem:[%s5053_s2] sm:$0x1] }
   0x3   :  { %583 = vmatpush.bf16.msra.mxu0 %v2775_v0  ;;  %v88_v3 = vld [vmem:[%s5053_s2 + $0x1] sm:$0x1]  ;;  %v90_v4 = vsel %vm89_vm0, %v87_v2, 0.0  ;;  %v94_v6 = vld [vmem:[%s5054_s3] sm:$0x1]  ;;  %v2773_v11 = vld [vmem:[%s5057_s6 + $0x28] sm:$0xff] }
   0x4   :  { %v91_v5 = vsel %vm89_vm0, %v88_v3, 0.0  ;;  %v95_v7 = vld [vmem:[%s5054_s3 + $0x1] sm:$0x1]  ;;  %v96_v9 = vsel %vm89_vm0, %v94_v6, 0.0 }
   0x5   :  { %v92_v8 = vadd.f32 %v91_v5, %v90_v4  ;;  %v97_v10 = vsel %vm89_vm0, %v95_v7, 0.0 }
   0x6   :  { %v98_v12 = vadd.f32 %v97_v10, %v96_v9 }
   0x7   :  { %584 = vmatpush.bf16.msra.mxu0 %v2774_v1  ;;  %v93_v13 = vmul.f32 0.0078125, %v92_v8 }
   0x8   :  { %v99_v14 = vmul.f32 0.0078125, %v98_v12 }
   0x9   :  { %v100_v15 = vmul.f32 %v93_v13, %v93_v13 }
   0xa   :  { %21 = vsyncpa [#allocation3], 0  ;;  %v2772_v16 = vld [vmem:[%s5057_s6 + $0x20] sm:$0xff]  ;;  %v2771_v19 = vld [vmem:[%s5057_s6 + $0x18] sm:$0xff]  ;;  %v3240_v28 = vperm.slane %v93_v13, 0  ;;  %s5092_s22 = sld [smem:[#allocation5_spill]] }
   0xb   :  { %585 = vmatpush.bf16.msra.mxu0 %v2773_v11  ;;  %v101_v17 = vsub.f32 %v99_v14, %v100_v15  ;;  %v2770_v20 = vld [vmem:[%s5057_s6 + $0x10] sm:$0xff]  ;;  %v2769_v22 = vld [vmem:[%s5057_s6 + $0x8] sm:$0xff]  ;;  %v2768_v25 = vld [vmem:[%s5057_s6] sm:$0xff]  ;;  %s3115_s26 = smov 8  }
   0xc   :  { %v71_v27 = vld [vmem:[%s5052_s1] sm:$0xff]  ;;  %v72_v29 = vld [vmem:[%s5052_s1 + $0x8] sm:$0xff]  ;;  %v73_v31 = vld [vmem:[%s5052_s1 + $0x10] sm:$0xff] }
   0xd   :  { %v119_v18 = vadd.f32 1e-05, %v101_v17  ;;  %v74_v32 = vld [vmem:[%s5052_s1 + $0x18] sm:$0xff]  ;;  %v103_v34 = vsub.f32 %v71_v27, %v3240_v28  ;;  %v104_v35 = vsub.f32 %v72_v29, %v3240_v28  ;;  %v105_v36 = vsub.f32 %v73_v31, %v3240_v28  ;;  %v3260_v40 = vld [vmem:[%s5055_s4] ss:$0 sm:$0xff]  ;;  %v76_v42 = vld [vmem:[%s5052_s1 + $0x28] sm:$0xff] }
   0xe   :  { %v106_v37 = vsub.f32 %v74_v32, %v3240_v28  ;;  %v75_v41 = vld [vmem:[%s5052_s1 + $0x20] sm:$0xff]  ;;  %v108_v44 = vsub.f32 %v76_v42, %v3240_v28  ;;  %v77_v14 = vld [vmem:[%s5052_s1 + $0x30] sm:$0xff]  ;;  %s2564_s4 = sshll.u32 %s5067_s16, 4  ;;  %s2565_s4 = int_to_ptr.hbm [resolvable:$true] %s2564_s4 }
   0xf   :  { %586 = vmatpush.bf16.msra.mxu0 %v2772_v16  ;;  %2824 = vrsqrt.f32 %v119_v18  ;;  %vm126_vm1 = vweird.f32 %v119_v18  ;;  %v107_v43 = vsub.f32 %v75_v41, %v3240_v28  ;;  %v3275_v47 = vld [vmem:[%s5056_s5] ss:$0 sm:$0xff]  ;;  %v78_v16 = vld [vmem:[%s5052_s1 + $0x38] sm:$0xff]  ;;  %s3114_s5 = smov 128  }
  0x10   :  { %v110_v27 = vsub.f32 %v78_v16, %v3240_v28 }
  0x13   :  { %587 = vmatpush.bf16.msra.mxu0 %v2771_v19 }
  0x15   :  { %v2825_v21 = vpop.eup %2824 }
  0x16   :  { %v121_v23 = vmul.f32 %v2825_v21, %v119_v18  ;;  %vm127_vm2 = vweird.f32 %v2825_v21 }
  0x17   :  { %588 = vmatpush.bf16.msra.mxu0 %v2770_v20  ;;  %vm128_vm3 = vmor %vm126_vm1, %vm127_vm2 }
  0x18   :  { %v122_v24 = vmul.f32 %v2825_v21, %v121_v23 }
  0x1a   :  { %v123_v26 = vmul.f32 0.5, %v122_v24 }
  0x1b   :  { %589 = vmatpush.bf16.msra.mxu0 %v2769_v22  ;;  %v109_v22 = vsub.f32 %v77_v14, %v3240_v28 }
  0x1c   :  { %v124_v30 = vsub.f32 1.5, %v123_v26 }
  0x1e   :  { %v125_v33 = vmul.f32 %v2825_v21, %v124_v30 }
  0x1f   :  { %590 = vmatpush.bf16.msra.mxu0 %v2768_v25 }
  0x20   :  { %v129_v38 = vsel %vm128_vm3, %v2825_v21, %v125_v33 }
  0x21   :  { %v3255_v39 = vperm.slane %v129_v38, 0 }
  0x23   :  { %v131_v45 = vmul.f32 %v3255_v39, %v103_v34  ;;  %v132_v46 = vmul.f32 %v3255_v39, %v104_v35  ;;  %v133_v48 = vmul.f32 %v3255_v39, %v105_v36  ;;  %v134_v49 = vmul.f32 %v3255_v39, %v106_v37 }
  0x24   :  { %v135_v50 = vmul.f32 %v3255_v39, %v107_v43  ;;  %v136_v55 = vmul.f32 %v3255_v39, %v108_v44 }
  0x25   :  { %v151_v51 = vmul.f32 %v3260_v40, %v131_v45  ;;  %v152_v52 = vmul.f32 %v3260_v40, %v132_v46  ;;  %v153_v53 = vmul.f32 %v3260_v40, %v133_v48  ;;  %v154_v54 = vmul.f32 %v3260_v40, %v134_v49  ;;  %v81_v48 = vld [vmem:[%s5052_s1 + $0x50] sm:$0xff] }
  0x26   :  { %v155_v56 = vmul.f32 %v3260_v40, %v135_v50  ;;  %v156_v1 = vmul.f32 %v3260_v40, %v136_v55  ;;  %v137_v55 = vmul.f32 %v3255_v39, %v109_v22 }
  0x27   :  { %v3287_v57 = vadd.f32 %v3275_v47, %v151_v51  ;;  %v3290_v58 = vadd.f32 %v3275_v47, %v152_v52  ;;  %v3293_v59 = vadd.f32 %v3275_v47, %v153_v53  ;;  %v3296_v60 = vadd.f32 %v3275_v47, %v154_v54 }
  0x28   :  { %v3304_v2 = vadd.f32 %v3275_v47, %v155_v56  ;;  %v3307_v3 = vadd.f32 %v3275_v47, %v156_v1  ;;  %v138_v56 = vmul.f32 %v3255_v39, %v110_v27  ;;  %v79_v1 = vld [vmem:[%s5052_s1 + $0x40] sm:$0xff] }
  0x29   :  { %v2576_v61 = vmul.f32 -1.442695, %v3287_v57  ;;  %v2577_v62 = vmul.f32 -1.442695, %v3290_v58  ;;  %v2578_v63 = vmul.f32 -1.442695, %v3293_v59 }
  0x2a   :  { %v2579_v0 = vmul.f32 -1.442695, %v3296_v60  ;;  %v2580_v4 = vmul.f32 -1.442695, %v3304_v2  ;;  %v2581_v8 = vmul.f32 -1.442695, %v3307_v3 }
  0x2b   :  { %2826 = vpow2.f32 %v2576_v61 }
  0x2c   :  { %2828 = vpow2.f32 %v2577_v62 }
  0x2d   :  { %2830 = vpow2.f32 %v2578_v63 }
  0x2e   :  { %2832 = vpow2.f32 %v2579_v0 }
  0x2f   :  { %2834 = vpow2.f32 %v2580_v4 }
  0x31   :  { %v2827_v5 = vpop.eup %2826 }
  0x32   :  { %v2829_v6 = vpop.eup %2828  ;;  %v235_v7 = vadd.f32 1.0, %v2827_v5 }
  0x33   :  { %v2831_v9 = vpop.eup %2830  ;;  %v236_v10 = vadd.f32 1.0, %v2829_v6 }
  0x34   :  { %v2833_v11 = vpop.eup %2832  ;;  %2836 = vrcp.f32 %v235_v7  ;;  %v3311_v12 = vadd.f32 1.0, %v2831_v9  ;;  %v260_v18 = vand.u32 2147483647, %v235_v7  ;;  %v262_v21 = vand.u32 2147483648, %v235_v7 }
  0x35   :  { %2838 = vrcp.f32 %v236_v10  ;;  %v3313_v13 = vadd.f32 1.0, %v2833_v11  ;;  %v2835_v15 = vpop.eup %2834  ;;  %v275_v25 = vand.u32 2147483647, %v236_v10  ;;  %v277_v26 = vand.u32 2147483648, %v236_v10 }
  0x36   :  { %2840 = vpow2.f32 %v2581_v8  ;;  %vm256_vm4 = vweird.f32 %v235_v7  ;;  %vm271_vm6 = vweird.f32 %v236_v10  ;;  %vm3327_vm7 = vcmp.eq.f32.partialorder %v260_v18, 8.507059e+37 }
  0x37   :  { %2842 = vrcp.f32 %v3311_v12  ;;  %v3331_v33 = vadd.f32 1.0, %v2835_v15  ;;  %v263_v36 = vor.u32 1.1754944e-38, %v262_v21  ;;  %vm3343_vm10 = vcmp.eq.f32.partialorder %v275_v25, 8.507059e+37 }
  0x38   :  { %2844 = vrcp.f32 %v3313_v13  ;;  %v278_v44 = vor.u32 1.1754944e-38, %v277_v26  ;;  %vm286_vm12 = vweird.f32 %v3311_v12  ;;  %v290_v50 = vand.u32 2147483647, %v3311_v12 }
  0x39   :  { %v292_v52 = vand.u32 2147483648, %v3311_v12  ;;  %2846 = vrcp.f32 %v3331_v33  ;;  %vm301_vm14 = vweird.f32 %v3313_v13  ;;  %v307_v8 = vand.u32 2147483648, %v3313_v13 }
  0x3a   :  { %v2837_v17 = vpop.eup %2836  ;;  %v157_v9 = vmul.f32 %v3260_v40, %v137_v55  ;;  %v111_v11 = vsub.f32 %v79_v1, %v3240_v28  ;;  %vm3399_vm1 = vcmp.eq.f32.partialorder %v290_v50, 8.507059e+37 }
  0x3b   :  { %v2839_v19 = vpop.eup %2838  ;;  %v252_v20 = vmul.f32 %v2837_v17, %v235_v7  ;;  %vm257_vm5 = vweird.f32 %v2837_v17  ;;  %v305_v7 = vand.u32 2147483647, %v3313_v13  ;;  %v293_v21 = vor.u32 1.1754944e-38, %v292_v52 }
  0x3c   :  { %v2841_v23 = vpop.eup %2840  ;;  %v267_v24 = vmul.f32 %v2839_v19, %v236_v10  ;;  %vm272_vm8 = vweird.f32 %v2839_v19  ;;  %vm3339_vm9 = vmor %vm256_vm4, %vm257_vm5  ;;  %v158_v10 = vmul.f32 %v3260_v40, %v138_v56  ;;  %v139_v27 = vmul.f32 %v3255_v39, %v111_v11 }
  0x3d   :  { %v253_v29 = vsub.f32 1.0, %v252_v20  ;;  %v3325_v30 = vpop.eup %2842  ;;  %v3337_v38 = vadd.f32 1.0, %v2841_v23  ;;  %vm3350_vm11 = vmor %vm271_vm6, %vm272_vm8  ;;  %v3410_v20 = vadd.f32 %v3275_v47, %v157_v9  ;;  %vm3412_vm3 = vcmp.eq.f32.partialorder %v305_v7, 8.507059e+37 }
  0x3e   :  { %v268_v32 = vsub.f32 1.0, %v267_v24  ;;  %v3333_v34 = vpop.eup %2844  ;;  %v282_v37 = vmul.f32 %v3325_v30, %v3311_v12  ;;  %vm287_vm13 = vweird.f32 %v3325_v30  ;;  %v308_v23 = vor.u32 1.1754944e-38, %v307_v8 }
  0x3f   :  { %v254_v35 = vmul.f32 %v2837_v17, %v253_v29  ;;  %v297_v45 = vmul.f32 %v3333_v34, %v3313_v13  ;;  %2848 = vrcp.f32 %v3337_v38  ;;  %vm302_vm15 = vweird.f32 %v3333_v34  ;;  %v3384_v14 = vpop.eup %2846  ;;  %vm3389_vm0 = vmor %vm286_vm12, %vm287_vm13 }
  0x40   :  { %v269_v42 = vmul.f32 %v2839_v19, %v268_v32  ;;  %v283_v49 = vsub.f32 1.0, %v282_v37  ;;  %vm3405_vm2 = vmor %vm301_vm14, %vm302_vm15  ;;  %v3417_v24 = vadd.f32 %v3275_v47, %v158_v10  ;;  %v312_v13 = vmul.f32 %v3384_v14, %v3331_v33 }
  0x41   :  { %v255_v46 = vadd.f32 %v2837_v17, %v254_v35  ;;  %v298_v53 = vsub.f32 1.0, %v297_v45  ;;  %v2582_v25 = vmul.f32 -1.442695, %v3410_v20  ;;  %v159_v37 = vmul.f32 %v3260_v40, %v139_v27 }
  0x42   :  { %v270_v51 = vadd.f32 %v2839_v19, %v269_v42  ;;  %v284_v63 = vmul.f32 %v3325_v30, %v283_v49  ;;  %v2583_v35 = vmul.f32 -1.442695, %v3417_v24  ;;  %v313_v43 = vsub.f32 1.0, %v312_v13  ;;  %v82_v49 = vld [vmem:[%s5052_s1 + $0x58] sm:$0xff] }
  0x43   :  { %v259_v54 = vsel %vm3339_vm9, %v2837_v17, %v255_v46  ;;  %v299_v0 = vmul.f32 %v3333_v34, %v298_v53  ;;  %v80_v17 = vld [vmem:[%s5052_s1 + $0x48] sm:$0xff]  ;;  %2850 = vpow2.f32 %v2582_v25  ;;  %v113_v52 = vsub.f32 %v81_v48, %v3240_v28 }
  0x44   :  { %v264_v61 = vsel %vm3327_vm7, %v263_v36, %v259_v54  ;;  %v274_v62 = vsel %vm3350_vm11, %v2839_v19, %v270_v51  ;;  %v285_v15 = vadd.f32 %v3325_v30, %v284_v63  ;;  %v112_v26 = vsub.f32 %v80_v17, %v3240_v28 }
  0x45   :  { %v279_v4 = vsel %vm3343_vm10, %v278_v44, %v274_v62  ;;  %v491_v5 = vmul.f32 %v264_v61, %v3287_v57  ;;  %v300_v16 = vadd.f32 %v3333_v34, %v299_v0  ;;  %v3397_v18 = vpop.eup %2848  ;;  %2852 = vpow2.f32 %v2583_v35 }
  0x46   :  { %v492_v6 = vmul.f32 %v279_v4, %v3290_v58  ;;  %v289_v29 = vsel %vm3389_vm0, %v3325_v30, %v285_v15  ;;  %v327_v32 = vmul.f32 %v3397_v18, %v3337_v38  ;;  %v140_v36 = vmul.f32 %v3255_v39, %v112_v26 }
  0x47   :  { %v304_v31 = vsel %vm3405_vm2, %v3333_v34, %v300_v16  ;;  %v294_v41 = vsel %vm3399_vm1, %v293_v21, %v289_v29  ;;  %v3441_v34 = vadd.f32 %v3275_v47, %v159_v37  ;;  %v114_v53 = vsub.f32 %v82_v49, %v3240_v28 }
  0x48   :  { %v507_v57 = vpack.c.bf16 %v492_v6, %v491_v5  ;;  %v309_v30 = vsel %vm3412_vm3, %v308_v23, %v304_v31  ;;  %v160_v42 = vmul.f32 %v3260_v40, %v140_v36  ;;  %v328_v44 = vsub.f32 1.0, %v327_v32 }
  0x49   :  { %v2584_v46 = vmul.f32 -1.442695, %v3441_v34  ;;  %v493_v50 = vmul.f32 %v294_v41, %v3293_v59  ;;  %v494_v51 = vmul.f32 %v309_v30, %v3296_v60  ;;  %v2851_v54 = vpop.eup %2850  ;;  %vm316_vm4 = vweird.f32 %v3331_v33 }
  0x4a   :  { %591 = vmatmul.bf16.vlgmr.msra.gmra.mxu0 %v507_v57  ;;  %v3444_v45 = vadd.f32 %v3275_v47, %v160_v42  ;;  %vm331_vm5 = vweird.f32 %v3337_v38  ;;  %v314_v61 = vmul.f32 %v3384_v14, %v313_v43  ;;  %v329_v62 = vmul.f32 %v3397_v18, %v328_v44 }
  0x4b   :  { %v2853_v56 = vpop.eup %2852  ;;  %v3462_v63 = vadd.f32 1.0, %v2851_v54  ;;  %2854 = vpow2.f32 %v2584_v46  ;;  %vm317_vm6 = vweird.f32 %v3384_v14  ;;  %v141_v60 = vmul.f32 %v3255_v39, %v113_v52 }
  0x4c   :  { %v2585_v55 = vmul.f32 -1.442695, %v3444_v45  ;;  %v3465_v59 = vadd.f32 1.0, %v2853_v56  ;;  %v508_v0 = vpack.c.bf16 %v494_v51, %v493_v50  ;;  %vm332_vm7 = vweird.f32 %v3397_v18  ;;  %vm3477_vm8 = vmor %vm316_vm4, %vm317_vm6 }
  0x4d   :  { %v142_v1 = vmul.f32 %v3255_v39, %v114_v53  ;;  %v322_v4 = vand.u32 2147483648, %v3331_v33  ;;  %v337_v5 = vand.u32 2147483648, %v3337_v38  ;;  %v315_v6 = vadd.f32 %v3384_v14, %v314_v61  ;;  %vm3486_vm9 = vmor %vm331_vm5, %vm332_vm7 }
  0x4e   :  { %2856 = vpow2.f32 %v2585_v55  ;;  %v320_v8 = vand.u32 2147483647, %v3331_v33  ;;  %v330_v9 = vadd.f32 %v3397_v18, %v329_v62  ;;  %v335_v10 = vand.u32 2147483647, %v3337_v38 }
  0x4f   :  { %2858 = vrcp.f32 %v3462_v63  ;;  %v161_v57 = vmul.f32 %v3260_v40, %v141_v60  ;;  %v162_v58 = vmul.f32 %v3260_v40, %v142_v1  ;;  %v323_v17 = vor.u32 1.1754944e-38, %v322_v4 }
  0x50   :  { %2860 = vrcp.f32 %v3465_v59  ;;  %v338_v19 = vor.u32 1.1754944e-38, %v337_v5  ;;  %v319_v12 = vsel %vm3477_vm8, %v3384_v14, %v315_v6  ;;  %vm321_vm10 = vcmp.eq.f32.partialorder %v320_v8, 8.507059e+37 }
  0x51   :  { %v2855_v15 = vpop.eup %2854  ;;  %v334_v38 = vsel %vm3486_vm9, %v3397_v18, %v330_v9  ;;  %vm336_vm11 = vcmp.eq.f32.partialorder %v335_v10, 8.507059e+37  ;;  %v3500_v23 = vadd.f32 %v3275_v47, %v161_v57  ;;  %v3506_v26 = vadd.f32 %v3275_v47, %v162_v58 }
  0x52   :  { %v3503_v25 = vadd.f32 1.0, %v2855_v15  ;;  %v324_v14 = vsel %vm321_vm10, %v323_v17, %v319_v12  ;;  %v339_v27 = vsel %vm336_vm11, %v338_v19, %v334_v38  ;;  %vm346_vm12 = vweird.f32 %v3462_v63 }
  0x53   :  { %v2586_v32 = vmul.f32 -1.442695, %v3500_v23  ;;  %v495_v35 = vmul.f32 %v324_v14, %v3304_v2  ;;  %v496_v36 = vmul.f32 %v339_v27, %v3307_v3  ;;  %v2587_v37 = vmul.f32 -1.442695, %v3506_v26 }
  0x54   :  { %v2857_v16 = vpop.eup %2856  ;;  %2862 = vrcp.f32 %v3503_v25  ;;  %vm361_vm14 = vweird.f32 %v3465_v59  ;;  %v350_v2 = vand.u32 2147483647, %v3462_v63  ;;  %v352_v3 = vand.u32 2147483648, %v3462_v63 }
  0x55   :  { %v2859_v33 = vpop.eup %2858  ;;  %v3508_v29 = vadd.f32 1.0, %v2857_v16  ;;  %v509_v42 = vpack.c.bf16 %v496_v36, %v495_v35  ;;  %v365_v43 = vand.u32 2147483647, %v3465_v59  ;;  %v367_v44 = vand.u32 2147483648, %v3465_v59 }
  0x56   :  { %v2861_v21 = vpop.eup %2860  ;;  %v342_v22 = vmul.f32 %v2859_v33, %v3462_v63  ;;  %vm347_vm13 = vweird.f32 %v2859_v33  ;;  %vm351_vm2 = vcmp.eq.f32.partialorder %v350_v2, 8.507059e+37  ;;  %v353_v53 = vor.u32 1.1754944e-38, %v352_v3 }
  0x57   :  { %v357_v13 = vmul.f32 %v2861_v21, %v3465_v59  ;;  %2864 = vrcp.f32 %v3508_v29  ;;  %vm362_vm15 = vweird.f32 %v2861_v21  ;;  %vm3522_vm0 = vmor %vm346_vm12, %vm347_vm13  ;;  %vm366_vm3 = vcmp.eq.f32.partialorder %v365_v43, 8.507059e+37 }
  0x58   :  { %v343_v31 = vsub.f32 1.0, %v342_v22  ;;  %2866 = vpow2.f32 %v2586_v32  ;;  %vm363_vm1 = vmor %vm361_vm14, %vm362_vm15  ;;  %v368_v54 = vor.u32 1.1754944e-38, %v367_v44  ;;  %vm376_vm4 = vweird.f32 %v3503_v25 }
  0x59   :  { %v358_v18 = vsub.f32 1.0, %v357_v13  ;;  %2868 = vpow2.f32 %v2587_v37  ;;  %vm391_vm6 = vweird.f32 %v3508_v29  ;;  %v380_v11 = vand.u32 2147483647, %v3503_v25 }
  0x5a   :  { %596 = vmatmul.bf16.gmra.mxu0 %v508_v0  ;;  %v344_v41 = vmul.f32 %v2859_v33, %v343_v31  ;;  %v2863_v46 = vpop.eup %2862  ;;  %v382_v57 = vand.u32 2147483648, %v3503_v25  ;;  %v395_v15 = vand.u32 2147483647, %v3508_v29 }
  0x5b   :  { %v359_v30 = vmul.f32 %v2861_v21, %v358_v18  ;;  %v372_v62 = vmul.f32 %v2863_v46, %v3503_v25  ;;  %vm377_vm5 = vweird.f32 %v2863_v46  ;;  %vm381_vm10 = vcmp.eq.f32.partialorder %v380_v11, 8.507059e+37 }
  0x5c   :  { %v345_v48 = vadd.f32 %v2859_v33, %v344_v41  ;;  %vm378_vm8 = vmor %vm376_vm4, %vm377_vm5  ;;  %v383_v19 = vor.u32 1.1754944e-38, %v382_v57  ;;  %vm396_vm11 = vcmp.eq.f32.partialorder %v395_v15, 8.507059e+37  ;;  %vm650_vm4 = vcmask 523264   ;;  %v63_v57 = vld [vmem:[%s5092_s22 + $0x40] sm:$0xff] }
  0x5d   :  { %v360_v50 = vadd.f32 %v2861_v21, %v359_v30  ;;  %v2865_v51 = vpop.eup %2864  ;;  %v373_v4 = vsub.f32 1.0, %v372_v62 }
  0x5e   :  { %v2867_v52 = vpop.eup %2866  ;;  %v349_v56 = vsel %vm3522_vm0, %v2859_v33, %v345_v48  ;;  %v387_v63 = vmul.f32 %v2865_v51, %v3508_v29  ;;  %vm392_vm7 = vweird.f32 %v2865_v51 }
  0x5f   :  { %v2869_v55 = vpop.eup %2868  ;;  %v364_v61 = vsel %vm363_vm1, %v2861_v21, %v360_v50  ;;  %v245_v59 = vadd.f32 1.0, %v2867_v52  ;;  %v354_v60 = vsel %vm351_vm2, %v353_v53, %v349_v56  ;;  %v374_v8 = vmul.f32 %v2863_v46, %v373_v4  ;;  %vm393_vm9 = vmor %vm391_vm6, %vm392_vm7 }
  0x60   :  { %v369_v0 = vsel %vm366_vm3, %v368_v54, %v364_v61  ;;  %v246_v1 = vadd.f32 1.0, %v2869_v55  ;;  %v388_v5 = vsub.f32 1.0, %v387_v63  ;;  %v497_v6 = vmul.f32 %v354_v60, %v3410_v20  ;;  %v3551_v61 = vld [vmem:[%s5058_s7] ss:$0 sm:$0xff]  ;;  %v62_v60 = vld [vmem:[%s5092_s22 + $0x38] sm:$0xff] }
  0x61   :  { %v498_v7 = vmul.f32 %v369_v0, %v3417_v24  ;;  %2870 = vrcp.f32 %v245_v59  ;;  %v397_v20 = vand.u32 2147483648, %v3508_v29  ;;  %v375_v58 = vadd.f32 %v2863_v46, %v374_v8  ;;  %v83_v8 = vld [vmem:[%s5052_s1 + $0x60] sm:$0xff] }
  0x62   :  { %2872 = vrcp.f32 %v246_v1  ;;  %v389_v9 = vmul.f32 %v2865_v51, %v388_v5  ;;  %vm406_vm12 = vweird.f32 %v245_v59  ;;  %vm421_vm14 = vweird.f32 %v246_v1 }
  0x63   :  { %v510_v10 = vpack.c.bf16 %v498_v7, %v497_v6  ;;  %v398_v33 = vor.u32 1.1754944e-38, %v397_v20  ;;  %v379_v12 = vsel %vm378_vm8, %v2863_v46, %v375_v58  ;;  %v412_v36 = vand.u32 2147483648, %v245_v59  ;;  %v55_v7 = vld [vmem:[%s5092_s22] sm:$0xff] }
  0x64   :  { %v390_v16 = vadd.f32 %v2865_v51, %v389_v9  ;;  %v384_v13 = vsel %vm381_vm10, %v383_v19, %v379_v12  ;;  %v427_v37 = vand.u32 2147483648, %v246_v1  ;;  %v410_v30 = vand.u32 2147483647, %v245_v59  ;;  %v84_v9 = vld [vmem:[%s5052_s1 + $0x68] sm:$0xff] }
  0x65   :  { %v499_v29 = vmul.f32 %v384_v13, %v3441_v34  ;;  %v425_v2 = vand.u32 2147483647, %v246_v1  ;;  %v413_v3 = vor.u32 1.1754944e-38, %v412_v36  ;;  %v116_v11 = vsub.f32 %v84_v9, %v3240_v28 }
  0x66   :  { %v394_v38 = vsel %vm393_vm9, %v2865_v51, %v390_v16  ;;  %v428_v34 = vor.u32 1.1754944e-38, %v427_v37  ;;  %vm411_vm2 = vcmp.eq.f32.partialorder %v410_v30, 8.507059e+37 }
  0x67   :  { %v2871_v24 = vpop.eup %2870  ;;  %v399_v25 = vsel %vm396_vm11, %v398_v33, %v394_v38  ;;  %vm426_vm3 = vcmp.eq.f32.partialorder %v425_v2, 8.507059e+37  ;;  %v144_v16 = vmul.f32 %v3255_v39, %v116_v11 }
  0x68   :  { %v2873_v17 = vpop.eup %2872  ;;  %v402_v21 = vmul.f32 %v2871_v24, %v245_v59  ;;  %v500_v31 = vmul.f32 %v399_v25, %v3444_v45  ;;  %vm407_vm13 = vweird.f32 %v2871_v24 }
  0x69   :  { %v417_v22 = vmul.f32 %v2873_v17, %v246_v1  ;;  %vm422_vm15 = vweird.f32 %v2873_v17  ;;  %vm408_vm0 = vmor %vm406_vm12, %vm407_vm13  ;;  %v164_v33 = vmul.f32 %v3260_v40, %v144_v16 }
  0x6a   :  { %601 = vmatmul.bf16.gmra.mxu0 %v509_v42  ;;  %v403_v14 = vsub.f32 1.0, %v402_v21  ;;  %v511_v35 = vpack.c.bf16 %v500_v31, %v499_v29  ;;  %vm423_vm1 = vmor %vm421_vm14, %vm422_vm15 }
  0x6b   :  { %v418_v27 = vsub.f32 1.0, %v417_v22  ;;  %v3601_v22 = vadd.f32 %v3275_v47, %v164_v33 }
  0x6c   :  { %v404_v18 = vmul.f32 %v2871_v24, %v403_v14  ;;  %v64_v14 = vld [vmem:[%s5092_s22 + $0x48] sm:$0xff] }
  0x6d   :  { %v419_v32 = vmul.f32 %v2873_v17, %v418_v27  ;;  %v2589_v25 = vmul.f32 -1.442695, %v3601_v22 }
  0x6e   :  { %v405_v41 = vadd.f32 %v2871_v24, %v404_v18 }
  0x6f   :  { %v420_v42 = vadd.f32 %v2873_v17, %v419_v32 }
  0x70   :  { %v409_v43 = vsel %vm408_vm0, %v2871_v24, %v405_v41  ;;  %v65_v41 = vld [vmem:[%s5092_s22 + $0x50] sm:$0xff] }
  0x71   :  { %v424_v45 = vsel %vm423_vm1, %v2873_v17, %v420_v42  ;;  %v414_v44 = vsel %vm411_vm2, %v413_v3, %v409_v43 }
  0x72   :  { %v429_v46 = vsel %vm426_vm3, %v428_v34, %v424_v45  ;;  %v501_v48 = vmul.f32 %v414_v44, %v3500_v23  ;;  %v61_v23 = vld [vmem:[%s5092_s22 + $0x30] sm:$0xff] }
  0x73   :  { %v502_v49 = vmul.f32 %v429_v46, %v3506_v26 }
  0x75   :  { %v512_v50 = vpack.c.bf16 %v502_v49, %v501_v48  ;;  %v57_v48 = vld [vmem:[%s5092_s22 + $0x10] sm:$0xff] }
  0x7a   :  { %606 = vmatmul.bf16.gmra.mxu0 %v510_v10  ;;  %v115_v10 = vsub.f32 %v83_v8, %v3240_v28 }
  0x7c   :  { %v143_v58 = vmul.f32 %v3255_v39, %v115_v10 }
  0x7e   :  { %v163_v19 = vmul.f32 %v3260_v40, %v143_v58 }
  0x80   :  { %v3598_v21 = vadd.f32 %v3275_v47, %v163_v19 }
  0x82   :  { %v2588_v13 = vmul.f32 -1.442695, %v3598_v21 }
  0x84   :  { %2874 = vpow2.f32 %v2588_v13 }
  0x85   :  { %2876 = vpow2.f32 %v2589_v25 }
  0x8a   :  { %611 = vmatmul.bf16.gmra.mxu0 %v511_v35  ;;  %v56_v35 = vld [vmem:[%s5092_s22 + $0x8] sm:$0xff]  ;;  %v2875_v36 = vpop.eup %2874 }
  0x8b   :  { %v2877_v37 = vpop.eup %2876  ;;  %v247_v42 = vadd.f32 1.0, %v2875_v36 }
  0x8c   :  { %v248_v34 = vadd.f32 1.0, %v2877_v37 }
  0x8d   :  { %2878 = vrcp.f32 %v247_v42  ;;  %vm436_vm5 = vweird.f32 %v247_v42 }
  0x8e   :  { %2880 = vrcp.f32 %v248_v34  ;;  %vm451_vm7 = vweird.f32 %v248_v34 }
  0x93   :  { %v2879_v49 = vpop.eup %2878 }
  0x94   :  { %vm437_vm6 = vweird.f32 %v2879_v49 }
  0x95   :  { %vm438_vm9 = vmor %vm436_vm5, %vm437_vm6 }
  0x9a   :  { %616 = vmatmul.bf16.gmra.mxu0 %v512_v50  ;;  %v66_v50 = vld [vmem:[%s5092_s22 + $0x58] sm:$0xff] }
  0xc7   :  { %v592_v51 = vpop.f32.mrf.mxu0 }
  0xc8   :  { %v593_v5 = vadd.f32 %v3551_v61, %v592_v51 }
  0xca   :  { %v3584_v20 = vadd.f32 %v593_v5, %v55_v7  ;;  %v457_v5 = vand.u32 2147483648, %v248_v34  ;;  %v455_v7 = vand.u32 2147483647, %v248_v34 }
  0xcc   :  { %v651_v38 = vsel %vm650_vm4, %v3584_v20, 0.0  ;;  %vm456_vm12 = vcmp.eq.f32.partialorder %v455_v7, 8.507059e+37 }
  0xcf   :  { %v594_v52 = vpop.f32.mrf.mxu0 }
  0xd0   :  { %v595_v18 = vadd.f32 %v3551_v61, %v594_v52  ;;  %v2881_v52 = vpop.eup %2880 }
  0xd1   :  { %vm452_vm8 = vweird.f32 %v2881_v52 }
  0xd2   :  { %v3620_v2 = vadd.f32 %v595_v18, %v56_v35  ;;  %vm453_vm11 = vmor %vm451_vm7, %vm452_vm8 }
  0xd4   :  { %v654_v46 = vsel %vm650_vm4, %v3620_v2, 0.0 }
  0xd7   :  { %v597_v53 = vpop.f32.mrf.mxu0 }
  0xd8   :  { %v598_v45 = vadd.f32 %v3551_v61, %v597_v53 }
  0xda   :  { %v3636_v53 = vadd.f32 %v598_v45, %v57_v48 }
  0xdc   :  { %v657_v9 = vsel %vm650_vm4, %v3636_v53, 0.0 }
  0xdf   :  { %v3542_v54 = vpop.f32.mrf.mxu0 }
  0xe7   :  { %v3544_v55 = vpop.f32.mrf.mxu0 }
  0xef   :  { %v3546_v56 = vpop.f32.mrf.mxu0 }
  0xf7   :  { %v607_v26 = vpop.f32.mrf.mxu0 }
  0xf8   :  { %v608_v62 = vadd.f32 %v3551_v61, %v607_v26  ;;  %v432_v26 = vmul.f32 %v2879_v49, %v247_v42 }
  0xfa   :  { %v3557_v63 = vadd.f32 %v608_v62, %v61_v23  ;;  %v440_v62 = vand.u32 2147483647, %v247_v42 }
  0xfc   :  { %v669_v59 = vsel %vm650_vm4, %v3557_v63, 0.0  ;;  %vm441_vm10 = vcmp.eq.f32.partialorder %v440_v62, 8.507059e+37 }
  0xfd   :  { %670 = vadd.xlane.f32.xlu0 %v669_v59  ;;  %v442_v59 = vand.u32 2147483648, %v247_v42 }
  0xff   :  { %v609_v0 = vpop.f32.mrf.mxu0  ;;  %v443_v11 = vor.u32 1.1754944e-38, %v442_v59 }
 0x100   :  { %v610_v1 = vadd.f32 %v3551_v61, %v609_v0 }
 0x102   :  { %v3565_v4 = vadd.f32 %v610_v1, %v62_v60  ;;  %v447_v60 = vmul.f32 %v2881_v52, %v248_v34  ;;  %v433_v1 = vsub.f32 1.0, %v432_v26 }
 0x104   :  { %v672_v6 = vsel %vm650_vm4, %v3565_v4, 0.0  ;;  %v434_v10 = vmul.f32 %v2879_v49, %v433_v1 }
 0x105   :  { %673 = vadd.xlane.f32.xlu0 %v672_v6  ;;  %v448_v6 = vsub.f32 1.0, %v447_v60 }
 0x107   :  { %v612_v15 = vpop.f32.mrf.mxu0 }
 0x108   :  { %v613_v24 = vadd.f32 %v3551_v61, %v612_v15  ;;  %v435_v15 = vadd.f32 %v2879_v49, %v434_v10 }
 0x10a   :  { %v3589_v17 = vadd.f32 %v613_v24, %v63_v57  ;;  %v449_v57 = vmul.f32 %v2881_v52, %v448_v6  ;;  %v458_v24 = vor.u32 1.1754944e-38, %v457_v5  ;;  %v439_v16 = vsel %vm438_vm9, %v2879_v49, %v435_v15 }
 0x10b   :  { %v444_v19 = vsel %vm441_vm10, %v443_v11, %v439_v16 }
 0x10c   :  { %v675_v12 = vsel %vm650_vm4, %v3589_v17, 0.0  ;;  %v450_v58 = vadd.f32 %v2881_v52, %v449_v57 }
 0x10d   :  { %676 = vadd.xlane.f32.xlu1 %v675_v12  ;;  %652 = vadd.xlane.f32.xlu0 %v651_v38  ;;  %v503_v38 = vmul.f32 %v444_v19, %v3598_v21 }
 0x10e   :  { %v454_v33 = vsel %vm453_vm11, %v2881_v52, %v450_v58 }
 0x10f   :  { %v614_v27 = vpop.f32.mrf.mxu0  ;;  %v459_v12 = vsel %vm456_vm12, %v458_v24, %v454_v33 }
 0x110   :  { %v615_v29 = vadd.f32 %v3551_v61, %v614_v27  ;;  %v504_v13 = vmul.f32 %v459_v12, %v3601_v22  ;;  %v86_v27 = vld [vmem:[%s5052_s1 + $0x78] sm:$0xff] }
 0x111   :  { %v118_v18 = vsub.f32 %v86_v27, %v3240_v28  ;;  %v58_v27 = vld [vmem:[%s5092_s22 + $0x18] sm:$0xff] }
 0x112   :  { %v3609_v31 = vadd.f32 %v615_v29, %v64_v14  ;;  %v513_v25 = vpack.c.bf16 %v504_v13, %v503_v38  ;;  %v85_v14 = vld [vmem:[%s5052_s1 + $0x70] sm:$0xff] }
 0x113   :  { %v117_v29 = vsub.f32 %v85_v14, %v3240_v28  ;;  %v146_v21 = vmul.f32 %v3255_v39, %v118_v18 }
 0x114   :  { %v678_v32 = vsel %vm650_vm4, %v3609_v31, 0.0  ;;  %621 = vmatmul.bf16.gmra.mxu0 %v513_v25  ;;  %v600_v25 = vadd.f32 %v3551_v61, %v3542_v54  ;;  %v603_v54 = vadd.f32 %v3551_v61, %v3544_v55 }
 0x115   :  { %679 = vadd.xlane.f32.xlu1 %v678_v32  ;;  %v145_v32 = vmul.f32 %v3255_v39, %v117_v29  ;;  %v166_v35 = vmul.f32 %v3260_v40, %v146_v21 }
 0x117   :  { %v617_v30 = vpop.f32.mrf.mxu0  ;;  %v165_v22 = vmul.f32 %v3260_v40, %v145_v32  ;;  %v186_v37 = vadd.f32 %v3275_v47, %v166_v35  ;;  %v3112_v40 = vmov 64.0   ;;  %v3677_v32 = vadd.f32 %v600_v25, %v58_v27  ;;  %v2650_v27 = vld [vmem:[%s5061_s10 + $0x30] sm:$0xf] }
 0x118   :  { %v618_v3 = vadd.f32 %v3551_v61, %v617_v30 }
 0x119   :  { %v185_v36 = vadd.f32 %v3275_v47, %v165_v22  ;;  %v2591_v30 = vmul.f32 -1.442695, %v186_v37  ;;  %v660_v35 = vsel %vm650_vm4, %v3677_v32, 0.0 }
 0x11a   :  { %v3623_v43 = vadd.f32 %v618_v3, %v65_v41 }
 0x11b   :  { %v2590_v41 = vmul.f32 -1.442695, %v185_v36 }
 0x11c   :  { %v681_v44 = vsel %vm650_vm4, %v3623_v43, 0.0 }
 0x11d   :  { %682 = vadd.xlane.f32.xlu2 %v681_v44  ;;  %655 = vadd.xlane.f32.xlu1 %v654_v46  ;;  %2882 = vpow2.f32 %v2590_v41 }
 0x11e   :  { %2884 = vpow2.f32 %v2591_v30 }
 0x11f   :  { %v619_v51 = vpop.f32.mrf.mxu0 }
 0x120   :  { %v620_v23 = vadd.f32 %v3551_v61, %v619_v51 }
 0x122   :  { %v3639_v0 = vadd.f32 %v620_v23, %v66_v50 }
 0x123   :  { %v2883_v42 = vpop.eup %2882 }
 0x124   :  { %v684_v8 = vsel %vm650_vm4, %v3639_v0, 0.0  ;;  %v2885_v3 = vpop.eup %2884  ;;  %v249_v34 = vadd.f32 1.0, %v2883_v42 }
 0x125   :  { %685 = vadd.xlane.f32.xlu2 %v684_v8  ;;  %658 = vadd.xlane.f32.xlu1 %v657_v9  ;;  %v250_v28 = vadd.f32 1.0, %v2885_v3 }
 0x126   :  { %2886 = vrcp.f32 %v249_v34  ;;  %v472_v47 = vand.u32 2147483648, %v249_v34  ;;  %vm466_vm13 = vweird.f32 %v249_v34  ;;  %v470_v26 = vand.u32 2147483647, %v249_v34 }
 0x127   :  { %2888 = vrcp.f32 %v250_v28  ;;  %v487_v52 = vand.u32 2147483648, %v250_v28  ;;  %vm481_vm0 = vweird.f32 %v250_v28  ;;  %v485_v1 = vand.u32 2147483647, %v250_v28 }
 0x128   :  { %2890 = vrcp.f32 %v3112_v40  ;;  %v473_v62 = vor.u32 1.1754944e-38, %v472_v47  ;;  %vm471_vm2 = vcmp.eq.f32.partialorder %v470_v26, 8.507059e+37 }
 0x129   :  { %v488_v5 = vor.u32 1.1754944e-38, %v487_v52  ;;  %vm486_vm5 = vcmp.eq.f32.partialorder %v485_v1, 8.507059e+37 }
 0x12c   :  { %v2887_v45 = vpop.eup %2886 }
 0x12d   :  { %v2889_v39 = vpop.eup %2888  ;;  %v462_v44 = vmul.f32 %v2887_v45, %v249_v34  ;;  %vm467_vm14 = vweird.f32 %v2887_v45  ;;  %v605_v34 = vadd.f32 %v3551_v61, %v3546_v56 }
 0x12e   :  { %v477_v46 = vmul.f32 %v2889_v39, %v250_v28  ;;  %vm468_vm15 = vmor %vm466_vm13, %vm467_vm14  ;;  %vm482_vm1 = vweird.f32 %v2889_v39  ;;  %v2891_v6 = vpop.eup %2890 }
 0x12f   :  { %v463_v48 = vsub.f32 1.0, %v462_v44  ;;  %vm483_vm3 = vmor %vm481_vm0, %vm482_vm1  ;;  %v700_v11 = vmul.f32 64.0, %v2891_v6  ;;  %vm704_vm6 = vweird.f32 %v2891_v6 }
 0x130   :  { %v478_v49 = vsub.f32 1.0, %v477_v46 }
 0x131   :  { %v464_v50 = vmul.f32 %v2887_v45, %v463_v48  ;;  %v701_v24 = vsub.f32 1.0, %v700_v11 }
 0x132   :  { %v479_v51 = vmul.f32 %v2889_v39, %v478_v49 }
 0x133   :  { %v465_v23 = vadd.f32 %v2887_v45, %v464_v50  ;;  %v702_v58 = vmul.f32 %v2891_v6, %v701_v24 }
 0x134   :  { %v480_v59 = vadd.f32 %v2889_v39, %v479_v51 }
 0x135   :  { %v469_v60 = vsel %vm468_vm15, %v2887_v45, %v465_v23  ;;  %v703_v16 = vadd.f32 %v2891_v6, %v702_v58 }
 0x136   :  { %v474_v7 = vsel %vm471_vm2, %v473_v62, %v469_v60  ;;  %v484_v8 = vsel %vm483_vm3, %v2889_v39, %v480_v59  ;;  %v60_v39 = vld [vmem:[%s5092_s22 + $0x28] sm:$0xff] }
 0x137   :  { %v505_v9 = vmul.f32 %v474_v7, %v185_v36  ;;  %v489_v10 = vsel %vm486_vm5, %v488_v5, %v484_v8  ;;  %v3662_v19 = vsel %vm704_vm6, %v2891_v6, %v703_v16  ;;  %v3709_v40 = vadd.f32 %v605_v34, %v60_v39 }
 0x138   :  { %v506_v57 = vmul.f32 %v489_v10, %v186_v37  ;;  %v59_v37 = vld [vmem:[%s5092_s22 + $0x20] sm:$0xff] }
 0x139   :  { %v3693_v42 = vadd.f32 %v603_v54, %v59_v37  ;;  %v666_v52 = vsel %vm650_vm4, %v3709_v40, 0.0  ;;  %v2781_v54 = vld [vmem:[%s5061_s10 + $0x24] sm:$0xf0]  ;;  %v2634_v37 = vld [vmem:[%s5061_s10 + $0x10] sm:$0xf] }
 0x13a   :  { %v514_v15 = vpack.c.bf16 %v506_v57, %v505_v9 }
 0x13b   :  { %v663_v28 = vsel %vm650_vm4, %v3693_v42, 0.0 }
 0x13c   :  { %626 = vmatmul.bf16.gmra.mxu0 %v514_v15 }
 0x170   :  { %v671_v33 = vpop.xlane.xlu0 %670 }
 0x171   :  { %v712_v12 = vmul.f32 %v3662_v19, %v671_v33 }
 0x173   :  { %v3666_v38 = vsub.f32 %v3557_v63, %v712_v12 }
 0x175   :  { %v744_v13 = vmul.f32 %v3666_v38, %v3666_v38 }
 0x177   :  { %v772_v14 = vsel %vm650_vm4, %v744_v13, 0.0 }
 0x178   :  { %773 = vadd.xlane.f32.xlu2 %v772_v14  ;;  %v674_v29 = vpop.xlane.xlu0 %673 }
 0x179   :  { %v713_v18 = vmul.f32 %v3662_v19, %v674_v29  ;;  %v2783_v29 = vld [vmem:[%s5061_s10 + $0x34] sm:$0xf0] }
 0x17b   :  { %v3680_v21 = vsub.f32 %v3565_v4, %v713_v18  ;;  %v2651_v18 = vor.u32 %v2783_v29, %v2650_v27 }
 0x17d   :  { %v745_v22 = vmul.f32 %v3680_v21, %v3680_v21  ;;  %2801 = vmatpush.bf16.msra.mxu2 %v2651_v18  ;;  %1138 = vmatpush.bf16.msrb.mxu0 %v2651_v18 }
 0x17e   :  { %2800 = vmatpush.bf16.msra.mxu1 %v2651_v18  ;;  %2802 = vmatpush.bf16.msra.mxu3 %v2651_v18 }
 0x17f   :  { %v775_v36 = vsel %vm650_vm4, %v745_v22, 0.0  ;;  %v2642_v22 = vld [vmem:[%s5061_s10 + $0x20] sm:$0xf] }
 0x180   :  { %v677_v41 = vpop.xlane.xlu1 %676  ;;  %661 = vadd.xlane.f32.xlu2 %v660_v35  ;;  %776 = vadd.xlane.f32.xlu0 %v775_v36  ;;  %v653_v44 = vpop.xlane.xlu0 %652  ;;  %v2643_v35 = vor.u32 %v2781_v54, %v2642_v22 }
 0x181   :  { %v714_v30 = vmul.f32 %v3662_v19, %v677_v41  ;;  %v706_v49 = vmul.f32 %v3662_v19, %v653_v44  ;;  %v2779_v41 = vld [vmem:[%s5061_s10 + $0x14] sm:$0xf0] }
 0x182   :  { %2804 = vmatpush.bf16.msra.mxu2 %v2643_v35  ;;  %1139 = vmatpush.bf16.msrb.mxu0 %v2643_v35 }
 0x183   :  { %v3696_v3 = vsub.f32 %v3589_v17, %v714_v30  ;;  %v3718_v47 = vsub.f32 %v3584_v20, %v706_v49  ;;  %2803 = vmatpush.bf16.msra.mxu1 %v2643_v35  ;;  %2805 = vmatpush.bf16.msra.mxu3 %v2643_v35  ;;  %v2635_v30 = vor.u32 %v2779_v41, %v2634_v37  ;;  %v70_v37 = vld [vmem:[%s5092_s22 + $0x78] sm:$0xff] }
 0x185   :  { %v746_v55 = vmul.f32 %v3696_v3, %v3696_v3  ;;  %v738_v1 = vmul.f32 %v3718_v47, %v3718_v47 }
 0x186   :  { %2807 = vmatpush.bf16.msra.mxu2 %v2635_v30  ;;  %1140 = vmatpush.bf16.msrb.mxu0 %v2635_v30 }
 0x187   :  { %v778_v45 = vsel %vm650_vm4, %v746_v55, 0.0  ;;  %v754_v8 = vsel %vm650_vm4, %v738_v1, 0.0  ;;  %2806 = vmatpush.bf16.msra.mxu1 %v2635_v30  ;;  %2808 = vmatpush.bf16.msra.mxu3 %v2635_v30 }
 0x188   :  { %v680_v46 = vpop.xlane.xlu1 %679  ;;  %664 = vadd.xlane.f32.xlu2 %v663_v28  ;;  %779 = vadd.xlane.f32.xlu0 %v778_v45  ;;  %v2626_v28 = vld [vmem:[%s5061_s10] sm:$0xf]  ;;  %v2777_v45 = vld [vmem:[%s5061_s10 + $0x4] sm:$0xf0] }
 0x189   :  { %v715_v48 = vmul.f32 %v3662_v19, %v680_v46  ;;  %v2627_v44 = vor.u32 %v2777_v45, %v2626_v28  ;;  %v68_v45 = vld [vmem:[%s5092_s22 + $0x68] sm:$0xff] }
 0x18b   :  { %v3713_v56 = vsub.f32 %v3609_v31, %v715_v48  ;;  %2810 = vmatpush.bf16.msra.mxu2 %v2627_v44  ;;  %1141 = vmatpush.bf16.msrb.mxu0 %v2627_v44 }
 0x18c   :  { %2809 = vmatpush.bf16.msra.mxu1 %v2627_v44  ;;  %2811 = vmatpush.bf16.msra.mxu3 %v2627_v44 }
 0x18d   :  { %v747_v50 = vmul.f32 %v3713_v56, %v3713_v56 }
 0x18f   :  { %v781_v51 = vsel %vm650_vm4, %v747_v50, 0.0 }
 0x190   :  { %v683_v23 = vpop.xlane.xlu2 %682  ;;  %782 = vadd.xlane.f32.xlu1 %v781_v51  ;;  %v656_v26 = vpop.xlane.xlu1 %655  ;;  %667 = vadd.xlane.f32.xlu0 %v666_v52 }
 0x191   :  { %v716_v62 = vmul.f32 %v3662_v19, %v683_v23  ;;  %v707_v60 = vmul.f32 %v3662_v19, %v656_v26  ;;  %v622_v14 = vpop.f32.mrf.mxu0 }
 0x193   :  { %v3725_v59 = vsub.f32 %v3623_v43, %v716_v62  ;;  %v3733_v6 = vsub.f32 %v3620_v2, %v707_v60  ;;  %v623_v60 = vadd.f32 %v3551_v61, %v622_v14 }
 0x195   :  { %v748_v5 = vmul.f32 %v3725_v59, %v3725_v59  ;;  %v739_v24 = vmul.f32 %v3733_v6, %v3733_v6 }
 0x197   :  { %v784_v7 = vsel %vm650_vm4, %v748_v5, 0.0  ;;  %v757_v12 = vsel %vm650_vm4, %v739_v24, 0.0 }
 0x198   :  { %v686_v9 = vpop.xlane.xlu2 %685  ;;  %785 = vadd.xlane.f32.xlu1 %v784_v7  ;;  %v659_v10 = vpop.xlane.xlu1 %658  ;;  %755 = vadd.xlane.f32.xlu0 %v754_v8  ;;  %v67_v7 = vld [vmem:[%s5092_s22 + $0x60] sm:$0xff] }
 0x199   :  { %v717_v11 = vmul.f32 %v3662_v19, %v686_v9  ;;  %v708_v15 = vmul.f32 %v3662_v19, %v659_v10  ;;  %v624_v36 = vpop.f32.mrf.mxu0 }
 0x19a   :  { %v625_v30 = vadd.f32 %v3551_v61, %v624_v36 }
 0x19b   :  { %v3739_v57 = vsub.f32 %v3639_v0, %v717_v11  ;;  %v3747_v16 = vsub.f32 %v3636_v53, %v708_v15  ;;  %v3793_v15 = vadd.f32 %v623_v60, %v67_v7 }
 0x19d   :  { %v749_v58 = vmul.f32 %v3739_v57, %v3739_v57  ;;  %v740_v13 = vmul.f32 %v3747_v16, %v3747_v16  ;;  %v687_v22 = vsel %vm650_vm4, %v3793_v15, 0.0 }
 0x19f   :  { %v787_v33 = vsel %vm650_vm4, %v749_v58, 0.0  ;;  %v760_v25 = vsel %vm650_vm4, %v740_v13, 0.0 }
 0x1a0   :  { %788 = vadd.xlane.f32.xlu2 %v787_v33  ;;  %758 = vadd.xlane.f32.xlu1 %v757_v12 }
 0x1a8   :  { %761 = vadd.xlane.f32.xlu2 %v760_v25 }
 0x1b9   :  { %v3779_v46 = vpop.f32.mrf.mxu0 }
 0x1c1   :  { %v629_v12 = vpop.f32.mrf.mxu0 }
 0x1c2   :  { %v630_v54 = vadd.f32 %v3551_v61, %v629_v12 }
 0x1eb   :  { %v774_v55 = vpop.xlane.xlu2 %773 }
 0x1ec   :  { %v808_v34 = vmul.f32 %v774_v55, %v3662_v19 }
 0x1ee   :  { %v824_v39 = vadd.f32 1e-05, %v808_v34 }
 0x1f0   :  { %2892 = vrsqrt.f32 %v824_v39  ;;  %vm900_vm8 = vweird.f32 %v824_v39 }
 0x1f3   :  { %v662_v48 = vpop.xlane.xlu2 %661  ;;  %v777_v49 = vpop.xlane.xlu0 %776 }
 0x1f4   :  { %v709_v50 = vmul.f32 %v3662_v19, %v662_v48  ;;  %v809_v51 = vmul.f32 %v777_v49, %v3662_v19 }
 0x1f6   :  { %v2893_v52 = vpop.eup %2892  ;;  %v3784_v23 = vsub.f32 %v3677_v32, %v709_v50  ;;  %v825_v26 = vadd.f32 1e-05, %v809_v51  ;;  %v3824_v50 = vadd.f32 %v630_v54, %v70_v37 }
 0x1f7   :  { %v895_v62 = vmul.f32 %v2893_v52, %v824_v39  ;;  %vm901_vm7 = vweird.f32 %v2893_v52 }
 0x1f8   :  { %2894 = vrsqrt.f32 %v825_v26  ;;  %v741_v1 = vmul.f32 %v3784_v23, %v3784_v23  ;;  %vm3811_vm9 = vmor %vm900_vm8, %vm901_vm7  ;;  %vm910_vm11 = vweird.f32 %v825_v26 }
 0x1f9   :  { %v896_v5 = vmul.f32 %v2893_v52, %v895_v62  ;;  %v3829_v62 = vadd.f32 %v625_v30, %v68_v45 }
 0x1fa   :  { %v763_v8 = vsel %vm650_vm4, %v741_v1, 0.0 }
 0x1fb   :  { %v897_v9 = vmul.f32 0.5, %v896_v5  ;;  %v665_v10 = vpop.xlane.xlu2 %664  ;;  %764 = vadd.xlane.f32.xlu0 %v763_v8  ;;  %v780_v11 = vpop.xlane.xlu0 %779  ;;  %v3839_v5 = vld [vmem:[%s5059_s8] ss:$0 sm:$0xff] }
 0x1fc   :  { %v710_v24 = vmul.f32 %v3662_v19, %v665_v10  ;;  %v810_v58 = vmul.f32 %v780_v11, %v3662_v19 }
 0x1fd   :  { %v898_v33 = vsub.f32 1.5, %v897_v9 }
 0x1fe   :  { %v2895_v13 = vpop.eup %2894  ;;  %v3798_v25 = vsub.f32 %v3693_v42, %v710_v24  ;;  %v3800_v14 = vadd.f32 1e-05, %v810_v58  ;;  %v628_v24 = vadd.f32 %v3551_v61, %v3779_v46  ;;  %v69_v58 = vld [vmem:[%s5092_s22 + $0x70] sm:$0xff] }
 0x1ff   :  { %v899_v27 = vmul.f32 %v2893_v52, %v898_v33  ;;  %v905_v29 = vmul.f32 %v2895_v13, %v825_v26  ;;  %vm911_vm10 = vweird.f32 %v2895_v13  ;;  %v690_v33 = vsel %vm650_vm4, %v3829_v62, 0.0 }
 0x200   :  { %2896 = vrsqrt.f32 %v3800_v14  ;;  %v742_v18 = vmul.f32 %v3798_v25, %v3798_v25  ;;  %vm912_vm12 = vmor %vm910_vm11, %vm911_vm10  ;;  %vm920_vm14 = vweird.f32 %v3800_v14 }
 0x201   :  { %v906_v35 = vmul.f32 %v2895_v13, %v905_v29  ;;  %v903_v34 = vsel %vm3811_vm9, %v2893_v52, %v899_v27 }
 0x202   :  { %v766_v55 = vsel %vm650_vm4, %v742_v18, 0.0  ;;  %v1000_v52 = vmul.f32 %v903_v34, %v3666_v38  ;;  %v696_v38 = vsel %vm650_vm4, %v3824_v50, 0.0 }
 0x203   :  { %v907_v28 = vmul.f32 0.5, %v906_v35  ;;  %767 = vadd.xlane.f32.xlu1 %v766_v55  ;;  %v783_v39 = vpop.xlane.xlu1 %782  ;;  %688 = vadd.xlane.f32.xlu0 %v687_v22  ;;  %v668_v44 = vpop.xlane.xlu0 %667  ;;  %v3867_v35 = vadd.f32 %v628_v24, %v69_v58 }
 0x204   :  { %v811_v48 = vmul.f32 %v783_v39, %v3662_v19  ;;  %v711_v49 = vmul.f32 %v3662_v19, %v668_v44  ;;  %v1019_v27 = vmul.f32 %v3839_v5, %v1000_v52 }
 0x205   :  { %v908_v36 = vsub.f32 1.5, %v907_v28 }
 0x206   :  { %v3826_v51 = vpop.eup %2896  ;;  %v3831_v60 = vadd.f32 1e-05, %v811_v48  ;;  %v3834_v1 = vsub.f32 %v3709_v40, %v711_v49  ;;  %v693_v48 = vsel %vm650_vm4, %v3867_v35, 0.0  ;;  %v2782_v49 = vld [vmem:[%s5061_s10 + $0x34] sm:$0xf] }
 0x207   :  { %v909_v7 = vmul.f32 %v2895_v13, %v908_v36  ;;  %v915_v8 = vmul.f32 %v3826_v51, %v3800_v14  ;;  %vm921_vm13 = vweird.f32 %v3826_v51  ;;  %v2652_v36 = vld [vmem:[%s5061_s10 + $0x38] sm:$0xf0] }
 0x208   :  { %2898 = vrsqrt.f32 %v3831_v60  ;;  %v743_v9 = vmul.f32 %v3834_v1, %v3834_v1  ;;  %v2655_v52 = vor.u32 %v2782_v49, %v2652_v36  ;;  %vm3893_vm15 = vmor %vm920_vm14, %vm921_vm13  ;;  %vm930_vm1 = vweird.f32 %v3831_v60 }
 0x209   :  { %v913_v10 = vsel %vm912_vm12, %v2895_v13, %v909_v7  ;;  %v916_v11 = vmul.f32 %v3826_v51, %v915_v8  ;;  %v3862_v13 = vld [vmem:[%s5060_s9] ss:$0 sm:$0xff] }
 0x20a   :  { %v1001_v26 = vmul.f32 %v913_v10, %v3680_v21  ;;  %v769_v12 = vsel %vm650_vm4, %v743_v9, 0.0  ;;  %v1038_v55 = vadd.f32 %v3862_v13, %v1019_v27  ;;  %v2780_v10 = vld [vmem:[%s5061_s10 + $0x24] sm:$0xf]  ;;  %1187 = vmatpush.bf16.msrb.mxu2 %v2655_v52  ;;  %v2636_v27 = vld [vmem:[%s5061_s10 + $0x18] sm:$0xf0] }
 0x20b   :  { %v917_v29 = vmul.f32 0.5, %v916_v11  ;;  %691 = vadd.xlane.f32.xlu1 %v690_v33  ;;  %v786_v61 = vpop.xlane.xlu1 %785  ;;  %697 = vadd.xlane.f32.xlu0 %v696_v38  ;;  %v756_v21 = vpop.xlane.xlu0 %755  ;;  %v2644_v11 = vld [vmem:[%s5061_s10 + $0x28] sm:$0xf0] }
 0x20c   :  { %v812_v46 = vmul.f32 %v786_v61, %v3662_v19  ;;  %770 = vadd.xlane.f32.xlu2 %v769_v12  ;;  %v802_v18 = vmul.f32 %v756_v21, %v3662_v19  ;;  %v1020_v22 = vmul.f32 %v3839_v5, %v1001_v26  ;;  %v2647_v33 = vor.u32 %v2780_v10, %v2644_v11  ;;  %v2778_v12 = vld [vmem:[%s5061_s10 + $0x14] sm:$0xf] }
 0x20d   :  { %v918_v54 = vsub.f32 1.5, %v917_v29 }
 0x20e   :  { %v2899_v37 = vpop.eup %2898  ;;  %v3869_v41 = vadd.f32 1e-05, %v812_v46  ;;  %v3871_v30 = vadd.f32 1e-05, %v802_v18  ;;  %v1039_v34 = vadd.f32 %v3862_v13, %v1020_v22  ;;  %1188 = vmatpush.bf16.msrb.mxu2 %v2647_v33 }
 0x20f   :  { %v925_v28 = vmul.f32 %v2899_v37, %v3831_v60  ;;  %v919_v45 = vmul.f32 %v3826_v51, %v918_v54  ;;  %vm931_vm0 = vweird.f32 %v2899_v37 }
 0x210   :  { %2900 = vrsqrt.f32 %v3869_v41  ;;  %v3879_v39 = vpack.c.bf16 %v1039_v34, %v1038_v55  ;;  %vm932_vm2 = vmor %vm930_vm1, %vm931_vm0  ;;  %v2639_v55 = vor.u32 %v2778_v12, %v2636_v27  ;;  %vm940_vm6 = vweird.f32 %v3869_v41 }
 0x211   :  { %v926_v44 = vmul.f32 %v2899_v37, %v925_v28  ;;  %2902 = vrsqrt.f32 %v3871_v30  ;;  %v923_v14 = vsel %vm3893_vm15, %v3826_v51, %v919_v45  ;;  %v2776_v45 = vld [vmem:[%s5061_s10 + $0x4] sm:$0xf]  ;;  %vm840_vm8 = vweird.f32 %v3871_v30 }
 0x212   :  { %2659 = vmatmul.msk.bf16.vlgmr.msra.gmra.mxu2 %vm650_vm4, %v3879_v39  ;;  %v1002_v46 = vmul.f32 %v923_v14, %v3696_v3  ;;  %v2628_v3 = vld [vmem:[%s5061_s10 + $0x8] sm:$0xf0] }
 0x213   :  { %v927_v8 = vmul.f32 0.5, %v926_v44  ;;  %v789_v38 = vpop.xlane.xlu2 %788  ;;  %v759_v9 = vpop.xlane.xlu1 %758  ;;  %1189 = vmatpush.bf16.msrb.mxu2 %v2639_v55 }
 0x214   :  { %v813_v24 = vmul.f32 %v789_v38, %v3662_v19  ;;  %v803_v26 = vmul.f32 %v759_v9, %v3662_v19  ;;  %694 = vadd.xlane.f32.xlu2 %v693_v48  ;;  %v1021_v49 = vmul.f32 %v3839_v5, %v1002_v46 }
 0x215   :  { %v928_v58 = vsub.f32 1.5, %v927_v8 }
 0x216   :  { %v2901_v29 = vpop.eup %2900  ;;  %v829_v61 = vadd.f32 1e-05, %v813_v24  ;;  %v819_v51 = vadd.f32 1e-05, %v803_v26 }
 0x217   :  { %v2903_v21 = vpop.eup %2902  ;;  %v929_v18 = vmul.f32 %v2899_v37, %v928_v58  ;;  %v935_v22 = vmul.f32 %v2901_v29, %v3869_v41  ;;  %vm941_vm3 = vweird.f32 %v2901_v29 }
 0x218   :  { %v835_v54 = vmul.f32 %v2903_v21, %v3871_v30  ;;  %2904 = vrsqrt.f32 %v829_v61  ;;  %vm841_vm5 = vweird.f32 %v2903_v21  ;;  %vm942_vm7 = vmor %vm940_vm6, %vm941_vm3  ;;  %vm950_vm12 = vweird.f32 %v829_v61 }
 0x219   :  { %v933_v34 = vsel %vm932_vm2, %v2899_v37, %v929_v18  ;;  %v936_v28 = vmul.f32 %v2901_v29, %v935_v22  ;;  %2906 = vrsqrt.f32 %v819_v51  ;;  %v2631_v37 = vor.u32 %v2776_v45, %v2628_v3  ;;  %vm842_vm9 = vmor %vm840_vm8, %vm841_vm5 }
 0x21a   :  { %v1003_v60 = vmul.f32 %v933_v34, %v3713_v56  ;;  %v836_v44 = vmul.f32 %v2903_v21, %v835_v54  ;;  %v1040_v56 = vadd.f32 %v3862_v13, %v1021_v49  ;;  %vm850_vm14 = vweird.f32 %v819_v51 }
 0x21b   :  { %v937_v48 = vmul.f32 0.5, %v936_v28  ;;  %1190 = vmatpush.bf16.msrb.mxu2 %v2631_v37 }
 0x21c   :  { %v837_v36 = vmul.f32 0.5, %v836_v44  ;;  %v1022_v52 = vmul.f32 %v3839_v5, %v1003_v60 }
 0x21d   :  { %v938_v7 = vsub.f32 1.5, %v937_v48 }
 0x21e   :  { %v2905_v8 = vpop.eup %2904  ;;  %v838_v38 = vsub.f32 1.5, %v837_v36  ;;  %v1041_v9 = vadd.f32 %v3862_v13, %v1022_v52 }
 0x21f   :  { %v2907_v10 = vpop.eup %2906  ;;  %v939_v11 = vmul.f32 %v2901_v29, %v938_v7  ;;  %v945_v14 = vmul.f32 %v2905_v8, %v829_v61  ;;  %vm951_vm10 = vweird.f32 %v2905_v8 }
 0x220   :  { %v839_v24 = vmul.f32 %v2903_v21, %v838_v38  ;;  %v845_v26 = vmul.f32 %v2907_v10, %v819_v51  ;;  %v3930_v33 = vpack.c.bf16 %v1041_v9, %v1040_v56  ;;  %vm851_vm11 = vweird.f32 %v2907_v10  ;;  %vm952_vm13 = vmor %vm950_vm12, %vm951_vm10 }
 0x221   :  { %v946_v58 = vmul.f32 %v2905_v8, %v945_v14  ;;  %v943_v27 = vsel %vm942_vm7, %v2901_v29, %v939_v11  ;;  %vm852_vm15 = vmor %vm850_vm14, %vm851_vm11 }
 0x222   :  { %v846_v12 = vmul.f32 %v2907_v10, %v845_v26  ;;  %2660 = vmatmul.msk.bf16.gmra.mxu2 %vm650_vm4, %v3930_v33  ;;  %v843_v18 = vsel %vm842_vm9, %v2903_v21, %v839_v24  ;;  %v1004_v55 = vmul.f32 %v943_v27, %v3725_v59 }
 0x223   :  { %v947_v46 = vmul.f32 0.5, %v946_v58  ;;  %v994_v34 = vmul.f32 %v843_v18, %v3718_v47 }
 0x224   :  { %v847_v22 = vmul.f32 0.5, %v846_v12  ;;  %v1023_v21 = vmul.f32 %v3839_v5, %v1004_v55 }
 0x225   :  { %v948_v54 = vsub.f32 1.5, %v947_v46  ;;  %v1013_v59 = vmul.f32 %v3839_v5, %v994_v34 }
 0x226   :  { %v848_v41 = vsub.f32 1.5, %v847_v22  ;;  %v1042_v61 = vadd.f32 %v3862_v13, %v1023_v21 }
 0x227   :  { %v949_v28 = vmul.f32 %v2905_v8, %v948_v54  ;;  %v1032_v51 = vadd.f32 %v3862_v13, %v1013_v59 }
 0x228   :  { %v849_v30 = vmul.f32 %v2907_v10, %v848_v41 }
 0x229   :  { %v953_v29 = vsel %vm952_vm13, %v2905_v8, %v949_v28 }
 0x22a   :  { %v1005_v45 = vmul.f32 %v953_v29, %v3739_v57  ;;  %v853_v3 = vsel %vm852_vm15, %v2907_v10, %v849_v30 }
 0x22b   :  { %v995_v60 = vmul.f32 %v853_v3, %v3733_v6  ;;  %v762_v6 = vpop.xlane.xlu2 %761 }
 0x22c   :  { %v1024_v44 = vmul.f32 %v3839_v5, %v1005_v45  ;;  %v804_v52 = vmul.f32 %v762_v6, %v3662_v19 }
 0x22d   :  { %v1014_v47 = vmul.f32 %v3839_v5, %v995_v60 }
 0x22e   :  { %v1043_v48 = vadd.f32 %v3862_v13, %v1024_v44  ;;  %v820_v37 = vadd.f32 1e-05, %v804_v52 }
 0x22f   :  { %v1033_v49 = vadd.f32 %v3862_v13, %v1014_v47 }
 0x230   :  { %v3947_v57 = vpack.c.bf16 %v1043_v48, %v1042_v61  ;;  %2908 = vrsqrt.f32 %v820_v37  ;;  %vm860_vm1 = vweird.f32 %v820_v37 }
 0x231   :  { %v1048_v36 = vpack.c.bf16 %v1033_v49, %v1032_v51 }
 0x232   :  { %2661 = vmatmul.msk.bf16.gmra.mxu2 %vm650_vm4, %v3947_v57 }
 0x233   :  { %2656 = vmatmul.msk.bf16.vlgmr.msrb.gmra.mxu0 %vm650_vm4, %v1048_v36 }
 0x236   :  { %v2909_v7 = vpop.eup %2908 }
 0x237   :  { %v855_v8 = vmul.f32 %v2909_v7, %v820_v37  ;;  %vm861_vm0 = vweird.f32 %v2909_v7 }
 0x238   :  { %vm862_vm2 = vmor %vm860_vm1, %vm861_vm0 }
 0x239   :  { %v856_v38 = vmul.f32 %v2909_v7, %v855_v8 }
 0x23b   :  { %v857_v14 = vmul.f32 0.5, %v856_v38 }
 0x23d   :  { %v858_v56 = vsub.f32 1.5, %v857_v14 }
 0x23f   :  { %v859_v22 = vmul.f32 %v2909_v7, %v858_v56 }
 0x241   :  { %v863_v28 = vsel %vm862_vm2, %v2909_v7, %v859_v22 }
 0x242   :  { %2664 = vmatmul.msk.bf16.vlgmr.msrb.gmra.mxu2 %vm650_vm4, %v1048_v36  ;;  %v996_v61 = vmul.f32 %v863_v28, %v3747_v16 }
 0x26e   :  { %v765_v9 = vpop.xlane.xlu0 %764 }
 0x26f   :  { %v805_v10 = vmul.f32 %v765_v9, %v3662_v19 }
 0x271   :  { %v821_v11 = vadd.f32 1e-05, %v805_v10  ;;  %v1015_v10 = vmul.f32 %v3839_v5, %v996_v61 }
 0x273   :  { %2910 = vrsqrt.f32 %v821_v11  ;;  %vm870_vm5 = vweird.f32 %v821_v11 }
 0x276   :  { %v768_v24 = vpop.xlane.xlu1 %767  ;;  %v689_v26 = vpop.xlane.xlu0 %688 }
 0x277   :  { %v806_v58 = vmul.f32 %v768_v24, %v3662_v19  ;;  %v718_v12 = vmul.f32 %v3662_v19, %v689_v26 }
 0x279   :  { %v2911_v27 = vpop.eup %2910  ;;  %v822_v46 = vadd.f32 1e-05, %v806_v58  ;;  %v3958_v18 = vsub.f32 %v3793_v15, %v718_v12  ;;  %v1034_v58 = vadd.f32 %v3862_v13, %v1015_v10 }
 0x27a   :  { %v865_v54 = vmul.f32 %v2911_v27, %v821_v11  ;;  %vm871_vm3 = vweird.f32 %v2911_v27 }
 0x27b   :  { %2912 = vrsqrt.f32 %v822_v46  ;;  %v750_v55 = vmul.f32 %v3958_v18, %v3958_v18  ;;  %vm872_vm6 = vmor %vm870_vm5, %vm871_vm3  ;;  %vm880_vm8 = vweird.f32 %v822_v46 }
 0x27c   :  { %v866_v41 = vmul.f32 %v2911_v27, %v865_v54 }
 0x27d   :  { %v790_v34 = vsel %vm650_vm4, %v750_v55, 0.0 }
 0x27e   :  { %v867_v30 = vmul.f32 0.5, %v866_v41  ;;  %v692_v29 = vpop.xlane.xlu1 %691  ;;  %791 = vadd.xlane.f32.xlu1 %v790_v34  ;;  %v698_v45 = vpop.xlane.xlu0 %697 }
 0x27f   :  { %v719_v3 = vmul.f32 %v3662_v19, %v692_v29  ;;  %v771_v21 = vpop.xlane.xlu2 %770  ;;  %v721_v60 = vmul.f32 %v3662_v19, %v698_v45  ;;  %v3996_v45 = vld [vmem:[%s5062_s11] sm:$0x3] }
 0x280   :  { %v868_v59 = vsub.f32 1.5, %v867_v30  ;;  %v807_v44 = vmul.f32 %v771_v21, %v3662_v19  ;;  %v4000_v21 = vperm.slane %v3996_v45, 0 }
 0x281   :  { %v2913_v47 = vpop.eup %2912  ;;  %v3968_v48 = vsub.f32 %v3829_v62, %v719_v3  ;;  %v3971_v51 = vsub.f32 %v3824_v50, %v721_v60 }
 0x282   :  { %v869_v49 = vmul.f32 %v2911_v27, %v868_v59  ;;  %v875_v36 = vmul.f32 %v2913_v47, %v822_v46  ;;  %v823_v6 = vadd.f32 1e-05, %v807_v44  ;;  %vm881_vm7 = vweird.f32 %v2913_v47 }
 0x283   :  { %v751_v52 = vmul.f32 %v3968_v48, %v3968_v48  ;;  %v753_v37 = vmul.f32 %v3971_v51, %v3971_v51  ;;  %vm882_vm9 = vmor %vm880_vm8, %vm881_vm7 }
 0x284   :  { %v873_v7 = vsel %vm872_vm6, %v2911_v27, %v869_v49  ;;  %v876_v8 = vmul.f32 %v2913_v47, %v875_v36  ;;  %2914 = vrsqrt.f32 %v823_v6  ;;  %vm890_vm11 = vweird.f32 %v823_v6 }
 0x285   :  { %v997_v16 = vmul.f32 %v873_v7, %v3784_v23  ;;  %v793_v38 = vsel %vm650_vm4, %v751_v52, 0.0  ;;  %v799_v9 = vsel %vm650_vm4, %v753_v37, 0.0 }
 0x286   :  { %v877_v11 = vmul.f32 0.5, %v876_v8  ;;  %794 = vadd.xlane.f32.xlu2 %v793_v38  ;;  %800 = vadd.xlane.f32.xlu1 %v799_v9 }
 0x287   :  { %v695_v14 = vpop.xlane.xlu2 %694  ;;  %v1016_v56 = vmul.f32 %v3839_v5, %v997_v16 }
 0x288   :  { %v878_v24 = vsub.f32 1.5, %v877_v11  ;;  %v720_v26 = vmul.f32 %v3662_v19, %v695_v14 }
 0x289   :  { %v1035_v12 = vadd.f32 %v3862_v13, %v1016_v56 }
 0x28a   :  { %v2915_v23 = vpop.eup %2914  ;;  %v3986_v27 = vsub.f32 %v3867_v35, %v720_v26  ;;  %v879_v22 = vmul.f32 %v2913_v47, %v878_v24 }
 0x28b   :  { %v885_v54 = vmul.f32 %v2915_v23, %v823_v6  ;;  %v1049_v55 = vpack.c.bf16 %v1035_v12, %v1034_v58  ;;  %vm891_vm10 = vweird.f32 %v2915_v23 }
 0x28c   :  { %v752_v41 = vmul.f32 %v3986_v27, %v3986_v27  ;;  %v883_v30 = vsel %vm882_vm9, %v2913_v47, %v879_v22  ;;  %vm892_vm12 = vmor %vm890_vm11, %vm891_vm10 }
 0x28d   :  { %v886_v34 = vmul.f32 %v2915_v23, %v885_v54  ;;  %2657 = vmatmul.msk.bf16.vlgmr.msra.gmra.mxu1 %vm650_vm4, %v1049_v55  ;;  %2665 = vmatmul.msk.bf16.gmra.mxu2 %vm650_vm4, %v1049_v55  ;;  %v998_v46 = vmul.f32 %v883_v30, %v3798_v25 }
 0x28e   :  { %v796_v28 = vsel %vm650_vm4, %v752_v41, 0.0 }
 0x28f   :  { %v887_v29 = vmul.f32 0.5, %v886_v34  ;;  %797 = vadd.xlane.f32.xlu0 %v796_v28  ;;  %v1017_v49 = vmul.f32 %v3839_v5, %v998_v46 }
 0x291   :  { %v888_v3 = vsub.f32 1.5, %v887_v29  ;;  %v1036_v25 = vadd.f32 %v3862_v13, %v1017_v49  ;;  %v2799_v49 = vld [vmem:[%s5063_s12 + $0x78] sm:$0xff] }
 0x292   :  { %2069 = vmatpush.bf16.msrb.mxu1 %v2799_v49 }
 0x293   :  { %v889_v60 = vmul.f32 %v2915_v23, %v888_v3 }
 0x295   :  { %v893_v59 = vsel %vm892_vm12, %v2915_v23, %v889_v60  ;;  %v1158_v44 = vpop.f32.mrf.mxu2 }
 0x296   :  { %v999_v47 = vmul.f32 %v893_v59, %v3834_v1  ;;  %v4004_v61 = vadd.f32 %v1158_v44, %v4000_v21 }
 0x298   :  { %v2684_v36 = vmul.f32 -1.442695, %v4004_v61  ;;  %v1018_v52 = vmul.f32 %v3839_v5, %v999_v47 }
 0x29a   :  { %2916 = vpow2.f32 %v2684_v36  ;;  %v1037_v37 = vadd.f32 %v3862_v13, %v1018_v52 }
 0x29c   :  { %v1050_v6 = vpack.c.bf16 %v1037_v37, %v1036_v25 }
 0x29d   :  { %v1160_v7 = vpop.f32.mrf.mxu2 }
 0x29e   :  { %2658 = vmatmul.msk.bf16.gmra.mxu1 %vm650_vm4, %v1050_v6  ;;  %v1161_v1 = vadd.f32 %v1160_v7, %v4000_v21  ;;  %2666 = vmatmul.msk.bf16.gmra.mxu2 %vm650_vm4, %v1050_v6 }
 0x2a0   :  { %v2917_v8 = vpop.eup %2916  ;;  %v2686_v16 = vmul.f32 -1.442695, %v1161_v1 }
 0x2a1   :  { %v1340_v38 = vadd.f32 1.0, %v2917_v8 }
 0x2a2   :  { %2918 = vpow2.f32 %v2686_v16 }
 0x2a3   :  { %2920 = vrcp.f32 %v1340_v38  ;;  %v1551_v28 = vand.u32 2147483648, %v1340_v38  ;;  %vm1545_vm14 = vweird.f32 %v1340_v38  ;;  %v1549_v29 = vand.u32 2147483647, %v1340_v38 }
 0x2a5   :  { %v1163_v9 = vpop.f32.mrf.mxu2  ;;  %v1552_v36 = vor.u32 1.1754944e-38, %v1551_v28  ;;  %vm1550_vm1 = vcmp.eq.f32.partialorder %v1549_v29, 8.507059e+37 }
 0x2a6   :  { %v4015_v10 = vadd.f32 %v1163_v9, %v4000_v21  ;;  %v2798_v9 = vld [vmem:[%s5063_s12 + $0x70] sm:$0xff] }
 0x2a7   :  { %2070 = vmatpush.bf16.msrb.mxu1 %v2798_v9 }
 0x2a8   :  { %v2919_v11 = vpop.eup %2918  ;;  %v2688_v56 = vmul.f32 -1.442695, %v4015_v10 }
 0x2a9   :  { %v2921_v14 = vpop.eup %2920  ;;  %v1342_v13 = vadd.f32 1.0, %v2919_v11 }
 0x2aa   :  { %v1541_v24 = vmul.f32 %v2921_v14, %v1340_v38  ;;  %vm1546_vm13 = vweird.f32 %v2921_v14 }
 0x2ab   :  { %2922 = vrcp.f32 %v1342_v13  ;;  %vm4026_vm15 = vmor %vm1545_vm14, %vm1546_vm13  ;;  %v1579_v44 = vand.u32 2147483647, %v1342_v13  ;;  %vm1575_vm2 = vweird.f32 %v1342_v13 }
 0x2ac   :  { %v1542_v26 = vsub.f32 1.0, %v1541_v24  ;;  %2924 = vpow2.f32 %v2688_v56 }
 0x2ad   :  { %v1165_v12 = vpop.f32.mrf.mxu2  ;;  %vm1580_vm5 = vcmp.eq.f32.partialorder %v1579_v44, 8.507059e+37 }
 0x2ae   :  { %v1543_v58 = vmul.f32 %v2921_v14, %v1542_v26  ;;  %2667 = vmatmul.msk.bf16.gmra.mxu2 %vm650_vm4, %v3879_v39  ;;  %v4021_v23 = vadd.f32 %v1165_v12, %v4000_v21  ;;  %v1581_v39 = vand.u32 2147483648, %v1342_v13  ;;  %v2797_v12 = vld [vmem:[%s5063_s12 + $0x68] sm:$0xff] }
 0x2af   :  { %2071 = vmatpush.bf16.msrb.mxu1 %v2797_v12 }
 0x2b0   :  { %v2690_v54 = vmul.f32 -1.442695, %v4021_v23  ;;  %v1544_v41 = vadd.f32 %v2921_v14, %v1543_v58  ;;  %v1582_v7 = vor.u32 1.1754944e-38, %v1581_v39  ;;  %v4068_v39 = vperm.slane %v3996_v45, 1 }
 0x2b1   :  { %v2923_v22 = vpop.eup %2922 }
 0x2b2   :  { %v2925_v55 = vpop.eup %2924  ;;  %v1571_v34 = vmul.f32 %v2923_v22, %v1342_v13  ;;  %2926 = vpow2.f32 %v2690_v54  ;;  %v1548_v60 = vsel %vm4026_vm15, %v2921_v14, %v1544_v41  ;;  %vm1576_vm0 = vweird.f32 %v2923_v22 }
 0x2b3   :  { %v4024_v30 = vadd.f32 1.0, %v2925_v55  ;;  %v1553_v6 = vsel %vm1550_vm1, %v1552_v36, %v1548_v60  ;;  %vm1577_vm3 = vmor %vm1575_vm2, %vm1576_vm0 }
 0x2b4   :  { %v1572_v3 = vsub.f32 1.0, %v1571_v34  ;;  %v4044_v56 = vmul.f32 %v1553_v6, %v4004_v61 }
 0x2b5   :  { %2928 = vrcp.f32 %v4024_v30  ;;  %v1168_v47 = vpop.f32.mrf.mxu2  ;;  %vm1605_vm7 = vweird.f32 %v4024_v30  ;;  %v1609_v60 = vand.u32 2147483647, %v4024_v30 }
 0x2b6   :  { %v1573_v59 = vmul.f32 %v2923_v22, %v1572_v3  ;;  %v4037_v52 = vadd.f32 %v1168_v47, %v4000_v21  ;;  %v1611_v3 = vand.u32 2147483648, %v4024_v30  ;;  %v2795_v47 = vld [vmem:[%s5063_s12 + $0x58] sm:$0xff] }
 0x2b7   :  { %vm1610_vm11 = vcmp.eq.f32.partialorder %v1609_v60, 8.507059e+37 }
 0x2b8   :  { %v1574_v25 = vadd.f32 %v2923_v22, %v1573_v59  ;;  %v2927_v37 = vpop.eup %2926  ;;  %v2692_v8 = vmul.f32 -1.442695, %v4037_v52 }
 0x2b9   :  { %v1346_v38 = vadd.f32 1.0, %v2927_v37  ;;  %v1612_v37 = vor.u32 1.1754944e-38, %v1611_v3 }
 0x2ba   :  { %v1578_v16 = vsel %vm1577_vm3, %v2923_v22, %v1574_v25  ;;  %2930 = vpow2.f32 %v2692_v8 }
 0x2bb   :  { %v2929_v11 = vpop.eup %2928  ;;  %v1583_v14 = vsel %vm1580_vm5, %v1582_v7, %v1578_v16  ;;  %2932 = vrcp.f32 %v1346_v38  ;;  %v1641_v59 = vand.u32 2147483648, %v1346_v38  ;;  %v1639_v25 = vand.u32 2147483647, %v1346_v38  ;;  %v2794_v16 = vld [vmem:[%s5063_s12 + $0x50] sm:$0xff] }
 0x2bc   :  { %v4046_v13 = vmul.f32 %v1583_v14, %v1161_v1  ;;  %v1601_v24 = vmul.f32 %v2929_v11, %v4024_v30  ;;  %vm1606_vm6 = vweird.f32 %v2929_v11  ;;  %vm1635_vm10 = vweird.f32 %v1346_v38 }
 0x2bd   :  { %v1170_v58 = vpop.f32.mrf.mxu2  ;;  %vm4075_vm8 = vmor %vm1605_vm7, %vm1606_vm6  ;;  %v1642_v8 = vor.u32 1.1754944e-38, %v1641_v59  ;;  %vm1640_vm13 = vcmp.eq.f32.partialorder %v1639_v25, 8.507059e+37 }
 0x2be   :  { %v1602_v26 = vsub.f32 1.0, %v1601_v24  ;;  %2668 = vmatmul.msk.bf16.gmra.mxu2 %vm650_vm4, %v3930_v33  ;;  %v1878_v22 = vpack.c.bf16 %v4046_v13, %v4044_v56  ;;  %v4057_v1 = vadd.f32 %v1170_v58, %v4000_v21  ;;  %v2796_v33 = vld [vmem:[%s5063_s12 + $0x60] sm:$0xff] }
 0x2bf   :  { %2072 = vmatpush.bf16.msrb.mxu1 %v2796_v33 }
 0x2c0   :  { %v1603_v61 = vmul.f32 %v2929_v11, %v1602_v26  ;;  %v2931_v54 = vpop.eup %2930  ;;  %v2694_v29 = vmul.f32 -1.442695, %v4057_v1 }
 0x2c1   :  { %v2933_v55 = vpop.eup %2932  ;;  %v4059_v41 = vadd.f32 1.0, %v2931_v54  ;;  %v2793_v54 = vld [vmem:[%s5063_s12 + $0x48] sm:$0xff] }
 0x2c2   :  { %v1631_v34 = vmul.f32 %v2933_v55, %v1346_v38  ;;  %v1604_v28 = vadd.f32 %v2929_v11, %v1603_v61  ;;  %vm1636_vm9 = vweird.f32 %v2933_v55 }
 0x2c3   :  { %2934 = vrcp.f32 %v4059_v41  ;;  %2073 = vmatpush.bf16.msrb.mxu1 %v2795_v47  ;;  %vm1637_vm12 = vmor %vm1635_vm10, %vm1636_vm9  ;;  %vm1665_vm15 = vweird.f32 %v4059_v41  ;;  %v1669_v47 = vand.u32 2147483647, %v4059_v41 }
 0x2c4   :  { %v1632_v46 = vsub.f32 1.0, %v1631_v34  ;;  %v1608_v45 = vsel %vm4075_vm8, %v2929_v11, %v1604_v28  ;;  %2936 = vpow2.f32 %v2694_v29 }
 0x2c5   :  { %v1192_v44 = vpop.f32.mrf.mxu2  ;;  %v1613_v9 = vsel %vm1610_vm11, %v1612_v37, %v1608_v45  ;;  %vm1670_vm2 = vcmp.eq.f32.partialorder %v1669_v47, 8.507059e+37 }
 0x2c6   :  { %v1633_v36 = vmul.f32 %v2933_v55, %v1632_v46  ;;  %v4082_v6 = vadd.f32 %v1192_v44, %v4068_v39  ;;  %v4093_v12 = vmul.f32 %v1613_v9, %v4015_v10  ;;  %v1671_v44 = vand.u32 2147483648, %v4059_v41 }
 0x2c7   :  { %2074 = vmatpush.bf16.msrb.mxu1 %v2794_v16 }
 0x2c8   :  { %v1634_v30 = vadd.f32 %v2933_v55, %v1633_v36  ;;  %v2673_v11 = vmul.f32 -1.442695, %v4082_v6  ;;  %v1672_v9 = vor.u32 1.1754944e-38, %v1671_v44 }
 0x2c9   :  { %v2935_v7 = vpop.eup %2934 }
 0x2ca   :  { %v1638_v14 = vsel %vm1637_vm12, %v2933_v55, %v1634_v30  ;;  %v1661_v26 = vmul.f32 %v2935_v7, %v4059_v41  ;;  %2938 = vpow2.f32 %v2673_v11  ;;  %v2937_v58 = vpop.eup %2936  ;;  %vm1666_vm14 = vweird.f32 %v2935_v7 }
 0x2cb   :  { %v1643_v24 = vsel %vm1640_vm13, %v1642_v8, %v1638_v14  ;;  %v1350_v55 = vadd.f32 1.0, %v2937_v58  ;;  %2075 = vmatpush.bf16.msrb.mxu1 %v2793_v54  ;;  %vm1667_vm0 = vmor %vm1665_vm15, %vm1666_vm14 }
 0x2cc   :  { %v4090_v38 = vmul.f32 %v1643_v24, %v4021_v23  ;;  %v1662_v34 = vsub.f32 1.0, %v1661_v26  ;;  %v2792_v23 = vld [vmem:[%s5063_s12 + $0x40] sm:$0xff] }
 0x2cd   :  { %v1194_v61 = vpop.f32.mrf.mxu2  ;;  %2940 = vrcp.f32 %v1350_v55  ;;  %v1699_v25 = vand.u32 2147483647, %v1350_v55  ;;  %v1701_v45 = vand.u32 2147483648, %v1350_v55  ;;  %vm1695_vm3 = vweird.f32 %v1350_v55 }
 0x2ce   :  { %2669 = vmatmul.msk.bf16.gmra.mxu2 %vm650_vm4, %v3947_v57  ;;  %v4101_v33 = vadd.f32 %v1194_v61, %v4068_v39  ;;  %v1663_v29 = vmul.f32 %v2935_v7, %v1662_v34 }
 0x2cf   :  { %2076 = vmatpush.bf16.msrb.mxu1 %v2792_v23  ;;  %v1702_v26 = vor.u32 1.1754944e-38, %v1701_v45  ;;  %vm1700_vm6 = vcmp.eq.f32.partialorder %v1699_v25, 8.507059e+37 }
 0x2d0   :  { %v2675_v57 = vmul.f32 -1.442695, %v4101_v33  ;;  %v2939_v28 = vpop.eup %2938  ;;  %v1664_v60 = vadd.f32 %v2935_v7, %v1663_v29 }
 0x2d1   :  { %v1329_v3 = vadd.f32 1.0, %v2939_v28 }
 0x2d2   :  { %2942 = vpow2.f32 %v2675_v57  ;;  %v1668_v30 = vsel %vm1667_vm0, %v2935_v7, %v1664_v60 }
 0x2d3   :  { %2944 = vrcp.f32 %v1329_v3  ;;  %v2941_v46 = vpop.eup %2940  ;;  %v1673_v24 = vsel %vm1670_vm2, %v1672_v9, %v1668_v30  ;;  %v1386_v29 = vand.u32 2147483648, %v1329_v3  ;;  %vm1380_vm8 = vweird.f32 %v1329_v3 }
 0x2d4   :  { %v1691_v59 = vmul.f32 %v2941_v46, %v1350_v55  ;;  %vm1696_vm1 = vweird.f32 %v2941_v46  ;;  %v4113_v34 = vmul.f32 %v1673_v24, %v4037_v52  ;;  %v1384_v60 = vand.u32 2147483647, %v1329_v3 }
 0x2d5   :  { %vm1697_vm5 = vmor %vm1695_vm3, %vm1696_vm1 }
 0x2d6   :  { %v1692_v49 = vsub.f32 1.0, %v1691_v59  ;;  %v1143_v59 = vpop.f32.mrf.mxu0  ;;  %vm1385_vm11 = vcmp.eq.f32.partialorder %v1384_v60, 8.507059e+37 }
 0x2d8   :  { %v2943_v36 = vpop.eup %2942  ;;  %v1693_v8 = vmul.f32 %v2941_v46, %v1692_v49 }
 0x2d9   :  { %v2945_v37 = vpop.eup %2944  ;;  %v1331_v16 = vadd.f32 1.0, %v2943_v36 }
 0x2da   :  { %v1376_v14 = vmul.f32 %v2945_v37, %v1329_v3  ;;  %v1694_v11 = vadd.f32 %v2941_v46, %v1693_v8  ;;  %vm1381_vm7 = vweird.f32 %v2945_v37 }
 0x2db   :  { %2946 = vrcp.f32 %v1331_v16  ;;  %vm1382_vm9 = vmor %vm1380_vm8, %vm1381_vm7  ;;  %v1416_v44 = vand.u32 2147483648, %v1331_v16  ;;  %v1414_v49 = vand.u32 2147483647, %v1331_v16  ;;  %vm1410_vm12 = vweird.f32 %v1331_v16 }
 0x2dc   :  { %v1377_v41 = vsub.f32 1.0, %v1376_v14  ;;  %v1698_v58 = vsel %vm1697_vm5, %v2941_v46, %v1694_v11 }
 0x2dd   :  { %v1703_v61 = vsel %vm1700_vm6, %v1702_v26, %v1698_v58  ;;  %v1417_v45 = vor.u32 1.1754944e-38, %v1416_v44  ;;  %vm1415_vm14 = vcmp.eq.f32.partialorder %v1414_v49, 8.507059e+37 }
 0x2de   :  { %v1378_v54 = vmul.f32 %v2945_v37, %v1377_v41  ;;  %v4116_v7 = vmul.f32 %v1703_v61, %v4057_v1  ;;  %v1387_v1 = vor.u32 1.1754944e-38, %v1386_v29 }
 0x2e0   :  { %v1379_v55 = vadd.f32 %v2945_v37, %v1378_v54 }
 0x2e1   :  { %v2947_v23 = vpop.eup %2946 }
 0x2e2   :  { %v1406_v28 = vmul.f32 %v2947_v23, %v1331_v16  ;;  %v1383_v47 = vsel %vm1382_vm9, %v2945_v37, %v1379_v55  ;;  %vm1411_vm10 = vweird.f32 %v2947_v23  ;;  %v1145_v37 = vpop.f32.mrf.mxu0  ;;  %v4127_v16 = vadd.f32 %v1143_v59, %v4000_v21 }
 0x2e3   :  { %v1388_v25 = vsel %vm1385_vm11, %v1387_v1, %v1383_v47  ;;  %vm1412_vm13 = vmor %vm1410_vm12, %vm1411_vm10  ;;  %v4124_v41 = vadd.f32 %v1145_v37, %v4000_v21  ;;  %v2789_v37 = vld [vmem:[%s5063_s12 + $0x28] sm:$0xff] }
 0x2e4   :  { %v1407_v46 = vsub.f32 1.0, %v1406_v28  ;;  %v1841_v3 = vmul.f32 %v1388_v25, %v4082_v6  ;;  %v2672_v55 = vmul.f32 -1.442695, %v4127_v16 }
 0x2e5   :  { %v2674_v58 = vmul.f32 -1.442695, %v4124_v41 }
 0x2e6   :  { %v1408_v52 = vmul.f32 %v2947_v23, %v1407_v46  ;;  %v2791_v46 = vld [vmem:[%s5063_s12 + $0x38] sm:$0xff] }
 0x2e7   :  { %2020 = vmatpush.bf16.msrb.mxu3 %v2791_v46 }
 0x2e8   :  { %v1409_v36 = vadd.f32 %v2947_v23, %v1408_v52  ;;  %v2790_v52 = vld [vmem:[%s5063_s12 + $0x30] sm:$0xff] }
 0x2ea   :  { %v1413_v30 = vsel %vm1412_vm13, %v2947_v23, %v1409_v36 }
 0x2eb   :  { %v1418_v8 = vsel %vm1415_vm14, %v1417_v45, %v1413_v30  ;;  %2021 = vmatpush.bf16.msrb.mxu3 %v2790_v52  ;;  %v2787_v52 = vld [vmem:[%s5063_s12 + $0x18] sm:$0xff] }
 0x2ec   :  { %v1843_v9 = vmul.f32 %v1418_v8, %v4101_v33 }
 0x2ee   :  { %v1873_v14 = vpack.c.bf16 %v1843_v9, %v1841_v3 }
 0x2ef   :  { %2022 = vmatpush.bf16.msrb.mxu3 %v2789_v37 }
 0x2f0   :  { %2077 = vmatmul.bf16.vlgmr.msrb.gmra.mxu1 %v1873_v14 }
 0x2f1   :  { %v792_v11 = vpop.xlane.xlu1 %791 }
 0x2f2   :  { %v814_v24 = vmul.f32 %v792_v11, %v3662_v19 }
 0x2f4   :  { %v830_v26 = vadd.f32 1e-05, %v814_v24 }
 0x2f6   :  { %2948 = vrsqrt.f32 %v830_v26  ;;  %vm960_vm0 = vweird.f32 %v830_v26 }
 0x2f7   :  { %2950 = vpow2.f32 %v2674_v58 }
 0x2f9   :  { %v795_v61 = vpop.xlane.xlu2 %794  ;;  %v801_v6 = vpop.xlane.xlu1 %800 }
 0x2fa   :  { %v815_v33 = vmul.f32 %v795_v61, %v3662_v19  ;;  %v817_v54 = vmul.f32 %v801_v6, %v3662_v19 }
 0x2fc   :  { %v2949_v23 = vpop.eup %2948  ;;  %v831_v28 = vadd.f32 1e-05, %v815_v33  ;;  %v4133_v29 = vadd.f32 1e-05, %v817_v54  ;;  %v2788_v54 = vld [vmem:[%s5063_s12 + $0x20] sm:$0xff] }
 0x2fd   :  { %v955_v60 = vmul.f32 %v2949_v23, %v830_v26  ;;  %v2951_v49 = vpop.eup %2950  ;;  %vm961_vm15 = vweird.f32 %v2949_v23  ;;  %2023 = vmatpush.bf16.msrb.mxu3 %v2788_v54  ;;  %v4196_v54 = vld [vmem:[%s5060_s9] ss:$0 sm:$0xff] }
 0x2fe   :  { %2952 = vrsqrt.f32 %v831_v28  ;;  %v4147_v14 = vadd.f32 1.0, %v2951_v49  ;;  %vm962_vm1 = vmor %vm960_vm0, %vm961_vm15  ;;  %vm970_vm3 = vweird.f32 %v831_v28  ;;  %vm990_vm9 = vweird.f32 %v4133_v29 }
 0x2ff   :  { %v956_v59 = vmul.f32 %v2949_v23, %v955_v60  ;;  %2954 = vrsqrt.f32 %v4133_v29 }
 0x300   :  { %2956 = vpow2.f32 %v2672_v55  ;;  %vm1395_vm14 = vweird.f32 %v4147_v14 }
 0x301   :  { %v957_v44 = vmul.f32 0.5, %v956_v59  ;;  %2024 = vmatpush.bf16.msrb.mxu3 %v2787_v52 }
 0x302   :  { %v798_v47 = vpop.xlane.xlu0 %797 }
 0x303   :  { %v958_v1 = vsub.f32 1.5, %v957_v44  ;;  %v816_v36 = vmul.f32 %v798_v47, %v3662_v19 }
 0x304   :  { %v2953_v25 = vpop.eup %2952 }
 0x305   :  { %v4143_v45 = vpop.eup %2954  ;;  %v959_v30 = vmul.f32 %v2949_v23, %v958_v1  ;;  %v965_v8 = vmul.f32 %v2953_v25, %v831_v28  ;;  %v4145_v3 = vadd.f32 1e-05, %v816_v36  ;;  %vm971_vm2 = vweird.f32 %v2953_v25 }
 0x306   :  { %v2957_v9 = vpop.eup %2956  ;;  %v985_v11 = vmul.f32 %v4143_v45, %v4133_v29  ;;  %vm972_vm5 = vmor %vm970_vm3, %vm971_vm2  ;;  %vm991_vm7 = vweird.f32 %v4143_v45 }
 0x307   :  { %v966_v24 = vmul.f32 %v2953_v25, %v965_v8  ;;  %2958 = vrsqrt.f32 %v4145_v3  ;;  %v963_v58 = vsel %vm962_vm1, %v2949_v23, %v959_v30  ;;  %v4155_v61 = vadd.f32 1.0, %v2957_v9  ;;  %vm4211_vm11 = vmor %vm990_vm9, %vm991_vm7 }
 0x308   :  { %v986_v33 = vmul.f32 %v4143_v45, %v985_v11  ;;  %2960 = vrcp.f32 %v4147_v14  ;;  %v1006_v55 = vmul.f32 %v963_v58, %v3958_v18  ;;  %vm980_vm8 = vweird.f32 %v4145_v3 }
 0x309   :  { %v967_v6 = vmul.f32 0.5, %v966_v24  ;;  %2962 = vrcp.f32 %v4155_v61  ;;  %vm1365_vm0 = vweird.f32 %v4155_v61 }
 0x30a   :  { %v1148_v26 = vpop.f32.mrf.mxu1  ;;  %v987_v44 = vmul.f32 0.5, %v986_v33  ;;  %v1025_v49 = vmul.f32 %v3839_v5, %v1006_v55 }
 0x30b   :  { %v968_v60 = vsub.f32 1.5, %v967_v6  ;;  %v4164_v46 = vadd.f32 %v1148_v26, %v4000_v21 }
 0x30c   :  { %v988_v28 = vsub.f32 1.5, %v987_v44  ;;  %v1044_v55 = vadd.f32 %v4196_v54, %v1025_v49 }
 0x30d   :  { %v2959_v23 = vpop.eup %2958  ;;  %v969_v59 = vmul.f32 %v2953_v25, %v968_v60  ;;  %v2676_v8 = vmul.f32 -1.442695, %v4164_v46 }
 0x30e   :  { %v975_v47 = vmul.f32 %v2959_v23, %v4145_v3  ;;  %v4172_v1 = vpop.eup %2960  ;;  %vm981_vm6 = vweird.f32 %v2959_v23  ;;  %v989_v44 = vmul.f32 %v4143_v45, %v988_v28 }
 0x30f   :  { %v973_v18 = vsel %vm972_vm5, %v2953_v25, %v969_v59  ;;  %v3084_v25 = vld [vmem:[%s5059_s8] ss:$0 sm:$0xff]  ;;  %v4185_v58 = vpop.eup %2962  ;;  %v1391_v6 = vmul.f32 %v4172_v1, %v4147_v14  ;;  %2964 = vpow2.f32 %v2676_v8  ;;  %vm982_vm10 = vmor %vm980_vm8, %vm981_vm6  ;;  %vm1396_vm12 = vweird.f32 %v4172_v1 }
 0x310   :  { %v1007_v36 = vmul.f32 %v973_v18, %v3968_v48  ;;  %v976_v30 = vmul.f32 %v2959_v23, %v975_v47  ;;  %v1197_v9 = vpop.f32.mrf.mxu2  ;;  %v2786_v48 = vld [vmem:[%s5063_s12 + $0x10] sm:$0xff]  ;;  %v1361_v52 = vmul.f32 %v4185_v58, %v4155_v61  ;;  %v993_v3 = vsel %vm4211_vm11, %v4143_v45, %v989_v44  ;;  %vm4250_vm15 = vmor %vm1395_vm14, %vm1396_vm12 }
 0x311   :  { %v4177_v11 = vadd.f32 %v1197_v9, %v4068_v39  ;;  %2025 = vmatpush.bf16.msrb.mxu3 %v2786_v48  ;;  %v1009_v45 = vmul.f32 %v993_v3, %v3971_v51  ;;  %vm1366_vm13 = vweird.f32 %v4185_v58 }
 0x312   :  { %v977_v37 = vmul.f32 0.5, %v976_v30  ;;  %v1150_v24 = vpop.f32.mrf.mxu1  ;;  %v1026_v5 = vmul.f32 %v3084_v25, %v1007_v36  ;;  %v2785_v36 = vld [vmem:[%s5063_s12 + $0x8] sm:$0xff]  ;;  %v1392_v30 = vsub.f32 1.0, %v1391_v6  ;;  %vm4276_vm1 = vmor %vm1365_vm0, %vm1366_vm13 }
 0x313   :  { %v2677_v33 = vmul.f32 -1.442695, %v4177_v11  ;;  %v4191_v26 = vadd.f32 %v1150_v24, %v4000_v21  ;;  %v1362_v24 = vsub.f32 1.0, %v1361_v52 }
 0x314   :  { %v978_v60 = vsub.f32 1.5, %v977_v37  ;;  %v1045_v59 = vadd.f32 %v4196_v54, %v1026_v5  ;;  %v1393_v6 = vmul.f32 %v4172_v1, %v1392_v30  ;;  %v1401_v30 = vand.u32 2147483648, %v4147_v14 }
 0x315   :  { %2966 = vpow2.f32 %v2677_v33  ;;  %v2678_v47 = vmul.f32 -1.442695, %v4191_v26  ;;  %2026 = vmatpush.bf16.msrb.mxu3 %v2785_v36  ;;  %v2965_v29 = vpop.eup %2964  ;;  %v1399_v36 = vand.u32 2147483647, %v4147_v14  ;;  %v1369_v14 = vand.u32 2147483647, %v4155_v61 }
 0x316   :  { %v979_v18 = vmul.f32 %v2959_v23, %v978_v60  ;;  %v1054_v49 = vpack.c.bf16 %v1045_v59, %v1044_v55  ;;  %v4232_v44 = vadd.f32 1.0, %v2965_v29 }
 0x317   :  { %2968 = vpow2.f32 %v2678_v47  ;;  %v1363_v47 = vmul.f32 %v4185_v58, %v1362_v24  ;;  %vm1400_vm2 = vcmp.eq.f32.partialorder %v1399_v36, 8.507059e+37  ;;  %vm1370_vm3 = vcmp.eq.f32.partialorder %v1369_v14, 8.507059e+37 }
 0x318   :  { %v983_v9 = vsel %vm982_vm10, %v2959_v23, %v979_v18  ;;  %2662 = vmatmul.msk.bf16.vlgmr.msra.gmra.mxu3 %vm650_vm4, %v1054_v49  ;;  %v1199_v28 = vpop.f32.mrf.mxu2  ;;  %2670 = vmatmul.msk.bf16.gmra.mxu2 %vm650_vm4, %v1054_v49  ;;  %v2784_v23 = vld [vmem:[%s5063_s12] sm:$0xff]  ;;  %v1394_v18 = vadd.f32 %v4172_v1, %v1393_v6  ;;  %v1028_v49 = vmul.f32 %v3084_v25, %v1009_v45  ;;  %vm1425_vm0 = vweird.f32 %v4232_v44 }
 0x319   :  { %v4221_v37 = vadd.f32 %v1199_v28, %v4068_v39  ;;  %v1008_v5 = vmul.f32 %v983_v9, %v3986_v27  ;;  %2027 = vmatpush.bf16.msrb.mxu3 %v2784_v23  ;;  %v1364_v28 = vadd.f32 %v4185_v58, %v1363_v47  ;;  %v1402_v47 = vor.u32 1.1754944e-38, %v1401_v30 }
 0x31a   :  { %v1398_v23 = vsel %vm4250_vm15, %v4172_v1, %v1394_v18 }
 0x31b   :  { %v2967_v48 = vpop.eup %2966  ;;  %v2679_v33 = vmul.f32 -1.442695, %v4221_v37  ;;  %v1153_v55 = vpop.f32.mrf.mxu1  ;;  %v1027_v52 = vmul.f32 %v3084_v25, %v1008_v5  ;;  %v1371_v5 = vand.u32 2147483648, %v4155_v61 }
 0x31c   :  { %v4230_v60 = vadd.f32 1.0, %v2967_v48  ;;  %v4235_v27 = vadd.f32 %v1153_v55, %v4000_v21 }
 0x31d   :  { %v2969_v59 = vpop.eup %2968  ;;  %2970 = vpow2.f32 %v2679_v33  ;;  %v1046_v25 = vadd.f32 %v4196_v54, %v1027_v52  ;;  %v1368_v52 = vsel %vm4276_vm1, %v4185_v58, %v1364_v28 }
 0x31e   :  { %2972 = vrcp.f32 %v4230_v60  ;;  %v4241_v51 = vadd.f32 1.0, %v2969_v59  ;;  %v2680_v8 = vmul.f32 -1.442695, %v4235_v27  ;;  %v1047_v59 = vadd.f32 %v4196_v54, %v1028_v49 }
 0x31f   :  { %2974 = vrcp.f32 %v4232_v44  ;;  %v1372_v49 = vor.u32 1.1754944e-38, %v1371_v5  ;;  %vm1440_vm7 = vweird.f32 %v4230_v60 }
 0x320   :  { %2976 = vrcp.f32 %v4241_v51  ;;  %v1055_v18 = vpack.c.bf16 %v1047_v59, %v1046_v25  ;;  %vm1455_vm14 = vweird.f32 %v4241_v51 }
 0x321   :  { %v1202_v9 = vpop.f32.mrf.mxu2  ;;  %2978 = vpow2.f32 %v2680_v8  ;;  %v1373_v8 = vsel %vm1370_vm3, %v1372_v49, %v1368_v52 }
 0x322   :  { %v4256_v29 = vadd.f32 %v1202_v9, %v4068_v39  ;;  %v1403_v9 = vsel %vm1400_vm2, %v1402_v47, %v1398_v23 }
 0x323   :  { %v2971_v24 = vpop.eup %2970  ;;  %v1155_v48 = vpop.f32.mrf.mxu1  ;;  %v1842_v28 = vmul.f32 %v1403_v9, %v4124_v41 }
 0x324   :  { %v4265_v6 = vpop.eup %2972  ;;  %v4267_v33 = vadd.f32 1.0, %v2971_v24  ;;  %v2681_v55 = vmul.f32 -1.442695, %v4256_v29  ;;  %v4271_v45 = vadd.f32 %v1155_v48, %v4000_v21  ;;  %v1840_v48 = vmul.f32 %v1373_v8, %v4127_v16 }
 0x325   :  { %v1436_v1 = vmul.f32 %v4265_v6, %v4230_v60  ;;  %v4286_v54 = vpop.eup %2974  ;;  %vm1441_vm5 = vweird.f32 %v4265_v6 }
 0x326   :  { %2980 = vrcp.f32 %v4267_v33  ;;  %v2682_v3 = vmul.f32 -1.442695, %v4271_v45  ;;  %v4289_v30 = vpop.eup %2976  ;;  %v1421_v25 = vmul.f32 %v4286_v54, %v4232_v44  ;;  %v1872_v52 = vpack.c.bf16 %v1842_v28, %v1840_v48  ;;  %vm4322_vm8 = vmor %vm1440_vm7, %vm1441_vm5 }
 0x327   :  { %2982 = vpow2.f32 %v2681_v55  ;;  %v1437_v58 = vsub.f32 1.0, %v1436_v1  ;;  %v2979_v5 = vpop.eup %2978  ;;  %v1451_v14 = vmul.f32 %v4289_v30, %v4241_v51  ;;  %v1476_v16 = vand.u32 2147483648, %v4267_v33 }
 0x328   :  { %2663 = vmatmul.msk.bf16.gmra.mxu3 %vm650_vm4, %v1055_v18  ;;  %2671 = vmatmul.msk.bf16.gmra.mxu2 %vm650_vm4, %v1055_v18  ;;  %2984 = vpow2.f32 %v2682_v3  ;;  %v1422_v47 = vsub.f32 1.0, %v1421_v25  ;;  %v1474_v3 = vand.u32 2147483647, %v4267_v33  ;;  %v4310_v8 = vadd.f32 1.0, %v2979_v5 }
 0x329   :  { %v1204_v36 = vpop.f32.mrf.mxu2  ;;  %v1438_v61 = vmul.f32 %v4265_v6, %v1437_v58  ;;  %v1452_v18 = vsub.f32 1.0, %v1451_v14  ;;  %v1431_v14 = vand.u32 2147483648, %v4232_v44  ;;  %v1444_v48 = vand.u32 2147483647, %v4230_v60 }
 0x32a   :  { %v4297_v24 = vadd.f32 %v1204_v36, %v4068_v39  ;;  %vm1470_vm9 = vweird.f32 %v4267_v33  ;;  %vm1426_vm10 = vweird.f32 %v4286_v54  ;;  %vm1475_vm12 = vcmp.eq.f32.partialorder %v1474_v3, 8.507059e+37 }
 0x32b   :  { %v1439_v58 = vadd.f32 %v4265_v6, %v1438_v61  ;;  %vm1445_vm13 = vcmp.eq.f32.partialorder %v1444_v48, 8.507059e+37  ;;  %vm1456_vm15 = vweird.f32 %v4289_v30  ;;  %v1461_v3 = vand.u32 2147483648, %v4241_v51  ;;  %vm4369_vm2 = vmor %vm1425_vm0, %vm1426_vm10 }
 0x32c   :  { %v2981_v23 = vpop.eup %2980  ;;  %v2683_v55 = vmul.f32 -1.442695, %v4297_v24  ;;  %vm4361_vm1 = vmor %vm1455_vm14, %vm1456_vm15  ;;  %v1432_v10 = vor.u32 1.1754944e-38, %v1431_v14 }
 0x32d   :  { %v2983_v59 = vpop.eup %2982  ;;  %v1466_v41 = vmul.f32 %v2981_v23, %v4267_v33  ;;  %vm1471_vm6 = vweird.f32 %v2981_v23  ;;  %v1443_v57 = vsel %vm4322_vm8, %v4265_v6, %v1439_v58 }
 0x32e   :  { %v4305_v1 = vadd.f32 1.0, %v2983_v59  ;;  %2986 = vpow2.f32 %v2683_v55  ;;  %v2985_v9 = vpop.eup %2984  ;;  %v1446_v55 = vand.u32 2147483648, %v4230_v60  ;;  %v1453_v59 = vmul.f32 %v4289_v30, %v1452_v18  ;;  %vm1472_vm11 = vmor %vm1470_vm9, %vm1471_vm6 }
 0x32f   :  { %v1467_v49 = vsub.f32 1.0, %v1466_v41  ;;  %v4314_v25 = vadd.f32 1.0, %v2985_v9  ;;  %v1423_v41 = vmul.f32 %v4286_v54, %v1422_v47 }
 0x330   :  { %2988 = vrcp.f32 %v4305_v1  ;;  %v1447_v47 = vor.u32 1.1754944e-38, %v1446_v55  ;;  %v1459_v55 = vand.u32 2147483647, %v4241_v51  ;;  %vm1500_vm6 = vweird.f32 %v4305_v1 }
 0x331   :  { %v1468_v36 = vmul.f32 %v2981_v23, %v1467_v49  ;;  %v1207_v28 = vpop.f32.mrf.mxu2  ;;  %2990 = vrcp.f32 %v4314_v25  ;;  %v1477_v49 = vor.u32 1.1754944e-38, %v1476_v16  ;;  %v1454_v16 = vadd.f32 %v4289_v30, %v1453_v59 }
 0x332   :  { %v4332_v60 = vadd.f32 %v1207_v28, %v4068_v39  ;;  %2992 = vrcp.f32 %v4310_v8  ;;  %v1424_v6 = vadd.f32 %v4286_v54, %v1423_v41  ;;  %v1429_v41 = vand.u32 2147483647, %v4232_v44 }
 0x333   :  { %v1469_v61 = vadd.f32 %v2981_v23, %v1468_v36  ;;  %v1458_v44 = vsel %vm4361_vm1, %v4289_v30, %v1454_v16  ;;  %vm1460_vm3 = vcmp.eq.f32.partialorder %v1459_v55, 8.507059e+37  ;;  %v1504_v55 = vand.u32 2147483647, %v4305_v1 }
 0x334   :  { %v2987_v9 = vpop.eup %2986  ;;  %v2685_v58 = vmul.f32 -1.442695, %v4332_v60  ;;  %vm1430_vm5 = vcmp.eq.f32.partialorder %v1429_v41, 8.507059e+37  ;;  %vm1515_vm0 = vweird.f32 %v4314_v25 }
 0x335   :  { %v1473_v18 = vsel %vm1472_vm11, %v2981_v23, %v1469_v61  ;;  %v4345_v5 = vadd.f32 1.0, %v2987_v9  ;;  %v1448_v23 = vsel %vm1445_vm13, %v1447_v47, %v1443_v57  ;;  %v1462_v47 = vor.u32 1.1754944e-38, %v1461_v3 }
 0x336   :  { %v4338_v33 = vpop.eup %2988  ;;  %v1478_v36 = vsel %vm1475_vm12, %v1477_v49, %v1473_v18  ;;  %v1845_v9 = vmul.f32 %v1448_v23, %v4177_v11  ;;  %v1428_v18 = vsel %vm4369_vm2, %v4286_v54, %v1424_v6  ;;  %vm1505_vm11 = vcmp.eq.f32.partialorder %v1504_v55, 8.507059e+37 }
 0x337   :  { %v1496_v28 = vmul.f32 %v4338_v33, %v4305_v1  ;;  %v4350_v48 = vpop.eup %2990  ;;  %v1847_v59 = vmul.f32 %v1478_v36, %v4221_v37  ;;  %2994 = vrcp.f32 %v4345_v5  ;;  %v1463_v23 = vsel %vm1460_vm3, %v1462_v47, %v1458_v44 }
 0x338   :  { %2028 = vmatmul.bf16.vlgmr.msrb.gmra.mxu3 %v1872_v52  ;;  %v4365_v52 = vpop.eup %2992  ;;  %v1511_v51 = vmul.f32 %v4350_v48, %v4314_v25  ;;  %2996 = vpow2.f32 %v2685_v58  ;;  %v1433_v57 = vsel %vm1430_vm5, %v1432_v10, %v1428_v18  ;;  %vm1501_vm7 = vweird.f32 %v4338_v33 }
 0x339   :  { %v1497_v61 = vsub.f32 1.0, %v1496_v28  ;;  %v1209_v49 = vpop.f32.mrf.mxu2  ;;  %v1875_v11 = vpack.c.bf16 %v1847_v59, %v1845_v9  ;;  %v1481_v30 = vmul.f32 %v4365_v52, %v4310_v8  ;;  %v1846_v3 = vmul.f32 %v1463_v23, %v4191_v26  ;;  %vm4402_vm8 = vmor %vm1500_vm6, %vm1501_vm7 }
 0x33a   :  { %v4384_v28 = vadd.f32 %v1209_v49, %v4068_v39  ;;  %v1512_v37 = vsub.f32 1.0, %v1511_v51  ;;  %v1506_v59 = vand.u32 2147483648, %v4305_v1  ;;  %v1844_v44 = vmul.f32 %v1433_v57, %v4164_v46 }
 0x33b   :  { %v1498_v36 = vmul.f32 %v4338_v33, %v1497_v61  ;;  %2082 = vmatmul.bf16.gmra.mxu1 %v1875_v11  ;;  %v1482_v10 = vsub.f32 1.0, %v1481_v30  ;;  %v1534_v18 = vand.u32 2147483647, %v4345_v5  ;;  %v1536_v1 = vand.u32 2147483648, %v4345_v5 }
 0x33c   :  { %v2687_v16 = vmul.f32 -1.442695, %v4384_v28  ;;  %v1513_v26 = vmul.f32 %v4350_v48, %v1512_v37  ;;  %vm1486_vm10 = vweird.f32 %v4365_v52  ;;  %v1507_v46 = vor.u32 1.1754944e-38, %v1506_v59 }
 0x33d   :  { %v2995_v58 = vpop.eup %2994  ;;  %v1499_v54 = vadd.f32 %v4338_v33, %v1498_v36  ;;  %v1483_v23 = vmul.f32 %v4365_v52, %v1482_v10  ;;  %vm1530_vm12 = vweird.f32 %v4345_v5  ;;  %vm1516_vm13 = vweird.f32 %v4350_v48 }
 0x33e   :  { %v1526_v14 = vmul.f32 %v2995_v58, %v4345_v5  ;;  %v2997_v6 = vpop.eup %2996  ;;  %2998 = vpow2.f32 %v2687_v16  ;;  %vm1531_vm9 = vweird.f32 %v2995_v58  ;;  %v1874_v16 = vpack.c.bf16 %v1846_v3, %v1844_v44  ;;  %vm4431_vm1 = vmor %vm1515_vm0, %vm1516_vm13 }
 0x33f   :  { %v4396_v41 = vadd.f32 1.0, %v2997_v6  ;;  %v1503_v47 = vsel %vm4402_vm8, %v4338_v33, %v1499_v54  ;;  %vm1532_vm14 = vmor %vm1530_vm12, %vm1531_vm9  ;;  %v1537_v33 = vor.u32 1.1754944e-38, %v1536_v1  ;;  %v1514_v54 = vadd.f32 %v4350_v48, %v1513_v26 }
 0x340   :  { %v1527_v49 = vsub.f32 1.0, %v1526_v14  ;;  %v1508_v37 = vsel %vm1505_vm11, %v1507_v46, %v1503_v47  ;;  %vm1535_vm15 = vcmp.eq.f32.partialorder %v1534_v18, 8.507059e+37  ;;  %v1519_v55 = vand.u32 2147483647, %v4314_v25 }
 0x341   :  { %v1212_v61 = vpop.f32.mrf.mxu2  ;;  %3000 = vrcp.f32 %v4396_v41  ;;  %v1521_v5 = vand.u32 2147483648, %v4314_v25  ;;  %v1484_v10 = vadd.f32 %v4365_v52, %v1483_v23  ;;  %vm1485_vm2 = vweird.f32 %v4310_v8 }
 0x342   :  { %v4399_v9 = vadd.f32 %v1212_v61, %v4068_v39  ;;  %v1528_v36 = vmul.f32 %v2995_v58, %v1527_v49  ;;  %v1849_v49 = vmul.f32 %v1508_v37, %v4256_v29  ;;  %v1489_v29 = vand.u32 2147483647, %v4310_v8  ;;  %vm4446_vm3 = vmor %vm1485_vm2, %vm1486_vm10 }
 0x343   :  { %vm1520_vm5 = vcmp.eq.f32.partialorder %v1519_v55, 8.507059e+37  ;;  %v1566_v55 = vand.u32 2147483648, %v4396_v41  ;;  %vm1560_vm8 = vweird.f32 %v4396_v41 }
 0x344   :  { %v2689_v11 = vmul.f32 -1.442695, %v4399_v9  ;;  %v1529_v30 = vadd.f32 %v2995_v58, %v1528_v36  ;;  %v2999_v57 = vpop.eup %2998  ;;  %v1522_v36 = vor.u32 1.1754944e-38, %v1521_v5  ;;  %vm1490_vm6 = vcmp.eq.f32.partialorder %v1489_v29, 8.507059e+37 }
 0x345   :  { %v4419_v6 = vadd.f32 1.0, %v2999_v57 }
 0x346   :  { %3002 = vpow2.f32 %v2689_v11  ;;  %v1533_v14 = vsel %vm1532_vm14, %v2995_v58, %v1529_v30  ;;  %v1491_v58 = vand.u32 2147483648, %v4310_v8  ;;  %v1488_v8 = vsel %vm4446_vm3, %v4365_v52, %v1484_v10 }
 0x347   :  { %v1538_v3 = vsel %vm1535_vm15, %v1537_v33, %v1533_v14  ;;  %v3001_v61 = vpop.eup %3000  ;;  %3004 = vrcp.f32 %v4419_v6  ;;  %v1594_v29 = vand.u32 2147483647, %v4419_v6  ;;  %vm1590_vm12 = vweird.f32 %v4419_v6 }
 0x348   :  { %2033 = vmatmul.bf16.gmra.mxu3 %v1874_v16  ;;  %v1851_v44 = vmul.f32 %v1538_v3, %v4297_v24  ;;  %v1556_v25 = vmul.f32 %v3001_v61, %v4396_v41  ;;  %v1518_v24 = vsel %vm4431_vm1, %v4350_v48, %v1514_v54  ;;  %v1492_v48 = vor.u32 1.1754944e-38, %v1491_v58 }
 0x349   :  { %v1214_v59 = vpop.f32.mrf.mxu2  ;;  %v1523_v30 = vsel %vm1520_vm5, %v1522_v36, %v1518_v24  ;;  %vm1561_vm7 = vweird.f32 %v3001_v61  ;;  %v1564_v3 = vand.u32 2147483647, %v4396_v41  ;;  %v1567_v24 = vor.u32 1.1754944e-38, %v1566_v55 }
 0x34a   :  { %v4437_v26 = vadd.f32 %v1214_v59, %v4068_v39  ;;  %v1877_v18 = vpack.c.bf16 %v1851_v44, %v1849_v49  ;;  %v1557_v46 = vsub.f32 1.0, %v1556_v25  ;;  %v1493_v37 = vsel %vm1490_vm6, %v1492_v48, %v1488_v8  ;;  %vm4466_vm9 = vmor %vm1560_vm8, %vm1561_vm7 }
 0x34b   :  { %v1850_v52 = vmul.f32 %v1523_v30, %v4271_v45  ;;  %v1848_v10 = vmul.f32 %v1493_v37, %v4235_v27  ;;  %v1596_v44 = vand.u32 2147483648, %v4419_v6  ;;  %vm1565_vm11 = vcmp.eq.f32.partialorder %v1564_v3, 8.507059e+37 }
 0x34c   :  { %v3003_v1 = vpop.eup %3002  ;;  %v2691_v11 = vmul.f32 -1.442695, %v4437_v26  ;;  %v1558_v16 = vmul.f32 %v3001_v61, %v1557_v46  ;;  %2087 = vmatmul.bf16.gmra.mxu1 %v1877_v18  ;;  %vm1595_vm14 = vcmp.eq.f32.partialorder %v1594_v29, 8.507059e+37 }
 0x34d   :  { %v4454_v23 = vadd.f32 1.0, %v3003_v1  ;;  %v3005_v57 = vpop.eup %3004  ;;  %v1876_v27 = vpack.c.bf16 %v1850_v52, %v1848_v10  ;;  %v1597_v46 = vor.u32 1.1754944e-38, %v1596_v44 }
 0x34e   :  { %3006 = vpow2.f32 %v2691_v11  ;;  %v1559_v33 = vadd.f32 %v3001_v61, %v1558_v16  ;;  %v1586_v54 = vmul.f32 %v3005_v57, %v4419_v6  ;;  %vm1591_vm10 = vweird.f32 %v3005_v57 }
 0x34f   :  { %3008 = vrcp.f32 %v4454_v23  ;;  %vm1592_vm13 = vmor %vm1590_vm12, %vm1591_vm10  ;;  %vm1620_vm0 = vweird.f32 %v4454_v23 }
 0x350   :  { %v1587_v59 = vsub.f32 1.0, %v1586_v54  ;;  %v1563_v51 = vsel %vm4466_vm9, %v3001_v61, %v1559_v33 }
 0x351   :  { %v1217_v14 = vpop.f32.mrf.mxu2  ;;  %v1568_v36 = vsel %vm1565_vm11, %v1567_v24, %v1563_v51 }
 0x352   :  { %v4461_v5 = vadd.f32 %v1217_v14, %v4068_v39  ;;  %v1588_v25 = vmul.f32 %v3005_v57, %v1587_v59  ;;  %v1853_v16 = vmul.f32 %v1568_v36, %v4332_v60  ;;  %v1626_v59 = vand.u32 2147483648, %v4454_v23 }
 0x353   :  { %v1624_v60 = vand.u32 2147483647, %v4454_v23 }
 0x354   :  { %v2693_v45 = vmul.f32 -1.442695, %v4461_v5  ;;  %v3007_v58 = vpop.eup %3006  ;;  %v1589_v1 = vadd.f32 %v3005_v57, %v1588_v25  ;;  %v1627_v51 = vor.u32 1.1754944e-38, %v1626_v59 }
 0x355   :  { %v3009_v41 = vpop.eup %3008  ;;  %v1347_v18 = vadd.f32 1.0, %v3007_v58  ;;  %vm1625_vm3 = vcmp.eq.f32.partialorder %v1624_v60, 8.507059e+37 }
 0x356   :  { %3010 = vpow2.f32 %v2693_v45  ;;  %v1616_v47 = vmul.f32 %v3009_v41, %v4454_v23  ;;  %v1593_v61 = vsel %vm1592_vm13, %v3005_v57, %v1589_v1  ;;  %vm1621_vm15 = vweird.f32 %v3009_v41 }
 0x357   :  { %3012 = vrcp.f32 %v1347_v18  ;;  %v1598_v48 = vsel %vm1595_vm14, %v1597_v46, %v1593_v61  ;;  %vm1622_vm1 = vmor %vm1620_vm0, %vm1621_vm15  ;;  %v1656_v10 = vand.u32 2147483648, %v1347_v18  ;;  %v1654_v45 = vand.u32 2147483647, %v1347_v18 }
 0x358   :  { %2038 = vmatmul.bf16.gmra.mxu3 %v1876_v27  ;;  %v1617_v11 = vsub.f32 1.0, %v1616_v47  ;;  %v1855_v37 = vmul.f32 %v1598_v48, %v4384_v28  ;;  %vm1650_vm5 = vweird.f32 %v1347_v18 }
 0x359   :  { %v1219_v8 = vpop.f32.mrf.mxu2  ;;  %v1657_v1 = vor.u32 1.1754944e-38, %v1656_v10  ;;  %vm1655_vm7 = vcmp.eq.f32.partialorder %v1654_v45, 8.507059e+37  ;;  %v5122_v10 = vpack.c.bf16 %v4116_v7, %v4113_v34 }
 0x35a   :  { %v4478_v30 = vadd.f32 %v1219_v8, %v4068_v39  ;;  %v1618_v6 = vmul.f32 %v3009_v41, %v1617_v11  ;;  %v1879_v52 = vpack.c.bf16 %v1855_v37, %v1853_v16 }
 0x35c   :  { %v3011_v33 = vpop.eup %3010  ;;  %v2695_v54 = vmul.f32 -1.442695, %v4478_v30  ;;  %v1619_v57 = vadd.f32 %v3009_v41, %v1618_v6  ;;  %2092 = vmatmul.bf16.gmra.mxu1 %v1879_v52 }
 0x35d   :  { %v1349_v14 = vadd.f32 1.0, %v3011_v33  ;;  %v3013_v55 = vpop.eup %3012 }
 0x35e   :  { %3014 = vpow2.f32 %v2695_v54  ;;  %v1646_v3 = vmul.f32 %v3013_v55, %v1347_v18  ;;  %v1623_v49 = vsel %vm1622_vm1, %v3009_v41, %v1619_v57  ;;  %vm1651_vm2 = vweird.f32 %v3013_v55 }
 0x35f   :  { %3016 = vrcp.f32 %v1349_v14  ;;  %v1628_v27 = vsel %vm1625_vm3, %v1627_v51, %v1623_v49  ;;  %vm1652_vm6 = vmor %vm1650_vm5, %vm1651_vm2  ;;  %v1686_v37 = vand.u32 2147483648, %v1349_v14  ;;  %vm1680_vm9 = vweird.f32 %v1349_v14 }
 0x360   :  { %v1647_v28 = vsub.f32 1.0, %v1646_v3  ;;  %v1857_v41 = vmul.f32 %v1628_v27, %v4399_v9  ;;  %v1684_v33 = vand.u32 2147483647, %v1349_v14 }
 0x362   :  { %v1648_v44 = vmul.f32 %v3013_v55, %v1647_v28  ;;  %vm1685_vm13 = vcmp.eq.f32.partialorder %v1684_v33, 8.507059e+37 }
 0x364   :  { %v3015_v58 = vpop.eup %3014  ;;  %v1649_v29 = vadd.f32 %v3013_v55, %v1648_v44 }
 0x365   :  { %v3017_v25 = vpop.eup %3016  ;;  %v1351_v24 = vadd.f32 1.0, %v3015_v58 }
 0x366   :  { %v1676_v47 = vmul.f32 %v3017_v25, %v1349_v14  ;;  %v1653_v36 = vsel %vm1652_vm6, %v3013_v55, %v1649_v29  ;;  %vm1681_vm8 = vweird.f32 %v3017_v25  ;;  %v5121_v14 = vpack.c.bf16 %v4090_v38, %v4093_v12 }
 0x367   :  { %3018 = vrcp.f32 %v1351_v24  ;;  %v1658_v23 = vsel %vm1655_vm7, %v1657_v1, %v1653_v36  ;;  %v1716_v54 = vand.u32 2147483648, %v1351_v24  ;;  %vm1682_vm10 = vmor %vm1680_vm9, %vm1681_vm8  ;;  %v1714_v56 = vand.u32 2147483647, %v1351_v24 }
 0x368   :  { %v1677_v46 = vsub.f32 1.0, %v1676_v47  ;;  %2043 = vmatmul.bf16.gmra.mxu3 %v1878_v22  ;;  %v1859_v61 = vmul.f32 %v1658_v23, %v4437_v26  ;;  %v1687_v22 = vor.u32 1.1754944e-38, %v1686_v37  ;;  %vm1710_vm12 = vweird.f32 %v1351_v24 }
 0x369   :  { %v1717_v26 = vor.u32 1.1754944e-38, %v1716_v54  ;;  %vm1715_vm15 = vcmp.eq.f32.partialorder %v1714_v56, 8.507059e+37 }
 0x36a   :  { %v1678_v11 = vmul.f32 %v3017_v25, %v1677_v46  ;;  %v1881_v18 = vpack.c.bf16 %v1859_v61, %v1857_v41 }
 0x36c   :  { %v1679_v16 = vadd.f32 %v3017_v25, %v1678_v11  ;;  %2097 = vmatmul.bf16.gmra.mxu1 %v1881_v18 }
 0x36d   :  { %v3019_v8 = vpop.eup %3018  ;;  %v4517_v47 = vpop.f32.mrf.mxu1 }
 0x36e   :  { %v1706_v48 = vmul.f32 %v3019_v8, %v1351_v24  ;;  %vm1711_vm11 = vweird.f32 %v3019_v8  ;;  %v1683_v13 = vsel %vm1682_vm10, %v3017_v25, %v1679_v16 }
 0x36f   :  { %vm1712_vm14 = vmor %vm1710_vm12, %vm1711_vm11  ;;  %v1688_v55 = vsel %vm1685_vm13, %v1687_v22, %v1683_v13 }
 0x370   :  { %v1707_v6 = vsub.f32 1.0, %v1706_v48  ;;  %v1861_v60 = vmul.f32 %v1688_v55, %v4461_v5 }
 0x372   :  { %v1708_v52 = vmul.f32 %v3019_v8, %v1707_v6 }
 0x374   :  { %v1709_v9 = vadd.f32 %v3019_v8, %v1708_v52 }
 0x375   :  { %v4540_v22 = vpop.f32.mrf.mxu1 }
 0x376   :  { %v1713_v57 = vsel %vm1712_vm14, %v3019_v8, %v1709_v9 }
 0x377   :  { %v1718_v3 = vsel %vm1715_vm15, %v1717_v26, %v1713_v57 }
 0x378   :  { %v1863_v59 = vmul.f32 %v1718_v3, %v4478_v30  ;;  %2048 = vmatmul.bf16.gmra.mxu3 %v5121_v14 }
 0x37a   :  { %v1883_v28 = vpack.c.bf16 %v1863_v59, %v1861_v60 }
 0x37c   :  { %2102 = vmatmul.bf16.gmra.mxu1 %v1883_v28 }
 0x388   :  { %2053 = vmatmul.bf16.gmra.mxu3 %v5122_v10 }
 0x39b   :  { %v1173_v49 = vpop.f32.mrf.mxu3  ;;  %v1222_v44 = vpop.f32.mrf.mxu2 }
 0x39c   :  { %v4500_v45 = vadd.f32 %v1173_v49, %v4000_v21  ;;  %v4503_v58 = vadd.f32 %v1222_v44, %v4068_v39 }
 0x39e   :  { %v2696_v30 = vmul.f32 -1.442695, %v4500_v45  ;;  %v2697_v38 = vmul.f32 -1.442695, %v4503_v58 }
 0x3a0   :  { %3020 = vpow2.f32 %v2696_v30 }
 0x3a1   :  { %3022 = vpow2.f32 %v2697_v38 }
 0x3a3   :  { %v1175_v12 = vpop.f32.mrf.mxu3  ;;  %v1224_v5 = vpop.f32.mrf.mxu2 }
 0x3a4   :  { %v4508_v51 = vadd.f32 %v1175_v12, %v4000_v21  ;;  %v4511_v34 = vadd.f32 %v1224_v5, %v4068_v39 }
 0x3a6   :  { %v3021_v7 = vpop.eup %3020  ;;  %v2698_v25 = vmul.f32 -1.442695, %v4508_v51  ;;  %v2699_v27 = vmul.f32 -1.442695, %v4511_v34 }
 0x3a7   :  { %v3023_v29 = vpop.eup %3022  ;;  %v1352_v24 = vadd.f32 1.0, %v3021_v7 }
 0x3a8   :  { %v4515_v1 = vadd.f32 1.0, %v3023_v29  ;;  %3024 = vpow2.f32 %v2698_v25 }
 0x3a9   :  { %3026 = vrcp.f32 %v1352_v24  ;;  %v1729_v26 = vand.u32 2147483647, %v1352_v24  ;;  %vm1725_vm0 = vweird.f32 %v1352_v24  ;;  %v1731_v55 = vand.u32 2147483648, %v1352_v24 }
 0x3aa   :  { %3028 = vrcp.f32 %v4515_v1  ;;  %v1746_v57 = vand.u32 2147483648, %v4515_v1  ;;  %v1744_v59 = vand.u32 2147483647, %v4515_v1  ;;  %vm1740_vm3 = vweird.f32 %v4515_v1 }
 0x3ab   :  { %3030 = vpow2.f32 %v2699_v27  ;;  %v1178_v36 = vpop.f32.mrf.mxu3  ;;  %v1227_v23 = vpop.f32.mrf.mxu2  ;;  %vm4556_vm2 = vcmp.eq.f32.partialorder %v1729_v26, 8.507059e+37  ;;  %v1732_v25 = vor.u32 1.1754944e-38, %v1731_v55 }
 0x3ac   :  { %v4521_v46 = vadd.f32 %v1178_v36, %v4000_v21  ;;  %v4524_v41 = vadd.f32 %v1227_v23, %v4068_v39  ;;  %v1747_v29 = vor.u32 1.1754944e-38, %v1746_v57  ;;  %v4570_v36 = vld [vmem:[%s5064_s13] ss:$0 sm:$0xff]  ;;  %vm4580_vm7 = vcmp.eq.f32.partialorder %v1744_v59, 8.507059e+37 }
 0x3ae   :  { %v3025_v61 = vpop.eup %3024  ;;  %v2700_v11 = vmul.f32 -1.442695, %v4521_v46  ;;  %v2701_v48 = vmul.f32 -1.442695, %v4524_v41 }
 0x3af   :  { %v4527_v18 = vpop.eup %3026  ;;  %v4529_v8 = vadd.f32 1.0, %v3025_v61 }
 0x3b0   :  { %v4532_v16 = vpop.eup %3028  ;;  %v1721_v37 = vmul.f32 %v4527_v18, %v1352_v24  ;;  %3032 = vpow2.f32 %v2700_v11  ;;  %vm1726_vm1 = vweird.f32 %v4527_v18 }
 0x3b1   :  { %v3031_v6 = vpop.eup %3030  ;;  %v1736_v33 = vmul.f32 %v4532_v16, %v4515_v1  ;;  %3034 = vrcp.f32 %v4529_v8  ;;  %v1759_v14 = vand.u32 2147483647, %v4529_v8  ;;  %v1761_v30 = vand.u32 2147483648, %v4529_v8  ;;  %vm4575_vm5 = vmor %vm1725_vm0, %vm1726_vm1 }
 0x3b2   :  { %v1722_v54 = vsub.f32 1.0, %v1721_v37  ;;  %v4538_v52 = vadd.f32 1.0, %v3031_v6  ;;  %3036 = vpow2.f32 %v2701_v48  ;;  %vm1741_vm6 = vweird.f32 %v4532_v16 }
 0x3b3   :  { %v1737_v56 = vsub.f32 1.0, %v1736_v33  ;;  %v1180_v13 = vpop.f32.mrf.mxu3  ;;  %v1229_v28 = vpop.f32.mrf.mxu2  ;;  %vm1755_vm8 = vweird.f32 %v4529_v8  ;;  %vm4585_vm9 = vcmp.eq.f32.partialorder %v1759_v14, 8.507059e+37  ;;  %v1762_v6 = vor.u32 1.1754944e-38, %v1761_v30  ;;  %vm4607_vm11 = vmor %vm1740_vm3, %vm1741_vm6 }
 0x3b4   :  { %v1723_v9 = vmul.f32 %v4527_v18, %v1722_v54  ;;  %3038 = vrcp.f32 %v4538_v52  ;;  %v4549_v60 = vadd.f32 %v1180_v13, %v4000_v21  ;;  %v4565_v27 = vadd.f32 %v1229_v28, %v4068_v39 }
 0x3b5   :  { %v1738_v44 = vmul.f32 %v4532_v16, %v1737_v56  ;;  %v1774_v55 = vand.u32 2147483647, %v4538_v52  ;;  %v1776_v28 = vand.u32 2147483648, %v4538_v52  ;;  %vm1770_vm14 = vweird.f32 %v4538_v52 }
 0x3b6   :  { %v3033_v3 = vpop.eup %3032  ;;  %v1724_v49 = vadd.f32 %v4527_v18, %v1723_v9  ;;  %v2702_v21 = vmul.f32 -1.442695, %v4549_v60  ;;  %v2703_v57 = vmul.f32 -1.442695, %v4565_v27 }
 0x3b7   :  { %v3035_v10 = vpop.eup %3034  ;;  %v4554_v38 = vadd.f32 1.0, %v3033_v3  ;;  %v1739_v37 = vadd.f32 %v4532_v16, %v1738_v44  ;;  %vm1775_vm15 = vcmp.eq.f32.partialorder %v1774_v55, 8.507059e+37 }
 0x3b8   :  { %v1751_v5 = vmul.f32 %v3035_v10, %v4529_v8  ;;  %v3037_v7 = vpop.eup %3036  ;;  %v1728_v24 = vsel %vm4575_vm5, %v4527_v18, %v1724_v49  ;;  %vm1756_vm10 = vweird.f32 %v3035_v10  ;;  %v4596_v9 = vpop.f32.mrf.mxu1 }
 0x3b9   :  { %3040 = vrcp.f32 %v4554_v38  ;;  %v4594_v13 = vadd.f32 1.0, %v3037_v7  ;;  %v1733_v3 = vsel %vm4556_vm2, %v1732_v25, %v1728_v24  ;;  %vm1757_vm12 = vmor %vm1755_vm8, %vm1756_vm10  ;;  %v1743_v1 = vsel %vm4607_vm11, %v4532_v16, %v1739_v37 }
 0x3ba   :  { %v3039_v23 = vpop.eup %3038  ;;  %v1752_v39 = vsub.f32 1.0, %v1751_v5  ;;  %3042 = vpow2.f32 %v2702_v21  ;;  %v1864_v61 = vmul.f32 %v1733_v3, %v4500_v45  ;;  %v1791_v3 = vand.u32 2147483648, %v4554_v38 }
 0x3bb   :  { %v1766_v33 = vmul.f32 %v3039_v23, %v4538_v52  ;;  %v2029_v54 = vpop.f32.mrf.mxu3  ;;  %3044 = vrcp.f32 %v4594_v13  ;;  %vm1771_vm13 = vweird.f32 %v3039_v23  ;;  %v1748_v52 = vsel %vm4580_vm7, %v1747_v29, %v1743_v1 }
 0x3bc   :  { %v1753_v56 = vmul.f32 %v3035_v10, %v1752_v39  ;;  %v2030_v18 = vadd.f32 %v4570_v36, %v2029_v54  ;;  %3046 = vpow2.f32 %v2703_v57  ;;  %vm1772_vm0 = vmor %vm1770_vm14, %vm1771_vm13  ;;  %v1777_v39 = vor.u32 1.1754944e-38, %v1776_v28 }
 0x3bd   :  { %v1767_v26 = vsub.f32 1.0, %v1766_v33  ;;  %vm1785_vm2 = vweird.f32 %v4554_v38  ;;  %v1792_v1 = vor.u32 1.1754944e-38, %v1791_v3  ;;  %vm1800_vm6 = vweird.f32 %v4594_v13 }
 0x3be   :  { %v1754_v14 = vadd.f32 %v3035_v10, %v1753_v56  ;;  %v2079_v30 = vadd.f32 %v4517_v47, %v2030_v18  ;;  %v1789_v18 = vand.u32 2147483647, %v4554_v38 }
 0x3bf   :  { %v4613_v49 = vpop.eup %3040  ;;  %v1768_v44 = vmul.f32 %v3039_v23, %v1767_v26 }
 0x3c0   :  { %v1758_v12 = vsel %vm1757_vm12, %v3035_v10, %v1754_v14  ;;  %v1781_v5 = vmul.f32 %v4613_v49, %v4554_v38  ;;  %v2118_v7 = vmul.f32 0.5, %v2079_v30  ;;  %v3043_v25 = vpop.eup %3042  ;;  %v4642_v29 = vpop.f32.mrf.mxu1  ;;  %vm1786_vm1 = vweird.f32 %v4613_v49 }
 0x3c1   :  { %v1763_v21 = vsel %vm4585_vm9, %v1762_v6, %v1758_v12  ;;  %v1769_v8 = vadd.f32 %v3039_v23, %v1768_v44  ;;  %v4630_v24 = vadd.f32 1.0, %v3043_v25  ;;  %v4635_v6 = vpop.eup %3044  ;;  %vm4658_vm3 = vcmp.eq.f32.partialorder %v1789_v18, 8.507059e+37  ;;  %vm4669_vm5 = vmor %vm1785_vm2, %vm1786_vm1 }
 0x3c2   :  { %v1866_v47 = vmul.f32 %v1763_v21, %v4508_v51  ;;  %v1782_v16 = vsub.f32 1.0, %v1781_v5  ;;  %v4633_v48 = vadd.f32 %v2118_v7, %v3584_v20  ;;  %v3047_v51 = vpop.eup %3046  ;;  %v1796_v11 = vmul.f32 %v4635_v6, %v4594_v13 }
 0x3c3   :  { %v1773_v10 = vsel %vm1772_vm0, %v3039_v23, %v1769_v8  ;;  %v2031_v37 = vpop.f32.mrf.mxu3  ;;  %3048 = vrcp.f32 %v4630_v24  ;;  %v1865_v23 = vmul.f32 %v1748_v52, %v4503_v58  ;;  %v4646_v55 = vadd.f32 1.0, %v3047_v51 }
 0x3c4   :  { %v1778_v33 = vsel %vm1775_vm15, %v1777_v39, %v1773_v10  ;;  %v2032_v45 = vadd.f32 %v4570_v36, %v2031_v37  ;;  %v1884_v54 = vpack.c.bf16 %v1866_v47, %v1864_v61  ;;  %v1783_v20 = vmul.f32 %v4613_v49, %v1782_v16 }
 0x3c5   :  { %v1867_v56 = vmul.f32 %v1778_v33, %v4511_v34  ;;  %v1797_v26 = vsub.f32 1.0, %v1796_v11  ;;  %v2152_v34 = vsel %vm650_vm4, %v4633_v48, 0.0  ;;  %3050 = vrcp.f32 %v4646_v55 }
 0x3c6   :  { %2058 = vmatmul.bf16.gmra.mxu3 %v1884_v54  ;;  %v2081_v57 = vadd.f32 %v4540_v22, %v2032_v45  ;;  %2153 = vadd.xlane.f32.xlu2 %v2152_v34  ;;  %v1784_v28 = vadd.f32 %v4613_v49, %v1783_v20  ;;  %v1804_v5 = vand.u32 2147483647, %v4594_v13  ;;  %v1819_v21 = vand.u32 2147483647, %v4630_v24 }
 0x3c7   :  { %v1885_v59 = vpack.c.bf16 %v1867_v56, %v1865_v23  ;;  %v1798_v22 = vmul.f32 %v4635_v6, %v1797_v26  ;;  %vm1801_vm7 = vweird.f32 %v4635_v6  ;;  %v1821_v61 = vand.u32 2147483648, %v4630_v24 }
 0x3c8   :  { %v2119_v58 = vmul.f32 0.5, %v2081_v57  ;;  %v1788_v39 = vsel %vm4669_vm5, %v4613_v49, %v1784_v28  ;;  %v1806_v37 = vand.u32 2147483648, %v4594_v13  ;;  %vm4685_vm9 = vcmp.eq.f32.partialorder %v1804_v5, 8.507059e+37  ;;  %vm4700_vm12 = vmor %vm1800_vm6, %vm1801_vm7 }
 0x3c9   :  { %2107 = vmatmul.bf16.gmra.mxu1 %v1885_v59  ;;  %v3049_v14 = vpop.eup %3048  ;;  %v1799_v16 = vadd.f32 %v4635_v6, %v1798_v22  ;;  %vm1815_vm10 = vweird.f32 %v4630_v24  ;;  %vm4690_vm11 = vcmp.eq.f32.partialorder %v1819_v21, 8.507059e+37  ;;  %v1793_v51 = vsel %vm4658_vm3, %v1792_v1, %v1788_v39 }
 0x3ca   :  { %v1811_v12 = vmul.f32 %v3049_v14, %v4630_v24  ;;  %v4667_v7 = vadd.f32 %v2119_v58, %v3620_v2  ;;  %v2088_v2 = vpop.f32.mrf.mxu1  ;;  %vm1816_vm8 = vweird.f32 %v3049_v14  ;;  %v1822_v23 = vor.u32 1.1754944e-38, %v1821_v61 }
 0x3cb   :  { %v2034_v44 = vpop.f32.mrf.mxu3  ;;  %v3051_v47 = vpop.eup %3050  ;;  %v1803_v24 = vsel %vm4700_vm12, %v4635_v6, %v1799_v16  ;;  %vm1817_vm13 = vmor %vm1815_vm10, %vm1816_vm8  ;;  %v1834_v26 = vand.u32 2147483647, %v4646_v55  ;;  %v1836_v57 = vand.u32 2147483648, %v4646_v55  ;;  %v1807_v58 = vor.u32 1.1754944e-38, %v1806_v37 }
 0x3cc   :  { %v2035_v8 = vadd.f32 %v4570_v36, %v2034_v44  ;;  %v1812_v38 = vsub.f32 1.0, %v1811_v12  ;;  %v2155_v10 = vsel %vm650_vm4, %v4667_v7, 0.0  ;;  %v1826_v45 = vmul.f32 %v3051_v47, %v4646_v55 }
 0x3cd   :  { %2156 = vadd.xlane.f32.xlu0 %v2155_v10  ;;  %vm1831_vm14 = vweird.f32 %v3051_v47  ;;  %vm1830_vm15 = vweird.f32 %v4646_v55  ;;  %v1868_v22 = vmul.f32 %v1793_v51, %v4521_v46  ;;  %v1808_v30 = vsel %vm4685_vm9, %v1807_v58, %v1803_v24 }
 0x3ce   :  { %v2084_v52 = vadd.f32 %v4596_v9, %v2035_v8  ;;  %v1813_v33 = vmul.f32 %v3049_v14, %v1812_v38  ;;  %v1827_v20 = vsub.f32 1.0, %v1826_v45  ;;  %vm1832_vm0 = vmor %vm1830_vm15, %vm1831_vm14  ;;  %v1837_v1 = vor.u32 1.1754944e-38, %v1836_v57 }
 0x3cf   :  { %vm1835_vm1 = vcmp.eq.f32.partialorder %v1834_v26, 8.507059e+37  ;;  %v1869_v25 = vmul.f32 %v1808_v30, %v4524_v41 }
 0x3d0   :  { %v2120_v9 = vmul.f32 0.5, %v2084_v52  ;;  %v1814_v11 = vadd.f32 %v3049_v14, %v1813_v33  ;;  %v1828_v3 = vmul.f32 %v3051_v47, %v1827_v20 }
 0x3d2   :  { %v4710_v18 = vadd.f32 %v2120_v9, %v3636_v53  ;;  %v1818_v13 = vsel %vm1817_vm13, %v3049_v14, %v1814_v11  ;;  %v1829_v53 = vadd.f32 %v3051_v47, %v1828_v3  ;;  %v2090_v8 = vpop.f32.mrf.mxu1 }
 0x3d3   :  { %v2036_v34 = vpop.f32.mrf.mxu3  ;;  %v1823_v28 = vsel %vm4690_vm11, %v1822_v23, %v1818_v13 }
 0x3d4   :  { %v2037_v59 = vadd.f32 %v4570_v36, %v2036_v34  ;;  %v2158_v6 = vsel %vm650_vm4, %v4710_v18, 0.0  ;;  %v1870_v44 = vmul.f32 %v1823_v28, %v4549_v60  ;;  %v1833_v12 = vsel %vm1832_vm0, %v3051_v47, %v1829_v53 }
 0x3d5   :  { %2159 = vadd.xlane.f32.xlu1 %v2158_v6  ;;  %v1838_v21 = vsel %vm1835_vm1, %v1837_v1, %v1833_v12 }
 0x3d6   :  { %v2086_v14 = vadd.f32 %v4642_v29, %v2037_v59  ;;  %v1886_v55 = vpack.c.bf16 %v1870_v44, %v1868_v22  ;;  %v1871_v46 = vmul.f32 %v1838_v21, %v4565_v27 }
 0x3d8   :  { %v2121_v5 = vmul.f32 0.5, %v2086_v14  ;;  %2063 = vmatmul.bf16.gmra.mxu3 %v1886_v55  ;;  %v1887_v38 = vpack.c.bf16 %v1871_v46, %v1869_v25 }
 0x3da   :  { %v4726_v60 = vadd.f32 %v2121_v5, %v3677_v32  ;;  %2112 = vmatmul.bf16.gmra.mxu1 %v1887_v38  ;;  %v2093_v41 = vpop.f32.mrf.mxu1 }
 0x3db   :  { %v2039_v29 = vpop.f32.mrf.mxu3 }
 0x3dc   :  { %v2040_v61 = vadd.f32 %v4570_v36, %v2039_v29  ;;  %v2161_v47 = vsel %vm650_vm4, %v4726_v60, 0.0 }
 0x3dd   :  { %2162 = vadd.xlane.f32.xlu2 %v2161_v47 }
 0x3de   :  { %v2089_v39 = vadd.f32 %v2088_v2, %v2040_v61 }
 0x3e0   :  { %v2122_v16 = vmul.f32 0.5, %v2089_v39 }
 0x3e2   :  { %v4732_v52 = vadd.f32 %v2122_v16, %v3693_v42  ;;  %v2095_v49 = vpop.f32.mrf.mxu1 }
 0x3e3   :  { %v2041_v27 = vpop.f32.mrf.mxu3 }
 0x3e4   :  { %v2042_v10 = vadd.f32 %v4570_v36, %v2041_v27  ;;  %v2164_v32 = vsel %vm650_vm4, %v4732_v52, 0.0 }
 0x3e5   :  { %2165 = vadd.xlane.f32.xlu0 %v2164_v32 }
 0x3e6   :  { %v2091_v37 = vadd.f32 %v2090_v8, %v2042_v10 }
 0x3e8   :  { %v2123_v33 = vmul.f32 0.5, %v2091_v37 }
 0x3ea   :  { %v4738_v45 = vadd.f32 %v2123_v33, %v3709_v40  ;;  %v2098_v24 = vpop.f32.mrf.mxu1 }
 0x3eb   :  { %v2044_v54 = vpop.f32.mrf.mxu3 }
 0x3ec   :  { %v2045_v2 = vadd.f32 %v4570_v36, %v2044_v54  ;;  %v2167_v42 = vsel %vm650_vm4, %v4738_v45, 0.0 }
 0x3ed   :  { %2168 = vadd.xlane.f32.xlu1 %v2167_v42 }
 0x3ee   :  { %v2094_v9 = vadd.f32 %v2093_v41, %v2045_v2 }
 0x3f0   :  { %v2124_v51 = vmul.f32 0.5, %v2094_v9 }
 0x3f2   :  { %v4744_v56 = vadd.f32 %v2124_v51, %v3557_v63  ;;  %v2100_v58 = vpop.f32.mrf.mxu1 }
 0x3f3   :  { %v2046_v11 = vpop.f32.mrf.mxu3 }
 0x3f4   :  { %v2047_v23 = vadd.f32 %v4570_v36, %v2046_v11  ;;  %v2170_v40 = vsel %vm650_vm4, %v4744_v56, 0.0 }
 0x3f5   :  { %2171 = vadd.xlane.f32.xlu2 %v2170_v40 }
 0x3f6   :  { %v2096_v20 = vadd.f32 %v2095_v49, %v2047_v23 }
 0x3f8   :  { %v2125_v26 = vmul.f32 0.5, %v2096_v20 }
 0x3fa   :  { %v4750_v57 = vadd.f32 %v2125_v26, %v3565_v4  ;;  %v2103_v30 = vpop.f32.mrf.mxu1 }
 0x3fb   :  { %v2049_v34 = vpop.f32.mrf.mxu3 }
 0x3fc   :  { %v2050_v13 = vadd.f32 %v4570_v36, %v2049_v34  ;;  %v2173_v63 = vsel %vm650_vm4, %v4750_v57, 0.0 }
 0x3fd   :  { %2174 = vadd.xlane.f32.xlu0 %v2173_v63 }
 0x3fe   :  { %v2099_v3 = vadd.f32 %v2098_v24, %v2050_v13 }
 0x400   :  { %v2126_v59 = vmul.f32 0.5, %v2099_v3 }
 0x402   :  { %v4756_v28 = vadd.f32 %v2126_v59, %v3589_v17  ;;  %v2105_v46 = vpop.f32.mrf.mxu1 }
 0x403   :  { %v2051_v6 = vpop.f32.mrf.mxu3 }
 0x404   :  { %v2052_v22 = vadd.f32 %v4570_v36, %v2051_v6  ;;  %v2176_v4 = vsel %vm650_vm4, %v4756_v28, 0.0 }
 0x405   :  { %2177 = vadd.xlane.f32.xlu1 %v2176_v4 }
 0x406   :  { %v2101_v44 = vadd.f32 %v2100_v58, %v2052_v22 }
 0x408   :  { %v2127_v53 = vmul.f32 0.5, %v2101_v44 }
 0x40a   :  { %v4762_v14 = vadd.f32 %v2127_v53, %v3609_v31 }
 0x40b   :  { %v2054_v1 = vpop.f32.mrf.mxu3 }
 0x40c   :  { %v2055_v12 = vadd.f32 %v4570_v36, %v2054_v1  ;;  %v2179_v17 = vsel %vm650_vm4, %v4762_v14, 0.0 }
 0x40d   :  { %2180 = vadd.xlane.f32.xlu2 %v2179_v17 }
 0x40e   :  { %v2104_v5 = vadd.f32 %v2103_v30, %v2055_v12 }
 0x410   :  { %v2128_v55 = vmul.f32 0.5, %v2104_v5 }
 0x412   :  { %v4768_v21 = vadd.f32 %v2128_v55, %v3623_v43 }
 0x413   :  { %v2056_v8 = vpop.f32.mrf.mxu3 }
 0x414   :  { %v2057_v25 = vadd.f32 %v4570_v36, %v2056_v8  ;;  %v2182_v31 = vsel %vm650_vm4, %v4768_v21, 0.0 }
 0x415   :  { %2183 = vadd.xlane.f32.xlu0 %v2182_v31 }
 0x416   :  { %v2106_v29 = vadd.f32 %v2105_v46, %v2057_v25 }
 0x418   :  { %v2129_v38 = vmul.f32 0.5, %v2106_v29 }
 0x41a   :  { %v4774_v61 = vadd.f32 %v2129_v38, %v3639_v0 }
 0x41c   :  { %v2185_v47 = vsel %vm650_vm4, %v4774_v61, 0.0 }
 0x41d   :  { %2186 = vadd.xlane.f32.xlu1 %v2185_v47 }
 0x439   :  { %v2154_v33 = vpop.xlane.xlu2 %2153 }
 0x43a   :  { %v2200_v42 = vmul.f32 %v2154_v33, %v3662_v19 }
 0x43c   :  { %v4790_v51 = vsub.f32 %v4633_v48, %v2200_v42 }
 0x43e   :  { %v2232_v26 = vmul.f32 %v4790_v51, %v4790_v51 }
 0x440   :  { %v2157_v34 = vpop.xlane.xlu0 %2156  ;;  %v2248_v3 = vsel %vm650_vm4, %v2232_v26, 0.0 }
 0x441   :  { %v2201_v13 = vmul.f32 %v2157_v34, %v3662_v19 }
 0x443   :  { %v4807_v6 = vsub.f32 %v4667_v7, %v2201_v13 }
 0x445   :  { %v2233_v55 = vmul.f32 %v4807_v6, %v4807_v6 }
 0x446   :  { %v2108_v39 = vpop.f32.mrf.mxu1 }
 0x447   :  { %v2251_v38 = vsel %vm650_vm4, %v2233_v55, 0.0 }
 0x448   :  { %v2160_v22 = vpop.xlane.xlu1 %2159 }
 0x449   :  { %v2059_v43 = vpop.f32.mrf.mxu3 }
 0x44a   :  { %v2060_v16 = vadd.f32 %v4570_v36, %v2059_v43 }
 0x44c   :  { %v2109_v41 = vadd.f32 %v2108_v39, %v2060_v16 }
 0x44e   :  { %v2130_v27 = vmul.f32 0.5, %v2109_v41  ;;  %v2110_v54 = vpop.f32.mrf.mxu1 }
 0x450   :  { %v4780_v10 = vadd.f32 %v2130_v27, %v3793_v15  ;;  %v2163_v11 = vpop.xlane.xlu2 %2162 }
 0x451   :  { %v2061_v32 = vpop.f32.mrf.mxu3  ;;  %v2203_v20 = vmul.f32 %v2163_v11, %v3662_v19 }
 0x452   :  { %v2062_v37 = vadd.f32 %v4570_v36, %v2061_v32  ;;  %v2188_v0 = vsel %vm650_vm4, %v4780_v10, 0.0 }
 0x453   :  { %2189 = vadd.xlane.f32.xlu2 %v2188_v0  ;;  %v4800_v48 = vsub.f32 %v4726_v60, %v2203_v20 }
 0x454   :  { %v2111_v2 = vadd.f32 %v2110_v54, %v2062_v37 }
 0x455   :  { %v2235_v60 = vmul.f32 %v4800_v48, %v4800_v48 }
 0x456   :  { %v2131_v49 = vmul.f32 0.5, %v2111_v2 }
 0x457   :  { %v2113_v23 = vpop.f32.mrf.mxu1 }
 0x458   :  { %v4787_v9 = vadd.f32 %v2131_v49, %v3829_v62  ;;  %v2166_v53 = vpop.xlane.xlu0 %2165 }
 0x459   :  { %v2204_v7 = vmul.f32 %v2166_v53, %v3662_v19 }
 0x45a   :  { %v2191_v15 = vsel %vm650_vm4, %v4787_v9, 0.0 }
 0x45b   :  { %2192 = vadd.xlane.f32.xlu0 %v2191_v15  ;;  %v2064_v40 = vpop.f32.mrf.mxu3  ;;  %v4830_v46 = vsub.f32 %v4732_v52, %v2204_v7 }
 0x45c   :  { %v2065_v24 = vadd.f32 %v4570_v36, %v2064_v40 }
 0x45d   :  { %v2236_v16 = vmul.f32 %v4830_v46, %v4830_v46 }
 0x45e   :  { %v2114_v62 = vadd.f32 %v2113_v23, %v2065_v24 }
 0x45f   :  { %v2115_v30 = vpop.f32.mrf.mxu1  ;;  %v2260_v37 = vsel %vm650_vm4, %v2236_v16, 0.0 }
 0x460   :  { %v2132_v63 = vmul.f32 0.5, %v2114_v62 }
 0x462   :  { %v4804_v59 = vadd.f32 %v2132_v63, %v3867_v35  ;;  %v2202_v35 = vmul.f32 %v2160_v22, %v3662_v19 }
 0x463   :  { %2249 = vadd.xlane.f32.xlu0 %v2248_v3  ;;  %v2066_v58 = vpop.f32.mrf.mxu3 }
 0x464   :  { %v2067_v4 = vadd.f32 %v4570_v36, %v2066_v58  ;;  %v2194_v44 = vsel %vm650_vm4, %v4804_v59, 0.0  ;;  %v2257_v36 = vsel %vm650_vm4, %v2235_v60, 0.0  ;;  %v4827_v31 = vsub.f32 %v4710_v18, %v2202_v35 }
 0x465   :  { %2195 = vadd.xlane.f32.xlu1 %v2194_v44 }
 0x466   :  { %v2116_v1 = vadd.f32 %v2115_v30, %v2067_v4 }
 0x468   :  { %v2172_v12 = vpop.xlane.xlu2 %2171  ;;  %v2133_v5 = vmul.f32 0.5, %v2116_v1 }
 0x469   :  { %v2206_v17 = vmul.f32 %v2172_v12, %v3662_v19 }
 0x46a   :  { %v4824_v25 = vadd.f32 %v2133_v5, %v3824_v50  ;;  %v2234_v50 = vmul.f32 %v4827_v31, %v4827_v31 }
 0x46b   :  { %v4821_v8 = vsub.f32 %v4744_v56, %v2206_v17  ;;  %2258 = vadd.xlane.f32.xlu0 %v2257_v36  ;;  %v2169_v56 = vpop.xlane.xlu1 %2168 }
 0x46c   :  { %v2197_v29 = vsel %vm650_vm4, %v4824_v25, 0.0  ;;  %v2205_v18 = vmul.f32 %v2169_v56, %v3662_v19  ;;  %v2254_v32 = vsel %vm650_vm4, %v2234_v50, 0.0 }
 0x46d   :  { %v2238_v47 = vmul.f32 %v4821_v8, %v4821_v8  ;;  %2198 = vadd.xlane.f32.xlu2 %v2197_v29  ;;  %2252 = vadd.xlane.f32.xlu1 %v2251_v38 }
 0x46e   :  { %v4845_v41 = vsub.f32 %v4738_v45, %v2205_v18 }
 0x46f   :  { %v2266_v43 = vsel %vm650_vm4, %v2238_v47, 0.0 }
 0x470   :  { %v2175_v39 = vpop.xlane.xlu0 %2174  ;;  %v2237_v54 = vmul.f32 %v4845_v41, %v4845_v41 }
 0x471   :  { %v2207_v52 = vmul.f32 %v2175_v39, %v3662_v19 }
 0x473   :  { %2267 = vadd.xlane.f32.xlu0 %v2266_v43  ;;  %v4848_v27 = vsub.f32 %v4750_v57, %v2207_v52  ;;  %v2263_v57 = vsel %vm650_vm4, %v2237_v54, 0.0 }
 0x475   :  { %2255 = vadd.xlane.f32.xlu2 %v2254_v32  ;;  %2261 = vadd.xlane.f32.xlu1 %v2260_v37  ;;  %v2239_v2 = vmul.f32 %v4848_v27, %v4848_v27 }
 0x477   :  { %v2269_v42 = vsel %vm650_vm4, %v2239_v2, 0.0 }
 0x478   :  { %v2178_v0 = vpop.xlane.xlu1 %2177 }
 0x479   :  { %v2208_v33 = vmul.f32 %v2178_v0, %v3662_v19 }
 0x47b   :  { %v4858_v45 = vsub.f32 %v4756_v28, %v2208_v33 }
 0x47d   :  { %2264 = vadd.xlane.f32.xlu2 %v2263_v57  ;;  %2270 = vadd.xlane.f32.xlu1 %v2269_v42  ;;  %v2240_v11 = vmul.f32 %v4858_v45, %v4858_v45 }
 0x47f   :  { %v2272_v28 = vsel %vm650_vm4, %v2240_v11, 0.0 }
 0x480   :  { %v2181_v49 = vpop.xlane.xlu2 %2180 }
 0x481   :  { %v2209_v15 = vmul.f32 %v2181_v49, %v3662_v19 }
 0x483   :  { %v4866_v23 = vsub.f32 %v4762_v14, %v2209_v15 }
 0x485   :  { %v2241_v40 = vmul.f32 %v4866_v23, %v4866_v23  ;;  %2273 = vadd.xlane.f32.xlu2 %v2272_v28 }
 0x487   :  { %v2275_v20 = vsel %vm650_vm4, %v2241_v40, 0.0 }
 0x488   :  { %v2184_v24 = vpop.xlane.xlu0 %2183  ;;  %2276 = vadd.xlane.f32.xlu0 %v2275_v20  ;;  %v4926_v20 = vld [vmem:[%s5065_s14] ss:$0 sm:$0xff]  ;;  %s3113_s14 = smov [#allocation2]  }
 0x489   :  { %v2210_v26 = vmul.f32 %v2184_v24, %v3662_v19 }
 0x48b   :  { %v4874_v34 = vsub.f32 %v4768_v21, %v2210_v26 }
 0x48d   :  { %v2242_v62 = vmul.f32 %v4874_v34, %v4874_v34 }
 0x48f   :  { %v2278_v14 = vsel %vm650_vm4, %v2242_v62, 0.0 }
 0x490   :  { %v2187_v13 = vpop.xlane.xlu1 %2186  ;;  %2279 = vadd.xlane.f32.xlu1 %v2278_v14 }
 0x491   :  { %v2211_v63 = vmul.f32 %v2187_v13, %v3662_v19 }
 0x493   :  { %v4881_v3 = vsub.f32 %v4774_v61, %v2211_v63  ;;  %v4934_v63 = vld [vmem:[%s5066_s15] ss:$0 sm:$0xff]  ;;  %s2562_s15 = sshll.u32 %s3113_s14, 4  ;;  %s2563_s15 = int_to_ptr.vmem [resolvable:$true] %s2562_s15 }
 0x495   :  { %v2243_v58 = vmul.f32 %v4881_v3, %v4881_v3 }
 0x497   :  { %v2281_v22 = vsel %vm650_vm4, %v2243_v58, 0.0 }
 0x498   :  { %2282 = vadd.xlane.f32.xlu2 %v2281_v22 }
 0x4c6   :  { %v2190_v21 = vpop.xlane.xlu2 %2189 }
 0x4c7   :  { %v2212_v4 = vmul.f32 %v2190_v21, %v3662_v19 }
 0x4c9   :  { %v4888_v44 = vsub.f32 %v4780_v10, %v2212_v4 }
 0x4cb   :  { %v2244_v60 = vmul.f32 %v4888_v44, %v4888_v44 }
 0x4cd   :  { %v2284_v53 = vsel %vm650_vm4, %v2244_v60, 0.0 }
 0x4ce   :  { %v2193_v30 = vpop.xlane.xlu0 %2192  ;;  %2285 = vadd.xlane.f32.xlu0 %v2284_v53 }
 0x4cf   :  { %v2213_v61 = vmul.f32 %v2193_v30, %v3662_v19 }
 0x4d1   :  { %v4895_v1 = vsub.f32 %v4787_v9, %v2213_v61 }
 0x4d3   :  { %v2245_v12 = vmul.f32 %v4895_v1, %v4895_v1 }
 0x4d5   :  { %v2287_v35 = vsel %vm650_vm4, %v2245_v12, 0.0 }
 0x4d6   :  { %v2250_v17 = vpop.xlane.xlu0 %2249  ;;  %2288 = vadd.xlane.f32.xlu1 %v2287_v35 }
 0x4d7   :  { %v2296_v10 = vmul.f32 %v2250_v17, %v3662_v19 }
 0x4d8   :  { %v2196_v5 = vpop.xlane.xlu1 %2195 }
 0x4d9   :  { %v2312_v7 = vadd.f32 1e-05, %v2296_v10  ;;  %v2214_v36 = vmul.f32 %v2196_v5, %v3662_v19 }
 0x4db   :  { %3052 = vrsqrt.f32 %v2312_v7  ;;  %v4903_v55 = vsub.f32 %v4804_v59, %v2214_v36  ;;  %vm2334_vm3 = vweird.f32 %v2312_v7 }
 0x4dd   :  { %v2246_v38 = vmul.f32 %v4903_v55, %v4903_v55 }
 0x4de   :  { %v2259_v29 = vpop.xlane.xlu0 %2258 }
 0x4df   :  { %v2299_v9 = vmul.f32 %v2259_v29, %v3662_v19  ;;  %v2290_v39 = vsel %vm650_vm4, %v2246_v38, 0.0 }
 0x4e0   :  { %v2199_v18 = vpop.xlane.xlu2 %2198  ;;  %2291 = vadd.xlane.f32.xlu2 %v2290_v39  ;;  %v2253_v52 = vpop.xlane.xlu1 %2252 }
 0x4e1   :  { %v3053_v47 = vpop.eup %3052  ;;  %v2315_v56 = vadd.f32 1e-05, %v2299_v9  ;;  %v2215_v43 = vmul.f32 %v2199_v18, %v3662_v19  ;;  %v2297_v59 = vmul.f32 %v2253_v52, %v3662_v19 }
 0x4e2   :  { %v2329_v50 = vmul.f32 %v3053_v47, %v2312_v7  ;;  %vm2335_vm2 = vweird.f32 %v3053_v47 }
 0x4e3   :  { %3054 = vrsqrt.f32 %v2315_v56  ;;  %v4912_v32 = vsub.f32 %v4824_v25, %v2215_v43  ;;  %v4914_v37 = vadd.f32 1e-05, %v2297_v59  ;;  %vm2336_vm5 = vmor %vm2334_vm3, %vm2335_vm2  ;;  %vm2364_vm7 = vweird.f32 %v2315_v56 }
 0x4e4   :  { %v2330_v16 = vmul.f32 %v3053_v47, %v2329_v50 }
 0x4e5   :  { %3056 = vrsqrt.f32 %v4914_v37  ;;  %v2247_v2 = vmul.f32 %v4912_v32, %v4912_v32  ;;  %vm2344_vm10 = vweird.f32 %v4914_v37 }
 0x4e6   :  { %v2331_v0 = vmul.f32 0.5, %v2330_v16  ;;  %v2268_v33 = vpop.xlane.xlu0 %2267 }
 0x4e7   :  { %v2302_v54 = vmul.f32 %v2268_v33, %v3662_v19  ;;  %v2293_v15 = vsel %vm650_vm4, %v2247_v2, 0.0 }
 0x4e8   :  { %v2332_v57 = vsub.f32 1.5, %v2331_v0  ;;  %2294 = vadd.xlane.f32.xlu0 %v2293_v15  ;;  %v2256_v40 = vpop.xlane.xlu2 %2255  ;;  %v2262_v28 = vpop.xlane.xlu1 %2261 }
 0x4e9   :  { %v3055_v42 = vpop.eup %3054  ;;  %v4920_v49 = vadd.f32 1e-05, %v2302_v54  ;;  %v2298_v24 = vmul.f32 %v2256_v40, %v3662_v19  ;;  %v2300_v26 = vmul.f32 %v2262_v28, %v3662_v19 }
 0x4ea   :  { %v2333_v25 = vmul.f32 %v3053_v47, %v2332_v57  ;;  %v2359_v11 = vmul.f32 %v3055_v42, %v2315_v56  ;;  %vm2365_vm6 = vweird.f32 %v3055_v42 }
 0x4eb   :  { %3058 = vrsqrt.f32 %v4920_v49  ;;  %v3057_v13 = vpop.eup %3056  ;;  %v4937_v22 = vadd.f32 1e-05, %v2298_v24  ;;  %v4939_v21 = vadd.f32 1e-05, %v2300_v26  ;;  %vm2366_vm8 = vmor %vm2364_vm7, %vm2365_vm6  ;;  %vm2394_vm13 = vweird.f32 %v4920_v49 }
 0x4ec   :  { %v2337_v62 = vsel %vm2336_vm5, %v3053_v47, %v2333_v25  ;;  %v2360_v14 = vmul.f32 %v3055_v42, %v2359_v11  ;;  %v2339_v60 = vmul.f32 %v3057_v13, %v4914_v37  ;;  %vm2345_vm9 = vweird.f32 %v3057_v13 }
 0x4ed   :  { %v2488_v58 = vmul.f32 %v2337_v62, %v4790_v51  ;;  %3060 = vrsqrt.f32 %v4937_v22  ;;  %vm2346_vm11 = vmor %vm2344_vm10, %vm2345_vm9  ;;  %vm2354_vm1 = vweird.f32 %v4937_v22  ;;  %vm2374_vm3 = vweird.f32 %v4939_v21 }
 0x4ee   :  { %v2361_v4 = vmul.f32 0.5, %v2360_v14  ;;  %v2340_v61 = vmul.f32 %v3057_v13, %v2339_v60  ;;  %3062 = vrsqrt.f32 %v4939_v21 }
 0x4ef   :  { %v2507_v53 = vmul.f32 %v4926_v20, %v2488_v58 }
 0x4f0   :  { %v2362_v30 = vsub.f32 1.5, %v2361_v4  ;;  %v2341_v17 = vmul.f32 0.5, %v2340_v61  ;;  %v2265_v7 = vpop.xlane.xlu2 %2264  ;;  %v2271_v5 = vpop.xlane.xlu1 %2270 }
 0x4f1   :  { %v3059_v12 = vpop.eup %3058  ;;  %v2526_v35 = vadd.f32 %v4934_v63, %v2507_v53  ;;  %v2301_v36 = vmul.f32 %v2265_v7, %v3662_v19  ;;  %v2303_v29 = vmul.f32 %v2271_v5, %v3662_v19 }
 0x4f2   :  { %v2363_v51 = vmul.f32 %v3055_v42, %v2362_v30  ;;  %v2389_v10 = vmul.f32 %v3059_v12, %v4920_v49  ;;  %v2342_v38 = vsub.f32 1.5, %v2341_v17  ;;  %vm2395_vm12 = vweird.f32 %v3059_v12 }
 0x4f3   :  { %2542 = vst.msk [vmem:[#allocation2] sm:$0xff] %vm650_vm4, %v2526_v35  ;;  %v3061_v39 = vpop.eup %3060  ;;  %v4951_v56 = vadd.f32 1e-05, %v2301_v36  ;;  %v4953_v18 = vadd.f32 1e-05, %v2303_v29  ;;  %vm2396_vm14 = vmor %vm2394_vm13, %vm2395_vm12 }
 0x4f4   :  { %v2367_v9 = vsel %vm2366_vm8, %v3055_v42, %v2363_v51  ;;  %v2390_v47 = vmul.f32 %v3059_v12, %v2389_v10  ;;  %v3063_v52 = vpop.eup %3062  ;;  %v2343_v43 = vmul.f32 %v3057_v13, %v2342_v38  ;;  %v2349_v16 = vmul.f32 %v3061_v39, %v4937_v22 }
 0x4f5   :  { %v2491_v50 = vmul.f32 %v2367_v9, %v4800_v48  ;;  %v2369_v33 = vmul.f32 %v3063_v52, %v4939_v21  ;;  %3064 = vrsqrt.f32 %v4951_v56  ;;  %vm2355_vm15 = vweird.f32 %v3061_v39 }
 0x4f6   :  { %v2391_v59 = vmul.f32 0.5, %v2390_v47  ;;  %v2347_v54 = vsel %vm2346_vm11, %v3057_v13, %v2343_v43  ;;  %v2350_v2 = vmul.f32 %v3061_v39, %v2349_v16  ;;  %3066 = vrsqrt.f32 %v4953_v18  ;;  %vm2356_vm2 = vmor %vm2354_vm1, %vm2355_vm15 }
 0x4f7   :  { %v2510_v0 = vmul.f32 %v4926_v20, %v2491_v50  ;;  %v2489_v42 = vmul.f32 %v2347_v54, %v4807_v6  ;;  %v2370_v15 = vmul.f32 %v3063_v52, %v2369_v33  ;;  %vm2375_vm0 = vweird.f32 %v3063_v52 }
 0x4f8   :  { %v2392_v48 = vsub.f32 1.5, %v2391_v59  ;;  %v2351_v25 = vmul.f32 0.5, %v2350_v2  ;;  %v2274_v11 = vpop.xlane.xlu2 %2273  ;;  %vm2376_vm5 = vmor %vm2374_vm3, %vm2375_vm0  ;;  %vm2384_vm7 = vweird.f32 %v4951_v56  ;;  %vm2404_vm10 = vweird.f32 %v4953_v18 }
 0x4f9   :  { %v2529_v57 = vadd.f32 %v4934_v63, %v2510_v0  ;;  %v2508_v40 = vmul.f32 %v4926_v20, %v2489_v42  ;;  %v2371_v28 = vmul.f32 0.5, %v2370_v15  ;;  %v2304_v24 = vmul.f32 %v2274_v11, %v3662_v19 }
 0x4fa   :  { %v2393_v37 = vmul.f32 %v3059_v12, %v2392_v48  ;;  %v2352_v6 = vsub.f32 1.5, %v2351_v25 }
 0x4fb   :  { %2545 = vst.msk [vmem:[#allocation2 + $0x18] sm:$0xff] %vm650_vm4, %v2529_v57  ;;  %v2277_v26 = vpop.xlane.xlu0 %2276  ;;  %v3065_v13 = vpop.eup %3064  ;;  %v2527_v49 = vadd.f32 %v4934_v63, %v2508_v40  ;;  %v2372_v4 = vsub.f32 1.5, %v2371_v28  ;;  %v4970_v60 = vadd.f32 1e-05, %v2304_v24 }
 0x4fc   :  { %v2397_v62 = vsel %vm2396_vm14, %v3059_v12, %v2393_v37  ;;  %v2305_v14 = vmul.f32 %v2277_v26, %v3662_v19  ;;  %v2353_v53 = vmul.f32 %v3061_v39, %v2352_v6  ;;  %v2379_v30 = vmul.f32 %v3065_v13, %v4951_v56  ;;  %v3067_v12 = vpop.eup %3066 }
 0x4fd   :  { %v2494_v58 = vmul.f32 %v2397_v62, %v4821_v8  ;;  %2543 = vst.msk [vmem:[#allocation2 + $0x8] sm:$0xff] %vm650_vm4, %v2527_v49  ;;  %v2373_v51 = vmul.f32 %v3063_v52, %v2372_v4  ;;  %3068 = vrsqrt.f32 %v4970_v60  ;;  %v2399_v17 = vmul.f32 %v3067_v12, %v4953_v18 }
 0x4fe   :  { %v4974_v61 = vadd.f32 1e-05, %v2305_v14  ;;  %v2357_v8 = vsel %vm2356_vm2, %v3061_v39, %v2353_v53  ;;  %v2380_v22 = vmul.f32 %v3065_v13, %v2379_v30  ;;  %vm2385_vm6 = vweird.f32 %v3065_v13 }
 0x4ff   :  { %v2513_v35 = vmul.f32 %v4926_v20, %v2494_v58  ;;  %v2490_v7 = vmul.f32 %v2357_v8, %v4827_v31  ;;  %v2377_v5 = vsel %vm2376_vm5, %v3063_v52, %v2373_v51  ;;  %v2400_v9 = vmul.f32 %v3067_v12, %v2399_v17  ;;  %vm2386_vm9 = vmor %vm2384_vm7, %vm2385_vm6 }
 0x500   :  { %3070 = vrsqrt.f32 %v4974_v61  ;;  %v2492_v36 = vmul.f32 %v2377_v5, %v4830_v46  ;;  %v2381_v29 = vmul.f32 0.5, %v2380_v22  ;;  %vm2405_vm8 = vweird.f32 %v3067_v12 }
 0x501   :  { %v2532_v10 = vadd.f32 %v4934_v63, %v2513_v35  ;;  %v2509_v21 = vmul.f32 %v4926_v20, %v2490_v7  ;;  %v2401_v50 = vmul.f32 0.5, %v2400_v9  ;;  %vm2406_vm11 = vmor %vm2404_vm10, %vm2405_vm8  ;;  %vm2414_vm13 = vweird.f32 %v4970_v60 }
 0x502   :  { %v2511_v47 = vmul.f32 %v4926_v20, %v2492_v36  ;;  %v2382_v39 = vsub.f32 1.5, %v2381_v29  ;;  %vm2424_vm0 = vweird.f32 %v4974_v61 }
 0x503   :  { %2548 = vst.msk [vmem:[#allocation2 + $0x30] sm:$0xff] %vm650_vm4, %v2532_v10  ;;  %v2280_v38 = vpop.xlane.xlu1 %2279  ;;  %v3069_v31 = vpop.eup %3068  ;;  %v2528_v52 = vadd.f32 %v4934_v63, %v2509_v21  ;;  %v2402_v16 = vsub.f32 1.5, %v2401_v50 }
 0x504   :  { %v2306_v43 = vmul.f32 %v2280_v38, %v3662_v19  ;;  %v2530_v46 = vadd.f32 %v4934_v63, %v2511_v47  ;;  %v2383_v59 = vmul.f32 %v3065_v13, %v2382_v39  ;;  %v2409_v0 = vmul.f32 %v3069_v31, %v4970_v60 }
 0x505   :  { %2544 = vst.msk [vmem:[#allocation2 + $0x10] sm:$0xff] %vm650_vm4, %v2528_v52  ;;  %v2403_v2 = vmul.f32 %v3067_v12, %v2402_v16  ;;  %vm2415_vm12 = vweird.f32 %v3069_v31 }
 0x506   :  { %v3071_v33 = vpop.eup %3070  ;;  %v2322_v54 = vadd.f32 1e-05, %v2306_v43  ;;  %2546 = vst.msk [vmem:[#allocation2 + $0x20] sm:$0xff] %vm650_vm4, %v2530_v46  ;;  %v2387_v48 = vsel %vm2386_vm9, %v3065_v13, %v2383_v59  ;;  %v2410_v56 = vmul.f32 %v3069_v31, %v2409_v0  ;;  %vm2416_vm15 = vmor %vm2414_vm13, %vm2415_vm12 }
 0x507   :  { %v2419_v57 = vmul.f32 %v3071_v33, %v4974_v61  ;;  %v2493_v42 = vmul.f32 %v2387_v48, %v4845_v41  ;;  %v2407_v15 = vsel %vm2406_vm11, %v3067_v12, %v2403_v2  ;;  %vm2425_vm14 = vweird.f32 %v3071_v33 }
 0x508   :  { %3072 = vrsqrt.f32 %v2322_v54  ;;  %v2411_v37 = vmul.f32 0.5, %v2410_v56  ;;  %v2495_v18 = vmul.f32 %v2407_v15, %v4848_v27  ;;  %vm2426_vm1 = vmor %vm2424_vm0, %vm2425_vm14  ;;  %vm2434_vm3 = vweird.f32 %v2322_v54 }
 0x509   :  { %v2420_v25 = vmul.f32 %v3071_v33, %v2419_v57  ;;  %v2512_v11 = vmul.f32 %v4926_v20, %v2493_v42 }
 0x50a   :  { %v2412_v28 = vsub.f32 1.5, %v2411_v37  ;;  %v2514_v41 = vmul.f32 %v4926_v20, %v2495_v18 }
 0x50b   :  { %v2283_v40 = vpop.xlane.xlu2 %2282  ;;  %v2421_v24 = vmul.f32 0.5, %v2420_v25  ;;  %v2531_v62 = vadd.f32 %v4934_v63, %v2512_v11 }
 0x50c   :  { %v2307_v26 = vmul.f32 %v2283_v40, %v3662_v19  ;;  %v2413_v6 = vmul.f32 %v3069_v31, %v2412_v28  ;;  %v2533_v27 = vadd.f32 %v4934_v63, %v2514_v41 }
 0x50d   :  { %v2422_v14 = vsub.f32 1.5, %v2421_v24  ;;  %2547 = vst.msk [vmem:[#allocation2 + $0x28] sm:$0xff] %vm650_vm4, %v2531_v62 }
 0x50e   :  { %v2323_v13 = vadd.f32 1e-05, %v2307_v26  ;;  %v3073_v49 = vpop.eup %3072  ;;  %v2417_v58 = vsel %vm2416_vm15, %v3069_v31, %v2413_v6  ;;  %2549 = vst.msk [vmem:[#allocation2 + $0x38] sm:$0xff] %vm650_vm4, %v2533_v27 }
 0x50f   :  { %v2423_v4 = vmul.f32 %v3071_v33, %v2422_v14  ;;  %v2429_v53 = vmul.f32 %v3073_v49, %v2322_v54  ;;  %v2496_v30 = vmul.f32 %v2417_v58, %v4858_v45  ;;  %vm2435_vm2 = vweird.f32 %v3073_v49 }
 0x510   :  { %3074 = vrsqrt.f32 %v2323_v13  ;;  %vm2436_vm5 = vmor %vm2434_vm3, %vm2435_vm2  ;;  %vm2444_vm7 = vweird.f32 %v2323_v13 }
 0x511   :  { %v2427_v60 = vsel %vm2426_vm1, %v3071_v33, %v2423_v4  ;;  %v2430_v12 = vmul.f32 %v3073_v49, %v2429_v53  ;;  %v2515_v35 = vmul.f32 %v4926_v20, %v2496_v30 }
 0x512   :  { %v2497_v51 = vmul.f32 %v2427_v60, %v4866_v23 }
 0x513   :  { %v2431_v8 = vmul.f32 0.5, %v2430_v12  ;;  %v2534_v22 = vadd.f32 %v4934_v63, %v2515_v35 }
 0x514   :  { %v2516_v17 = vmul.f32 %v4926_v20, %v2497_v51 }
 0x515   :  { %v2432_v10 = vsub.f32 1.5, %v2431_v8  ;;  %2550 = vst.msk [vmem:[#allocation2 + $0x40] sm:$0xff] %vm650_vm4, %v2534_v22 }
 0x516   :  { %v3075_v61 = vpop.eup %3074  ;;  %v2535_v45 = vadd.f32 %v4934_v63, %v2516_v17 }
 0x517   :  { %v2433_v7 = vmul.f32 %v3073_v49, %v2432_v10  ;;  %v2439_v5 = vmul.f32 %v3075_v61, %v2323_v13  ;;  %vm2445_vm6 = vweird.f32 %v3075_v61 }
 0x518   :  { %2551 = vst.msk [vmem:[#allocation2 + $0x48] sm:$0xff] %vm650_vm4, %v2535_v45  ;;  %vm2446_vm8 = vmor %vm2444_vm7, %vm2445_vm6 }
 0x519   :  { %v2437_v36 = vsel %vm2436_vm5, %v3073_v49, %v2433_v7  ;;  %v2440_v23 = vmul.f32 %v3075_v61, %v2439_v5 }
 0x51a   :  { %v2498_v29 = vmul.f32 %v2437_v36, %v4874_v34 }
 0x51b   :  { %v2441_v9 = vmul.f32 0.5, %v2440_v23 }
 0x51c   :  { %v2517_v21 = vmul.f32 %v4926_v20, %v2498_v29 }
 0x51d   :  { %v2442_v38 = vsub.f32 1.5, %v2441_v9 }
 0x51e   :  { %v2536_v47 = vadd.f32 %v4934_v63, %v2517_v21 }
 0x51f   :  { %v2443_v39 = vmul.f32 %v3075_v61, %v2442_v38 }
 0x520   :  { %2552 = vst.msk [vmem:[#allocation2 + $0x50] sm:$0xff] %vm650_vm4, %v2536_v47 }
 0x521   :  { %v2447_v50 = vsel %vm2446_vm8, %v3075_v61, %v2443_v39 }
 0x522   :  { %v2499_v43 = vmul.f32 %v2447_v50, %v4881_v3 }
 0x524   :  { %v2518_v31 = vmul.f32 %v4926_v20, %v2499_v43 }
 0x526   :  { %v2537_v52 = vadd.f32 %v4934_v63, %v2518_v31 }
 0x528   :  { %2553 = vst.msk [vmem:[#allocation2 + $0x58] sm:$0xff] %vm650_vm4, %v2537_v52 }
 0x541   :  { %v2286_v34 = vpop.xlane.xlu0 %2285 }
 0x542   :  { %v2308_v46 = vmul.f32 %v2286_v34, %v3662_v19 }
 0x544   :  { %v2324_v59 = vadd.f32 1e-05, %v2308_v46 }
 0x546   :  { %3076 = vrsqrt.f32 %v2324_v59  ;;  %vm2454_vm10 = vweird.f32 %v2324_v59 }
 0x549   :  { %v2289_v16 = vpop.xlane.xlu1 %2288 }
 0x54a   :  { %v2309_v0 = vmul.f32 %v2289_v16, %v3662_v19 }
 0x54c   :  { %v3077_v33 = vpop.eup %3076  ;;  %v2325_v54 = vadd.f32 1e-05, %v2309_v0 }
 0x54d   :  { %v2449_v48 = vmul.f32 %v3077_v33, %v2324_v59  ;;  %vm2455_vm9 = vweird.f32 %v3077_v33 }
 0x54e   :  { %3078 = vrsqrt.f32 %v2325_v54  ;;  %vm2456_vm11 = vmor %vm2454_vm10, %vm2455_vm9  ;;  %vm2464_vm13 = vweird.f32 %v2325_v54 }
 0x54f   :  { %v2450_v2 = vmul.f32 %v3077_v33, %v2449_v48 }
 0x551   :  { %v2451_v3 = vmul.f32 0.5, %v2450_v2 }
 0x553   :  { %v2452_v56 = vsub.f32 1.5, %v2451_v3  ;;  %v2292_v37 = vpop.xlane.xlu2 %2291 }
 0x554   :  { %v3079_v57 = vpop.eup %3078  ;;  %v2310_v25 = vmul.f32 %v2292_v37, %v3662_v19 }
 0x555   :  { %v2453_v42 = vmul.f32 %v3077_v33, %v2452_v56  ;;  %v2459_v15 = vmul.f32 %v3079_v57, %v2325_v54  ;;  %vm2465_vm12 = vweird.f32 %v3079_v57 }
 0x556   :  { %v2326_v28 = vadd.f32 1e-05, %v2310_v25  ;;  %vm2466_vm14 = vmor %vm2464_vm13, %vm2465_vm12 }
 0x557   :  { %v2457_v11 = vsel %vm2456_vm11, %v3077_v33, %v2453_v42  ;;  %v2460_v18 = vmul.f32 %v3079_v57, %v2459_v15 }
 0x558   :  { %v2500_v40 = vmul.f32 %v2457_v11, %v4888_v44  ;;  %3080 = vrsqrt.f32 %v2326_v28  ;;  %vm2474_vm0 = vweird.f32 %v2326_v28 }
 0x559   :  { %v2461_v24 = vmul.f32 0.5, %v2460_v18 }
 0x55a   :  { %v2519_v26 = vmul.f32 %v4926_v20, %v2500_v40 }
 0x55b   :  { %v2462_v62 = vsub.f32 1.5, %v2461_v24  ;;  %v2295_v14 = vpop.xlane.xlu0 %2294 }
 0x55c   :  { %v2538_v41 = vadd.f32 %v4934_v63, %v2519_v26  ;;  %v2311_v13 = vmul.f32 %v2295_v14, %v3662_v19 }
 0x55d   :  { %v2463_v6 = vmul.f32 %v3079_v57, %v2462_v62 }
 0x55e   :  { %2554 = vst.msk [vmem:[#allocation2 + $0x60] sm:$0xff] %vm650_vm4, %v2538_v41  ;;  %v3081_v27 = vpop.eup %3080  ;;  %v2327_v58 = vadd.f32 1e-05, %v2311_v13 }
 0x55f   :  { %v2467_v49 = vsel %vm2466_vm14, %v3079_v57, %v2463_v6  ;;  %v2469_v4 = vmul.f32 %v3081_v27, %v2326_v28  ;;  %vm2475_vm15 = vweird.f32 %v3081_v27 }
 0x560   :  { %v2501_v44 = vmul.f32 %v2467_v49, %v4895_v1  ;;  %3082 = vrsqrt.f32 %v2327_v58  ;;  %vm2476_vm1 = vmor %vm2474_vm0, %vm2475_vm15  ;;  %vm2484_vm3 = vweird.f32 %v2327_v58 }
 0x561   :  { %v2470_v30 = vmul.f32 %v3081_v27, %v2469_v4 }
 0x562   :  { %v2520_v53 = vmul.f32 %v4926_v20, %v2501_v44 }
 0x563   :  { %v2471_v12 = vmul.f32 0.5, %v2470_v30 }
 0x564   :  { %v2539_v60 = vadd.f32 %v4934_v63, %v2520_v53 }
 0x565   :  { %v2472_v35 = vsub.f32 1.5, %v2471_v12 }
 0x566   :  { %2555 = vst.msk [vmem:[#allocation2 + $0x68] sm:$0xff] %vm650_vm4, %v2539_v60  ;;  %v3083_v51 = vpop.eup %3082 }
 0x567   :  { %v2473_v8 = vmul.f32 %v3081_v27, %v2472_v35  ;;  %v2479_v19 = vmul.f32 %v3083_v51, %v2327_v58  ;;  %vm2485_vm2 = vweird.f32 %v3083_v51 }
 0x568   :  { %vm2486_vm5 = vmor %vm2484_vm3, %vm2485_vm2 }
 0x569   :  { %v2477_v22 = vsel %vm2476_vm1, %v3081_v27, %v2473_v8  ;;  %v2480_v1 = vmul.f32 %v3083_v51, %v2479_v19 }
 0x56a   :  { %v2502_v17 = vmul.f32 %v2477_v22, %v4903_v55 }
 0x56b   :  { %v2481_v10 = vmul.f32 0.5, %v2480_v1 }
 0x56c   :  { %v2521_v61 = vmul.f32 %v4926_v20, %v2502_v17 }
 0x56d   :  { %v2482_v45 = vsub.f32 1.5, %v2481_v10 }
 0x56e   :  { %v2540_v7 = vadd.f32 %v4934_v63, %v2521_v61 }
 0x56f   :  { %v2483_v5 = vmul.f32 %v3083_v51, %v2482_v45 }
 0x570   :  { %2556 = vst.msk [vmem:[#allocation2 + $0x70] sm:$0xff] %vm650_vm4, %v2540_v7 }
 0x571   :  { %v2487_v36 = vsel %vm2486_vm5, %v3083_v51, %v2483_v5 }
 0x572   :  { %v2503_v23 = vmul.f32 %v2487_v36, %v4912_v32 }
 0x574   :  { %v2522_v55 = vmul.f32 %v4926_v20, %v2503_v23 }
 0x576   :  { %v2541_v29 = vadd.f32 %v4934_v63, %v2522_v55 }
 0x578   :  { %2557 = vst.msk [vmem:[#allocation2 + $0x78] sm:$0xff] %vm650_vm4, %v2541_v29 }
 0x579   :  { %2570 = dma.vmem_to_hbm [thread:$0]  %s2563_s15, 2048, %s2565_s4, [#allocation3], %s3114_s5, %s3114_s5, %s3115_s26  }
 0x57a   :  { %3110 = dma.done.wait [#allocation3], 2048  }
 0x57b   :  { %3111 = vsyncadd [#allocation3], 4294965248 }
 0x57c   :  { %2575 = vsyncpa [#allocation3], 1 }

// kernel: conformer_block.2
= control target key start
LH: loop header
LB: loop body
LE: loop exit
PB: predicated region body
PF: predicated region fallthrough
CT: control target
= control target key end

     0   :  { %s8855_s0 = inlined_call_operand.vmem [shape: f32[2,64,64], index: 0, kind: input, shape index: {}]   ;;  %s8856_s1 = inlined_call_operand.vmem [shape: f32[1,64], index: 1, kind: input, shape index: {}]   ;;  %s8857_s2 = inlined_call_operand.vmem [shape: f32[1,64], index: 2, kind: input, shape index: {}]   ;;  %s8858_s3 = inlined_call_operand.vmem [shape: bf16[64,256], index: 3, kind: input, shape index: {}]   ;;  %s8859_s4 = inlined_call_operand.vmem [shape: f32[1,256], index: 4, kind: input, shape index: {}]   ;;  %s8860_s5 = inlined_call_operand.vmem [shape: bf16[256,64], index: 5, kind: input, shape index: {}]   ;;  %s8861_s6 = inlined_call_operand.vmem [shape: f32[1,64], index: 6, kind: input, shape index: {}]   ;;  %s8862_s7 = inlined_call_operand.vmem [shape: f32[1,64], index: 7, kind: input, shape index: {}]   ;;  %s8863_s8 = inlined_call_operand.vmem [shape: f32[1,64], index: 8, kind: input, shape index: {}]   ;;  %s8864_s9 = inlined_call_operand.vmem [shape: bf16[64,192], index: 9, kind: input, shape index: {}]   ;;  %s8865_s10 = inlined_call_operand.vmem [shape: bf16[4,16,64], index: 10, kind: input, shape index: {}]   ;;  %s8866_s11 = inlined_call_operand.vmem [shape: f32[1,64], index: 11, kind: input, shape index: {}]   ;;  %s8867_s12 = inlined_call_operand.vmem [shape: f32[1,64], index: 12, kind: input, shape index: {}]   ;;  %s8868_s13 = inlined_call_operand.vmem [shape: bf16[64,256], index: 13, kind: input, shape index: {}]   ;;  %s8869_s14 = inlined_call_operand.vmem [shape: f32[1,256], index: 14, kind: input, shape index: {}]   ;;  %s8870_s15 = inlined_call_operand.vmem [shape: f32[31,128], index: 15, kind: input, shape index: {}]   ;;  %s8871_s16 = inlined_call_operand.vmem [shape: f32[1,128], index: 16, kind: input, shape index: {}]   ;;  %s8872_s17 = inlined_call_operand.vmem [shape: f32[2,64,64], index: 17, kind: output, shape index: {0}]   ;;  %s8873_s18 = inlined_call_operand.vmem [shape: f32[2,64,128], index: 18, kind: output, shape index: {1}]   ;;  %s8874_s19 = inlined_call_operand.vmem [shape: f32[2,1,128], index: 19, kind: output, shape index: {2}]   ;;  %s8875_s20 = inlined_call_operand.vmem [shape: f32[2,1,128], index: 20, kind: output, shape index: {3}]  }
   0x1   :  { %8957 = sst [smem:[#allocation64_spill]] %s8855_s0 }
   0x2   :  { %8958 = sst [smem:[#allocation65_spill]] %s8856_s1  ;;  %s5941_s1 = smov 0  }
   0x3   :  { %8959 = sst [smem:[#allocation66_spill]] %s8857_s2 }
   0x4   :  { %8960 = sst [smem:[#allocation67_spill]] %s8858_s3 }
   0x5   :  { %8961 = sst [smem:[#allocation68_spill]] %s8859_s4 }
   0x6 LB: > { %s5191_s22 = sadd.s32 4294967295, %s5826_s1   ;;  %p5195_p0 = scmp.ge.s32.totalorder %s5826_s1, 1  ;;  %s5826_s1 = sphi %s5941_s1, %s31_s1  }
   0x7   : > { %p569_p1 = scmp.lt.s32.totalorder %s5826_s1, 3 }
   0x9   : > { %p570_p2 = pnand %p5195_p0, %p569_p1 }
   0xb   : > { %573 = sbr.rel (%p570_p2) target bundleno = 2957 (0xb8d), region = 88 }
  0x10   : > { %p638_p3 = scmp.lt.s32.totalorder %s5191_s22, 1  ;;  %vm670_vm0 = vcmask 523264   ;;  %s8962_s25 = sld [smem:[#allocation64_spill]]  ;;  %v5828_v14 = vmov 64.0  }
  0x11   : > { %5553 = vrcp.f32 %v5828_v14  ;;  %s8964_s28 = sld [smem:[#allocation67_spill]]  ;;  %s5830_s4 = smov 48  }
  0x12   : > { %s9198_s22 = smov (!%p638_p3, %s5191_s22), 1  ;;  %s8965_s30 = sld [smem:[#allocation65_spill]] }
  0x13   : > { %s5952_s23 = sshll.u32 %s9198_s22, 6  ;;  %s8973_s2 = sld [smem:[#allocation68_spill]] }
  0x14   : > { %s5831_s29 = smov 112   ;;  %s5833_s0 = smov 32  }
  0x15   : > { %s5834_s21 = smov 80   ;;  %s5835_s24 = smov 96  }
  0x16   : > { %s5958_s3 = scalar_lea.vmem %s8962_s25, %s5952_s23  ;;  %s8968_s25 = sld [smem:[#allocation66_spill]] }
  0x17   : > { %v664_v0 = vld [vmem:[%s5958_s3 + $0x20] sm:$0xff]  ;;  %v662_v1 = vld [vmem:[%s5958_s3 + $0x10] sm:$0xff]  ;;  %v665_v6 = vld [vmem:[%s5958_s3 + $0x28] sm:$0xff]  ;;  %v5554_v15 = vpop.eup %5553  ;;  %s7300_s26 = scalar_lea.vmem %s8872_s17, %s5952_s23 }
  0x18   : > { %v660_v2 = vld [vmem:[%s5958_s3] sm:$0xff]  ;;  %v683_v3 = vsel %vm670_vm0, %v664_v0, 0.0  ;;  %v677_v4 = vsel %vm670_vm0, %v662_v1, 0.0  ;;  %v663_v7 = vld [vmem:[%s5958_s3 + $0x18] sm:$0xff]  ;;  %v661_v8 = vld [vmem:[%s5958_s3 + $0x8] sm:$0xff]  ;;  %v686_v9 = vsel %vm670_vm0, %v665_v6, 0.0  ;;  %vm700_vm1 = vweird.f32 %v5554_v15 }
  0x19   : > { %v671_v5 = vsel %vm670_vm0, %v660_v2, 0.0  ;;  %684 = vadd.xlane.f32.xlu2 %v683_v3  ;;  %678 = vadd.xlane.f32.xlu1 %v677_v4  ;;  %v680_v10 = vsel %vm670_vm0, %v663_v7, 0.0  ;;  %v674_v11 = vsel %vm670_vm0, %v661_v8, 0.0  ;;  %v666_v12 = vld [vmem:[%s5958_s3 + $0x30] sm:$0xff]  ;;  %v696_v16 = vmul.f32 64.0, %v5554_v15  ;;  %v5989_v36 = vld [vmem:[%s5958_s3 + $0x38] sm:$0xff] }
  0x1a   : > { %672 = vadd.xlane.f32.xlu0 %v671_v5  ;;  %v689_v13 = vsel %vm670_vm0, %v666_v12, 0.0  ;;  %v692_v41 = vsel %vm670_vm0, %v5989_v36, 0.0  ;;  %v5228_v58 = vld [vmem:[%s8964_s28 + $0x30] sm:$0xf]  ;;  %v5492_v59 = vld [vmem:[%s8964_s28 + $0x34] sm:$0xf0] }
  0x1b   : > { %v697_v17 = vsub.f32 1.0, %v696_v16  ;;  %v5491_v60 = vld [vmem:[%s8964_s28 + $0x34] sm:$0xf]  ;;  %v5229_v61 = vor.u32 %v5492_v59, %v5228_v58  ;;  %v5230_v62 = vld [vmem:[%s8964_s28 + $0x38] sm:$0xf0] }
  0x1c   : > { %v5233_v63 = vor.u32 %v5491_v60, %v5230_v62  ;;  %v5222_v4 = vld [vmem:[%s8964_s28 + $0x28] sm:$0xf0]  ;;  %v5204_v14 = vld [vmem:[%s8964_s28] sm:$0xf]  ;;  %v5485_v16 = vld [vmem:[%s8964_s28 + $0x4] sm:$0xf] }
  0x1d   : > { %v698_v18 = vmul.f32 %v5554_v15, %v697_v17  ;;  %950 = vmatpush.bf16.msra.mxu0 %v5229_v61 }
  0x1e   : > { %979 = vmatpush.bf16.msra.mxu1 %v5233_v63 }
  0x1f   : > { %v699_v19 = vadd.f32 %v5554_v15, %v698_v18 }
  0x21   : > { %687 = vadd.xlane.f32.xlu2 %v686_v9  ;;  %681 = vadd.xlane.f32.xlu1 %v680_v10  ;;  %v5974_v20 = vsel %vm700_vm1, %v5554_v15, %v699_v19  ;;  %v5214_v10 = vld [vmem:[%s8964_s28 + $0x18] sm:$0xf0]  ;;  %v5486_v15 = vld [vmem:[%s8964_s28 + $0x4] sm:$0xf0]  ;;  %v5206_v19 = vld [vmem:[%s8964_s28 + $0x8] sm:$0xf0] }
  0x22   : > { %675 = vadd.xlane.f32.xlu0 %v674_v11  ;;  %8963 = vst [vmem:[#allocation2_spill] sm:$0xff] %v5974_v20  ;;  %v5205_v18 = vor.u32 %v5486_v15, %v5204_v14 }
  0x29   : > { %690 = vadd.xlane.f32.xlu2 %v689_v13 }
  0x8c   : > { %v685_v21 = vpop.xlane.xlu2 %684  ;;  %v679_v22 = vpop.xlane.xlu1 %678 }
  0x8d   : > { %v673_v23 = vpop.xlane.xlu0 %672  ;;  %v706_v32 = vmul.f32 %v5974_v20, %v685_v21  ;;  %v704_v33 = vmul.f32 %v5974_v20, %v679_v22  ;;  %v5209_v21 = vor.u32 %v5485_v16, %v5206_v19 }
  0x8e   : > { %v702_v24 = vmul.f32 %v5974_v20, %v673_v23 }
  0x8f   : > { %v5995_v39 = vsub.f32 %v664_v0, %v706_v32  ;;  %v5997_v40 = vsub.f32 %v662_v1, %v704_v33  ;;  %v5220_v0 = vld [vmem:[%s8964_s28 + $0x20] sm:$0xf]  ;;  %v5490_v1 = vld [vmem:[%s8964_s28 + $0x24] sm:$0xf0] }
  0x90   : > { %v5977_v25 = vsub.f32 %v660_v2, %v702_v24  ;;  %v5489_v2 = vld [vmem:[%s8964_s28 + $0x24] sm:$0xf]  ;;  %v5221_v3 = vor.u32 %v5490_v1, %v5220_v0 }
  0x91   : > { %v722_v48 = vmul.f32 %v5995_v39, %v5995_v39  ;;  %v720_v49 = vmul.f32 %v5997_v40, %v5997_v40  ;;  %v5225_v5 = vor.u32 %v5489_v2, %v5222_v4  ;;  %v6091_v4 = vld [vmem:[%s8965_s30] ss:$0 sm:$0xff]  ;;  %s5832_s30 = smov 16  }
  0x92   : > { %v718_v26 = vmul.f32 %v5977_v25, %v5977_v25  ;;  %951 = vmatpush.bf16.msra.mxu0 %v5221_v3 }
  0x93   : > { %v738_v53 = vsel %vm670_vm0, %v722_v48, 0.0  ;;  %v732_v54 = vsel %vm670_vm0, %v720_v49, 0.0  ;;  %980 = vmatpush.bf16.msra.mxu1 %v5225_v5 }
  0x94   : > { %v688_v27 = vpop.xlane.xlu2 %687  ;;  %v682_v28 = vpop.xlane.xlu1 %681  ;;  %v726_v29 = vsel %vm670_vm0, %v718_v26, 0.0 }
  0x95   : > { %v705_v30 = vmul.f32 %v5974_v20, %v682_v28  ;;  %727 = vadd.xlane.f32.xlu0 %v726_v29  ;;  %v676_v31 = vpop.xlane.xlu0 %675  ;;  %v707_v47 = vmul.f32 %v5974_v20, %v688_v27 }
  0x96   : > { %v703_v34 = vmul.f32 %v5974_v20, %v676_v31 }
  0x97   : > { %v5986_v35 = vsub.f32 %v663_v7, %v705_v30  ;;  %v6015_v52 = vsub.f32 %v665_v6, %v707_v47  ;;  %v5212_v6 = vld [vmem:[%s8964_s28 + $0x10] sm:$0xf]  ;;  %v5488_v7 = vld [vmem:[%s8964_s28 + $0x14] sm:$0xf0] }
  0x98   : > { %v5991_v37 = vsub.f32 %v661_v8, %v703_v34  ;;  %v5487_v8 = vld [vmem:[%s8964_s28 + $0x14] sm:$0xf]  ;;  %v5213_v9 = vor.u32 %v5488_v7, %v5212_v6 }
  0x99   : > { %v721_v38 = vmul.f32 %v5986_v35, %v5986_v35  ;;  %v723_v56 = vmul.f32 %v6015_v52, %v6015_v52 }
  0x9a   : > { %v719_v42 = vmul.f32 %v5991_v37, %v5991_v37  ;;  %952 = vmatpush.bf16.msra.mxu0 %v5213_v9  ;;  %v6096_v9 = vld [vmem:[%s8862_s7] ss:$0 sm:$0xff] }
  0x9b   : > { %v735_v43 = vsel %vm670_vm0, %v721_v38, 0.0  ;;  %v741_v57 = vsel %vm670_vm0, %v723_v56, 0.0 }
  0x9c   : > { %v691_v44 = vpop.xlane.xlu2 %690  ;;  %736 = vadd.xlane.f32.xlu2 %v735_v43  ;;  %v729_v45 = vsel %vm670_vm0, %v719_v42, 0.0 }
  0x9d   : > { %v708_v46 = vmul.f32 %v5974_v20, %v691_v44  ;;  %693 = vadd.xlane.f32.xlu0 %v692_v41  ;;  %730 = vadd.xlane.f32.xlu1 %v729_v45 }
  0x9e   : > { %953 = vmatpush.bf16.msra.mxu0 %v5205_v18  ;;  %v6110_v18 = vld [vmem:[%s8968_s25] ss:$0 sm:$0xff]  ;;  %s5829_s25 = smov 64  }
  0x9f   : > { %v6011_v50 = vsub.f32 %v666_v12, %v708_v46  ;;  %v5217_v12 = vor.u32 %v5487_v8, %v5214_v10 }
  0xa1   : > { %v724_v51 = vmul.f32 %v6011_v50, %v6011_v50  ;;  %981 = vmatpush.bf16.msra.mxu1 %v5217_v12 }
  0xa3   : > { %v744_v55 = vsel %vm670_vm0, %v724_v51, 0.0 }
  0xa4   : > { %745 = vadd.xlane.f32.xlu2 %v744_v55 }
  0xa5   : > { %739 = vadd.xlane.f32.xlu0 %v738_v53  ;;  %733 = vadd.xlane.f32.xlu1 %v732_v54 }
  0xa6   : > { %982 = vmatpush.bf16.msra.mxu1 %v5209_v21 }
  0xad   : > { %742 = vadd.xlane.f32.xlu1 %v741_v57 }
 0x108   : > { %v728_v11 = vpop.xlane.xlu0 %727 }
 0x109   : > { %v750_v13 = vmul.f32 %v728_v11, %v5974_v20 }
 0x10b   : > { %v758_v17 = vadd.f32 1e-05, %v750_v13 }
 0x10d   : > { %5555 = vrsqrt.f32 %v758_v17  ;;  %vm772_vm3 = vweird.f32 %v758_v17 }
 0x10f   : > { %v737_v22 = vpop.xlane.xlu2 %736 }
 0x110   : > { %v753_v23 = vmul.f32 %v737_v22, %v5974_v20  ;;  %v731_v24 = vpop.xlane.xlu1 %730  ;;  %v694_v26 = vpop.xlane.xlu0 %693 }
 0x111   : > { %v751_v27 = vmul.f32 %v731_v24, %v5974_v20  ;;  %v709_v28 = vmul.f32 %v5974_v20, %v694_v26 }
 0x112   : > { %v761_v29 = vadd.f32 1e-05, %v753_v23 }
 0x113   : > { %v5556_v30 = vpop.eup %5555  ;;  %v759_v31 = vadd.f32 1e-05, %v751_v27  ;;  %v6076_v32 = vsub.f32 %v5989_v36, %v709_v28 }
 0x114   : > { %v767_v33 = vmul.f32 %v5556_v30, %v758_v17  ;;  %5557 = vrsqrt.f32 %v761_v29  ;;  %vm773_vm2 = vweird.f32 %v5556_v30  ;;  %vm802_vm7 = vweird.f32 %v761_v29 }
 0x115   : > { %5559 = vrsqrt.f32 %v759_v31  ;;  %v725_v34 = vmul.f32 %v6076_v32, %v6076_v32  ;;  %vm774_vm4 = vmor %vm772_vm3, %vm773_vm2  ;;  %vm782_vm5 = vweird.f32 %v759_v31 }
 0x116   : > { %v768_v38 = vmul.f32 %v5556_v30, %v767_v33 }
 0x117   : > { %v747_v41 = vsel %vm670_vm0, %v725_v34, 0.0  ;;  %v746_v10 = vpop.xlane.xlu2 %745 }
 0x118   : > { %v769_v42 = vmul.f32 0.5, %v768_v38  ;;  %v734_v43 = vpop.xlane.xlu1 %733  ;;  %748 = vadd.xlane.f32.xlu0 %v747_v41  ;;  %v740_v44 = vpop.xlane.xlu0 %739 }
 0x119   : > { %v752_v45 = vmul.f32 %v734_v43, %v5974_v20  ;;  %v754_v46 = vmul.f32 %v740_v44, %v5974_v20 }
 0x11a   : > { %v5558_v47 = vpop.eup %5557  ;;  %v770_v36 = vsub.f32 1.5, %v769_v42 }
 0x11b   : > { %v5560_v48 = vpop.eup %5559  ;;  %v797_v49 = vmul.f32 %v5558_v47, %v761_v29  ;;  %v760_v51 = vadd.f32 1e-05, %v752_v45  ;;  %v6083_v53 = vadd.f32 1e-05, %v754_v46  ;;  %vm803_vm8 = vweird.f32 %v5558_v47 }
 0x11c   : > { %v771_v54 = vmul.f32 %v5556_v30, %v770_v36  ;;  %v777_v55 = vmul.f32 %v5560_v48, %v759_v31  ;;  %vm783_vm6 = vweird.f32 %v5560_v48  ;;  %vm6098_vm10 = vmor %vm802_vm7, %vm803_vm8 }
 0x11d   : > { %v798_v56 = vmul.f32 %v5558_v47, %v797_v49  ;;  %5561 = vrsqrt.f32 %v760_v51  ;;  %vm784_vm9 = vmor %vm782_vm5, %vm783_vm6  ;;  %vm792_vm11 = vweird.f32 %v760_v51  ;;  %vm812_vm13 = vweird.f32 %v6083_v53 }
 0x11e   : > { %v778_v57 = vmul.f32 %v5560_v48, %v777_v55  ;;  %5563 = vrsqrt.f32 %v6083_v53  ;;  %v775_v59 = vsel %vm774_vm4, %v5556_v30, %v771_v54 }
 0x11f   : > { %v799_v58 = vmul.f32 0.5, %v798_v56  ;;  %v846_v2 = vmul.f32 %v775_v59, %v5977_v25 }
 0x120   : > { %v779_v60 = vmul.f32 0.5, %v778_v57  ;;  %v743_v61 = vpop.xlane.xlu1 %742 }
 0x121   : > { %v800_v62 = vsub.f32 1.5, %v799_v58  ;;  %v755_v63 = vmul.f32 %v743_v61, %v5974_v20  ;;  %v857_v15 = vmul.f32 %v6091_v4, %v846_v2  ;;  %v1543_v19 = vmul.f32 %v6096_v9, %v846_v2 }
 0x122   : > { %v780_v0 = vsub.f32 1.5, %v779_v60 }
 0x123   : > { %v5562_v1 = vpop.eup %5561  ;;  %v763_v3 = vadd.f32 1e-05, %v755_v63  ;;  %v801_v6 = vmul.f32 %v5558_v47, %v800_v62  ;;  %v868_v33 = vadd.f32 %v6110_v18, %v857_v15 }
 0x124   : > { %v5564_v5 = vpop.eup %5563  ;;  %v781_v7 = vmul.f32 %v5560_v48, %v780_v0  ;;  %v787_v8 = vmul.f32 %v5562_v1, %v760_v51  ;;  %vm793_vm12 = vweird.f32 %v5562_v1 }
 0x125   : > { %v807_v25 = vmul.f32 %v5564_v5, %v6083_v53  ;;  %5565 = vrsqrt.f32 %v763_v3  ;;  %v805_v16 = vsel %vm6098_vm10, %v5558_v47, %v801_v6  ;;  %vm813_vm14 = vweird.f32 %v5564_v5  ;;  %vm794_vm15 = vmor %vm792_vm11, %vm793_vm12 }
 0x126   : > { %v785_v11 = vsel %vm784_vm9, %v5560_v48, %v781_v7  ;;  %v788_v12 = vmul.f32 %v5562_v1, %v787_v8  ;;  %v849_v26 = vmul.f32 %v805_v16, %v5986_v35  ;;  %vm6127_vm1 = vmor %vm812_vm13, %vm813_vm14  ;;  %vm822_vm2 = vweird.f32 %v763_v3 }
 0x127   : > { %v847_v13 = vmul.f32 %v785_v11, %v5991_v37  ;;  %v808_v14 = vmul.f32 %v5564_v5, %v807_v25  ;;  %v6116_v37 = vld [vmem:[%s8863_s8] ss:$0 sm:$0xff]  ;;  %v756_v25 = vmul.f32 %v746_v10, %v5974_v20 }
 0x128   : > { %v789_v17 = vmul.f32 0.5, %v788_v12  ;;  %v1554_v34 = vadd.f32 %v6116_v37, %v1543_v19  ;;  %v1546_v47 = vmul.f32 %v6096_v9, %v849_v26  ;;  %v860_v60 = vmul.f32 %v6091_v4, %v849_v26  ;;  %v5348_v12 = vld [vmem:[%s8864_s9 + $0x30] sm:$0xf]  ;;  %v5350_v19 = vld [vmem:[%s8864_s9 + $0x38] sm:$0xf0] }
 0x129   : > { %v809_v21 = vmul.f32 0.5, %v808_v14  ;;  %v858_v22 = vmul.f32 %v6091_v4, %v847_v13  ;;  %v1544_v23 = vmul.f32 %v6096_v9, %v847_v13  ;;  %v764_v11 = vadd.f32 1e-05, %v756_v25  ;;  %v5516_v13 = vld [vmem:[%s8864_s9 + $0x34] sm:$0xf0] }
 0x12a   : > { %v790_v24 = vsub.f32 1.5, %v789_v17  ;;  %v871_v0 = vadd.f32 %v6110_v18, %v860_v60  ;;  %v5349_v14 = vor.u32 %v5516_v13, %v5348_v12  ;;  %v5515_v17 = vld [vmem:[%s8864_s9 + $0x34] sm:$0xf]  ;;  %v5508_v60 = vld [vmem:[%s8860_s5 + $0x78] sm:$0xff] }
 0x12b   : > { %v810_v27 = vsub.f32 1.5, %v809_v21  ;;  %v869_v28 = vadd.f32 %v6110_v18, %v858_v22  ;;  %v1555_v29 = vadd.f32 %v6116_v37, %v1544_v23  ;;  %v5566_v30 = vpop.eup %5565  ;;  %5567 = vrsqrt.f32 %v764_v11  ;;  %v5340_v21 = vld [vmem:[%s8864_s9 + $0x20] sm:$0xf]  ;;  %v5514_v22 = vld [vmem:[%s8864_s9 + $0x24] sm:$0xf0]  ;;  %1493 = vmatpush.bf16.msra.mxu3 %v5508_v60 }
 0x12c   : > { %v791_v31 = vmul.f32 %v5562_v1, %v790_v24  ;;  %v817_v41 = vmul.f32 %v5566_v30, %v763_v3  ;;  %vm823_vm3 = vweird.f32 %v5566_v30  ;;  %1630 = vmatpush.bf16.msrb.mxu0 %v5349_v14  ;;  %v5353_v23 = vor.u32 %v5515_v17, %v5350_v19  ;;  %v888_v14 = vld [vmem:[%s8973_s2] sm:$0x3]  ;;  %v5496_v17 = vld [vmem:[%s8860_s5 + $0x18] sm:$0xff]  ;;  %s655_s2 = scalar_lea.vmem %s8874_s19, %s9198_s22 }
 0x12d   : > { %v811_v38 = vmul.f32 %v5564_v5, %v810_v27  ;;  %v876_v35 = vpack.c.bf16 %v869_v28, %v868_v33  ;;  %v6131_v44 = vpack.c.bf16 %v1555_v29, %v1554_v34  ;;  %vm824_vm4 = vmor %vm822_vm2, %vm823_vm3  ;;  %v5341_v27 = vor.u32 %v5514_v22, %v5340_v21  ;;  %v5504_v19 = vld [vmem:[%s8860_s5 + $0x58] sm:$0xff] }
 0x12e   : > { %v795_v42 = vsel %vm794_vm15, %v5562_v1, %v791_v31  ;;  %v818_v46 = vmul.f32 %v5566_v30, %v817_v41  ;;  %1659 = vmatpush.bf16.msrb.mxu1 %v5353_v23  ;;  %v5342_v31 = vld [vmem:[%s8864_s9 + $0x28] sm:$0xf0]  ;;  %v5512_v41 = vld [vmem:[%s8864_s9 + $0x14] sm:$0xf0]  ;;  %vm832_vm5 = vweird.f32 %v764_v11 }
 0x12f   : > { %v848_v45 = vmul.f32 %v795_v42, %v5997_v40  ;;  %5234 = vmatmul.msk.bf16.vlgmr.msra.gmra.mxu0 %vm670_vm0, %v876_v35  ;;  %5238 = vmatmul.msk.bf16.vlgmr.msra.gmra.mxu1 %vm670_vm0, %v876_v35  ;;  %v815_v36 = vsel %vm6127_vm1, %v5564_v5, %v811_v38  ;;  %v1557_v40 = vadd.f32 %v6116_v37, %v1546_v47  ;;  %v5332_v38 = vld [vmem:[%s8864_s9 + $0x10] sm:$0xf]  ;;  %v5511_v42 = vld [vmem:[%s8864_s9 + $0x14] sm:$0xf] }
 0x130   : > { %v819_v48 = vmul.f32 0.5, %v818_v46  ;;  %v850_v54 = vmul.f32 %v815_v36, %v5995_v39  ;;  %1631 = vmatpush.bf16.msrb.mxu0 %v5341_v27  ;;  %v5333_v35 = vor.u32 %v5512_v41, %v5332_v38  ;;  %v5503_v27 = vld [vmem:[%s8860_s5 + $0x50] sm:$0xff] }
 0x131   : > { %v1545_v49 = vmul.f32 %v6096_v9, %v848_v45  ;;  %v859_v57 = vmul.f32 %v6091_v4, %v848_v45  ;;  %v5568_v15 = vpop.eup %5567  ;;  %v5334_v45 = vld [vmem:[%s8864_s9 + $0x18] sm:$0xf0] }
 0x132   : > { %v820_v51 = vsub.f32 1.5, %v819_v48  ;;  %v1547_v61 = vmul.f32 %v6096_v9, %v850_v54  ;;  %v861_v5 = vmul.f32 %v6091_v4, %v850_v54  ;;  %v827_v16 = vmul.f32 %v5568_v15, %v764_v11 }
 0x133   : > { %v1556_v53 = vadd.f32 %v6116_v37, %v1545_v49  ;;  %v870_v62 = vadd.f32 %v6110_v18, %v859_v57  ;;  %v5337_v46 = vor.u32 %v5511_v42, %v5334_v45  ;;  %vm833_vm6 = vweird.f32 %v5568_v15  ;;  %v5326_v57 = vld [vmem:[%s8864_s9 + $0x8] sm:$0xf0]  ;;  %v5501_v45 = vld [vmem:[%s8860_s5 + $0x40] sm:$0xff] }
 0x134   : > { %v821_v55 = vmul.f32 %v5566_v30, %v820_v51  ;;  %v1558_v39 = vadd.f32 %v6116_v37, %v1547_v61  ;;  %v872_v7 = vadd.f32 %v6110_v18, %v861_v5  ;;  %v828_v24 = vmul.f32 %v5568_v15, %v827_v16  ;;  %1632 = vmatpush.bf16.msrb.mxu0 %v5333_v35  ;;  %vm6202_vm7 = vmor %vm832_vm5, %vm833_vm6  ;;  %v5324_v51 = vld [vmem:[%s8864_s9] sm:$0xf] }
 0x135   : > { %v6143_v56 = vpack.c.bf16 %v1557_v40, %v1556_v53  ;;  %v877_v2 = vpack.c.bf16 %v871_v0, %v870_v62  ;;  %v5510_v53 = vld [vmem:[%s8864_s9 + $0x4] sm:$0xf0]  ;;  %v5493_v35 = vld [vmem:[%s8860_s5] sm:$0xff] }
 0x136   : > { %v825_v58 = vsel %vm824_vm4, %v5566_v30, %v821_v55  ;;  %v5513_v30 = vld [vmem:[%s8864_s9 + $0x24] sm:$0xf]  ;;  %v829_v33 = vmul.f32 0.5, %v828_v24  ;;  %v5325_v54 = vor.u32 %v5510_v53, %v5324_v51 }
 0x137   : > { %v851_v59 = vmul.f32 %v825_v58, %v6015_v52  ;;  %v5345_v34 = vor.u32 %v5513_v30, %v5342_v31  ;;  %v5509_v55 = vld [vmem:[%s8864_s9 + $0x4] sm:$0xf]  ;;  %v5494_v30 = vld [vmem:[%s8860_s5 + $0x8] sm:$0xff] }
 0x138   : > { %v830_v43 = vsub.f32 1.5, %v829_v33  ;;  %v5329_v58 = vor.u32 %v5509_v55, %v5326_v57  ;;  %1633 = vmatpush.bf16.msrb.mxu0 %v5325_v54  ;;  %v5502_v31 = vld [vmem:[%s8860_s5 + $0x48] sm:$0xff] }
 0x139   : > { %v1548_v63 = vmul.f32 %v6096_v9, %v851_v59  ;;  %v862_v52 = vmul.f32 %v6091_v4, %v851_v59  ;;  %1660 = vmatpush.bf16.msrb.mxu1 %v5345_v34  ;;  %v5500_v59 = vld [vmem:[%s8860_s5 + $0x38] sm:$0xff] }
 0x13a   : > { %v831_v36 = vmul.f32 %v5568_v15, %v830_v43  ;;  %1464 = vmatpush.bf16.msra.mxu2 %v5500_v59 }
 0x13b   : > { %v1559_v1 = vadd.f32 %v6116_v37, %v1548_v63  ;;  %v873_v6 = vadd.f32 %v6110_v18, %v862_v52 }
 0x13c   : > { %v835_v61 = vsel %vm6202_vm7, %v5568_v15, %v831_v36 }
 0x13d   : > { %v6154_v3 = vpack.c.bf16 %v1559_v1, %v1558_v39  ;;  %v878_v8 = vpack.c.bf16 %v873_v6, %v872_v7  ;;  %1661 = vmatpush.bf16.msrb.mxu1 %v5337_v46  ;;  %v852_v0 = vmul.f32 %v835_v61, %v6011_v50  ;;  %v5499_v1 = vld [vmem:[%s8860_s5 + $0x30] sm:$0xff]  ;;  %v5498_v7 = vld [vmem:[%s8860_s5 + $0x28] sm:$0xff] }
 0x13e   : > { %1465 = vmatpush.bf16.msra.mxu2 %v5499_v1 }
 0x13f   : > { %5235 = vmatmul.msk.bf16.gmra.mxu0 %vm670_vm0, %v877_v2  ;;  %5239 = vmatmul.msk.bf16.gmra.mxu1 %vm670_vm0, %v877_v2  ;;  %v5507_v2 = vld [vmem:[%s8860_s5 + $0x70] sm:$0xff]  ;;  %v863_v6 = vmul.f32 %v6091_v4, %v852_v0  ;;  %v1549_v50 = vmul.f32 %v6096_v9, %v852_v0 }
 0x140   : > { %1494 = vmatpush.bf16.msra.mxu3 %v5507_v2 }
 0x141   : > { %1662 = vmatpush.bf16.msrb.mxu1 %v5329_v58  ;;  %v1560_v12 = vadd.f32 %v6116_v37, %v1549_v50 }
 0x142   : > { %1466 = vmatpush.bf16.msra.mxu2 %v5498_v7 }
 0x14f   : > { %5236 = vmatmul.msk.bf16.gmra.mxu0 %vm670_vm0, %v878_v8  ;;  %5240 = vmatmul.msk.bf16.gmra.mxu1 %vm670_vm0, %v878_v8  ;;  %v5506_v8 = vld [vmem:[%s8860_s5 + $0x68] sm:$0xff] }
 0x150   : > { %1495 = vmatpush.bf16.msra.mxu3 %v5506_v8 }
 0x18b   : > { %v749_v26 = vpop.xlane.xlu0 %748 }
 0x18c   : > { %v757_v28 = vmul.f32 %v749_v26, %v5974_v20  ;;  %v5495_v26 = vld [vmem:[%s8860_s5 + $0x10] sm:$0xff] }
 0x18e   : > { %v765_v29 = vadd.f32 1e-05, %v757_v28 }
 0x190   : > { %5569 = vrsqrt.f32 %v765_v29  ;;  %vm842_vm9 = vweird.f32 %v765_v29 }
 0x196   : > { %v5570_v47 = vpop.eup %5569 }
 0x197   : > { %v837_v48 = vmul.f32 %v5570_v47, %v765_v29  ;;  %vm843_vm8 = vweird.f32 %v5570_v47 }
 0x198   : > { %vm844_vm10 = vmor %vm842_vm9, %vm843_vm8 }
 0x199   : > { %v838_v40 = vmul.f32 %v5570_v47, %v837_v48 }
 0x19b   : > { %v839_v62 = vmul.f32 0.5, %v838_v40 }
 0x19d   : > { %v840_v63 = vsub.f32 1.5, %v839_v62 }
 0x19f   : > { %v841_v39 = vmul.f32 %v5570_v47, %v840_v63 }
 0x1a1   : > { %v845_v52 = vsel %vm844_vm10, %v5570_v47, %v841_v39 }
 0x1a2   : > { %v853_v5 = vmul.f32 %v845_v52, %v6076_v32  ;;  %v874_v32 = vadd.f32 %v6110_v18, %v863_v6 }
 0x1a4   : > { %v864_v10 = vmul.f32 %v6091_v4, %v853_v5  ;;  %v1550_v25 = vmul.f32 %v6096_v9, %v853_v5  ;;  %v5497_v4 = vld [vmem:[%s8860_s5 + $0x20] sm:$0xff] }
 0x1a5   : > { %v5505_v9 = vld [vmem:[%s8860_s5 + $0x60] sm:$0xff]  ;;  %1467 = vmatpush.bf16.msra.mxu2 %v5497_v4 }
 0x1a6   : > { %v875_v11 = vadd.f32 %v6110_v18, %v864_v10  ;;  %v1561_v13 = vadd.f32 %v6116_v37, %v1550_v25  ;;  %1496 = vmatpush.bf16.msra.mxu3 %v5505_v9  ;;  %v6261_v18 = vperm.slane %v888_v14, 0  ;;  %v6263_v37 = vperm.slane %v888_v14, 1 }
 0x1a8   : > { %v879_v15 = vpack.c.bf16 %v875_v11, %v874_v32  ;;  %v6257_v16 = vpack.c.bf16 %v1561_v13, %v1560_v12 }
 0x1a9   : > { %1468 = vmatpush.bf16.msra.mxu2 %v5496_v17 }
 0x1aa   : > { %5237 = vmatmul.msk.bf16.gmra.mxu0 %vm670_vm0, %v879_v15  ;;  %5241 = vmatmul.msk.bf16.gmra.mxu1 %vm670_vm0, %v879_v15 }
 0x1ab   : > { %1497 = vmatpush.bf16.msra.mxu3 %v5504_v19 }
 0x1ac   : > { %v955_v21 = vpop.f32.mrf.mxu0  ;;  %v984_v22 = vpop.f32.mrf.mxu1 }
 0x1ad   : > { %v6272_v23 = vadd.f32 %v955_v21, %v6261_v18  ;;  %v6275_v24 = vadd.f32 %v984_v22, %v6263_v37  ;;  %1469 = vmatpush.bf16.msra.mxu2 %v5495_v26 }
 0x1af   : > { %v5242_v28 = vmul.f32 -1.442695, %v6272_v23  ;;  %v5243_v29 = vmul.f32 -1.442695, %v6275_v24  ;;  %1498 = vmatpush.bf16.msra.mxu3 %v5503_v27 }
 0x1b1   : > { %5571 = vpow2.f32 %v5242_v28  ;;  %1470 = vmatpush.bf16.msra.mxu2 %v5494_v30 }
 0x1b2   : > { %5573 = vpow2.f32 %v5243_v29 }
 0x1b3   : > { %1499 = vmatpush.bf16.msra.mxu3 %v5502_v31 }
 0x1b4   : > { %v957_v33 = vpop.f32.mrf.mxu0  ;;  %v986_v34 = vpop.f32.mrf.mxu1 }
 0x1b5   : > { %v6292_v38 = vadd.f32 %v957_v33, %v6261_v18  ;;  %v6295_v41 = vadd.f32 %v986_v34, %v6263_v37  ;;  %1471 = vmatpush.bf16.msra.mxu2 %v5493_v35 }
 0x1b7   : > { %v5572_v42 = vpop.eup %5571  ;;  %v5244_v43 = vmul.f32 -1.442695, %v6292_v38  ;;  %v5245_v36 = vmul.f32 -1.442695, %v6295_v41  ;;  %1500 = vmatpush.bf16.msra.mxu3 %v5501_v45 }
 0x1b8   : > { %v5574_v46 = vpop.eup %5573  ;;  %v6304_v47 = vadd.f32 1.0, %v5572_v42 }
 0x1b9   : > { %v6307_v48 = vadd.f32 1.0, %v5574_v46  ;;  %5575 = vpow2.f32 %v5244_v43 }
 0x1ba   : > { %5354 = vmatmul.msk.bf16.vlgmr.msrb.gmra.mxu0 %vm670_vm0, %v6131_v44  ;;  %5358 = vmatmul.msk.bf16.vlgmr.msrb.gmra.mxu1 %vm670_vm0, %v6131_v44  ;;  %5577 = vrcp.f32 %v6304_v47  ;;  %v1077_v50 = vand.u32 2147483647, %v6304_v47  ;;  %v1079_v11 = vand.u32 2147483648, %v6304_v47  ;;  %vm1073_vm11 = vweird.f32 %v6304_v47 }
 0x1bb   : > { %5579 = vrcp.f32 %v6307_v48  ;;  %vm1088_vm14 = vweird.f32 %v6307_v48  ;;  %v1092_v9 = vand.u32 2147483647, %v6307_v48 }
 0x1bc   : > { %5581 = vpow2.f32 %v5245_v36  ;;  %v960_v49 = vpop.f32.mrf.mxu0  ;;  %v989_v51 = vpop.f32.mrf.mxu1  ;;  %vm6362_vm13 = vcmp.eq.f32.partialorder %v1077_v50, 8.507059e+37  ;;  %v1080_v28 = vor.u32 1.1754944e-38, %v1079_v11 }
 0x1bd   : > { %v6316_v53 = vadd.f32 %v960_v49, %v6261_v18  ;;  %v6319_v40 = vadd.f32 %v989_v51, %v6263_v37  ;;  %vm6399_vm3 = vcmp.eq.f32.partialorder %v1092_v9, 8.507059e+37 }
 0x1bf   : > { %v5576_v54 = vpop.eup %5575  ;;  %v5246_v55 = vmul.f32 -1.442695, %v6316_v53  ;;  %v5247_v44 = vmul.f32 -1.442695, %v6319_v40 }
 0x1c0   : > { %v6323_v57 = vpop.eup %5577  ;;  %v6325_v58 = vadd.f32 1.0, %v5576_v54 }
 0x1c1   : > { %v6327_v59 = vpop.eup %5579  ;;  %v1069_v60 = vmul.f32 %v6323_v57, %v6304_v47  ;;  %5583 = vpow2.f32 %v5246_v55  ;;  %vm1074_vm12 = vweird.f32 %v6323_v57 }
 0x1c2   : > { %v5582_v61 = vpop.eup %5581  ;;  %5585 = vrcp.f32 %v6325_v58  ;;  %v1084_v1 = vmul.f32 %v6327_v59, %v6307_v48  ;;  %v1107_v26 = vand.u32 2147483647, %v6325_v58  ;;  %vm6374_vm15 = vmor %vm1073_vm11, %vm1074_vm12  ;;  %v1109_v34 = vand.u32 2147483648, %v6325_v58 }
 0x1c3   : > { %v1070_v62 = vsub.f32 1.0, %v1069_v60  ;;  %v6332_v63 = vadd.f32 1.0, %v5582_v61  ;;  %5587 = vpow2.f32 %v5247_v44  ;;  %vm1089_vm2 = vweird.f32 %v6327_v59 }
 0x1c4   : > { %v962_v0 = vpop.f32.mrf.mxu0  ;;  %v991_v39 = vpop.f32.mrf.mxu1  ;;  %v1085_v12 = vsub.f32 1.0, %v1084_v1  ;;  %vm1103_vm4 = vweird.f32 %v6325_v58  ;;  %vm6406_vm5 = vcmp.eq.f32.partialorder %v1107_v26, 8.507059e+37  ;;  %vm6428_vm7 = vmor %vm1088_vm14, %vm1089_vm2 }
 0x1c5   : > { %v6337_v2 = vadd.f32 %v962_v0, %v6261_v18  ;;  %v6340_v52 = vadd.f32 %v991_v39, %v6263_v37  ;;  %v1071_v5 = vmul.f32 %v6323_v57, %v1070_v62  ;;  %5589 = vrcp.f32 %v6332_v63 }
 0x1c6   : > { %v1086_v29 = vmul.f32 %v6327_v59, %v1085_v12  ;;  %vm1118_vm9 = vweird.f32 %v6332_v63 }
 0x1c7   : > { %v5584_v6 = vpop.eup %5583  ;;  %v5248_v7 = vmul.f32 -1.442695, %v6337_v2  ;;  %v5249_v25 = vmul.f32 -1.442695, %v6340_v52  ;;  %v1072_v14 = vadd.f32 %v6323_v57, %v1071_v5 }
 0x1c8   : > { %v6346_v8 = vpop.eup %5585  ;;  %v6348_v10 = vadd.f32 1.0, %v5584_v6  ;;  %v1087_v54 = vadd.f32 %v6327_v59, %v1086_v29 }
 0x1c9   : > { %v5588_v32 = vpop.eup %5587  ;;  %5591 = vpow2.f32 %v5248_v7  ;;  %v1099_v13 = vmul.f32 %v6346_v8, %v6325_v58  ;;  %v1076_v33 = vsel %vm6374_vm15, %v6323_v57, %v1072_v14  ;;  %vm1104_vm1 = vweird.f32 %v6346_v8 }
 0x1ca   : > { %5355 = vmatmul.msk.bf16.gmra.mxu0 %vm670_vm0, %v6143_v56  ;;  %5359 = vmatmul.msk.bf16.gmra.mxu1 %vm670_vm0, %v6143_v56  ;;  %5593 = vrcp.f32 %v6348_v10  ;;  %v1094_v56 = vand.u32 2147483648, %v6307_v48  ;;  %v6371_v17 = vadd.f32 1.0, %v5588_v32  ;;  %v1081_v60 = vsel %vm6362_vm13, %v1080_v28, %v1076_v33  ;;  %vm1105_vm6 = vmor %vm1103_vm4, %vm1104_vm1 }
 0x1cb   : > { %v6369_v15 = vpop.eup %5589  ;;  %5595 = vpow2.f32 %v5249_v25  ;;  %v1100_v22 = vsub.f32 1.0, %v1099_v13  ;;  %v1110_v58 = vor.u32 1.1754944e-38, %v1109_v34  ;;  %v1308_v11 = vmul.f32 %v1081_v60, %v6272_v23 }
 0x1cc   : > { %v965_v19 = vpop.f32.mrf.mxu0  ;;  %v994_v21 = vpop.f32.mrf.mxu1  ;;  %5597 = vrcp.f32 %v6371_v17  ;;  %v1114_v46 = vmul.f32 %v6369_v15, %v6332_v63  ;;  %v1095_v6 = vor.u32 1.1754944e-38, %v1094_v56  ;;  %v1091_v48 = vsel %vm6428_vm7, %v6327_v59, %v1087_v54 }
 0x1cd   : > { %v6380_v30 = vadd.f32 %v965_v19, %v6261_v18  ;;  %v6383_v31 = vadd.f32 %v994_v21, %v6263_v37  ;;  %v1101_v45 = vmul.f32 %v6346_v8, %v1100_v22  ;;  %vm1119_vm8 = vweird.f32 %v6369_v15 }
 0x1ce   : > { %v1115_v61 = vsub.f32 1.0, %v1114_v46  ;;  %v1122_v59 = vand.u32 2147483647, %v6332_v63  ;;  %vm1133_vm10 = vweird.f32 %v6348_v10  ;;  %vm6463_vm11 = vmor %vm1118_vm9, %vm1119_vm8  ;;  %v1096_v28 = vsel %vm6399_vm3, %v1095_v6, %v1091_v48 }
 0x1cf   : > { %v5592_v42 = vpop.eup %5591  ;;  %v5250_v43 = vmul.f32 -1.442695, %v6380_v30  ;;  %v5251_v35 = vmul.f32 -1.442695, %v6383_v31  ;;  %v1102_v44 = vadd.f32 %v6346_v8, %v1101_v45  ;;  %v1139_v29 = vand.u32 2147483648, %v6348_v10 }
 0x1d0   : > { %v6396_v47 = vpop.eup %5593  ;;  %v6403_v49 = vadd.f32 1.0, %v5592_v42  ;;  %v1116_v32 = vmul.f32 %v6369_v15, %v1115_v61  ;;  %vm1123_vm13 = vcmp.eq.f32.partialorder %v1122_v59, 8.507059e+37  ;;  %vm1148_vm15 = vweird.f32 %v6371_v17 }
 0x1d1   : > { %v1129_v55 = vmul.f32 %v6396_v47, %v6348_v10  ;;  %5599 = vpow2.f32 %v5250_v43  ;;  %v5596_v57 = vpop.eup %5595  ;;  %v1106_v39 = vsel %vm1105_vm6, %v6346_v8, %v1102_v44  ;;  %v1124_v8 = vand.u32 2147483648, %v6332_v63 }
 0x1d2   : > { %5601 = vrcp.f32 %v6403_v49  ;;  %v6419_v0 = vadd.f32 1.0, %v5596_v57  ;;  %v6422_v1 = vpop.eup %5597  ;;  %v1111_v25 = vsel %vm6406_vm5, %v1110_v58, %v1106_v39  ;;  %v1117_v9 = vadd.f32 %v6369_v15, %v1116_v32 }
 0x1d3   : > { %v1130_v62 = vsub.f32 1.0, %v1129_v55  ;;  %5603 = vpow2.f32 %v5251_v35  ;;  %v1144_v12 = vmul.f32 %v6422_v1, %v6371_v17  ;;  %v1310_v4 = vmul.f32 %v1111_v25, %v6292_v38 }
 0x1d4   : > { %v967_v50 = vpop.f32.mrf.mxu0  ;;  %v996_v7 = vpop.f32.mrf.mxu1  ;;  %5605 = vrcp.f32 %v6419_v0  ;;  %v1137_v63 = vand.u32 2147483647, %v6348_v10  ;;  %v1121_v33 = vsel %vm6463_vm11, %v6369_v15, %v1117_v9  ;;  %v1125_v43 = vor.u32 1.1754944e-38, %v1124_v8 }
 0x1d5   : > { %v6444_v13 = vadd.f32 %v967_v50, %v6261_v18  ;;  %v6447_v14 = vadd.f32 %v996_v7, %v6263_v37  ;;  %v1131_v56 = vmul.f32 %v6396_v47, %v1130_v62  ;;  %v1324_v38 = vpack.c.bf16 %v1310_v4, %v1308_v11 }
 0x1d6   : > { %v1145_v34 = vsub.f32 1.0, %v1144_v12  ;;  %vm1134_vm12 = vweird.f32 %v6396_v47  ;;  %v1309_v15 = vmul.f32 %v1096_v28, %v6275_v24  ;;  %v1126_v46 = vsel %vm1123_vm13, %v1125_v43, %v1121_v33 }
 0x1d7   : > { %v5600_v23 = vpop.eup %5599  ;;  %v5252_v22 = vmul.f32 -1.442695, %v6444_v13  ;;  %v5253_v42 = vmul.f32 -1.442695, %v6447_v14  ;;  %1472 = vmatmul.bf16.vlgmr.msra.gmra.mxu2 %v1324_v38  ;;  %v1132_v35 = vadd.f32 %v6396_v47, %v1131_v56  ;;  %vm6487_vm14 = vcmp.eq.f32.partialorder %v1137_v63, 8.507059e+37  ;;  %vm6495_vm1 = vmor %vm1133_vm10, %vm1134_vm12 }
 0x1d8   : > { %v6455_v19 = vpop.eup %5601  ;;  %v6458_v21 = vadd.f32 1.0, %v5600_v23  ;;  %v1140_v54 = vor.u32 1.1754944e-38, %v1139_v29  ;;  %v1146_v24 = vmul.f32 %v6422_v1, %v1145_v34  ;;  %v1152_v44 = vand.u32 2147483647, %v6371_v17 }
 0x1d9   : > { %v5604_v27 = vpop.eup %5603  ;;  %v1167_v57 = vand.u32 2147483647, %v6403_v49  ;;  %v1136_v60 = vsel %vm6495_vm1, %v6396_v47, %v1132_v35  ;;  %v1311_v58 = vmul.f32 %v1126_v46, %v6295_v41  ;;  %v1169_v10 = vand.u32 2147483648, %v6403_v49 }
 0x1da   : > { %5356 = vmatmul.msk.bf16.gmra.mxu0 %vm670_vm0, %v6154_v3  ;;  %5360 = vmatmul.msk.bf16.gmra.mxu1 %vm670_vm0, %v6154_v3  ;;  %5607 = vrcp.f32 %v6458_v21  ;;  %v6482_v45 = vadd.f32 1.0, %v5604_v27  ;;  %v1159_v3 = vmul.f32 %v6455_v19, %v6403_v49  ;;  %v5606_v36 = vpop.eup %5605  ;;  %vm1149_vm2 = vweird.f32 %v6422_v1 }
 0x1db   : > { %5609 = vpow2.f32 %v5252_v22  ;;  %v1154_v39 = vand.u32 2147483648, %v6371_v17  ;;  %vm1163_vm3 = vweird.f32 %v6403_v49  ;;  %v1174_v5 = vmul.f32 %v5606_v36, %v6419_v0  ;;  %vm6538_vm8 = vmor %vm1148_vm15, %vm1149_vm2 }
 0x1dc   : > { %5611 = vrcp.f32 %v6482_v45  ;;  %v1160_v61 = vsub.f32 1.0, %v1159_v3  ;;  %v1325_v50 = vpack.c.bf16 %v1311_v58, %v1309_v15  ;;  %vm1164_vm4 = vweird.f32 %v6455_v19 }
 0x1dd   : > { %5613 = vpow2.f32 %v5253_v42  ;;  %v1141_v7 = vsel %vm6487_vm14, %v1140_v54, %v1136_v60  ;;  %v1147_v25 = vadd.f32 %v6422_v1, %v1146_v24  ;;  %vm6520_vm5 = vcmp.eq.f32.partialorder %v1167_v57, 8.507059e+37  ;;  %vm1165_vm6 = vmor %vm1163_vm3, %vm1164_vm4 }
 0x1de   : > { %v1161_v47 = vmul.f32 %v6455_v19, %v1160_v61  ;;  %v1175_v8 = vsub.f32 1.0, %v1174_v5  ;;  %1501 = vmatmul.bf16.vlgmr.msra.gmra.mxu3 %v1325_v50  ;;  %v1170_v4 = vor.u32 1.1754944e-38, %v1169_v10  ;;  %v1184_v9 = vand.u32 2147483648, %v6419_v0 }
 0x1df   : > { %vm1179_vm7 = vweird.f32 %v5606_v36  ;;  %v1182_v22 = vand.u32 2147483647, %v6419_v0  ;;  %v1312_v38 = vmul.f32 %v1141_v7, %v6316_v53  ;;  %v1151_v28 = vsel %vm6538_vm8, %v6422_v1, %v1147_v25 }
 0x1e0   : > { %v6507_v62 = vpop.eup %5607  ;;  %v1162_v12 = vadd.f32 %v6455_v19, %v1161_v47  ;;  %v1176_v59 = vmul.f32 %v5606_v36, %v1175_v8  ;;  %vm1178_vm9 = vweird.f32 %v6419_v0  ;;  %v1185_v33 = vor.u32 1.1754944e-38, %v1184_v9 }
 0x1e1   : > { %v1189_v6 = vmul.f32 %v6507_v62, %v6458_v21  ;;  %v5610_v41 = vpop.eup %5609  ;;  %vm1180_vm10 = vmor %vm1178_vm9, %vm1179_vm7  ;;  %vm1183_vm11 = vcmp.eq.f32.partialorder %v1182_v22, 8.507059e+37  ;;  %vm1153_vm12 = vcmp.eq.f32.partialorder %v1152_v44, 8.507059e+37  ;;  %v1197_v35 = vand.u32 2147483647, %v6458_v21 }
 0x1e2   : > { %v6524_v11 = vpop.eup %5611  ;;  %v6526_v48 = vadd.f32 1.0, %v5610_v41  ;;  %v1166_v49 = vsel %vm1165_vm6, %v6455_v19, %v1162_v12  ;;  %v1177_v63 = vadd.f32 %v5606_v36, %v1176_v59  ;;  %v1155_v19 = vor.u32 1.1754944e-38, %v1154_v39 }
 0x1e3   : > { %v5614_v23 = vpop.eup %5613  ;;  %v1190_v56 = vsub.f32 1.0, %v1189_v6  ;;  %v1171_v53 = vsel %vm6520_vm5, %v1170_v4, %v1166_v49  ;;  %v1204_v17 = vmul.f32 %v6524_v11, %v6482_v45  ;;  %vm1194_vm13 = vweird.f32 %v6507_v62 }
 0x1e4   : > { %5615 = vrcp.f32 %v6526_v48  ;;  %v6543_v27 = vadd.f32 1.0, %v5614_v23  ;;  %v1314_v29 = vmul.f32 %v1171_v53, %v6337_v2  ;;  %v1181_v42 = vsel %vm1180_vm10, %v5606_v36, %v1177_v63 }
 0x1e5   : > { %v1191_v34 = vmul.f32 %v6507_v62, %v1190_v56  ;;  %v1186_v43 = vsel %vm1183_vm11, %v1185_v33, %v1181_v42  ;;  %v1156_v0 = vsel %vm1153_vm12, %v1155_v19, %v1151_v28  ;;  %v1205_v15 = vsub.f32 1.0, %v1204_v17 }
 0x1e6   : > { %5617 = vrcp.f32 %v6543_v27  ;;  %v1326_v1 = vpack.c.bf16 %v1314_v29, %v1312_v38  ;;  %v1315_v46 = vmul.f32 %v1186_v43, %v6340_v52  ;;  %v1313_v54 = vmul.f32 %v1156_v0, %v6319_v40 }
 0x1e7   : > { %v1192_v3 = vadd.f32 %v6507_v62, %v1191_v34  ;;  %v1199_v55 = vand.u32 2147483648, %v6458_v21  ;;  %vm1193_vm14 = vweird.f32 %v6458_v21  ;;  %vm6569_vm15 = vcmp.eq.f32.partialorder %v1197_v35, 8.507059e+37 }
 0x1e8   : > { %1477 = vmatmul.bf16.gmra.mxu2 %v1326_v1  ;;  %vm6574_vm1 = vmor %vm1193_vm14, %vm1194_vm13  ;;  %v1206_v57 = vmul.f32 %v6524_v11, %v1205_v15  ;;  %v1327_v60 = vpack.c.bf16 %v1315_v46, %v1313_v54  ;;  %v1227_v40 = vand.u32 2147483647, %v6526_v48  ;;  %v1229_v58 = vand.u32 2147483648, %v6526_v48 }
 0x1e9   : > { %v1196_v21 = vsel %vm6574_vm1, %v6507_v62, %v1192_v3  ;;  %v1200_v39 = vor.u32 1.1754944e-38, %v1199_v55  ;;  %vm1209_vm3 = vweird.f32 %v6524_v11  ;;  %v1214_v5 = vand.u32 2147483648, %v6482_v45 }
 0x1ea   : > { %5357 = vmatmul.msk.bf16.gmra.mxu0 %vm670_vm0, %v6257_v16  ;;  %5361 = vmatmul.msk.bf16.gmra.mxu1 %vm670_vm0, %v6257_v16  ;;  %v5616_v2 = vpop.eup %5615  ;;  %vm1223_vm4 = vweird.f32 %v6526_v48  ;;  %v1244_v47 = vand.u32 2147483648, %v6543_v27  ;;  %v1207_v62 = vadd.f32 %v6524_v11, %v1206_v57  ;;  %v1230_v7 = vor.u32 1.1754944e-38, %v1229_v58 }
 0x1eb   : > { %v1219_v36 = vmul.f32 %v5616_v2, %v6526_v48  ;;  %vm1224_vm2 = vweird.f32 %v5616_v2  ;;  %v1201_v41 = vsel %vm6569_vm15, %v1200_v39, %v1196_v21  ;;  %v1242_v25 = vand.u32 2147483647, %v6543_v27 }
 0x1ec   : > { %v5618_v51 = vpop.eup %5617  ;;  %vm1225_vm6 = vmor %vm1223_vm4, %vm1224_vm2  ;;  %vm1228_vm7 = vcmp.eq.f32.partialorder %v1227_v40, 8.507059e+37  ;;  %vm1238_vm8 = vweird.f32 %v6543_v27  ;;  %vm1208_vm9 = vweird.f32 %v6482_v45  ;;  %v1212_v48 = vand.u32 2147483647, %v6482_v45 }
 0x1ed   : > { %v1220_v24 = vsub.f32 1.0, %v1219_v36  ;;  %v1234_v52 = vmul.f32 %v5618_v51, %v6543_v27  ;;  %vm1239_vm5 = vweird.f32 %v5618_v51  ;;  %v1316_v4 = vmul.f32 %v1201_v41, %v6380_v30  ;;  %vm1210_vm11 = vmor %vm1208_vm9, %vm1209_vm3 }
 0x1ee   : > { %1506 = vmatmul.bf16.gmra.mxu3 %v1327_v60  ;;  %vm1240_vm10 = vmor %vm1238_vm8, %vm1239_vm5  ;;  %v1245_v56 = vor.u32 1.1754944e-38, %v1244_v47  ;;  %v1211_v59 = vsel %vm1210_vm11, %v6524_v11, %v1207_v62  ;;  %vm1243_vm12 = vcmp.eq.f32.partialorder %v1242_v25, 8.507059e+37  ;;  %v1215_v22 = vor.u32 1.1754944e-38, %v1214_v5 }
 0x1ef   : > { %v1221_v61 = vmul.f32 %v5616_v2, %v1220_v24  ;;  %v1235_v10 = vsub.f32 1.0, %v1234_v52  ;;  %vm1213_vm13 = vcmp.eq.f32.partialorder %v1212_v48, 8.507059e+37 }
 0x1f0   : > { %v1216_v45 = vsel %vm1213_vm13, %v1215_v22, %v1211_v59 }
 0x1f1   : > { %v1222_v6 = vadd.f32 %v5616_v2, %v1221_v61  ;;  %v1236_v50 = vmul.f32 %v5618_v51, %v1235_v10  ;;  %v1317_v30 = vmul.f32 %v1216_v45, %v6383_v31 }
 0x1f3   : > { %v1226_v32 = vsel %vm1225_vm6, %v5616_v2, %v1222_v6  ;;  %v1237_v8 = vadd.f32 %v5618_v51, %v1236_v50 }
 0x1f4   : > { %v1231_v12 = vsel %vm1228_vm7, %v1230_v7, %v1226_v32 }
 0x1f5   : > { %v1318_v9 = vmul.f32 %v1231_v12, %v6444_v13  ;;  %v1241_v23 = vsel %vm1240_vm10, %v5618_v51, %v1237_v8 }
 0x1f6   : > { %v1246_v26 = vsel %vm1243_vm12, %v1245_v56, %v1241_v23 }
 0x1f7   : > { %v1328_v38 = vpack.c.bf16 %v1318_v9, %v1316_v4  ;;  %v1319_v27 = vmul.f32 %v1246_v26, %v6447_v14 }
 0x1f9   : > { %1482 = vmatmul.bf16.gmra.mxu2 %v1328_v38  ;;  %v1329_v49 = vpack.c.bf16 %v1319_v27, %v1317_v30 }
 0x1fe   : > { %1511 = vmatmul.bf16.gmra.mxu3 %v1329_v49 }
 0x227   : > { %v970_v28 = vpop.f32.mrf.mxu0  ;;  %v999_v53 = vpop.f32.mrf.mxu1 }
 0x228   : > { %v6604_v13 = vadd.f32 %v970_v28, %v6261_v18  ;;  %v6607_v11 = vadd.f32 %v999_v53, %v6263_v37 }
 0x22a   : > { %v5254_v63 = vmul.f32 -1.442695, %v6604_v13  ;;  %v5255_v17 = vmul.f32 -1.442695, %v6607_v11 }
 0x22c   : > { %5619 = vpow2.f32 %v5254_v63 }
 0x22d   : > { %5621 = vpow2.f32 %v5255_v17 }
 0x22f   : > { %v972_v29 = vpop.f32.mrf.mxu0  ;;  %v1001_v14 = vpop.f32.mrf.mxu1 }
 0x230   : > { %v6612_v31 = vadd.f32 %v972_v29, %v6261_v18  ;;  %v6615_v33 = vadd.f32 %v1001_v14, %v6263_v37 }
 0x232   : > { %v5620_v19 = vpop.eup %5619  ;;  %v5256_v34 = vmul.f32 -1.442695, %v6612_v31  ;;  %v5257_v43 = vmul.f32 -1.442695, %v6615_v33 }
 0x233   : > { %v5622_v42 = vpop.eup %5621  ;;  %v1064_v1 = vadd.f32 1.0, %v5620_v19 }
 0x234   : > { %v6619_v0 = vadd.f32 1.0, %v5622_v42  ;;  %5623 = vpow2.f32 %v5256_v34 }
 0x235   : > { %5625 = vrcp.f32 %v1064_v1  ;;  %vm1253_vm15 = vweird.f32 %v1064_v1  ;;  %v1257_v21 = vand.u32 2147483647, %v1064_v1  ;;  %v1259_v61 = vand.u32 2147483648, %v1064_v1 }
 0x236   : > { %5627 = vrcp.f32 %v6619_v0  ;;  %vm1268_vm1 = vweird.f32 %v6619_v0  ;;  %v1272_v39 = vand.u32 2147483647, %v6619_v0  ;;  %v1274_v41 = vand.u32 2147483648, %v6619_v0 }
 0x237   : > { %5629 = vpow2.f32 %v5257_v43  ;;  %v6622_v35 = vpop.f32.mrf.mxu0  ;;  %v6624_v18 = vpop.f32.mrf.mxu1  ;;  %vm1258_vm5 = vcmp.eq.f32.partialorder %v1257_v21, 8.507059e+37  ;;  %v1260_v12 = vor.u32 1.1754944e-38, %v1259_v61 }
 0x238   : > { %v1275_v27 = vor.u32 1.1754944e-38, %v1274_v41  ;;  %vm1273_vm11 = vcmp.eq.f32.partialorder %v1272_v39, 8.507059e+37 }
 0x23a   : > { %v5624_v37 = vpop.eup %5623 }
 0x23b   : > { %v5626_v2 = vpop.eup %5625  ;;  %v1066_v15 = vadd.f32 1.0, %v5624_v37 }
 0x23c   : > { %v5628_v46 = vpop.eup %5627  ;;  %v1249_v3 = vmul.f32 %v5626_v2, %v1064_v1  ;;  %vm1254_vm14 = vweird.f32 %v5626_v2 }
 0x23d   : > { %v5630_v36 = vpop.eup %5629  ;;  %v1264_v51 = vmul.f32 %v5628_v46, %v6619_v0  ;;  %5631 = vrcp.f32 %v1066_v15  ;;  %v1289_v6 = vand.u32 2147483648, %v1066_v15  ;;  %vm6633_vm2 = vmor %vm1253_vm15, %vm1254_vm14  ;;  %vm1269_vm3 = vweird.f32 %v5628_v46 }
 0x23e   : > { %v1250_v54 = vsub.f32 1.0, %v1249_v3  ;;  %v1067_v55 = vadd.f32 1.0, %v5630_v36  ;;  %v1287_v48 = vand.u32 2147483647, %v1066_v15  ;;  %vm1283_vm6 = vweird.f32 %v1066_v15  ;;  %vm6644_vm7 = vmor %vm1268_vm1, %vm1269_vm3  ;;  %v5549_v36 = vld [vmem:[%s8861_s6] ss:$0 sm:$0xff] }
 0x23f   : > { %v1265_v16 = vsub.f32 1.0, %v1264_v51  ;;  %v6627_v24 = vpop.f32.mrf.mxu0  ;;  %v6629_v52 = vpop.f32.mrf.mxu1  ;;  %v1290_v22 = vor.u32 1.1754944e-38, %v1289_v6  ;;  %vm1723_vm15 = vcmask 130048  }
 0x240   : > { %v1251_v44 = vmul.f32 %v5626_v2, %v1250_v54  ;;  %5633 = vrcp.f32 %v1067_v55  ;;  %v1302_v23 = vand.u32 2147483647, %v1067_v55  ;;  %v1304_v56 = vand.u32 2147483648, %v1067_v55 }
 0x241   : > { %v1266_v60 = vmul.f32 %v5628_v46, %v1265_v16  ;;  %vm1288_vm10 = vcmp.eq.f32.partialorder %v1287_v48, 8.507059e+37  ;;  %vm1298_vm12 = vweird.f32 %v1067_v55  ;;  %v6668_v16 = vpack.c.bf16 %v6627_v24, %v6622_v35 }
 0x242   : > { %v1252_v40 = vadd.f32 %v5626_v2, %v1251_v44  ;;  %v1305_v17 = vor.u32 1.1754944e-38, %v1304_v56  ;;  %vm1303_vm14 = vcmp.eq.f32.partialorder %v1302_v23, 8.507059e+37 }
 0x243   : > { %v5632_v57 = vpop.eup %5631  ;;  %v1267_v47 = vadd.f32 %v5628_v46, %v1266_v60 }
 0x244   : > { %v1279_v58 = vmul.f32 %v5632_v57, %v1066_v15  ;;  %v1256_v32 = vsel %vm6633_vm2, %v5626_v2, %v1252_v40  ;;  %vm1284_vm4 = vweird.f32 %v5632_v57 }
 0x245   : > { %v1261_v38 = vsel %vm1258_vm5, %v1260_v12, %v1256_v32  ;;  %v1271_v26 = vsel %vm6644_vm7, %v5628_v46, %v1267_v47  ;;  %vm1285_vm9 = vmor %vm1283_vm6, %vm1284_vm4  ;;  %v6694_v47 = vpack.c.bf16 %v6629_v52, %v6624_v18 }
 0x246   : > { %v5634_v10 = vpop.eup %5633  ;;  %v1280_v5 = vsub.f32 1.0, %v1279_v58  ;;  %v1320_v53 = vmul.f32 %v1261_v38, %v6604_v13  ;;  %v1276_v63 = vsel %vm1273_vm11, %v1275_v27, %v1271_v26 }
 0x247   : > { %v1640_v62 = vpop.f32.mrf.mxu0  ;;  %v6638_v7 = vpop.f32.mrf.mxu1  ;;  %v1294_v25 = vmul.f32 %v5634_v10, %v1067_v55  ;;  %vm1299_vm8 = vweird.f32 %v5634_v10  ;;  %v1321_v0 = vmul.f32 %v1276_v63, %v6607_v11 }
 0x248   : > { %v1281_v8 = vmul.f32 %v5632_v57, %v1280_v5  ;;  %vm1300_vm13 = vmor %vm1298_vm12, %vm1299_vm8 }
 0x249   : > { %v1295_v4 = vsub.f32 1.0, %v1294_v25 }
 0x24a   : > { %v1282_v59 = vadd.f32 %v5632_v57, %v1281_v8 }
 0x24b   : > { %v1296_v45 = vmul.f32 %v5634_v10, %v1295_v4 }
 0x24c   : > { %v1286_v30 = vsel %vm1285_vm9, %v5632_v57, %v1282_v59 }
 0x24d   : > { %v1297_v49 = vadd.f32 %v5634_v10, %v1296_v45  ;;  %v1291_v28 = vsel %vm1288_vm10, %v1290_v22, %v1286_v30  ;;  %v1684_v30 = vlaneseq }
 0x24e   : > { %v1322_v29 = vmul.f32 %v1291_v28, %v6612_v31 }
 0x24f   : > { %v1642_v14 = vpop.f32.mrf.mxu0  ;;  %v1671_v19 = vpop.f32.mrf.mxu1  ;;  %v1301_v34 = vsel %vm1300_vm13, %v5634_v10, %v1297_v49  ;;  %v6721_v49 = vshrl.u32 %v1684_v30, 7  ;;  %v6723_v28 = vand.u32 127, %v1684_v30 }
 0x250   : > { %v6653_v42 = vpack.c.bf16 %v1642_v14, %v1640_v62  ;;  %v1306_v1 = vsel %vm1303_vm14, %v1305_v17, %v1301_v34  ;;  %v1330_v43 = vpack.c.bf16 %v1322_v29, %v1320_v53  ;;  %v6689_v50 = vpack.c.bf16 %v1671_v19, %v6638_v7 }
 0x251   : > { %v1323_v37 = vmul.f32 %v1306_v1, %v6615_v33  ;;  %vm1695_vm1 = vcmp.le.s32.totalorder %v6723_v28, %v6721_v49  ;;  %v6732_v14 = vadd.s32 8, %v6721_v49 }
 0x252   : > { %1717 = vrot.lane.b32.xlu0 %v6653_v42, %s5829_s25  ;;  %1487 = vmatmul.bf16.gmra.mxu2 %v1330_v43 }
 0x253   : > { %v1331_v13 = vpack.c.bf16 %v1323_v37, %v1321_v0  ;;  %9002 = vst [vmem:[#allocation3_spill] sm:$0xff] %v6732_v14  ;;  %vm1696_vm2 = vcmp.le.s32.totalorder %v6723_v28, %v6732_v14  ;;  %v6741_v0 = vadd.s32 16, %v6721_v49 }
 0x255   : > { %1516 = vmatmul.bf16.gmra.mxu3 %v1331_v13  ;;  %vm1697_vm3 = vcmp.le.s32.totalorder %v6723_v28, %v6741_v0 }
 0x257   : > { %v1645_v2 = vpop.f32.mrf.mxu0  ;;  %v1674_v31 = vpop.f32.mrf.mxu1 }
 0x25a   : > { %v1473_v15 = vpop.f32.mrf.mxu2 }
 0x25b   : > { %v1474_v11 = vadd.f32 %v5549_v36, %v1473_v15  ;;  %v6750_v15 = vadd.s32 24, %v6721_v49 }
 0x25d   : > { %vm1698_vm4 = vcmp.le.s32.totalorder %v6723_v28, %v6750_v15 }
 0x25f   : > { %v1647_v46 = vpop.f32.mrf.mxu0  ;;  %v1676_v3 = vpop.f32.mrf.mxu1 }
 0x260   : > { %v6661_v51 = vpack.c.bf16 %v1647_v46, %v1645_v2  ;;  %v6681_v24 = vpack.c.bf16 %v1676_v3, %v1674_v31 }
 0x261   : > { %v1502_v54 = vpop.f32.mrf.mxu3 }
 0x262   : > { %1719 = vrot.lane.b32.xlu2 %v6661_v51, %s5829_s25  ;;  %v6664_v33 = vpop.f32.mrf.mxu2  ;;  %v6670_v44 = vadd.f32 %v1502_v54, %v1474_v11  ;;  %v6759_v54 = vadd.s32 32, %v6721_v49 }
 0x264   : > { %vm1699_vm5 = vcmp.le.s32.totalorder %v6723_v28, %v6759_v54 }
 0x267   : > { %v1650_v55 = vpop.f32.mrf.mxu0  ;;  %v1679_v57 = vpop.f32.mrf.mxu1 }
 0x269   : > { %v6673_v60 = vpop.f32.mrf.mxu3 }
 0x26a   : > { %1715 = vrot.lane.b32.xlu2 %v6668_v16, %s5829_s25 }
 0x26b   : > { %v1478_v40 = vpop.f32.mrf.mxu2 }
 0x26c   : > { %v1479_v35 = vadd.f32 %v5549_v36, %v1478_v40 }
 0x26f   : > { %v1652_v58 = vpop.f32.mrf.mxu0  ;;  %v1681_v21 = vpop.f32.mrf.mxu1 }
 0x270   : > { %v6675_v61 = vpack.c.bf16 %v1652_v58, %v1650_v55  ;;  %v6677_v10 = vpack.c.bf16 %v1681_v21, %v1679_v57  ;;  %v6768_v21 = vadd.s32 40, %v6721_v49 }
 0x271   : > { %v1507_v39 = vpop.f32.mrf.mxu3 }
 0x272   : > { %1901 = vmatpush.bf16.msrb.mxu3 %v6677_v10  ;;  %1721 = vrot.lane.b32.xlu1 %v6675_v61, %s5829_s25  ;;  %v6686_v6 = vadd.f32 %v1507_v39, %v1479_v35  ;;  %vm1700_vm6 = vcmp.le.s32.totalorder %v6723_v28, %v6768_v21 }
 0x273   : > { %v6683_v5 = vpop.f32.mrf.mxu2 }
 0x276   : > { %1902 = vmatpush.bf16.msrb.mxu3 %v6681_v24 }
 0x279   : > { %v6696_v41 = vpop.f32.mrf.mxu3 }
 0x27a   : > { %1903 = vmatpush.bf16.msrb.mxu3 %v6689_v50 }
 0x27c   : > { %v1483_v62 = vpop.f32.mrf.mxu2 }
 0x27d   : > { %v1484_v25 = vadd.f32 %v5549_v36, %v1483_v62 }
 0x27e   : > { %1904 = vmatpush.bf16.msrb.mxu3 %v6694_v47 }
 0x281   : > { %v1512_v32 = vpop.f32.mrf.mxu3 }
 0x282   : > { %v6699_v8 = vadd.f32 %v1512_v32, %v1484_v25  ;;  %v6777_v32 = vadd.s32 48, %v6721_v49 }
 0x284   : > { %v6701_v48 = vpop.f32.mrf.mxu2  ;;  %9003 = vst [vmem:[#allocation4_spill] sm:$0xff] %v6777_v32  ;;  %vm1701_vm7 = vcmp.le.s32.totalorder %v6723_v28, %v6777_v32 }
 0x289   : > { %v6703_v12 = vpop.f32.mrf.mxu3 }
 0x2bc   : > { %v1720_v56 = vpop.permute.xlu2 %1719 }
 0x2bd   : > { %v1743_v59 = vsel %vm1723_vm15, %v1720_v56, 0 }
 0x2c4   : > { %v1718_v22 = vpop.permute.xlu0 %1717  ;;  %v1716_v26 = vpop.permute.xlu2 %1715 }
 0x2c5   : > { %v1740_v38 = vsel %vm1723_vm15, %v1718_v22, 0  ;;  %v1737_v45 = vsel %vm1723_vm15, %v1716_v26, 0 }
 0x2d5   : > { %v1488_v7 = vpop.f32.mrf.mxu2 }
 0x2d6   : > { %v1489_v4 = vadd.f32 %v5549_v36, %v1488_v7 }
 0x2d8   : > { %v1517_v9 = vpop.f32.mrf.mxu3 }
 0x2d9   : > { %v6705_v23 = vadd.f32 %v1517_v9, %v1489_v4 }
 0x2dd   : > { %v6719_v27 = vpop.f32.mrf.mxu2 }
 0x2e4   : > { %v1722_v18 = vpop.permute.xlu1 %1721 }
 0x2e5   : > { %v1746_v52 = vsel %vm1723_vm15, %v1722_v18, 0 }
 0x2e6   : > { %1752 = vmatpush.bf16.xpose.msrb.mxu2 %v1746_v52  ;;  %v6786_v52 = vadd.s32 56, %v6721_v49 }
 0x2e8   : > { %9004 = vst [vmem:[#allocation5_spill] sm:$0xff] %v6786_v52  ;;  %vm1702_vm8 = vcmp.le.s32.totalorder %v6723_v28, %v6786_v52 }
 0x2ee   : > { %1753 = vmatpush.bf16.xpose.msrb.mxu2 %v1743_v59 }
 0x2f6   : > { %1754 = vmatpush.bf16.xpose.msrb.mxu2 %v1740_v38 }
 0x2fe   : > { %1755 = vmatpush.bf16.xpose.msrb.mxu2 %v1737_v45 }
 0x305   : > { %5362 = vmatmul.msk.bf16.vlgmr.msrb.gmra.mxu2 %vm1723_vm15, %v6668_v16 }
 0x315   : > { %5363 = vmatmul.msk.bf16.gmra.mxu2 %vm1723_vm15, %v6653_v42 }
 0x325   : > { %5364 = vmatmul.msk.bf16.gmra.mxu2 %vm1723_vm15, %v6661_v51 }
 0x335   : > { %5365 = vmatmul.msk.bf16.gmra.mxu2 %vm1723_vm15, %v6675_v61 }
 0x388   : > { %v1757_v53 = vpop.f32.mrf.mxu2 }
 0x389   : > { %v1777_v63 = vmul.f32 0.25, %v1757_v53 }
 0x38b   : > { %v1785_v17 = vsel %vm1695_vm1, %v1777_v63, -1e+30 }
 0x38c   : > { %v1793_v29 = vsel %vm670_vm0, %v1785_v17, -inf }
 0x38d   : > { %1794 = vmax.xlane.f32.xlu1 %v1793_v29 }
 0x390   : > { %v1759_v19 = vpop.f32.mrf.mxu2 }
 0x391   : > { %v1778_v34 = vmul.f32 0.25, %v1759_v19 }
 0x393   : > { %v1786_v1 = vsel %vm1696_vm2, %v1778_v34, -1e+30 }
 0x394   : > { %v1796_v43 = vsel %vm670_vm0, %v1786_v1, -inf }
 0x395   : > { %1797 = vmax.xlane.f32.xlu0 %v1796_v43 }
 0x398   : > { %v1762_v37 = vpop.f32.mrf.mxu2 }
 0x399   : > { %v1779_v13 = vmul.f32 0.25, %v1762_v37 }
 0x39b   : > { %v1787_v2 = vsel %vm1697_vm3, %v1779_v13, -1e+30 }
 0x39c   : > { %v1799_v31 = vsel %vm670_vm0, %v1787_v2, -inf }
 0x39d   : > { %1800 = vmax.xlane.f32.xlu2 %v1799_v31 }
 0x3a0   : > { %v1764_v46 = vpop.f32.mrf.mxu2 }
 0x3a1   : > { %v1780_v3 = vmul.f32 0.25, %v1764_v46 }
 0x3a3   : > { %v1788_v36 = vsel %vm1698_vm4, %v1780_v3, -1e+30 }
 0x3a4   : > { %v1802_v11 = vsel %vm670_vm0, %v1788_v36, -inf }
 0x3a5   : > { %1803 = vmax.xlane.f32.xlu1 %v1802_v11 }
 0x3a8   : > { %v1767_v55 = vpop.f32.mrf.mxu2 }
 0x3a9   : > { %v1781_v57 = vmul.f32 0.25, %v1767_v55 }
 0x3ab   : > { %v1789_v40 = vsel %vm1699_vm5, %v1781_v57, -1e+30 }
 0x3ac   : > { %v1805_v58 = vsel %vm670_vm0, %v1789_v40, -inf }
 0x3ad   : > { %1806 = vmax.xlane.f32.xlu0 %v1805_v58 }
 0x3b0   : > { %v1769_v35 = vpop.f32.mrf.mxu2 }
 0x3b1   : > { %v1782_v39 = vmul.f32 0.25, %v1769_v35 }
 0x3b3   : > { %v1790_v62 = vsel %vm1700_vm6, %v1782_v39, -1e+30 }
 0x3b4   : > { %v1808_v25 = vsel %vm670_vm0, %v1790_v62, -inf }
 0x3b5   : > { %1809 = vmax.xlane.f32.xlu2 %v1808_v25 }
 0x3b8   : > { %v1772_v7 = vpop.f32.mrf.mxu2 }
 0x3b9   : > { %v1783_v4 = vmul.f32 0.25, %v1772_v7 }
 0x3bb   : > { %v1791_v9 = vsel %vm1701_vm7, %v1783_v4, -1e+30 }
 0x3bc   : > { %v1811_v18 = vsel %vm670_vm0, %v1791_v9, -inf }
 0x3bd   : > { %1812 = vmax.xlane.f32.xlu1 %v1811_v18 }
 0x3c0   : > { %v1774_v56 = vpop.f32.mrf.mxu2 }
 0x3c1   : > { %v1784_v59 = vmul.f32 0.25, %v1774_v56 }
 0x3c3   : > { %v1792_v22 = vsel %vm1702_vm8, %v1784_v59, -1e+30 }
 0x3c4   : > { %v1814_v38 = vsel %vm670_vm0, %v1792_v22, -inf }
 0x3c5   : > { %1815 = vmax.xlane.f32.xlu0 %v1814_v38 }
 0x400   : > { %v1795_v26 = vpop.xlane.xlu1 %1794 }
 0x401   : > { %v1817_v45 = vsub.f32 %v1785_v17, %v1795_v26 }
 0x403   : > { %v1825_v30 = vmul.f32 1.442695, %v1817_v45 }
 0x405   : > { %5635 = vpow2.f32 %v1825_v30 }
 0x408   : > { %v1798_v53 = vpop.xlane.xlu0 %1797 }
 0x409   : > { %v1818_v63 = vsub.f32 %v1786_v1, %v1798_v53 }
 0x40b   : > { %v6794_v29 = vpop.eup %5635  ;;  %v1827_v19 = vmul.f32 1.442695, %v1818_v63 }
 0x40c   : > { %v1841_v34 = vsel %vm670_vm0, %v6794_v29, 0.0 }
 0x40d   : > { %5637 = vpow2.f32 %v1827_v19  ;;  %1842 = vadd.xlane.f32.xlu2 %v1841_v34 }
 0x410   : > { %v1801_v43 = vpop.xlane.xlu2 %1800 }
 0x411   : > { %v1819_v37 = vsub.f32 %v1787_v2, %v1801_v43 }
 0x413   : > { %v6798_v13 = vpop.eup %5637  ;;  %v1829_v31 = vmul.f32 1.442695, %v1819_v37 }
 0x414   : > { %v1844_v17 = vsel %vm670_vm0, %v6798_v13, 0.0 }
 0x415   : > { %5639 = vpow2.f32 %v1829_v31  ;;  %1845 = vadd.xlane.f32.xlu1 %v1844_v17 }
 0x418   : > { %v1804_v46 = vpop.xlane.xlu1 %1803 }
 0x419   : > { %v1820_v1 = vsub.f32 %v1788_v36, %v1804_v46 }
 0x41b   : > { %v6802_v3 = vpop.eup %5639  ;;  %v1831_v11 = vmul.f32 1.442695, %v1820_v1 }
 0x41c   : > { %v1847_v55 = vsel %vm670_vm0, %v6802_v3, 0.0 }
 0x41d   : > { %5641 = vpow2.f32 %v1831_v11  ;;  %1848 = vadd.xlane.f32.xlu0 %v1847_v55 }
 0x420   : > { %v1807_v57 = vpop.xlane.xlu0 %1806 }
 0x421   : > { %v1821_v2 = vsub.f32 %v1789_v40, %v1807_v57 }
 0x423   : > { %v6806_v58 = vpop.eup %5641  ;;  %v1833_v35 = vmul.f32 1.442695, %v1821_v2 }
 0x424   : > { %v1850_v39 = vsel %vm670_vm0, %v6806_v58, 0.0 }
 0x425   : > { %5643 = vpow2.f32 %v1833_v35  ;;  %1851 = vadd.xlane.f32.xlu2 %v1850_v39 }
 0x428   : > { %v1810_v25 = vpop.xlane.xlu2 %1809 }
 0x429   : > { %v1822_v36 = vsub.f32 %v1790_v62, %v1810_v25 }
 0x42b   : > { %v6810_v7 = vpop.eup %5643  ;;  %v1835_v4 = vmul.f32 1.442695, %v1822_v36 }
 0x42c   : > { %v1853_v18 = vsel %vm670_vm0, %v6810_v7, 0.0 }
 0x42d   : > { %5645 = vpow2.f32 %v1835_v4  ;;  %1854 = vadd.xlane.f32.xlu1 %v1853_v18 }
 0x430   : > { %v1813_v56 = vpop.xlane.xlu1 %1812 }
 0x431   : > { %v1823_v40 = vsub.f32 %v1791_v9, %v1813_v56 }
 0x433   : > { %v6814_v59 = vpop.eup %5645  ;;  %v1837_v38 = vmul.f32 1.442695, %v1823_v40 }
 0x434   : > { %v1856_v26 = vsel %vm670_vm0, %v6814_v59, 0.0 }
 0x435   : > { %5647 = vpow2.f32 %v1837_v38  ;;  %1857 = vadd.xlane.f32.xlu0 %v1856_v26 }
 0x438   : > { %v1816_v45 = vpop.xlane.xlu0 %1815 }
 0x439   : > { %v1824_v62 = vsub.f32 %v1792_v22, %v1816_v45 }
 0x43b   : > { %v6818_v30 = vpop.eup %5647  ;;  %v1839_v53 = vmul.f32 1.442695, %v1824_v62 }
 0x43c   : > { %v1859_v63 = vsel %vm670_vm0, %v6818_v30, 0.0 }
 0x43d   : > { %5649 = vpow2.f32 %v1839_v53  ;;  %1860 = vadd.xlane.f32.xlu2 %v1859_v63 }
 0x443   : > { %v6822_v19 = vpop.eup %5649 }
 0x444   : > { %v1862_v9 = vsel %vm670_vm0, %v6822_v19, 0.0 }
 0x445   : > { %1863 = vadd.xlane.f32.xlu1 %v1862_v9 }
 0x449   : > { %1946 = vrot.lane.b32.xlu0 %v6675_v61, %s5830_s4 }
 0x451   : > { %1940 = vrot.lane.b32.xlu0 %v6668_v16, %s5830_s4 }
 0x455   : > { %1944 = vrot.lane.b32.xlu2 %v6661_v51, %s5830_s4 }
 0x459   : > { %1934 = vrot.lane.b32.xlu0 %v6653_v42, %s5831_s29 }
 0x45d   : > { %1932 = vrot.lane.b32.xlu2 %v6668_v16, %s5831_s29 }
 0x45e   : > { %1942 = vrot.lane.b32.xlu1 %v6653_v42, %s5830_s4 }
 0x461   : > { %2573 = vrot.lane.b32.xlu0 %v6675_v61, %s5832_s30 }
 0x465   : > { %2281 = vrot.lane.b32.xlu2 %v6675_v61, %s5833_s0 }
 0x466   : > { %1936 = vrot.lane.b32.xlu1 %v6661_v51, %s5831_s29 }
 0x469   : > { %1938 = vrot.lane.b32.xlu0 %v6675_v61, %s5831_s29 }
 0x46d   : > { %2571 = vrot.lane.b32.xlu2 %v6661_v51, %s5832_s30 }
 0x46e   : > { %2279 = vrot.lane.b32.xlu1 %v6661_v51, %s5833_s0 }
 0x471   : > { %2275 = vrot.lane.b32.xlu0 %v6668_v16, %s5833_s0 }
 0x475   : > { %2569 = vrot.lane.b32.xlu2 %v6653_v42, %s5832_s30 }
 0x476   : > { %2277 = vrot.lane.b32.xlu1 %v6653_v42, %s5833_s0 }
 0x479   : > { %2559 = vrot.lane.b32.xlu0 %v6668_v16, %s5834_s21 }
 0x47d   : > { %2267 = vrot.lane.b32.xlu2 %v6668_v16, %s5835_s24 }
 0x47e   : > { %2567 = vrot.lane.b32.xlu1 %v6668_v16, %s5832_s30 }
 0x480   : > { %v1843_v22 = vpop.xlane.xlu2 %1842 }
 0x481   : > { %2271 = vrot.lane.b32.xlu0 %v6661_v51, %s5835_s24  ;;  %5651 = vrcp.f32 %v1843_v22 }
 0x485   : > { %2561 = vrot.lane.b32.xlu2 %v6653_v42, %s5834_s21 }
 0x486   : > { %2269 = vrot.lane.b32.xlu1 %v6653_v42, %s5835_s24 }
 0x487   : > { %v5652_v43 = vpop.eup %5651 }
 0x488   : > { %v1846_v34 = vpop.xlane.xlu1 %1845  ;;  %v1873_v37 = vmul.f32 %v5652_v43, %v6794_v29 }
 0x489   : > { %5653 = vrcp.f32 %v1846_v34  ;;  %2565 = vrot.lane.b32.xlu0 %v6675_v61, %s5834_s21 }
 0x48d   : > { %2273 = vrot.lane.b32.xlu2 %v6675_v61, %s5835_s24 }
 0x48e   : > { %2563 = vrot.lane.b32.xlu1 %v6661_v51, %s5834_s21 }
 0x48f   : > { %v5654_v16 = vpop.eup %5653 }
 0x490   : > { %v1874_v31 = vmul.f32 %v5654_v16, %v6798_v13  ;;  %v1849_v42 = vpop.xlane.xlu0 %1848 }
 0x491   : > { %5655 = vrcp.f32 %v1849_v42 }
 0x492   : > { %v1881_v17 = vpack.c.bf16 %v1874_v31, %v1873_v37 }
 0x494   : > { %5366 = vmatmul.msk.bf16.vlgmr.msrb.gmra.mxu3 %vm670_vm0, %v1881_v17 }
 0x497   : > { %v5656_v1 = vpop.eup %5655 }
 0x498   : > { %v1852_v46 = vpop.xlane.xlu2 %1851  ;;  %v1875_v55 = vmul.f32 %v5656_v1, %v6802_v3  ;;  %v5517_v3 = vld [vmem:[%s8865_s10] sm:$0xff] }
 0x499   : > { %5657 = vrcp.f32 %v1852_v46  ;;  %2245 = vmatpush.bf16.msra.mxu3 %v5517_v3 }
 0x49f   : > { %v5658_v11 = vpop.eup %5657 }
 0x4a0   : > { %v1876_v61 = vmul.f32 %v5658_v11, %v6806_v58  ;;  %v1855_v51 = vpop.xlane.xlu1 %1854 }
 0x4a1   : > { %5659 = vrcp.f32 %v1855_v51 }
 0x4a2   : > { %v1882_v57 = vpack.c.bf16 %v1876_v61, %v1875_v55 }
 0x4a4   : > { %5367 = vmatmul.msk.bf16.gmra.mxu3 %vm670_vm0, %v1882_v57 }
 0x4a7   : > { %v5660_v13 = vpop.eup %5659 }
 0x4a8   : > { %v1858_v29 = vpop.xlane.xlu0 %1857  ;;  %v1877_v39 = vmul.f32 %v5660_v13, %v6810_v7 }
 0x4a9   : > { %5661 = vrcp.f32 %v1858_v29 }
 0x4af   : > { %v5662_v2 = vpop.eup %5661 }
 0x4b0   : > { %v1861_v35 = vpop.xlane.xlu2 %1860  ;;  %v1878_v25 = vmul.f32 %v5662_v2, %v6814_v59 }
 0x4b1   : > { %5663 = vrcp.f32 %v1861_v35  ;;  %v6892_v35 = vpop.f32.mrf.mxu3 }
 0x4b2   : > { %v1883_v36 = vpack.c.bf16 %v1878_v25, %v1877_v39 }
 0x4b4   : > { %5368 = vmatmul.msk.bf16.gmra.mxu3 %vm670_vm0, %v1883_v36 }
 0x4b7   : > { %v5664_v40 = vpop.eup %5663 }
 0x4b8   : > { %v1864_v58 = vpop.xlane.xlu1 %1863  ;;  %v1945_v4 = vpop.permute.xlu2 %1944  ;;  %v1879_v59 = vmul.f32 %v5664_v40, %v6818_v30 }
 0x4b9   : > { %5665 = vrcp.f32 %v1864_v58  ;;  %v1967_v53 = vsel %vm1723_vm15, %v1945_v4, 0 }
 0x4bb   : > { %v1947_v18 = vpop.permute.xlu0 %1946 }
 0x4bc   : > { %v1970_v56 = vsel %vm1723_vm15, %v1947_v18, 0 }
 0x4bd   : > { %1976 = vmatpush.bf16.xpose.msra.mxu0 %v1970_v56 }
 0x4bf   : > { %v5666_v7 = vpop.eup %5665 }
 0x4c0   : > { %v1880_v38 = vmul.f32 %v5666_v7, %v6822_v19  ;;  %v1933_v45 = vpop.permute.xlu2 %1932 }
 0x4c2   : > { %v1884_v26 = vpack.c.bf16 %v1880_v38, %v1879_v59 }
 0x4c3   : > { %v1941_v62 = vpop.permute.xlu0 %1940 }
 0x4c4   : > { %5369 = vmatmul.msk.bf16.gmra.mxu3 %vm670_vm0, %v1884_v26  ;;  %v1961_v37 = vsel %vm1723_vm15, %v1941_v62, 0 }
 0x4c5   : > { %1977 = vmatpush.bf16.xpose.msra.mxu0 %v1967_v53 }
 0x4c8   : > { %v2282_v9 = vpop.permute.xlu2 %2281 }
 0x4c9   : > { %v2305_v31 = vsel %vm1723_vm15, %v2282_v9, 0 }
 0x4cb   : > { %v1935_v63 = vpop.permute.xlu0 %1934 }
 0x4d0   : > { %v1943_v22 = vpop.permute.xlu1 %1942  ;;  %v2572_v30 = vpop.permute.xlu2 %2571 }
 0x4d1   : > { %v1964_v34 = vsel %vm1723_vm15, %v1943_v22, 0  ;;  %v2594_v17 = vsel %vm1723_vm15, %v2572_v30, 0 }
 0x4d2   : > { %1978 = vmatpush.bf16.xpose.msra.mxu0 %v1964_v34 }
 0x4d3   : > { %v2574_v43 = vpop.permute.xlu0 %2573 }
 0x4d4   : > { %v2597_v16 = vsel %vm1723_vm15, %v2574_v43, 0 }
 0x4d5   : > { %2603 = vmatpush.bf16.xpose.msrb.mxu3 %v2597_v16 }
 0x4d8   : > { %v1937_v19 = vpop.permute.xlu1 %1936  ;;  %v2570_v46 = vpop.permute.xlu2 %2569 }
 0x4d9   : > { %v2591_v11 = vsel %vm1723_vm15, %v2570_v46, 0 }
 0x4da   : > { %1979 = vmatpush.bf16.xpose.msra.mxu0 %v1961_v37 }
 0x4db   : > { %v1939_v55 = vpop.permute.xlu0 %1938 }
 0x4dd   : > { %2604 = vmatpush.bf16.xpose.msrb.mxu3 %v2594_v17 }
 0x4e0   : > { %v2280_v42 = vpop.permute.xlu1 %2279  ;;  %v2268_v36 = vpop.permute.xlu2 %2267 }
 0x4e1   : > { %v2302_v1 = vsel %vm1723_vm15, %v2280_v42, 0  ;;  %5370 = vmatmul.msk.bf16.vlgmr.msra.gmra.mxu0 %vm1723_vm15, %v1933_v45 }
 0x4e2   : > { %2311 = vmatpush.bf16.xpose.msrb.mxu0 %v2305_v31 }
 0x4e3   : > { %v2276_v51 = vpop.permute.xlu0 %2275 }
 0x4e4   : > { %v2296_v2 = vsel %vm1723_vm15, %v2276_v51, 0 }
 0x4e5   : > { %2605 = vmatpush.bf16.xpose.msrb.mxu3 %v2591_v11 }
 0x4e8   : > { %v2278_v61 = vpop.permute.xlu1 %2277  ;;  %v2562_v45 = vpop.permute.xlu2 %2561 }
 0x4e9   : > { %v2299_v57 = vsel %vm1723_vm15, %v2278_v61, 0 }
 0x4ea   : > { %2312 = vmatpush.bf16.xpose.msrb.mxu0 %v2302_v1 }
 0x4eb   : > { %v2560_v40 = vpop.permute.xlu0 %2559 }
 0x4f0   : > { %v2568_v29 = vpop.permute.xlu1 %2567 }
 0x4f1   : > { %v2588_v13 = vsel %vm1723_vm15, %v2568_v29, 0  ;;  %5371 = vmatmul.msk.bf16.gmra.mxu0 %vm1723_vm15, %v1935_v63  ;;  %v2274_v63 = vpop.permute.xlu2 %2273 }
 0x4f2   : > { %2313 = vmatpush.bf16.xpose.msrb.mxu0 %v2299_v57  ;;  %2606 = vmatpush.bf16.xpose.msrb.mxu3 %v2588_v13 }
 0x4f3   : > { %v2272_v38 = vpop.permute.xlu0 %2271 }
 0x4f8   : > { %v2270_v18 = vpop.permute.xlu1 %2269 }
 0x4fa   : > { %2314 = vmatpush.bf16.xpose.msrb.mxu0 %v2296_v2 }
 0x500   : > { %v2564_v13 = vpop.permute.xlu1 %2563 }
 0x501   : > { %5372 = vmatmul.msk.bf16.gmra.mxu0 %vm1723_vm15, %v1937_v19 }
 0x511   : > { %5373 = vmatmul.msk.bf16.gmra.mxu0 %vm1723_vm15, %v1939_v55 }
 0x517   : > { %v1906_v39 = vpop.f32.mrf.mxu3 }
 0x51f   : > { %v1908_v25 = vpop.f32.mrf.mxu3 }
 0x520   : > { %v1926_v3 = vpack.c.bf16 %v1908_v25, %v1906_v39 }
 0x521   : > { %5396 = vmatmul.msk.bf16.vlgmr.msrb.gmra.mxu0 %vm1723_vm15, %v2268_v36 }
 0x522   : > { %5392 = vmatmul.msk.bf16.vlgmr.msra.gmra.mxu3 %vm1723_vm15, %v1926_v3 }
 0x527   : > { %v1911_v58 = vpop.f32.mrf.mxu3 }
 0x52f   : > { %v1913_v4 = vpop.f32.mrf.mxu3 }
 0x530   : > { %v1927_v56 = vpack.c.bf16 %v1913_v4, %v1911_v58 }
 0x531   : > { %5397 = vmatmul.msk.bf16.gmra.mxu0 %vm1723_vm15, %v2270_v18 }
 0x532   : > { %5393 = vmatmul.msk.bf16.gmra.mxu3 %vm1723_vm15, %v1927_v56  ;;  %v2566_v56 = vpop.permute.xlu0 %2565 }
 0x537   : > { %v1916_v7 = vpop.f32.mrf.mxu3 }
 0x53f   : > { %v1918_v59 = vpop.f32.mrf.mxu3 }
 0x540   : > { %v1928_v26 = vpack.c.bf16 %v1918_v59, %v1916_v7 }
 0x541   : > { %5398 = vmatmul.msk.bf16.gmra.mxu0 %vm1723_vm15, %v2272_v38 }
 0x542   : > { %5394 = vmatmul.msk.bf16.gmra.mxu3 %vm1723_vm15, %v1928_v26 }
 0x547   : > { %v1921_v62 = vpop.f32.mrf.mxu3 }
 0x54f   : > { %v1923_v53 = vpop.f32.mrf.mxu3 }
 0x550   : > { %v1929_v9 = vpack.c.bf16 %v1923_v53, %v1921_v62 }
 0x551   : > { %5399 = vmatmul.msk.bf16.gmra.mxu0 %vm1723_vm15, %v2274_v63 }
 0x552   : > { %5395 = vmatmul.msk.bf16.gmra.mxu3 %vm1723_vm15, %v1929_v9 }
 0x55e   : > { %v1981_v22 = vpop.f32.mrf.mxu0 }
 0x55f   : > { %v2001_v34 = vmul.f32 0.25, %v1981_v22 }
 0x561   : > { %v2009_v43 = vsel %vm1695_vm1, %v2001_v34, -1e+30 }
 0x562   : > { %5414 = vmatmul.msk.bf16.vlgmr.msrb.gmra.mxu3 %vm1723_vm15, %v2560_v40  ;;  %v2017_v16 = vsel %vm670_vm0, %v2009_v43, -inf }
 0x563   : > { %2018 = vmax.xlane.f32.xlu1 %v2017_v16 }
 0x566   : > { %v1983_v30 = vpop.f32.mrf.mxu0 }
 0x567   : > { %v2002_v19 = vmul.f32 0.25, %v1983_v30 }
 0x569   : > { %v2010_v37 = vsel %vm1696_vm2, %v2002_v19, -1e+30 }
 0x56a   : > { %v2020_v31 = vsel %vm670_vm0, %v2010_v37, -inf }
 0x56b   : > { %2021 = vmax.xlane.f32.xlu2 %v2020_v31 }
 0x56e   : > { %v1986_v17 = vpop.f32.mrf.mxu0 }
 0x56f   : > { %v2003_v42 = vmul.f32 0.25, %v1986_v17 }
 0x571   : > { %v6915_v46 = vsel %vm1697_vm3, %v2003_v42, -1e+30 }
 0x572   : > { %5415 = vmatmul.msk.bf16.gmra.mxu3 %vm1723_vm15, %v2562_v45  ;;  %v2023_v1 = vsel %vm670_vm0, %v6915_v46, -inf }
 0x573   : > { %2024 = vmax.xlane.f32.xlu0 %v2023_v1 }
 0x576   : > { %v1988_v11 = vpop.f32.mrf.mxu0 }
 0x577   : > { %v2004_v55 = vmul.f32 0.25, %v1988_v11 }
 0x579   : > { %v2012_v61 = vsel %vm1698_vm4, %v2004_v55, -1e+30 }
 0x57a   : > { %v2026_v57 = vsel %vm670_vm0, %v2012_v61, -inf }
 0x57b   : > { %2027 = vmax.xlane.f32.xlu1 %v2026_v57 }
 0x57e   : > { %v1991_v51 = vpop.f32.mrf.mxu0 }
 0x57f   : > { %v2005_v29 = vmul.f32 0.25, %v1991_v51 }
 0x581   : > { %v2013_v2 = vsel %vm1699_vm5, %v2005_v29, -1e+30 }
 0x582   : > { %5416 = vmatmul.msk.bf16.gmra.mxu3 %vm1723_vm15, %v2564_v13  ;;  %v2029_v39 = vsel %vm670_vm0, %v2013_v2, -inf }
 0x583   : > { %2030 = vmax.xlane.f32.xlu2 %v2029_v39 }
 0x586   : > { %v1993_v25 = vpop.f32.mrf.mxu0 }
 0x587   : > { %v2006_v36 = vmul.f32 0.25, %v1993_v25 }
 0x589   : > { %v6932_v3 = vsel %vm1700_vm6, %v2006_v36, -1e+30 }
 0x58a   : > { %v2032_v58 = vsel %vm670_vm0, %v6932_v3, -inf }
 0x58b   : > { %2033 = vmax.xlane.f32.xlu0 %v2032_v58 }
 0x58e   : > { %v1996_v4 = vpop.f32.mrf.mxu0 }
 0x58f   : > { %v2007_v18 = vmul.f32 0.25, %v1996_v4 }
 0x591   : > { %v2015_v40 = vsel %vm1701_vm7, %v2007_v18, -1e+30 }
 0x592   : > { %5417 = vmatmul.msk.bf16.gmra.mxu3 %vm1723_vm15, %v2566_v56  ;;  %v2035_v7 = vsel %vm670_vm0, %v2015_v40, -inf }
 0x593   : > { %2036 = vmax.xlane.f32.xlu1 %v2035_v7 }
 0x596   : > { %v1998_v59 = vpop.f32.mrf.mxu0 }
 0x597   : > { %v2008_v38 = vmul.f32 0.25, %v1998_v59 }
 0x599   : > { %v6944_v26 = vsel %vm1702_vm8, %v2008_v38, -1e+30 }
 0x59a   : > { %v2038_v45 = vsel %vm670_vm0, %v6944_v26, -inf }
 0x59b   : > { %2039 = vmax.xlane.f32.xlu2 %v2038_v45 }
 0x59e   : > { %v2316_v62 = vpop.f32.mrf.mxu0 }
 0x59f   : > { %2119 = vrot.lane.b32.xlu0 %v6677_v10, %s5831_s29  ;;  %v2336_v53 = vmul.f32 0.25, %v2316_v62 }
 0x5a1   : > { %v6955_v63 = vsel %vm1695_vm1, %v2336_v53, -1e+30 }
 0x5a2   : > { %v2352_v22 = vsel %vm670_vm0, %v6955_v63, -inf }
 0x5a5   : > { %v6957_v9 = vpop.f32.mrf.mxu3 }
 0x5a6   : > { %v2318_v25 = vpop.f32.mrf.mxu0 }
 0x5a7   : > { %2113 = vrot.lane.b32.xlu0 %v6694_v47, %s5831_s29 }
 0x5ad   : > { %v6961_v19 = vpop.f32.mrf.mxu3 }
 0x5b5   : > { %v6967_v55 = vpop.f32.mrf.mxu3 }
 0x5bd   : > { %v6973_v51 = vpop.f32.mrf.mxu3 }
 0x5c5   : > { %v6975_v58 = vpop.f32.mrf.mxu3 }
 0x5cd   : > { %v6985_v38 = vpop.f32.mrf.mxu3 }
 0x5d1   : > { %2353 = vmax.xlane.f32.xlu0 %v2352_v22 }
 0x5d6   : > { %v2019_v34 = vpop.xlane.xlu1 %2018 }
 0x5d7   : > { %v2041_v16 = vsub.f32 %v2009_v43, %v2019_v34 }
 0x5d9   : > { %v2049_v30 = vmul.f32 1.442695, %v2041_v16  ;;  %v6991_v16 = vpop.f32.mrf.mxu3 }
 0x5db   : > { %5667 = vpow2.f32 %v2049_v30 }
 0x5de   : > { %v2022_v31 = vpop.xlane.xlu2 %2021 }
 0x5df   : > { %v2042_v17 = vsub.f32 %v2010_v37, %v2022_v31 }
 0x5e1   : > { %v6963_v42 = vpop.eup %5667  ;;  %v2051_v1 = vmul.f32 1.442695, %v2042_v17 }
 0x5e2   : > { %v2065_v11 = vsel %vm670_vm0, %v6963_v42, 0.0 }
 0x5e3   : > { %5669 = vpow2.f32 %v2051_v1  ;;  %2066 = vadd.xlane.f32.xlu1 %v2065_v11  ;;  %v6997_v11 = vpop.f32.mrf.mxu3 }
 0x5e4   : > { %9005 = vst [vmem:[#allocation6_spill] sm:$0xff] %v6997_v11 }
 0x5e6   : > { %v2025_v59 = vpop.xlane.xlu0 %2024 }
 0x5e9   : > { %v6969_v57 = vpop.eup %5669 }
 0x5ea   : > { %v2068_v43 = vsel %vm670_vm0, %v6969_v57, 0.0 }
 0x5eb   : > { %2069 = vadd.xlane.f32.xlu2 %v2068_v43  ;;  %v2043_v43 = vsub.f32 %v6915_v46, %v2025_v59 }
 0x5ee   : > { %v2028_v29 = vpop.xlane.xlu1 %2027 }
 0x5ef   : > { %v2044_v37 = vsub.f32 %v2012_v61, %v2028_v29  ;;  %v2321_v61 = vpop.f32.mrf.mxu0  ;;  %v2053_v29 = vmul.f32 1.442695, %v2043_v43 }
 0x5f1   : > { %v2055_v13 = vmul.f32 1.442695, %v2044_v37 }
 0x5f3   : > { %5671 = vpow2.f32 %v2055_v13  ;;  %v7000_v13 = vpop.f32.mrf.mxu3 }
 0x5f6   : > { %v2031_v39 = vpop.xlane.xlu2 %2030 }
 0x5f7   : > { %v2045_v36 = vsub.f32 %v2013_v2, %v2031_v39  ;;  %v2323_v34 = vpop.f32.mrf.mxu0 }
 0x5f9   : > { %v6977_v4 = vpop.eup %5671  ;;  %v2057_v18 = vmul.f32 1.442695, %v2045_v36 }
 0x5fa   : > { %v2074_v56 = vsel %vm670_vm0, %v6977_v4, 0.0 }
 0x5fb   : > { %5673 = vpow2.f32 %v2057_v18  ;;  %2075 = vadd.xlane.f32.xlu0 %v2074_v56  ;;  %v2339_v18 = vmul.f32 0.25, %v2323_v34  ;;  %v2610_v56 = vpop.f32.mrf.mxu3 }
 0x5fc   : > { %2117 = vrot.lane.b32.xlu1 %v6681_v24, %s5831_s29 }
 0x5fe   : > { %v2034_v53 = vpop.xlane.xlu0 %2033 }
 0x5ff   : > { %v2326_v1 = vpop.f32.mrf.mxu0  ;;  %v2046_v59 = vsub.f32 %v6932_v3, %v2034_v53 }
 0x601   : > { %v6983_v7 = vpop.eup %5673 }
 0x602   : > { %v2077_v2 = vsel %vm670_vm0, %v6983_v7, 0.0 }
 0x603   : > { %2115 = vrot.lane.b32.xlu2 %v6689_v50, %s5831_s29  ;;  %2078 = vadd.xlane.f32.xlu0 %v2077_v2  ;;  %v7017_v2 = vsel %vm1698_vm4, %v2339_v18, -1e+30  ;;  %v7037_v43 = vpop.f32.mrf.mxu3 }
 0x606   : > { %v2037_v45 = vpop.xlane.xlu1 %2036 }
 0x607   : > { %v2047_v62 = vsub.f32 %v2015_v40, %v2037_v45  ;;  %v2337_v40 = vmul.f32 0.25, %v2318_v25  ;;  %v2328_v37 = vpop.f32.mrf.mxu0 }
 0x608   : > { %v2341_v34 = vmul.f32 0.25, %v2328_v37 }
 0x609   : > { %v2061_v22 = vmul.f32 1.442695, %v2047_v62  ;;  %v7005_v39 = vsel %vm1696_vm2, %v2337_v40, -1e+30  ;;  %v2338_v62 = vmul.f32 0.25, %v2321_v61 }
 0x60a   : > { %v2355_v36 = vsel %vm670_vm0, %v7005_v39, -inf  ;;  %v7033_v61 = vsel %vm1700_vm6, %v2341_v34, -1e+30 }
 0x60b   : > { %5675 = vpow2.f32 %v2061_v22  ;;  %v2361_v22 = vsel %vm670_vm0, %v7017_v2, -inf  ;;  %v7028_v3 = vsel %vm1697_vm3, %v2338_v62, -1e+30  ;;  %v2367_v40 = vsel %vm670_vm0, %v7033_v61, -inf  ;;  %v2615_v34 = vpop.f32.mrf.mxu3 }
 0x60c   : > { %5677 = vpow2.f32 %v2053_v29  ;;  %v2340_v62 = vmul.f32 0.25, %v2326_v1 }
 0x60e   : > { %v2040_v37 = vpop.xlane.xlu2 %2039 }
 0x60f   : > { %v2331_v25 = vpop.f32.mrf.mxu0  ;;  %v2048_v18 = vsub.f32 %v6944_v26, %v2040_v37  ;;  %v7056_v26 = vsel %vm1699_vm5, %v2340_v62, -1e+30 }
 0x611   : > { %v6993_v30 = vpop.eup %5675  ;;  %v2120_v31 = vpop.permute.xlu0 %2119 }
 0x612   : > { %2141 = vmatpush.bf16.msra.mxu1 %v2120_v31  ;;  %v2083_v17 = vsel %vm670_vm0, %v6993_v30, 0.0  ;;  %v7011_v46 = vpop.eup %5677  ;;  %v2059_v31 = vmul.f32 1.442695, %v2046_v59 }
 0x613   : > { %2084 = vadd.xlane.f32.xlu0 %v2083_v17  ;;  %v2071_v45 = vsel %vm670_vm0, %v7011_v46, 0.0  ;;  %v2358_v17 = vsel %vm670_vm0, %v7028_v3, -inf  ;;  %v7062_v1 = vpop.f32.mrf.mxu3 }
 0x614   : > { %5679 = vpow2.f32 %v2059_v31  ;;  %v2063_v31 = vmul.f32 1.442695, %v2048_v18  ;;  %v2629_v18 = vmul.f32 0.25, %v2610_v56 }
 0x616   : > { %5681 = vpow2.f32 %v2063_v31  ;;  %v2631_v31 = vmul.f32 0.25, %v2615_v34 }
 0x617   : > { %v2333_v53 = vpop.f32.mrf.mxu0 }
 0x618   : > { %v2343_v29 = vmul.f32 0.25, %v2333_v53  ;;  %v2364_v53 = vsel %vm670_vm0, %v7056_v26, -inf  ;;  %v7087_v56 = vsel %vm1698_vm4, %v2631_v31, -1e+30 }
 0x61a   : > { %v7047_v59 = vsel %vm1702_vm8, %v2343_v29, -1e+30  ;;  %v2342_v29 = vmul.f32 0.25, %v2331_v25 }
 0x61c   : > { %v7069_v37 = vsel %vm1701_vm7, %v2342_v29, -1e+30 }
 0x61d   : > { %v2370_v62 = vsel %vm670_vm0, %v7069_v37, -inf }
 0x626   : > { %2356 = vmax.xlane.f32.xlu1 %v2355_v36  ;;  %v7041_v36 = vpop.eup %5679 }
 0x627   : > { %2450 = vrot.lane.b32.xlu0 %v6677_v10, %s5835_s24 }
 0x62c   : > { %2072 = vadd.xlane.f32.xlu2 %v2071_v45  ;;  %v2080_v45 = vsel %vm670_vm0, %v7041_v36, 0.0 }
 0x62e   : > { %2362 = vmax.xlane.f32.xlu1 %v2361_v22  ;;  %v2373_v22 = vsel %vm670_vm0, %v7047_v59, -inf }
 0x62f   : > { %2444 = vrot.lane.b32.xlu0 %v6694_v47, %s5835_s24 }
 0x634   : > { %2359 = vmax.xlane.f32.xlu2 %v2358_v17  ;;  %v7060_v17 = vpop.eup %5681 }
 0x636   : > { %2368 = vmax.xlane.f32.xlu1 %v2367_v40  ;;  %v2086_v40 = vsel %vm670_vm0, %v7060_v17, 0.0 }
 0x63c   : > { %2081 = vadd.xlane.f32.xlu2 %v2080_v45  ;;  %v2620_v45 = vpop.f32.mrf.mxu3 }
 0x63d   : > { %v2633_v29 = vmul.f32 0.25, %v2620_v45  ;;  %v2114_v45 = vpop.permute.xlu0 %2113 }
 0x63e   : > { %2374 = vmax.xlane.f32.xlu1 %v2373_v22  ;;  %v7076_v22 = vsel %vm1696_vm2, %v2629_v18, -1e+30 }
 0x63f   : > { %v2647_v25 = vsel %vm670_vm0, %v7076_v22, -inf  ;;  %v7094_v18 = vsel %vm1700_vm6, %v2633_v29, -1e+30 }
 0x640   : > { %v2659_v14 = vsel %vm670_vm0, %v7094_v18, -inf }
 0x644   : > { %2365 = vmax.xlane.f32.xlu2 %v2364_v53  ;;  %v7082_v53 = vpop.f32.mrf.mxu3 }
 0x64c   : > { %2087 = vadd.xlane.f32.xlu2 %v2086_v40  ;;  %v2653_v40 = vsel %vm670_vm0, %v7087_v56, -inf }
 0x654   : > { %2371 = vmax.xlane.f32.xlu2 %v2370_v62  ;;  %v2625_v62 = vpop.f32.mrf.mxu3 }
 0x655   : > { %v2635_v20 = vmul.f32 0.25, %v2625_v62 }
 0x656   : > { %v2067_v34 = vpop.xlane.xlu1 %2066 }
 0x657   : > { %2446 = vrot.lane.b32.xlu1 %v6689_v50, %s5835_s24  ;;  %v7103_v15 = vsel %vm1702_vm8, %v2635_v20, -1e+30  ;;  %v2354_v20 = vpop.xlane.xlu0 %2353 }
 0x658   : > { %v2665_v31 = vsel %vm670_vm0, %v7103_v15, -inf  ;;  %v2376_v52 = vsub.f32 %v6955_v63, %v2354_v20  ;;  %v2628_v20 = vmul.f32 0.25, %v7000_v13 }
 0x659   : > { %2648 = vmax.xlane.f32.xlu0 %v2647_v25 }
 0x65e   : > { %v2070_v25 = vpop.xlane.xlu2 %2069 }
 0x65f   : > { %5683 = vrcp.f32 %v2070_v25 }
 0x660   : > { %5685 = vrcp.f32 %v2067_v34 }
 0x661   : > { %2654 = vmax.xlane.f32.xlu0 %v2653_v40 }
 0x665   : > { %v5684_v40 = vpop.eup %5683 }
 0x666   : > { %v2116_v29 = vpop.permute.xlu2 %2115  ;;  %v2098_v62 = vmul.f32 %v5684_v40, %v6969_v57 }
 0x669   : > { %2660 = vmax.xlane.f32.xlu0 %v2659_v14  ;;  %v5686_v14 = vpop.eup %5685 }
 0x66a   : > { %v2097_v34 = vmul.f32 %v5686_v14, %v6963_v42 }
 0x66c   : > { %2448 = vrot.lane.b32.xlu2 %v6681_v24, %s5835_s24  ;;  %v2105_v25 = vpack.c.bf16 %v2098_v62, %v2097_v34 }
 0x66e   : > { %v2118_v21 = vpop.permute.xlu1 %2117 }
 0x66f   : > { %2142 = vmatpush.bf16.msra.mxu1 %v2118_v21  ;;  %v2076_v21 = vpop.xlane.xlu0 %2075 }
 0x671   : > { %2666 = vmax.xlane.f32.xlu0 %v2665_v31 }
 0x673   : > { %2143 = vmatpush.bf16.msra.mxu1 %v2116_v29  ;;  %v2384_v29 = vmul.f32 1.442695, %v2376_v52 }
 0x674   : > { %2742 = vrot.lane.b32.xlu2 %v6677_v10, %s5834_s21 }
 0x675   : > { %5687 = vpow2.f32 %v2384_v29 }
 0x676   : > { %5689 = vrcp.f32 %v2076_v21 }
 0x677   : > { %2144 = vmatpush.bf16.msra.mxu1 %v2114_v45  ;;  %v2079_v31 = vpop.xlane.xlu0 %2078 }
 0x67a   : > { %5374 = vmatmul.msk.bf16.vlgmr.msra.gmra.mxu1 %vm670_vm0, %v2105_v25 }
 0x67b   : > { %v7115_v57 = vpop.eup %5687 }
 0x67c   : > { %v2400_v14 = vsel %vm670_vm0, %v7115_v57, 0.0  ;;  %v5690_v63 = vpop.eup %5689 }
 0x67d   : > { %v2100_v29 = vmul.f32 %v5690_v63, %v6977_v4 }
 0x685   : > { %2740 = vrot.lane.b32.xlu0 %v6681_v24, %s5834_s21 }
 0x686   : > { %v2085_v11 = vpop.xlane.xlu0 %2084 }
 0x699   : > { %v2357_v10 = vpop.xlane.xlu1 %2356  ;;  %v2451_v40 = vpop.permute.xlu0 %2450 }
 0x69a   : > { %v2377_v42 = vsub.f32 %v7005_v39, %v2357_v10  ;;  %2472 = vmatpush.bf16.msrb.mxu1 %v2451_v40 }
 0x69c   : > { %v2386_v45 = vmul.f32 1.442695, %v2377_v42  ;;  %v7131_v42 = vsel %vm1695_vm1, %v2628_v20, -1e+30 }
 0x69d   : > { %2401 = vadd.xlane.f32.xlu2 %v2400_v14  ;;  %v2644_v13 = vsel %vm670_vm0, %v7131_v42, -inf }
 0x69e   : > { %5691 = vpow2.f32 %v2386_v45 }
 0x69f   : > { %v2073_v24 = vpop.xlane.xlu2 %2072 }
 0x6a0   : > { %5693 = vrcp.f32 %v2073_v24 }
 0x6a1   : > { %v2363_v45 = vpop.xlane.xlu1 %2362 }
 0x6a4   : > { %v7120_v52 = vpop.eup %5691 }
 0x6a5   : > { %v2403_v62 = vsel %vm670_vm0, %v7120_v52, 0.0 }
 0x6a6   : > { %v5694_v34 = vpop.eup %5693  ;;  %2404 = vadd.xlane.f32.xlu1 %v2403_v62 }
 0x6a7   : > { %v2360_v39 = vpop.xlane.xlu2 %2359  ;;  %v2099_v25 = vmul.f32 %v5694_v34, %v7011_v46  ;;  %v2630_v46 = vmul.f32 0.25, %v7037_v43 }
 0x6a8   : > { %v2378_v21 = vsub.f32 %v7028_v3, %v2360_v39 }
 0x6a9   : > { %v2106_v10 = vpack.c.bf16 %v2100_v29, %v2099_v25  ;;  %v7142_v14 = vsel %vm1697_vm3, %v2630_v46, -1e+30  ;;  %v2369_v34 = vpop.xlane.xlu1 %2368 }
 0x6aa   : > { %v2388_v40 = vmul.f32 1.442695, %v2378_v21  ;;  %v2650_v62 = vsel %vm670_vm0, %v7142_v14, -inf  ;;  %v2381_v21 = vsub.f32 %v7033_v61, %v2369_v34 }
 0x6ab   : > { %5375 = vmatmul.msk.bf16.gmra.mxu1 %vm670_vm0, %v2106_v10 }
 0x6ac   : > { %5695 = vpow2.f32 %v2388_v40 }
 0x6ad   : > { %5697 = vrcp.f32 %v2079_v31  ;;  %v2632_v31 = vmul.f32 0.25, %v7062_v1  ;;  %v2379_v1 = vsub.f32 %v7017_v2, %v2363_v45 }
 0x6ae   : > { %2645 = vmax.xlane.f32.xlu1 %v2644_v13 }
 0x6af   : > { %v2082_v4 = vpop.xlane.xlu2 %2081  ;;  %v7156_v40 = vsel %vm1699_vm5, %v2632_v31, -1e+30  ;;  %v2390_v13 = vmul.f32 1.442695, %v2379_v1 }
 0x6b0   : > { %5699 = vrcp.f32 %v2082_v4 }
 0x6b1   : > { %v2375_v34 = vpop.xlane.xlu1 %2374 }
 0x6b2   : > { %v7137_v3 = vpop.eup %5695 }
 0x6b3   : > { %v2406_v24 = vsel %vm670_vm0, %v7137_v3, 0.0  ;;  %v5698_v63 = vpop.eup %5697 }
 0x6b4   : > { %2407 = vadd.xlane.f32.xlu0 %v2406_v24  ;;  %v2101_v39 = vmul.f32 %v5698_v63, %v6983_v7  ;;  %v2656_v7 = vsel %vm670_vm0, %v7156_v40, -inf }
 0x6b6   : > { %v5700_v43 = vpop.eup %5699  ;;  %2651 = vmax.xlane.f32.xlu1 %v2650_v62 }
 0x6b7   : > { %v2366_v20 = vpop.xlane.xlu2 %2365  ;;  %v2102_v0 = vmul.f32 %v5700_v43, %v7041_v36  ;;  %v2634_v36 = vmul.f32 0.25, %v7082_v53  ;;  %v2445_v53 = vpop.permute.xlu0 %2444 }
 0x6b8   : > { %v2380_v25 = vsub.f32 %v7056_v26, %v2366_v20  ;;  %v2394_v26 = vmul.f32 1.442695, %v2381_v21 }
 0x6b9   : > { %v2107_v29 = vpack.c.bf16 %v2102_v0, %v2101_v39  ;;  %v7168_v54 = vsel %vm1701_vm7, %v2634_v36, -1e+30 }
 0x6ba   : > { %v2392_v10 = vmul.f32 1.442695, %v2380_v25 }
 0x6bb   : > { %5376 = vmatmul.msk.bf16.gmra.mxu1 %vm670_vm0, %v2107_v29 }
 0x6bc   : > { %5701 = vpow2.f32 %v2392_v10 }
 0x6bd   : > { %5703 = vrcp.f32 %v2085_v11  ;;  %v2662_v11 = vsel %vm670_vm0, %v7168_v54, -inf }
 0x6be   : > { %2657 = vmax.xlane.f32.xlu1 %v2656_v7 }
 0x6bf   : > { %v2088_v61 = vpop.xlane.xlu2 %2087 }
 0x6c0   : > { %5705 = vrcp.f32 %v2088_v61 }
 0x6c1   : > { %5707 = vpow2.f32 %v2394_v26  ;;  %v2383_v26 = vsub.f32 %v7047_v59, %v2375_v34 }
 0x6c2   : > { %v7163_v46 = vpop.eup %5701  ;;  %5709 = vpow2.f32 %v2390_v13  ;;  %v5518_v13 = vld [vmem:[%s8865_s10 + $0x8] sm:$0xff] }
 0x6c3   : > { %v2412_v2 = vsel %vm670_vm0, %v7163_v46, 0.0  ;;  %v5704_v45 = vpop.eup %5703  ;;  %2198 = vmatpush.bf16.msra.mxu2 %v5518_v13 }
 0x6c4   : > { %2413 = vadd.xlane.f32.xlu0 %v2412_v2  ;;  %v2103_v63 = vmul.f32 %v5704_v45, %v6993_v30  ;;  %v2398_v2 = vmul.f32 1.442695, %v2383_v26 }
 0x6c6   : > { %v5706_v4 = vpop.eup %5705  ;;  %2663 = vmax.xlane.f32.xlu1 %v2662_v11 }
 0x6c7   : > { %v7174_v24 = vpop.xlane.xlu2 %2371  ;;  %v2104_v28 = vmul.f32 %v5706_v4, %v7060_v17  ;;  %v7178_v62 = vpop.eup %5707 }
 0x6c8   : > { %v7180_v31 = vpop.eup %5709  ;;  %v2415_v20 = vsel %vm670_vm0, %v7178_v62, 0.0 }
 0x6c9   : > { %v2108_v43 = vpack.c.bf16 %v2104_v28, %v2103_v63  ;;  %v2409_v30 = vsel %vm670_vm0, %v7180_v31, 0.0  ;;  %v2447_v29 = vpop.permute.xlu1 %2446 }
 0x6cb   : > { %5377 = vmatmul.msk.bf16.gmra.mxu1 %vm670_vm0, %v2108_v43 }
 0x6cc   : > { %2416 = vadd.xlane.f32.xlu0 %v2415_v20  ;;  %v2649_v39 = vpop.xlane.xlu0 %2648 }
 0x6cd   : > { %v2669_v0 = vsub.f32 %v7076_v22, %v2649_v39 }
 0x6ce   : > { %2410 = vadd.xlane.f32.xlu1 %v2409_v30 }
 0x6cf   : > { %v2678_v17 = vmul.f32 1.442695, %v2669_v0  ;;  %v2449_v25 = vpop.permute.xlu2 %2448 }
 0x6d0   : > { %2473 = vmatpush.bf16.msrb.mxu1 %v2449_v25 }
 0x6d1   : > { %5711 = vpow2.f32 %v2678_v17 }
 0x6d4   : > { %2474 = vmatpush.bf16.msrb.mxu1 %v2447_v29  ;;  %v2655_v21 = vpop.xlane.xlu0 %2654 }
 0x6d5   : > { %v2671_v0 = vsub.f32 %v7087_v56, %v2655_v21 }
 0x6d7   : > { %v7188_v10 = vpop.eup %5711  ;;  %v2743_v1 = vpop.permute.xlu2 %2742  ;;  %v2682_v30 = vmul.f32 1.442695, %v2671_v0 }
 0x6d8   : > { %2475 = vmatpush.bf16.msrb.mxu1 %v2445_v53  ;;  %2764 = vmatpush.bf16.msra.mxu0 %v2743_v1  ;;  %v2695_v7 = vsel %vm670_vm0, %v7188_v10, 0.0 }
 0x6d9   : > { %2696 = vadd.xlane.f32.xlu1 %v2695_v7 }
 0x6dc   : > { %v2661_v22 = vpop.xlane.xlu0 %2660 }
 0x6dd   : > { %v2673_v36 = vsub.f32 %v7094_v18, %v2661_v22 }
 0x6df   : > { %v2686_v61 = vmul.f32 1.442695, %v2673_v36 }
 0x6e1   : > { %5713 = vpow2.f32 %v2686_v61 }
 0x6e2   : > { %5715 = vpow2.f32 %v2398_v2 }
 0x6e4   : > { %v2667_v45 = vpop.xlane.xlu0 %2666 }
 0x6e5   : > { %v2675_v11 = vsub.f32 %v7103_v15, %v2667_v45 }
 0x6e7   : > { %v7197_v53 = vpop.eup %5713  ;;  %v2690_v18 = vmul.f32 1.442695, %v2675_v11 }
 0x6e8   : > { %v2707_v4 = vsel %vm670_vm0, %v7197_v53, 0.0  ;;  %v7202_v59 = vpop.eup %5715 }
 0x6e9   : > { %2708 = vadd.xlane.f32.xlu0 %v2707_v4  ;;  %5717 = vpow2.f32 %v2690_v18  ;;  %v2421_v63 = vsel %vm670_vm0, %v7202_v59, 0.0 }
 0x6ea   : > { %5719 = vpow2.f32 %v2682_v30 }
 0x6ef   : > { %v7208_v28 = vpop.eup %5717 }
 0x6f0   : > { %v2713_v15 = vsel %vm670_vm0, %v7208_v28, 0.0  ;;  %v7214_v25 = vpop.eup %5719 }
 0x6f1   : > { %2422 = vadd.xlane.f32.xlu0 %v2421_v63  ;;  %v2701_v29 = vsel %vm670_vm0, %v7214_v25, 0.0 }
 0x6f2   : > { %2736 = vrot.lane.b32.xlu1 %v6694_v47, %s5834_s21 }
 0x6f7   : > { %v2146_v43 = vpop.f32.mrf.mxu1  ;;  %v2741_v34 = vpop.permute.xlu0 %2740 }
 0x6f8   : > { %2765 = vmatpush.bf16.msra.mxu0 %v2741_v34 }
 0x6f9   : > { %2714 = vadd.xlane.f32.xlu0 %v2713_v15 }
 0x6ff   : > { %v2148_v20 = vpop.f32.mrf.mxu1 }
 0x700   : > { %v2166_v39 = vpack.c.bf16 %v2148_v20, %v2146_v43 }
 0x702   : > { %5384 = vmatmul.msk.bf16.vlgmr.msra.gmra.mxu2 %vm1723_vm15, %v2166_v39 }
 0x710   : > { %v2402_v17 = vpop.xlane.xlu2 %2401 }
 0x711   : > { %5721 = vrcp.f32 %v2402_v17 }
 0x717   : > { %v5722_v1 = vpop.eup %5721 }
 0x718   : > { %v2432_v22 = vmul.f32 %v5722_v1, %v7115_v57 }
 0x719   : > { %v2405_v47 = vpop.xlane.xlu1 %2404 }
 0x71a   : > { %5723 = vrcp.f32 %v2405_v47 }
 0x71c   : > { %2702 = vadd.xlane.f32.xlu1 %v2701_v29 }
 0x720   : > { %v5724_v7 = vpop.eup %5723 }
 0x721   : > { %v2433_v36 = vmul.f32 %v5724_v7, %v7120_v52  ;;  %v2646_v26 = vpop.xlane.xlu1 %2645 }
 0x722   : > { %v2668_v56 = vsub.f32 %v7131_v42, %v2646_v26 }
 0x723   : > { %v2440_v21 = vpack.c.bf16 %v2433_v36, %v2432_v22 }
 0x724   : > { %v2676_v61 = vmul.f32 1.442695, %v2668_v56 }
 0x725   : > { %5400 = vmatmul.msk.bf16.vlgmr.msrb.gmra.mxu1 %vm670_vm0, %v2440_v21 }
 0x726   : > { %5725 = vpow2.f32 %v2676_v61 }
 0x727   : > { %v2408_v42 = vpop.xlane.xlu0 %2407 }
 0x728   : > { %v2151_v13 = vpop.f32.mrf.mxu1  ;;  %5727 = vrcp.f32 %v2408_v42 }
 0x729   : > { %v2652_v2 = vpop.xlane.xlu1 %2651 }
 0x72c   : > { %v7222_v45 = vpop.eup %5725 }
 0x72d   : > { %v2692_v11 = vsel %vm670_vm0, %v7222_v45, 0.0 }
 0x72e   : > { %2693 = vadd.xlane.f32.xlu2 %v2692_v11  ;;  %v5728_v39 = vpop.eup %5727 }
 0x72f   : > { %v2434_v17 = vmul.f32 %v5728_v39, %v7137_v3  ;;  %v2670_v3 = vsub.f32 %v7142_v14, %v2652_v2 }
 0x730   : > { %v2153_v4 = vpop.f32.mrf.mxu1 }
 0x731   : > { %v2167_v57 = vpack.c.bf16 %v2153_v4, %v2151_v13  ;;  %v2658_v18 = vpop.xlane.xlu1 %2657  ;;  %v2382_v4 = vsub.f32 %v7069_v37, %v7174_v24 }
 0x732   : > { %v2672_v61 = vsub.f32 %v7156_v40, %v2658_v18 }
 0x733   : > { %5385 = vmatmul.msk.bf16.gmra.mxu2 %vm1723_vm15, %v2167_v57 }
 0x734   : > { %v2684_v13 = vmul.f32 1.442695, %v2672_v61 }
 0x737   : > { %v2414_v34 = vpop.xlane.xlu0 %2413 }
 0x738   : > { %v2156_v52 = vpop.f32.mrf.mxu1 }
 0x739   : > { %v2664_v63 = vpop.xlane.xlu1 %2663 }
 0x73a   : > { %v2674_v14 = vsub.f32 %v7168_v54, %v2664_v63  ;;  %v5519_v54 = vld [vmem:[%s8865_s10 + $0x10] sm:$0xff] }
 0x73b   : > { %2529 = vmatpush.bf16.msrb.mxu2 %v5519_v54 }
 0x73c   : > { %v2688_v40 = vmul.f32 1.442695, %v2674_v14 }
 0x73f   : > { %v2417_v29 = vpop.xlane.xlu0 %2416 }
 0x740   : > { %v2158_v43 = vpop.f32.mrf.mxu1 }
 0x741   : > { %v2168_v15 = vpack.c.bf16 %v2158_v43, %v2156_v52  ;;  %v2411_v20 = vpop.xlane.xlu1 %2410 }
 0x742   : > { %5729 = vrcp.f32 %v2411_v20 }
 0x743   : > { %5386 = vmatmul.msk.bf16.gmra.mxu2 %vm1723_vm15, %v2168_v15  ;;  %5731 = vrcp.f32 %v2417_v29 }
 0x744   : > { %5733 = vrcp.f32 %v2414_v34 }
 0x746   : > { %2738 = vrot.lane.b32.xlu2 %v6689_v50, %s5834_s21  ;;  %s8253_s21 = scalar_lea.vmem %s8873_s18, %s5952_s23 }
 0x748   : > { %v5730_v0 = vpop.eup %5729  ;;  %v2161_v30 = vpop.f32.mrf.mxu1 }
 0x749   : > { %v2435_v47 = vmul.f32 %v5730_v0, %v7180_v31  ;;  %v5732_v36 = vpop.eup %5731  ;;  %v2680_v31 = vmul.f32 1.442695, %v2670_v3 }
 0x74a   : > { %v5734_v26 = vpop.eup %5733  ;;  %v2437_v50 = vmul.f32 %v5732_v36, %v7178_v62  ;;  %v2396_v62 = vmul.f32 1.442695, %v2382_v4 }
 0x74b   : > { %v2441_v1 = vpack.c.bf16 %v2435_v47, %v2434_v17  ;;  %v2436_v56 = vmul.f32 %v5734_v26, %v7163_v46  ;;  %5735 = vpow2.f32 %v2680_v31 }
 0x74c   : > { %5737 = vpow2.f32 %v2684_v13  ;;  %v2697_v42 = vpop.xlane.xlu1 %2696 }
 0x74d   : > { %5401 = vmatmul.msk.bf16.gmra.mxu1 %vm670_vm0, %v2441_v1  ;;  %v2442_v21 = vpack.c.bf16 %v2437_v50, %v2436_v56  ;;  %5739 = vpow2.f32 %v2396_v62  ;;  %v5520_v62 = vld [vmem:[%s8865_s10 + $0x18] sm:$0xff] }
 0x74e   : > { %5741 = vpow2.f32 %v2688_v40  ;;  %2821 = vmatpush.bf16.msra.mxu1 %v5520_v62  ;;  %v1522_v62 = vmul.f32 0.5, %v6670_v44 }
 0x750   : > { %v2163_v7 = vpop.f32.mrf.mxu1 }
 0x751   : > { %v2169_v22 = vpack.c.bf16 %v2163_v7, %v2161_v30  ;;  %v5736_v11 = vpop.eup %5735 }
 0x752   : > { %v2698_v57 = vsel %vm670_vm0, %v5736_v11, 0.0  ;;  %v7242_v46 = vpop.eup %5737 }
 0x753   : > { %5387 = vmatmul.msk.bf16.gmra.mxu2 %vm1723_vm15, %v2169_v22  ;;  %v2704_v2 = vsel %vm670_vm0, %v7242_v46, 0.0  ;;  %v5740_v18 = vpop.eup %5739 }
 0x754   : > { %v2418_v52 = vsel %vm670_vm0, %v5740_v18, 0.0  ;;  %v7248_v37 = vpop.eup %5741 }
 0x755   : > { %v2710_v24 = vsel %vm670_vm0, %v7248_v37, 0.0 }
 0x75d   : > { %5402 = vmatmul.msk.bf16.gmra.mxu1 %vm670_vm0, %v2442_v21 }
 0x764   : > { %v2737_v47 = vpop.permute.xlu1 %2736 }
 0x76f   : > { %2699 = vadd.xlane.f32.xlu2 %v2698_v57 }
 0x777   : > { %2705 = vadd.xlane.f32.xlu2 %v2704_v2 }
 0x77f   : > { %2419 = vadd.xlane.f32.xlu2 %v2418_v52 }
 0x787   : > { %2711 = vadd.xlane.f32.xlu2 %v2710_v24 }
 0x78f   : > { %v2703_v26 = vpop.xlane.xlu1 %2702 }
 0x7a1   : > { %v2694_v63 = vpop.xlane.xlu2 %2693 }
 0x7a2   : > { %5743 = vrcp.f32 %v2694_v63  ;;  %v2477_v43 = vpop.f32.mrf.mxu1 }
 0x7a3   : > { %5745 = vrcp.f32 %v2697_v42 }
 0x7a4   : > { %5747 = vrcp.f32 %v2703_v26 }
 0x7a8   : > { %v5744_v34 = vpop.eup %5743 }
 0x7a9   : > { %v2739_v15 = vpop.permute.xlu2 %2738  ;;  %v5746_v20 = vpop.eup %5745  ;;  %v2724_v0 = vmul.f32 %v5744_v34, %v7222_v45 }
 0x7aa   : > { %v2479_v39 = vpop.f32.mrf.mxu1  ;;  %2766 = vmatpush.bf16.msra.mxu0 %v2739_v15  ;;  %v2725_v17 = vmul.f32 %v5746_v20, %v7188_v10  ;;  %v2709_v10 = vpop.xlane.xlu0 %2708 }
 0x7ab   : > { %v2497_v30 = vpack.c.bf16 %v2479_v39, %v2477_v43  ;;  %v5748_v21 = vpop.eup %5747 }
 0x7ac   : > { %v2732_v29 = vpack.c.bf16 %v2725_v17, %v2724_v0  ;;  %v2727_v31 = vmul.f32 %v5748_v21, %v7214_v25  ;;  %v2200_v17 = vpop.f32.mrf.mxu2 }
 0x7ad   : > { %5410 = vmatmul.msk.bf16.vlgmr.msrb.gmra.mxu2 %vm1723_vm15, %v2497_v30 }
 0x7ae   : > { %2767 = vmatpush.bf16.msra.mxu0 %v2737_v47 }
 0x7b1   : > { %5418 = vmatmul.msk.bf16.vlgmr.msra.gmra.mxu0 %vm670_vm0, %v2732_v29 }
 0x7b2   : > { %v2423_v57 = vpop.xlane.xlu0 %2422 }
 0x7b4   : > { %v2202_v29 = vpop.f32.mrf.mxu2 }
 0x7ba   : > { %v2715_v15 = vpop.xlane.xlu0 %2714 }
 0x7ca   : > { %v2482_v1 = vpop.f32.mrf.mxu1 }
 0x7d2   : > { %v2484_v7 = vpop.f32.mrf.mxu1 }
 0x7d3   : > { %v2498_v22 = vpack.c.bf16 %v2484_v7, %v2482_v1 }
 0x7d5   : > { %5411 = vmatmul.msk.bf16.gmra.mxu2 %vm1723_vm15, %v2498_v22  ;;  %v2205_v22 = vpop.f32.mrf.mxu2 }
 0x7da   : > { %v2487_v36 = vpop.f32.mrf.mxu1 }
 0x7dd   : > { %v2207_v26 = vpop.f32.mrf.mxu2 }
 0x7e2   : > { %v2700_v50 = vpop.xlane.xlu2 %2699  ;;  %v2489_v45 = vpop.f32.mrf.mxu1 }
 0x7e3   : > { %5749 = vrcp.f32 %v2700_v50  ;;  %v2499_v56 = vpack.c.bf16 %v2489_v45, %v2487_v36 }
 0x7e5   : > { %5412 = vmatmul.msk.bf16.gmra.mxu2 %vm1723_vm15, %v2499_v56 }
 0x7e9   : > { %v5750_v3 = vpop.eup %5749 }
 0x7ea   : > { %v2726_v61 = vmul.f32 %v5750_v3, %v5736_v11  ;;  %v2706_v13 = vpop.xlane.xlu2 %2705 }
 0x7eb   : > { %5751 = vrcp.f32 %v2706_v13 }
 0x7ec   : > { %v2733_v4 = vpack.c.bf16 %v2727_v31, %v2726_v61  ;;  %5753 = vrcp.f32 %v2709_v10  ;;  %v2210_v10 = vpop.f32.mrf.mxu2 }
 0x7ed   : > { %5755 = vrcp.f32 %v2423_v57 }
 0x7ee   : > { %5419 = vmatmul.msk.bf16.gmra.mxu0 %vm670_vm0, %v2733_v4 }
 0x7f1   : > { %v5752_v2 = vpop.eup %5751 }
 0x7f2   : > { %v2420_v14 = vpop.xlane.xlu2 %2419  ;;  %v5754_v40 = vpop.eup %5753  ;;  %v2728_v25 = vmul.f32 %v5752_v2, %v7242_v46 }
 0x7f3   : > { %5757 = vrcp.f32 %v2420_v14  ;;  %v5756_v52 = vpop.eup %5755  ;;  %v2729_v24 = vmul.f32 %v5754_v40, %v7197_v53  ;;  %v7289_v14 = vld [vmem:[%s8861_s6] ss:$0 sm:$0xff]  ;;  %v2248_v40 = vadd.f32 %v6957_v9, %v2200_v17  ;;  %v2250_v9 = vadd.f32 %v6961_v19, %v2202_v29  ;;  %v5814_v29 = vld [vmem:[%s5958_s3 + $0x10] sm:$0xff] }
 0x7f4   : > { %v2439_v54 = vmul.f32 %v5756_v52, %v7202_v59  ;;  %v7278_v31 = vpop.f32.mrf.mxu2  ;;  %v1476_v2 = vadd.f32 %v7289_v14, %v6664_v33 }
 0x7f5   : > { %v2734_v34 = vpack.c.bf16 %v2729_v24, %v2728_v25 }
 0x7f9   : > { %v5758_v11 = vpop.eup %5757 }
 0x7fa   : > { %v2438_v42 = vmul.f32 %v5758_v11, %v5740_v18  ;;  %v2712_v63 = vpop.xlane.xlu2 %2711  ;;  %v5812_v11 = vld [vmem:[%s5958_s3] sm:$0xff] }
 0x7fb   : > { %5759 = vrcp.f32 %v2712_v63  ;;  %v1530_v24 = vadd.f32 %v5812_v11, %v1522_v62 }
 0x7fc   : > { %v2443_v43 = vpack.c.bf16 %v2439_v54, %v2438_v42  ;;  %5761 = vrcp.f32 %v2715_v15  ;;  %v7281_v13 = vpop.f32.mrf.mxu2  ;;  %v1505_v54 = vadd.f32 %v6673_v60, %v1476_v2  ;;  %v5813_v15 = vld [vmem:[%s5958_s3 + $0x8] sm:$0xff]  ;;  %v5816_v2 = vld [vmem:[%s5958_s3 + $0x20] sm:$0xff] }
 0x7fe   : > { %5403 = vmatmul.msk.bf16.gmra.mxu1 %vm670_vm0, %v2443_v43  ;;  %5420 = vmatmul.msk.bf16.gmra.mxu0 %vm670_vm0, %v2734_v34  ;;  %v1523_v63 = vmul.f32 0.5, %v1505_v54 }
 0x801   : > { %v5760_v20 = vpop.eup %5759 }
 0x802   : > { %v5762_v39 = vpop.eup %5761  ;;  %v2730_v46 = vmul.f32 %v5760_v20, %v7248_v37  ;;  %v1531_v20 = vadd.f32 %v5813_v15, %v1523_v63 }
 0x803   : > { %v2731_v0 = vmul.f32 %v5762_v39, %v7208_v28 }
 0x804   : > { %v7283_v4 = vpop.f32.mrf.mxu2 }
 0x805   : > { %v2735_v53 = vpack.c.bf16 %v2731_v0, %v2730_v46 }
 0x80e   : > { %5421 = vmatmul.msk.bf16.gmra.mxu0 %vm670_vm0, %v2735_v53  ;;  %v1524_v53 = vmul.f32 0.5, %v6686_v6  ;;  %v2255_v6 = vadd.f32 %v6973_v51, %v2207_v26  ;;  %v1486_v51 = vadd.f32 %v7289_v14, %v6701_v48  ;;  %v2258_v26 = vadd.f32 %v6975_v58, %v2210_v10 }
 0x80f   : > { %v2260_v58 = vadd.f32 %v6985_v38, %v7278_v31  ;;  %v1491_v38 = vadd.f32 %v7289_v14, %v6719_v27  ;;  %v2263_v31 = vadd.f32 %v6991_v16, %v7281_v13 }
 0x82e   : > { %v2769_v59 = vpop.f32.mrf.mxu0 }
 0x830   : > { %v2531_v57 = vpop.f32.mrf.mxu2 }
 0x831   : > { %v2551_v52 = vadd.f32 %v2531_v57, %v2248_v40 }
 0x836   : > { %v2771_v18 = vpop.f32.mrf.mxu0 }
 0x837   : > { %v2789_v30 = vpack.c.bf16 %v2771_v18, %v2769_v59  ;;  %v1481_v59 = vadd.f32 %v7289_v14, %v6683_v5  ;;  %v2253_v18 = vadd.f32 %v6967_v55, %v2205_v22  ;;  %v9006_v14 = vld [vmem:[#allocation6_spill] sm:$0xff] }
 0x838   : > { %v2533_v33 = vpop.f32.mrf.mxu2  ;;  %v2265_v16 = vadd.f32 %v9006_v14, %v7283_v4 }
 0x839   : > { %5428 = vmatmul.msk.bf16.vlgmr.msra.gmra.mxu1 %vm1723_vm15, %v2789_v30  ;;  %v2552_v43 = vadd.f32 %v2533_v33, %v2250_v9 }
 0x858   : > { %v2536_v0 = vpop.f32.mrf.mxu2 }
 0x859   : > { %v2553_v17 = vadd.f32 %v2536_v0, %v2253_v18 }
 0x860   : > { %v2538_v30 = vpop.f32.mrf.mxu2 }
 0x861   : > { %v2554_v55 = vadd.f32 %v2538_v30, %v2255_v6  ;;  %v5819_v30 = vld [vmem:[%s5958_s3 + $0x38] sm:$0xff] }
 0x868   : > { %v2541_v22 = vpop.f32.mrf.mxu2 }
 0x869   : > { %v2555_v57 = vadd.f32 %v2541_v22, %v2258_v26 }
 0x86b   : > { %v2774_v47 = vpop.f32.mrf.mxu0 }
 0x873   : > { %v2776_v1 = vpop.f32.mrf.mxu0 }
 0x874   : > { %v2790_v7 = vpack.c.bf16 %v2776_v1, %v2774_v47  ;;  %v1532_v1 = vadd.f32 %v5814_v29, %v1524_v53 }
 0x876   : > { %5429 = vmatmul.msk.bf16.gmra.mxu1 %vm1723_vm15, %v2790_v7  ;;  %v1510_v7 = vadd.f32 %v6696_v41, %v1481_v59 }
 0x87b   : > { %v2492_v36 = vpop.f32.mrf.mxu1  ;;  %v2779_v37 = vpop.f32.mrf.mxu0 }
 0x883   : > { %v2494_v28 = vpop.f32.mrf.mxu1  ;;  %v2781_v50 = vpop.f32.mrf.mxu0 }
 0x884   : > { %v2500_v45 = vpack.c.bf16 %v2494_v28, %v2492_v36  ;;  %v2791_v56 = vpack.c.bf16 %v2781_v50, %v2779_v37  ;;  %v1525_v28 = vmul.f32 0.5, %v1510_v7 }
 0x886   : > { %5413 = vmatmul.msk.bf16.gmra.mxu2 %vm1723_vm15, %v2500_v45  ;;  %5430 = vmatmul.msk.bf16.gmra.mxu1 %vm1723_vm15, %v2791_v56  ;;  %v5815_v45 = vld [vmem:[%s5958_s3 + $0x18] sm:$0xff] }
 0x887   : > { %v1533_v41 = vadd.f32 %v5815_v45, %v1525_v28 }
 0x88b   : > { %v2784_v21 = vpop.f32.mrf.mxu0 }
 0x893   : > { %v2786_v3 = vpop.f32.mrf.mxu0 }
 0x894   : > { %v2792_v61 = vpack.c.bf16 %v2786_v3, %v2784_v21  ;;  %v1526_v3 = vmul.f32 0.5, %v6699_v8  ;;  %v1515_v8 = vadd.f32 %v6703_v12, %v1486_v51  ;;  %v5817_v12 = vld [vmem:[%s5958_s3 + $0x28] sm:$0xff] }
 0x896   : > { %5431 = vmatmul.msk.bf16.gmra.mxu1 %vm1723_vm15, %v2792_v61  ;;  %v1534_v40 = vadd.f32 %v5816_v2, %v1526_v3  ;;  %v1527_v48 = vmul.f32 0.5, %v1515_v8 }
 0x8b6   : > { %v2823_v25 = vpop.f32.mrf.mxu1 }
 0x8b7   : > { %v2843_v42 = vadd.f32 %v2823_v25, %v2551_v52  ;;  %v2543_v25 = vpop.f32.mrf.mxu2 }
 0x8b9   : > { %v7302_v44 = vadd.f32 %v2843_v42, %v1530_v24  ;;  %v2556_v24 = vadd.f32 %v2543_v25, %v2260_v58  ;;  %v1535_v42 = vadd.f32 %v5817_v12, %v1527_v48 }
 0x8bb   : > { %2859 = vst.msk [vmem:[%s7300_s26] sm:$0xff] %vm670_vm0, %v7302_v44  ;;  %v2869_v60 = vsel %vm670_vm0, %v7302_v44, 0.0 }
 0x8bc   : > { %2870 = vadd.xlane.f32.xlu1 %v2869_v60  ;;  %v1528_v60 = vmul.f32 0.5, %v6705_v23  ;;  %v1520_v23 = vadd.f32 %v6892_v35, %v1491_v38  ;;  %v5528_v38 = vld [vmem:[%s8868_s13 + $0x34] sm:$0xf0] }
 0x8be   : > { %v2825_v34 = vpop.f32.mrf.mxu1  ;;  %v1529_v27 = vmul.f32 0.5, %v1520_v23  ;;  %v5525_v23 = vld [vmem:[%s8868_s13 + $0x24] sm:$0xf] }
 0x8bf   : > { %v2844_v39 = vadd.f32 %v2825_v34, %v2552_v43 }
 0x8c1   : > { %v7311_v46 = vadd.f32 %v2844_v39, %v1531_v20  ;;  %v5818_v20 = vld [vmem:[%s5958_s3 + $0x30] sm:$0xff]  ;;  %s658_s3 = scalar_lea.vmem %s8875_s20, %s9198_s22 }
 0x8c2   : > { %v1536_v39 = vadd.f32 %v5818_v20, %v1528_v60  ;;  %v5458_v60 = vld [vmem:[%s8868_s13 + $0x30] sm:$0xf]  ;;  %v5526_v20 = vld [vmem:[%s8868_s13 + $0x24] sm:$0xf0] }
 0x8c3   : > { %2860 = vst.msk [vmem:[%s7300_s26 + $0x8] sm:$0xff] %vm670_vm0, %v7311_v46  ;;  %v2872_v19 = vsel %vm670_vm0, %v7311_v46, 0.0 }
 0x8c4   : > { %2873 = vadd.xlane.f32.xlu2 %v2872_v19 }
 0x8f3   : > { %v2828_v47 = vpop.f32.mrf.mxu1 }
 0x8f4   : > { %v2845_v36 = vadd.f32 %v2828_v47, %v2553_v17  ;;  %v1537_v17 = vadd.f32 %v5819_v30, %v1529_v27  ;;  %v5523_v30 = vld [vmem:[%s8868_s13 + $0x14] sm:$0xf] }
 0x8f6   : > { %v7324_v37 = vadd.f32 %v2845_v36, %v1532_v1  ;;  %v9007_v1 = vld [vmem:[#allocation2_spill] sm:$0xff] }
 0x8f8   : > { %2861 = vst.msk [vmem:[%s7300_s26 + $0x10] sm:$0xff] %vm670_vm0, %v7324_v37  ;;  %v2875_v5 = vsel %vm670_vm0, %v7324_v37, 0.0 }
 0x8f9   : > { %2876 = vadd.xlane.f32.xlu0 %v2875_v5 }
 0x8fb   : > { %v2830_v50 = vpop.f32.mrf.mxu1 }
 0x8fc   : > { %v2846_v56 = vadd.f32 %v2830_v50, %v2554_v55 }
 0x8fe   : > { %v7333_v21 = vadd.f32 %v2846_v56, %v1533_v41 }
 0x900   : > { %2862 = vst.msk [vmem:[%s7300_s26 + $0x18] sm:$0xff] %vm670_vm0, %v7333_v21  ;;  %v2878_v61 = vsel %vm670_vm0, %v7333_v21, 0.0 }
 0x901   : > { %2879 = vadd.xlane.f32.xlu1 %v2878_v61 }
 0x903   : > { %v2833_v62 = vpop.f32.mrf.mxu1 }
 0x904   : > { %v2847_v52 = vadd.f32 %v2833_v62, %v2555_v57 }
 0x906   : > { %v7346_v11 = vadd.f32 %v2847_v52, %v1534_v40 }
 0x908   : > { %2863 = vst.msk [vmem:[%s7300_s26 + $0x20] sm:$0xff] %vm670_vm0, %v7346_v11  ;;  %v2881_v10 = vsel %vm670_vm0, %v7346_v11, 0.0 }
 0x909   : > { %2882 = vadd.xlane.f32.xlu2 %v2881_v10  ;;  %v2546_v63 = vpop.f32.mrf.mxu2 }
 0x90a   : > { %v2557_v34 = vadd.f32 %v2546_v63, %v2263_v31  ;;  %v5527_v31 = vld [vmem:[%s8868_s13 + $0x34] sm:$0xf] }
 0x90b   : > { %v2835_v54 = vpop.f32.mrf.mxu1 }
 0x90c   : > { %v2848_v33 = vadd.f32 %v2835_v54, %v2556_v24 }
 0x90e   : > { %v2856_v9 = vadd.f32 %v2848_v33, %v1535_v42 }
 0x910   : > { %2864 = vst.msk [vmem:[%s7300_s26 + $0x28] sm:$0xff] %vm670_vm0, %v2856_v9  ;;  %v2884_v43 = vsel %vm670_vm0, %v2856_v9, 0.0 }
 0x911   : > { %2885 = vadd.xlane.f32.xlu0 %v2884_v43  ;;  %v2548_v53 = vpop.f32.mrf.mxu2  ;;  %v5459_v43 = vor.u32 %v5528_v38, %v5458_v60 }
 0x912   : > { %v2558_v59 = vadd.f32 %v2548_v53, %v2265_v16 }
 0x913   : > { %v2838_v15 = vpop.f32.mrf.mxu1  ;;  %3141 = vmatpush.bf16.msra.mxu2 %v5459_v43 }
 0x914   : > { %v2849_v19 = vadd.f32 %v2838_v15, %v2557_v34  ;;  %v5460_v34 = vld [vmem:[%s8868_s13 + $0x38] sm:$0xf0]  ;;  %v5450_v15 = vld [vmem:[%s8868_s13 + $0x20] sm:$0xf] }
 0x915   : > { %v5451_v27 = vor.u32 %v5526_v20, %v5450_v15 }
 0x916   : > { %v2857_v0 = vadd.f32 %v2849_v19, %v1536_v39  ;;  %v5463_v39 = vor.u32 %v5527_v31, %v5460_v34  ;;  %v5452_v19 = vld [vmem:[%s8868_s13 + $0x28] sm:$0xf0] }
 0x917   : > { %3142 = vmatpush.bf16.msra.mxu2 %v5451_v27 }
 0x918   : > { %2865 = vst.msk [vmem:[%s7300_s26 + $0x30] sm:$0xff] %vm670_vm0, %v2857_v0  ;;  %v2887_v13 = vsel %vm670_vm0, %v2857_v0, 0.0  ;;  %3170 = vmatpush.bf16.msra.mxu3 %v5463_v39 }
 0x919   : > { %2888 = vadd.xlane.f32.xlu0 %v2887_v13  ;;  %v5455_v13 = vor.u32 %v5525_v23, %v5452_v19 }
 0x91b   : > { %v2840_v18 = vpop.f32.mrf.mxu1 }
 0x91c   : > { %v2850_v47 = vadd.f32 %v2840_v18, %v2558_v59  ;;  %v5442_v59 = vld [vmem:[%s8868_s13 + $0x10] sm:$0xf]  ;;  %v5524_v18 = vld [vmem:[%s8868_s13 + $0x14] sm:$0xf0]  ;;  %3171 = vmatpush.bf16.msra.mxu3 %v5455_v13 }
 0x91e   : > { %v7372_v29 = vadd.f32 %v2850_v47, %v1537_v17  ;;  %v5444_v17 = vld [vmem:[%s8868_s13 + $0x18] sm:$0xf0] }
 0x920   : > { %2866 = vst.msk [vmem:[%s7300_s26 + $0x38] sm:$0xff] %vm670_vm0, %v7372_v29 }
 0x92f   : > { %v2871_v35 = vpop.xlane.xlu1 %2870 }
 0x930   : > { %v2893_v7 = vmul.f32 %v2871_v35, %v9007_v1 }
 0x932   : > { %v7379_v4 = vsub.f32 %v7302_v44, %v2893_v7  ;;  %v2890_v44 = vsel %vm670_vm0, %v7372_v29, 0.0 }
 0x934   : > { %v2909_v36 = vmul.f32 %v7379_v4, %v7379_v4 }
 0x936   : > { %v2917_v28 = vsel %vm670_vm0, %v2909_v36, 0.0 }
 0x937   : > { %v2874_v6 = vpop.xlane.xlu2 %2873  ;;  %2918 = vadd.xlane.f32.xlu1 %v2917_v28  ;;  %v5443_v28 = vor.u32 %v5524_v18, %v5442_v59 }
 0x938   : > { %v2894_v5 = vmul.f32 %v2874_v6, %v9007_v1 }
 0x939   : > { %3143 = vmatpush.bf16.msra.mxu2 %v5443_v28 }
 0x93a   : > { %v7386_v55 = vsub.f32 %v7311_v46, %v2894_v5  ;;  %v5447_v5 = vor.u32 %v5523_v30, %v5444_v17 }
 0x93c   : > { %v2910_v22 = vmul.f32 %v7386_v55, %v7386_v55  ;;  %3172 = vmatpush.bf16.msra.mxu3 %v5447_v5 }
 0x93e   : > { %v2920_v50 = vsel %vm670_vm0, %v2910_v22, 0.0  ;;  %v5434_v22 = vld [vmem:[%s8868_s13] sm:$0xf] }
 0x93f   : > { %2921 = vadd.xlane.f32.xlu2 %v2920_v50  ;;  %2891 = vadd.xlane.f32.xlu1 %v2890_v44  ;;  %v5522_v50 = vld [vmem:[%s8868_s13 + $0x4] sm:$0xf0] }
 0x96c   : > { %v2877_v45 = vpop.xlane.xlu0 %2876 }
 0x96d   : > { %v2895_v41 = vmul.f32 %v2877_v45, %v9007_v1  ;;  %v5436_v45 = vld [vmem:[%s8868_s13 + $0x8] sm:$0xf0] }
 0x96f   : > { %v7395_v56 = vsub.f32 %v7324_v37, %v2895_v41 }
 0x971   : > { %v2911_v46 = vmul.f32 %v7395_v56, %v7395_v56 }
 0x973   : > { %v2923_v3 = vsel %vm670_vm0, %v2911_v46, 0.0 }
 0x974   : > { %v2880_v51 = vpop.xlane.xlu1 %2879  ;;  %2924 = vadd.xlane.f32.xlu2 %v2923_v3  ;;  %v5435_v3 = vor.u32 %v5522_v50, %v5434_v22 }
 0x975   : > { %v2896_v26 = vmul.f32 %v2880_v51, %v9007_v1 }
 0x976   : > { %3144 = vmatpush.bf16.msra.mxu2 %v5435_v3 }
 0x977   : > { %v7402_v61 = vsub.f32 %v7333_v21, %v2896_v26 }
 0x979   : > { %v2912_v57 = vmul.f32 %v7402_v61, %v7402_v61 }
 0x97b   : > { %v2926_v62 = vsel %vm670_vm0, %v2912_v57, 0.0 }
 0x97c   : > { %v2883_v2 = vpop.xlane.xlu2 %2882  ;;  %2927 = vadd.xlane.f32.xlu0 %v2926_v62 }
 0x97d   : > { %v2897_v37 = vmul.f32 %v2883_v2, %v9007_v1 }
 0x97f   : > { %v7409_v40 = vsub.f32 %v7346_v11, %v2897_v37 }
 0x981   : > { %v2913_v8 = vmul.f32 %v7409_v40, %v7409_v40 }
 0x983   : > { %v2929_v52 = vsel %vm670_vm0, %v2913_v8, 0.0 }
 0x984   : > { %v2886_v25 = vpop.xlane.xlu0 %2885  ;;  %2930 = vadd.xlane.f32.xlu1 %v2929_v52 }
 0x985   : > { %v2898_v21 = vmul.f32 %v2886_v25, %v9007_v1 }
 0x987   : > { %v7415_v48 = vsub.f32 %v2856_v9, %v2898_v21  ;;  %v7486_v21 = vld [vmem:[%s8866_s11] ss:$0 sm:$0xff] }
 0x989   : > { %v2914_v58 = vmul.f32 %v7415_v48, %v7415_v48 }
 0x98b   : > { %v2932_v10 = vsel %vm670_vm0, %v2914_v58, 0.0 }
 0x98c   : > { %2933 = vadd.xlane.f32.xlu2 %v2932_v10  ;;  %v2889_v24 = vpop.xlane.xlu0 %2888 }
 0x98d   : > { %v2899_v11 = vmul.f32 %v2889_v24, %v9007_v1 }
 0x98f   : > { %v7421_v54 = vsub.f32 %v2857_v0, %v2899_v11  ;;  %v7492_v11 = vld [vmem:[%s8867_s12] ss:$0 sm:$0xff] }
 0x991   : > { %v2915_v12 = vmul.f32 %v7421_v54, %v7421_v54 }
 0x993   : > { %v2935_v42 = vsel %vm670_vm0, %v2915_v12, 0.0 }
 0x994   : > { %2936 = vadd.xlane.f32.xlu0 %v2935_v42 }
 0x9aa   : > { %v2919_v33 = vpop.xlane.xlu1 %2918 }
 0x9ab   : > { %v2941_v63 = vmul.f32 %v2919_v33, %v9007_v1 }
 0x9ad   : > { %v2949_v9 = vadd.f32 1e-05, %v2941_v63 }
 0x9af   : > { %5763 = vrsqrt.f32 %v2949_v9  ;;  %vm2963_vm10 = vweird.f32 %v2949_v9 }
 0x9b2   : > { %v2922_v0 = vpop.xlane.xlu2 %2921  ;;  %v2892_v53 = vpop.xlane.xlu1 %2891 }
 0x9b3   : > { %v2942_v14 = vmul.f32 %v2922_v0, %v9007_v1  ;;  %v2900_v16 = vmul.f32 %v2892_v53, %v9007_v1 }
 0x9b5   : > { %v5764_v47 = vpop.eup %5763  ;;  %v2950_v35 = vadd.f32 1e-05, %v2942_v14  ;;  %v7466_v7 = vsub.f32 %v7372_v29, %v2900_v16  ;;  %v5521_v29 = vld [vmem:[%s8868_s13 + $0x4] sm:$0xf] }
 0x9b6   : > { %v2958_v36 = vmul.f32 %v5764_v47, %v2949_v9  ;;  %v5439_v51 = vor.u32 %v5521_v29, %v5436_v45  ;;  %vm2964_vm9 = vweird.f32 %v5764_v47 }
 0x9b7   : > { %5765 = vrsqrt.f32 %v2950_v35  ;;  %v2916_v6 = vmul.f32 %v7466_v7, %v7466_v7  ;;  %vm2965_vm11 = vmor %vm2963_vm10, %vm2964_vm9  ;;  %vm2973_vm13 = vweird.f32 %v2950_v35 }
 0x9b8   : > { %v2959_v44 = vmul.f32 %v5764_v47, %v2958_v36  ;;  %3173 = vmatpush.bf16.msra.mxu3 %v5439_v51 }
 0x9b9   : > { %v2938_v41 = vsel %vm670_vm0, %v2916_v6, 0.0 }
 0x9ba   : > { %v2960_v46 = vmul.f32 0.5, %v2959_v44  ;;  %2939 = vadd.xlane.f32.xlu1 %v2938_v41 }
 0x9bc   : > { %v2961_v26 = vsub.f32 1.5, %v2960_v46 }
 0x9bd   : > { %v5766_v57 = vpop.eup %5765 }
 0x9be   : > { %v2962_v62 = vmul.f32 %v5764_v47, %v2961_v26  ;;  %v2968_v2 = vmul.f32 %v5766_v57, %v2950_v35  ;;  %vm2974_vm12 = vweird.f32 %v5766_v57 }
 0x9bf   : > { %vm2975_vm14 = vmor %vm2973_vm13, %vm2974_vm12 }
 0x9c0   : > { %v2969_v37 = vmul.f32 %v5766_v57, %v2968_v2  ;;  %v2966_v8 = vsel %vm2965_vm11, %v5764_v47, %v2962_v62 }
 0x9c1   : > { %v3037_v58 = vmul.f32 %v2966_v8, %v7379_v4 }
 0x9c2   : > { %v2970_v52 = vmul.f32 0.5, %v2969_v37 }
 0x9c3   : > { %v3048_v12 = vmul.f32 %v7486_v21, %v3037_v58 }
 0x9c4   : > { %v2971_v25 = vsub.f32 1.5, %v2970_v52 }
 0x9c5   : > { %v3059_v63 = vadd.f32 %v7492_v11, %v3048_v12 }
 0x9c6   : > { %v2972_v10 = vmul.f32 %v5766_v57, %v2971_v25 }
 0x9c8   : > { %v2976_v24 = vsel %vm2975_vm14, %v5766_v57, %v2972_v10 }
 0x9c9   : > { %v3038_v42 = vmul.f32 %v2976_v24, %v7386_v55 }
 0x9cb   : > { %v3049_v33 = vmul.f32 %v7486_v21, %v3038_v42 }
 0x9cd   : > { %v3060_v9 = vadd.f32 %v7492_v11, %v3049_v33 }
 0x9cf   : > { %v3067_v4 = vpack.c.bf16 %v3060_v9, %v3059_v63 }
 0x9d1   : > { %5464 = vmatmul.msk.bf16.vlgmr.msra.gmra.mxu2 %vm670_vm0, %v3067_v4  ;;  %5468 = vmatmul.msk.bf16.vlgmr.msra.gmra.mxu3 %vm670_vm0, %v3067_v4 }
 0x9e7   : > { %v2925_v60 = vpop.xlane.xlu2 %2924 }
 0x9e8   : > { %v2943_v38 = vmul.f32 %v2925_v60, %v9007_v1 }
 0x9ea   : > { %v2951_v31 = vadd.f32 1e-05, %v2943_v38 }
 0x9ec   : > { %5767 = vrsqrt.f32 %v2951_v31  ;;  %vm2983_vm1 = vweird.f32 %v2951_v31 }
 0x9ef   : > { %v2928_v43 = vpop.xlane.xlu0 %2927 }
 0x9f0   : > { %v2944_v34 = vmul.f32 %v2928_v43, %v9007_v1 }
 0x9f2   : > { %v5768_v55 = vpop.eup %5767  ;;  %v2952_v15 = vadd.f32 1e-05, %v2944_v34 }
 0x9f3   : > { %v2978_v20 = vmul.f32 %v5768_v55, %v2951_v31  ;;  %vm2984_vm15 = vweird.f32 %v5768_v55 }
 0x9f4   : > { %5769 = vrsqrt.f32 %v2952_v15  ;;  %vm2985_vm2 = vmor %vm2983_vm1, %vm2984_vm15  ;;  %vm2993_vm4 = vweird.f32 %v2952_v15 }
 0x9f5   : > { %v2979_v39 = vmul.f32 %v5768_v55, %v2978_v20 }
 0x9f7   : > { %v2980_v23 = vmul.f32 0.5, %v2979_v39  ;;  %v2931_v19 = vpop.xlane.xlu1 %2930 }
 0x9f8   : > { %v2945_v0 = vmul.f32 %v2931_v19, %v9007_v1 }
 0x9f9   : > { %v2981_v53 = vsub.f32 1.5, %v2980_v23 }
 0x9fa   : > { %v5770_v27 = vpop.eup %5769  ;;  %v2953_v14 = vadd.f32 1e-05, %v2945_v0 }
 0x9fb   : > { %v2982_v16 = vmul.f32 %v5768_v55, %v2981_v53  ;;  %v2988_v13 = vmul.f32 %v5770_v27, %v2952_v15  ;;  %vm2994_vm3 = vweird.f32 %v5770_v27 }
 0x9fc   : > { %5771 = vrsqrt.f32 %v2953_v14  ;;  %vm2995_vm5 = vmor %vm2993_vm4, %vm2994_vm3  ;;  %vm3003_vm7 = vweird.f32 %v2953_v14 }
 0x9fd   : > { %v2989_v59 = vmul.f32 %v5770_v27, %v2988_v13  ;;  %v2986_v18 = vsel %vm2985_vm2, %v5768_v55, %v2982_v16 }
 0x9fe   : > { %v3039_v28 = vmul.f32 %v2986_v18, %v7395_v56 }
 0x9ff   : > { %v2990_v30 = vmul.f32 0.5, %v2989_v59  ;;  %v2934_v17 = vpop.xlane.xlu2 %2933 }
 0xa00   : > { %v2946_v47 = vmul.f32 %v2934_v17, %v9007_v1  ;;  %v3050_v45 = vmul.f32 %v7486_v21, %v3039_v28 }
 0xa01   : > { %v2991_v35 = vsub.f32 1.5, %v2990_v30 }
 0xa02   : > { %v5772_v36 = vpop.eup %5771  ;;  %v2954_v6 = vadd.f32 1e-05, %v2946_v47  ;;  %v3061_v26 = vadd.f32 %v7492_v11, %v3050_v45 }
 0xa03   : > { %v2992_v5 = vmul.f32 %v5770_v27, %v2991_v35  ;;  %v2998_v22 = vmul.f32 %v5772_v36, %v2953_v14  ;;  %vm3004_vm6 = vweird.f32 %v5772_v36 }
 0xa04   : > { %5773 = vrsqrt.f32 %v2954_v6  ;;  %vm3005_vm8 = vmor %vm3003_vm7, %vm3004_vm6  ;;  %vm3013_vm10 = vweird.f32 %v2954_v6 }
 0xa05   : > { %v2996_v50 = vsel %vm2995_vm5, %v5770_v27, %v2992_v5  ;;  %v2999_v44 = vmul.f32 %v5772_v36, %v2998_v22 }
 0xa06   : > { %v3040_v29 = vmul.f32 %v2996_v50, %v7402_v61 }
 0xa07   : > { %v3000_v41 = vmul.f32 0.5, %v2999_v44  ;;  %v2937_v24 = vpop.xlane.xlu0 %2936 }
 0xa08   : > { %v3051_v46 = vmul.f32 %v7486_v21, %v3040_v29  ;;  %v2947_v33 = vmul.f32 %v2937_v24, %v9007_v1 }
 0xa09   : > { %v3001_v3 = vsub.f32 1.5, %v3000_v41 }
 0xa0a   : > { %v5774_v51 = vpop.eup %5773  ;;  %v3062_v56 = vadd.f32 %v7492_v11, %v3051_v46  ;;  %v2955_v60 = vadd.f32 1e-05, %v2947_v33 }
 0xa0b   : > { %v3002_v57 = vmul.f32 %v5772_v36, %v3001_v3  ;;  %v3008_v62 = vmul.f32 %v5774_v51, %v2954_v6  ;;  %vm3014_vm9 = vweird.f32 %v5774_v51 }
 0xa0c   : > { %v3068_v2 = vpack.c.bf16 %v3062_v56, %v3061_v26  ;;  %vm3015_vm11 = vmor %vm3013_vm10, %vm3014_vm9  ;;  %5775 = vrsqrt.f32 %v2955_v60  ;;  %vm3023_vm13 = vweird.f32 %v2955_v60  ;;  %vm3367_vm10 = vcmp.lt.s32.totalorder %v6721_v49, 7 }
 0xa0d   : > { %v3009_v37 = vmul.f32 %v5774_v51, %v3008_v62  ;;  %v3006_v61 = vsel %vm3005_vm8, %v5772_v36, %v3002_v57  ;;  %v3079_v36 = vld [vmem:[%s8869_s14] sm:$0x3] }
 0xa0e   : > { %5465 = vmatmul.msk.bf16.gmra.mxu2 %vm670_vm0, %v3068_v2  ;;  %5469 = vmatmul.msk.bf16.gmra.mxu3 %vm670_vm0, %v3068_v2  ;;  %v3041_v25 = vmul.f32 %v3006_v61, %v7409_v40  ;;  %v7534_v28 = vperm.slane %v3079_v36, 1 }
 0xa0f   : > { %v3010_v8 = vmul.f32 0.5, %v3009_v37 }
 0xa10   : > { %v3052_v42 = vmul.f32 %v7486_v21, %v3041_v25  ;;  %9008 = vst [vmem:[#allocation6_spill] sm:$0xff] %v7534_v28 }
 0xa11   : > { %v3011_v52 = vsub.f32 1.5, %v3010_v8 }
 0xa12   : > { %v3063_v9 = vadd.f32 %v7492_v11, %v3052_v42  ;;  %v5776_v40 = vpop.eup %5775 }
 0xa13   : > { %v3012_v58 = vmul.f32 %v5774_v51, %v3011_v52  ;;  %v3018_v31 = vmul.f32 %v5776_v40, %v2955_v60  ;;  %vm3024_vm12 = vweird.f32 %v5776_v40 }
 0xa14   : > { %vm3025_vm14 = vmor %vm3023_vm13, %vm3024_vm12  ;;  %vm3499_vm12 = vcmp.lt.s32.totalorder %v6721_v49, 5  ;;  %vm3565_vm13 = vcmp.lt.s32.totalorder %v6721_v49, 4 }
 0xa15   : > { %v3016_v10 = vsel %vm3015_vm11, %v5774_v51, %v3012_v58  ;;  %vm3433_vm11 = vcmp.lt.s32.totalorder %v6721_v49, 6 }
 0xa16   : > { %v3042_v12 = vmul.f32 %v3016_v10, %v7415_v48  ;;  %v3019_v48 = vmul.f32 %v5776_v40, %v3018_v31 }
 0xa18   : > { %v3053_v63 = vmul.f32 %v7486_v21, %v3042_v12  ;;  %v3020_v15 = vmul.f32 0.5, %v3019_v48  ;;  %v7538_v12 = vperm.slane %v3079_v36, 0 }
 0xa1a   : > { %v3064_v4 = vadd.f32 %v7492_v11, %v3053_v63  ;;  %v3021_v20 = vsub.f32 1.5, %v3020_v15  ;;  %9009 = vst [vmem:[#allocation2_spill] sm:$0xff] %v7538_v12 }
 0xa1c   : > { %v3069_v38 = vpack.c.bf16 %v3064_v4, %v3063_v9  ;;  %v3022_v23 = vmul.f32 %v5776_v40, %v3021_v20 }
 0xa1e   : > { %5466 = vmatmul.msk.bf16.gmra.mxu2 %vm670_vm0, %v3069_v38  ;;  %5470 = vmatmul.msk.bf16.gmra.mxu3 %vm670_vm0, %v3069_v38  ;;  %v3026_v53 = vsel %vm3025_vm14, %v5776_v40, %v3022_v23  ;;  %vm3631_vm14 = vcmp.lt.s32.totalorder %v6721_v49, 3 }
 0xa1f   : > { %v3043_v16 = vmul.f32 %v3026_v53, %v7421_v54 }
 0xa21   : > { %v3054_v18 = vmul.f32 %v7486_v21, %v3043_v16 }
 0xa23   : > { %v3065_v17 = vadd.f32 %v7492_v11, %v3054_v18 }
 0xa2d   : > { %v2940_v43 = vpop.xlane.xlu1 %2939 }
 0xa2e   : > { %v2948_v34 = vmul.f32 %v2940_v43, %v9007_v1 }
 0xa30   : > { %v2956_v55 = vadd.f32 1e-05, %v2948_v34 }
 0xa32   : > { %5777 = vrsqrt.f32 %v2956_v55  ;;  %vm3033_vm1 = vweird.f32 %v2956_v55 }
 0xa38   : > { %v5778_v39 = vpop.eup %5777 }
 0xa39   : > { %v3028_v19 = vmul.f32 %v5778_v39, %v2956_v55  ;;  %vm3034_vm15 = vweird.f32 %v5778_v39  ;;  %v3355_v55 = vld [vmem:[%s8870_s15] sm:$0xff] }
 0xa3a   : > { %vm3035_vm2 = vmor %vm3033_vm1, %vm3034_vm15  ;;  %v7556_v23 = vperm.slane %v3355_v55, 0  ;;  %vm3697_vm15 = vcmp.lt.s32.totalorder %v6721_v49, 2  ;;  %vm3763_vm1 = vcmp.lt.s32.totalorder %v6721_v49, 1 }
 0xa3b   : > { %v3029_v0 = vmul.f32 %v5778_v39, %v3028_v19  ;;  %v7558_v19 = vperm.slane %v3355_v55, 1 }
 0xa3d   : > { %v3030_v27 = vmul.f32 0.5, %v3029_v0 }
 0xa3f   : > { %v3031_v14 = vsub.f32 1.5, %v3030_v27 }
 0xa41   : > { %v3032_v13 = vmul.f32 %v5778_v39, %v3031_v14 }
 0xa43   : > { %v3036_v1 = vsel %vm3035_vm2, %v5778_v39, %v3032_v13 }
 0xa44   : > { %v3044_v59 = vmul.f32 %v3036_v1, %v7466_v7 }
 0xa46   : > { %v3055_v30 = vmul.f32 %v7486_v21, %v3044_v59  ;;  %v7583_v59 = vperm.slane %v3355_v55, 2 }
 0xa48   : > { %v3066_v47 = vadd.f32 %v7492_v11, %v3055_v30  ;;  %9011 = vst [vmem:[#allocation8_spill] sm:$0xff] %v7583_v59 }
 0xa4a   : > { %v3070_v35 = vpack.c.bf16 %v3066_v47, %v3065_v17 }
 0xa4c   : > { %5467 = vmatmul.msk.bf16.gmra.mxu2 %vm670_vm0, %v3070_v35  ;;  %5471 = vmatmul.msk.bf16.gmra.mxu3 %vm670_vm0, %v3070_v35 }
 0xa54   : > { %v3175_v54 = vpop.f32.mrf.mxu3  ;;  %v3146_v56 = vpop.f32.mrf.mxu2 }
 0xa55   : > { %v3176_v7 = vadd.f32 %v3175_v54, %v7534_v28  ;;  %v3147_v60 = vadd.f32 %v3146_v56, %v7538_v12 }
 0xa57   : > { %v5472_v22 = vmul.f32 -1.442695, %v3176_v7 }
 0xa5c   : > { %v3177_v6 = vpop.f32.mrf.mxu3  ;;  %v3148_v10 = vpop.f32.mrf.mxu2 }
 0xa5d   : > { %v3178_v21 = vadd.f32 %v3177_v6, %v7534_v28  ;;  %v3149_v9 = vadd.f32 %v3148_v10, %v7538_v12  ;;  %v7599_v6 = vperm.slane %v3355_v55, 3 }
 0xa5f   : > { %v5473_v5 = vmul.f32 -1.442695, %v3178_v21  ;;  %9012 = vst [vmem:[#allocation9_spill] sm:$0xff] %v7599_v6 }
 0xa61   : > { %5779 = vpow2.f32 %v5473_v5 }
 0xa62   : > { %5781 = vpow2.f32 %v5472_v22 }
 0xa67   : > { %v5780_v11 = vpop.eup %5779 }
 0xa68   : > { %v5782_v50 = vpop.eup %5781  ;;  %v3220_v44 = vadd.f32 1.0, %v5780_v11 }
 0xa69   : > { %v3219_v29 = vadd.f32 1.0, %v5782_v50 }
 0xa6a   : > { %5783 = vrcp.f32 %v3220_v44  ;;  %v3253_v37 = vand.u32 2147483648, %v3220_v44  ;;  %vm3247_vm4 = vweird.f32 %v3220_v44  ;;  %v3251_v8 = vand.u32 2147483647, %v3220_v44 }
 0xa6b   : > { %5785 = vrcp.f32 %v3219_v29  ;;  %v3238_v52 = vand.u32 2147483648, %v3219_v29  ;;  %vm3232_vm6 = vweird.f32 %v3219_v29  ;;  %v3236_v25 = vand.u32 2147483647, %v3219_v29 }
 0xa6c   : > { %v3254_v24 = vor.u32 1.1754944e-38, %v3253_v37  ;;  %vm3252_vm8 = vcmp.eq.f32.partialorder %v3251_v8, 8.507059e+37  ;;  %v7631_v37 = vperm.slane %v3355_v55, 7 }
 0xa6d   : > { %v3239_v33 = vor.u32 1.1754944e-38, %v3238_v52  ;;  %vm3237_vm9 = vcmp.eq.f32.partialorder %v3236_v25, 8.507059e+37  ;;  %v7637_v52 = vperm.slane %v3355_v55, 5  ;;  %v3357_v25 = vld [vmem:[%s8870_s15 + $0x10] sm:$0xff] }
 0xa6e   : > { %9014 = vst [vmem:[#allocation11_spill] sm:$0xff] %v7631_v37 }
 0xa6f   : > { %9015 = vst [vmem:[#allocation12_spill] sm:$0xff] %v7637_v52 }
 0xa70   : > { %v5784_v45 = vpop.eup %5783 }
 0xa71   : > { %v5786_v41 = vpop.eup %5785  ;;  %v3243_v46 = vmul.f32 %v5784_v45, %v3220_v44  ;;  %vm3248_vm0 = vweird.f32 %v5784_v45 }
 0xa72   : > { %v3228_v3 = vmul.f32 %v5786_v41, %v3219_v29  ;;  %vm3233_vm3 = vweird.f32 %v5786_v41  ;;  %vm3249_vm5 = vmor %vm3247_vm4, %vm3248_vm0 }
 0xa73   : > { %v3244_v51 = vsub.f32 1.0, %v3243_v46  ;;  %vm3234_vm7 = vmor %vm3232_vm6, %vm3233_vm3  ;;  %v3356_v46 = vld [vmem:[%s8870_s15 + $0x8] sm:$0xff] }
 0xa74   : > { %v3229_v26 = vsub.f32 1.0, %v3228_v3 }
 0xa75   : > { %v3245_v57 = vmul.f32 %v5784_v45, %v3244_v51 }
 0xa76   : > { %v3230_v62 = vmul.f32 %v5786_v41, %v3229_v26 }
 0xa77   : > { %v3246_v2 = vadd.f32 %v5784_v45, %v3245_v57 }
 0xa78   : > { %v3231_v61 = vadd.f32 %v5786_v41, %v3230_v62 }
 0xa79   : > { %v3250_v58 = vsel %vm3249_vm5, %v5784_v45, %v3246_v2 }
 0xa7a   : > { %v3235_v42 = vsel %vm3234_vm7, %v5786_v41, %v3231_v61  ;;  %v3255_v63 = vsel %vm3252_vm8, %v3254_v24, %v3250_v58  ;;  %v7615_v41 = vperm.slane %v3355_v55, 4  ;;  %v7633_v61 = vperm.slane %v3356_v46, 7 }
 0xa7b   : > { %v3240_v4 = vsel %vm3237_vm9, %v3239_v33, %v3235_v42  ;;  %v7542_v38 = vmul.f32 %v3255_v63, %v3149_v9  ;;  %v7653_v63 = vperm.slane %v3355_v55, 6 }
 0xa7c   : > { %v7544_v40 = vmul.f32 %v3240_v4, %v3147_v60  ;;  %9013 = vst [vmem:[#allocation10_spill] sm:$0xff] %v7615_v41 }
 0xa7d   : > { %v3360_v48 = vrot.slane %v7542_v38, 1  ;;  %v3426_v43 = vrot.slane %v7542_v38, 2  ;;  %v3492_v27 = vrot.slane %v7542_v38, 3  ;;  %v3558_v17 = vrot.slane %v7542_v38, 4  ;;  %9016 = vst [vmem:[#allocation13_spill] sm:$0xff] %v7653_v63 }
 0xa7e   : > { %9010 = vst [vmem:[#allocation7_spill] sm:$0xff] %v7544_v40  ;;  %v8889_v15 = vrot.slane %v7544_v40, 1  ;;  %v8888_v20 = vrot.slane %v7544_v40, 2  ;;  %v8887_v1 = vrot.slane %v7544_v40, 3  ;;  %v8886_v36 = vrot.slane %v7544_v40, 4 }
 0xa7f   : > { %v3624_v5 = vrot.slane %v7542_v38, 5  ;;  %v8885_v44 = vrot.slane %v7544_v40, 5  ;;  %v8895_v51 = vrot.slane %v7542_v38, 6  ;;  %v8884_v57 = vrot.slane %v7544_v40, 6 }
 0xa80   : > { %v7566_v0 = vsel %vm3367_vm10, %v8889_v15, %v3360_v48  ;;  %v7574_v53 = vsel %vm3433_vm11, %v8888_v20, %v3426_v43  ;;  %v7591_v30 = vsel %vm3499_vm12, %v8887_v1, %v3492_v27  ;;  %v7607_v21 = vsel %vm3565_vm13, %v8886_v36, %v3558_v17 }
 0xa81   : > { %v3411_v14 = vmul.f32 %v7556_v23, %v7566_v0  ;;  %v3477_v16 = vmul.f32 %v7558_v19, %v7574_v53  ;;  %v3543_v7 = vmul.f32 %v7583_v59, %v7591_v30  ;;  %v3609_v45 = vmul.f32 %v7599_v6, %v7607_v21 }
 0xa82   : > { %v7626_v3 = vsel %vm3631_vm14, %v8885_v44, %v3624_v5  ;;  %v7648_v58 = vsel %vm3697_vm15, %v8884_v57, %v8895_v51  ;;  %v8894_v10 = vrot.slane %v7542_v38, 7  ;;  %v8883_v42 = vrot.slane %v7544_v40, 7 }
 0xa83   : > { %v3485_v35 = vadd.f32 %v3477_v16, %v3411_v14  ;;  %v3675_v8 = vmul.f32 %v7615_v41, %v7626_v3  ;;  %v7659_v14 = vperm.slane %v3356_v46, 1  ;;  %v7661_v16 = vperm.slane %v3357_v25, 7 }
 0xa84   : > { %v7669_v55 = vsel %vm3763_vm1, %v8883_v42, %v8894_v10 }
 0xa85   : > { %v3551_v11 = vadd.f32 %v3543_v7, %v3485_v35  ;;  %v7673_v7 = vperm.slane %v3356_v46, 3 }
 0xa87   : > { %v3617_v56 = vadd.f32 %v3609_v45, %v3551_v11 }
 0xa89   : > { %v3683_v33 = vadd.f32 %v3675_v8, %v3617_v56  ;;  %v3807_v56 = vmul.f32 %v7653_v63, %v7669_v55 }
 0xa91   : > { %v3180_v31 = vpop.f32.mrf.mxu3 }
 0xa92   : > { %v3181_v34 = vadd.f32 %v3180_v31, %v7534_v28 }
 0xa94   : > { %v5474_v39 = vmul.f32 -1.442695, %v3181_v34  ;;  %v3741_v34 = vmul.f32 %v7637_v52, %v7648_v58 }
 0xa96   : > { %5787 = vpow2.f32 %v5474_v39  ;;  %v7657_v39 = vperm.slane %v3356_v46, 0  ;;  %v3749_v35 = vadd.f32 %v3741_v34, %v3683_v33  ;;  %v7688_v33 = vperm.slane %v3357_v25, 1 }
 0xa98   : > { %9017 = vst [vmem:[#allocation14_spill] sm:$0xff] %v7657_v39  ;;  %v7750_v1 = vmul.f32 %v7657_v39, %v7566_v0 }
 0xa99   : > { %v3182_v13 = vpop.f32.mrf.mxu3 }
 0xa9a   : > { %v3183_v47 = vadd.f32 %v3182_v13, %v7534_v28  ;;  %v3151_v13 = vpop.f32.mrf.mxu2  ;;  %9023 = vst [vmem:[#allocation20_spill] sm:$0xff] %v7750_v1 }
 0xa9c   : > { %v5788_v18 = vpop.eup %5787  ;;  %v5475_v22 = vmul.f32 -1.442695, %v3183_v47 }
 0xa9d   : > { %v3221_v54 = vadd.f32 1.0, %v5788_v18  ;;  %v7671_v18 = vperm.slane %v3356_v46, 2 }
 0xa9f   : > { %5789 = vrcp.f32 %v3221_v54  ;;  %v3268_v9 = vand.u32 2147483648, %v3221_v54  ;;  %v3266_v31 = vand.u32 2147483647, %v3221_v54  ;;  %vm3262_vm0 = vweird.f32 %v3221_v54 }
 0xaa0   : > { %5791 = vpow2.f32 %v5475_v22 }
 0xaa1   : > { %v3185_v50 = vpop.f32.mrf.mxu3  ;;  %v3269_v22 = vor.u32 1.1754944e-38, %v3268_v9  ;;  %vm3267_vm4 = vcmp.eq.f32.partialorder %v3266_v31, 8.507059e+37  ;;  %v7690_v9 = vperm.slane %v3357_v25, 2  ;;  %v7696_v31 = vperm.slane %v3357_v25, 4 }
 0xaa2   : > { %v3186_v29 = vadd.f32 %v3185_v50, %v7534_v28  ;;  %v7677_v50 = vperm.slane %v3356_v46, 4  ;;  %v3153_v44 = vpop.f32.mrf.mxu2 }
 0xaa4   : > { %v5476_v2 = vmul.f32 -1.442695, %v3186_v29  ;;  %v3152_v29 = vadd.f32 %v3151_v13, %v7538_v12 }
 0xaa5   : > { %v5790_v26 = vpop.eup %5789 }
 0xaa6   : > { %v3258_v62 = vmul.f32 %v5790_v26, %v3221_v54  ;;  %v5792_v4 = vpop.eup %5791  ;;  %vm3263_vm2 = vweird.f32 %v5790_v26  ;;  %5793 = vpow2.f32 %v5476_v2  ;;  %v7684_v2 = vperm.slane %v3356_v46, 6 }
 0xaa7   : > { %vm3264_vm3 = vmor %vm3262_vm0, %vm3263_vm2  ;;  %v7675_v11 = vadd.f32 1.0, %v5792_v4 }
 0xaa8   : > { %v3259_v24 = vsub.f32 1.0, %v3258_v62  ;;  %v7682_v62 = vperm.slane %v3356_v46, 5  ;;  %9019 = vst [vmem:[#allocation16_spill] sm:$0xff] %v7684_v2  ;;  %v7804_v32 = vmul.f32 %v7684_v2, %v7669_v55 }
 0xaa9   : > { %5795 = vrcp.f32 %v7675_v11  ;;  %vm3277_vm6 = vweird.f32 %v7675_v11 }
 0xaaa   : > { %v3260_v60 = vmul.f32 %v5790_v26, %v3259_v24  ;;  %9018 = vst [vmem:[#allocation15_spill] sm:$0xff] %v7682_v62  ;;  %v7686_v24 = vperm.slane %v3357_v25, 0 }
 0xaab   : > { %9029 = vst [vmem:[#allocation26_spill] sm:$0xff] %v7804_v32 }
 0xaac   : > { %v3261_v47 = vadd.f32 %v5790_v26, %v3260_v60  ;;  %v5794_v8 = vpop.eup %5793  ;;  %v3815_v60 = vadd.f32 %v3807_v56, %v3749_v35  ;;  %v7709_v35 = vperm.slane %v3357_v25, 6  ;;  %v3856_v56 = vmul.f32 %v7631_v37, %v7542_v38 }
 0xaae   : > { %v3265_v45 = vsel %vm3264_vm3, %v5790_v26, %v3261_v47  ;;  %v7694_v26 = vperm.slane %v3357_v25, 3  ;;  %v3864_v36 = vadd.f32 %v3856_v56, %v3815_v60  ;;  %v7766_v60 = vmul.f32 %v7659_v14, %v7574_v53 }
 0xaaf   : > { %v3270_v54 = vsel %vm3267_vm4, %v3269_v22, %v3265_v45  ;;  %v7705_v22 = vmul.f32 %v7631_v37, %v7544_v40  ;;  %v7711_v45 = vadd.f32 1.0, %v5794_v8  ;;  %v7762_v15 = vpop.eup %5795 }
 0xab0   : > { %v7692_v4 = vmul.f32 %v3270_v54, %v3152_v29  ;;  %v7707_v29 = vperm.slane %v3357_v25, 5  ;;  %9024 = vst [vmem:[#allocation21_spill] sm:$0xff] %v7766_v60  ;;  %v3273_v51 = vmul.f32 %v7762_v15, %v7675_v11  ;;  %vm3278_vm5 = vweird.f32 %v7762_v15 }
 0xab1   : > { %9021 = vst [vmem:[#allocation18_spill] sm:$0xff] %v7705_v22  ;;  %5797 = vrcp.f32 %v7711_v45  ;;  %vm3279_vm7 = vmor %vm3277_vm6, %vm3278_vm5  ;;  %vm3292_vm9 = vweird.f32 %v7711_v45  ;;  %v3296_v1 = vand.u32 2147483647, %v7711_v45 }
 0xab2   : > { %9020 = vst [vmem:[#allocation17_spill] sm:$0xff] %v7692_v4  ;;  %v8893_v46 = vrot.slane %v7692_v4, 1  ;;  %v8891_v34 = vrot.slane %v7692_v4, 2  ;;  %v8890_v13 = vrot.slane %v7692_v4, 3  ;;  %v8892_v47 = vrot.slane %v7692_v4, 4 }
 0xab3   : > { %vm7994_vm3 = vcmp.eq.f32.partialorder %v3296_v1, 8.507059e+37 }
 0xab4   : > { %v7721_v54 = vsel %vm3367_vm10, %v3360_v48, %v8893_v46  ;;  %v7729_v25 = vsel %vm3433_vm11, %v3426_v43, %v8891_v34  ;;  %v7737_v8 = vsel %vm3499_vm12, %v3492_v27, %v8890_v13  ;;  %v7741_v48 = vmul.f32 %v7633_v61, %v7544_v40 }
 0xab5   : > { %v3412_v42 = vmul.f32 %v7556_v23, %v7721_v54  ;;  %v3478_v57 = vmul.f32 %v7558_v19, %v7729_v25  ;;  %v8898_v43 = vrot.slane %v7692_v4, 5  ;;  %v7758_v27 = vsel %vm3565_vm13, %v3558_v17, %v8892_v47 }
 0xab6   : > { %9022 = vst [vmem:[#allocation19_spill] sm:$0xff] %v7741_v48  ;;  %v3905_v20 = vmul.f32 %v7657_v39, %v7721_v54  ;;  %v3544_v13 = vmul.f32 %v7583_v59, %v7737_v8  ;;  %v7773_v34 = vmul.f32 %v7671_v18, %v7591_v30  ;;  %v7777_v17 = vmul.f32 %v7673_v7, %v7607_v21 }
 0xab7   : > { %v3486_v56 = vadd.f32 %v3478_v57, %v3412_v42  ;;  %v3954_v46 = vmul.f32 %v7659_v14, %v7729_v25  ;;  %v3610_v57 = vmul.f32 %v7599_v6, %v7758_v27  ;;  %v7789_v42 = vsel %vm3631_vm14, %v3624_v5, %v8898_v43  ;;  %v7820_v32 = vpop.eup %5797 }
 0xab8   : > { %9025 = vst [vmem:[#allocation22_spill] sm:$0xff] %v7773_v34  ;;  %v3913_v47 = vadd.f32 %v3905_v20, %v3864_v36  ;;  %v7794_v20 = vmul.f32 %v7677_v50, %v7626_v3  ;;  %v7798_v36 = vmul.f32 %v7682_v62, %v7648_v58  ;;  %v7808_v5 = vmul.f32 %v7633_v61, %v7542_v38 }
 0xab9   : > { %9026 = vst [vmem:[#allocation23_spill] sm:$0xff] %v7777_v17  ;;  %v3552_v10 = vadd.f32 %v3544_v13, %v3486_v56  ;;  %v4003_v56 = vmul.f32 %v7671_v18, %v7737_v8  ;;  %v7814_v48 = vmul.f32 %v7686_v24, %v7566_v0  ;;  %v9034_v0 = vrot.slane %v7692_v4, 6 }
 0xaba   : > { %9027 = vst [vmem:[#allocation24_spill] sm:$0xff] %v7794_v20  ;;  %v3962_v13 = vadd.f32 %v3954_v46, %v3913_v47  ;;  %v3676_v46 = vmul.f32 %v7615_v41, %v7789_v42  ;;  %v3156_v20 = vpop.f32.mrf.mxu2  ;;  %vm3293_vm2 = vweird.f32 %v7820_v32 }
 0xabb   : > { %9028 = vst [vmem:[#allocation25_spill] sm:$0xff] %v7798_v36  ;;  %v3618_v43 = vadd.f32 %v3610_v57, %v3552_v10  ;;  %v4052_v36 = vmul.f32 %v7673_v7, %v7758_v27  ;;  %v7828_v10 = vmul.f32 %v7690_v9, %v7591_v30  ;;  %v9035_v57 = vrot.slane %v7542_v38, 6  ;;  %vm7985_vm0 = vmor %vm3292_vm9, %vm3293_vm2 }
 0xabc   : > { %9030 = vst [vmem:[#allocation27_spill] sm:$0xff] %v7808_v5  ;;  %v4011_v47 = vadd.f32 %v4003_v56, %v3962_v13  ;;  %v7824_v5 = vmul.f32 %v7688_v33, %v7574_v53  ;;  %v7845_v53 = vmul.f32 %v7696_v31, %v7626_v3  ;;  %v3283_v56 = vand.u32 2147483648, %v7675_v11  ;;  %v7863_v3 = vld [vmem:[%s8870_s15 + $0x18] sm:$0x7f] }
 0xabd   : > { %9031 = vst [vmem:[#allocation28_spill] sm:$0xff] %v7814_v48  ;;  %v7836_v13 = vsel %vm3697_vm15, %v9035_v57, %v9034_v0  ;;  %v7841_v48 = vmul.f32 %v7694_v26, %v7607_v21  ;;  %v3684_v30 = vadd.f32 %v3676_v46, %v3618_v43  ;;  %v7853_v0 = vmul.f32 %v7709_v35, %v7669_v55 }
 0xabe   : > { %9032 = vst [vmem:[#allocation29_spill] sm:$0xff] %v7824_v5  ;;  %v7849_v5 = vmul.f32 %v7707_v29, %v7648_v58  ;;  %v3274_v57 = vsub.f32 1.0, %v3273_v51  ;;  %v7858_v21 = vmul.f32 %v7661_v16, %v7542_v38  ;;  %v3742_v58 = vmul.f32 %v7637_v52, %v7836_v13 }
 0xabf   : > { %9033 = vst [vmem:[#allocation30_spill] sm:$0xff] %v7828_v10  ;;  %v4060_v10 = vadd.f32 %v4052_v36, %v4011_v47  ;;  %v4101_v55 = vmul.f32 %v7677_v50, %v7789_v42  ;;  %v3288_v51 = vmul.f32 %v7820_v32, %v7711_v45  ;;  %v9041_v43 = vrot.slane %v7692_v4, 7 }
 0xac0   : > { %9036 = vst [vmem:[#allocation31_spill] sm:$0xff] %v7841_v48  ;;  %v9042_v36 = vrot.slane %v7542_v38, 7  ;;  %v3275_v47 = vmul.f32 %v7762_v15, %v3274_v57  ;;  %v3154_v48 = vadd.f32 %v3153_v44, %v7538_v12  ;;  %v7884_v17 = vadd.f32 %v3156_v20, %v7538_v12 }
 0xac1   : > { %9037 = vst [vmem:[#allocation32_spill] sm:$0xff] %v7845_v53  ;;  %v4109_v53 = vadd.f32 %v4101_v55, %v4060_v10  ;;  %v7887_v38 = vperm.slane %v7863_v3, 0  ;;  %v3284_v57 = vor.u32 1.1754944e-38, %v3283_v56  ;;  %v3289_v10 = vsub.f32 1.0, %v3288_v51 }
 0xac2   : > { %9038 = vst [vmem:[#allocation33_spill] sm:$0xff] %v7849_v5  ;;  %v7877_v46 = vsel %vm3763_vm1, %v9042_v36, %v9041_v43  ;;  %v3750_v5 = vadd.f32 %v3742_v58, %v3684_v30  ;;  %v3276_v43 = vadd.f32 %v7762_v15, %v3275_v47  ;;  %v4150_v30 = vmul.f32 %v7682_v62, %v7836_v13 }
 0xac3   : > { %9039 = vst [vmem:[#allocation34_spill] sm:$0xff] %v7853_v0  ;;  %v3187_v0 = vpop.f32.mrf.mxu3  ;;  %v3808_v36 = vmul.f32 %v7653_v63, %v7877_v46  ;;  %v7897_v20 = vperm.slane %v7863_v3, 1  ;;  %v7900_v58 = vperm.slane %v7863_v3, 2  ;;  %v7904_v47 = vperm.slane %v7863_v3, 3 }
 0xac4   : > { %9040 = vst [vmem:[#allocation35_spill] sm:$0xff] %v7858_v21  ;;  %v3281_v21 = vand.u32 2147483647, %v7675_v11  ;;  %v3188_v44 = vadd.f32 %v3187_v0, %v7534_v28  ;;  %v3280_v55 = vsel %vm3279_vm7, %v7762_v15, %v3276_v43  ;;  %v4158_v56 = vadd.f32 %v4150_v30, %v4109_v53 }
 0xac5   : > { %9043 = vst [vmem:[#allocation36_spill] sm:$0xff] %v7877_v46  ;;  %v3816_v11 = vadd.f32 %v3808_v36, %v3750_v5  ;;  %v7907_v60 = vperm.slane %v7863_v3, 4  ;;  %v7910_v0 = vperm.slane %v7863_v3, 5  ;;  %v3857_v15 = vmul.f32 %v7631_v37, %v7692_v4 }
 0xac6   : > { %9044 = vst [vmem:[#allocation37_spill] sm:$0xff] %v7897_v20  ;;  %vm3282_vm8 = vcmp.eq.f32.partialorder %v3281_v21, 8.507059e+37  ;;  %v4199_v5 = vmul.f32 %v7684_v2, %v7877_v46  ;;  %v3290_v53 = vmul.f32 %v7820_v32, %v3289_v10  ;;  %v5477_v21 = vmul.f32 -1.442695, %v3188_v44 }
 0xac7   : > { %9045 = vst [vmem:[#allocation38_spill] sm:$0xff] %v7900_v58  ;;  %v3285_v34 = vsel %vm3282_vm8, %v3284_v57, %v3280_v55  ;;  %v4248_v55 = vmul.f32 %v7633_v61, %v7692_v4  ;;  %v9049_v10 = vrot.slane %v7692_v4, 1  ;;  %v9051_v36 = vrot.slane %v7692_v4, 2 }
 0xac8   : > { %9046 = vst [vmem:[#allocation39_spill] sm:$0xff] %v7904_v47  ;;  %v7912_v51 = vmul.f32 %v3285_v34, %v3154_v48  ;;  %v3865_v48 = vadd.f32 %v3857_v15, %v3816_v11  ;;  %v4207_v30 = vadd.f32 %v4199_v5, %v4158_v56  ;;  %v9053_v15 = vrot.slane %v7692_v4, 3 }
 0xac9   : > { %9047 = vst [vmem:[#allocation40_spill] sm:$0xff] %v7907_v60  ;;  %v3291_v22 = vadd.f32 %v7820_v32, %v3290_v53  ;;  %5799 = vpow2.f32 %v5477_v21 }
 0xaca   : > { %9048 = vst [vmem:[#allocation41_spill] sm:$0xff] %v7910_v0  ;;  %v8899_v43 = vrot.slane %v7912_v51, 1  ;;  %v8900_v57 = vrot.slane %v7912_v51, 2  ;;  %v9052_v56 = vrot.slane %v7912_v51, 3  ;;  %v8913_v28 = vrot.slane %v7912_v51, 7 }
 0xacb   : > { %v3298_v0 = vand.u32 2147483648, %v7711_v45  ;;  %v4256_v60 = vadd.f32 %v4248_v55, %v4207_v30  ;;  %v9056_v47 = vrot.slane %v7912_v51, 5  ;;  %v3295_v55 = vsel %vm7985_vm0, %v7820_v32, %v3291_v22 }
 0xacc   : > { %v7933_v44 = vsel %vm3367_vm10, %v9049_v10, %v8899_v43  ;;  %v7941_v11 = vsel %vm3433_vm11, %v9051_v36, %v8900_v57  ;;  %v7949_v5 = vsel %vm3499_vm12, %v9053_v15, %v9052_v56  ;;  %v9054_v36 = vrot.slane %v7912_v51, 4 }
 0xacd   : > { %9050 = vst [vmem:[#allocation42_spill] sm:$0xff] %v7933_v44  ;;  %v3413_v10 = vmul.f32 %v7556_v23, %v7933_v44  ;;  %v3479_v43 = vmul.f32 %v7558_v19, %v7941_v11  ;;  %v9055_v57 = vrot.slane %v7692_v4, 4  ;;  %v3906_v34 = vmul.f32 %v7657_v39, %v7933_v44 }
 0xace   : > { %v3545_v53 = vmul.f32 %v7583_v59, %v7949_v5  ;;  %v3955_v21 = vmul.f32 %v7659_v14, %v7941_v11  ;;  %v9063_v45 = vrot.slane %v7692_v4, 6  ;;  %v9064_v22 = vrot.slane %v7692_v4, 7 }
 0xacf   : > { %v7964_v56 = vsel %vm3565_vm13, %v9055_v57, %v9054_v36  ;;  %v3487_v40 = vadd.f32 %v3479_v43, %v3413_v10  ;;  %v9057_v57 = vrot.slane %v7692_v4, 5  ;;  %v3914_v15 = vadd.f32 %v3906_v34, %v3865_v48 }
 0xad0   : > { %v3611_v30 = vmul.f32 %v7599_v6, %v7964_v56  ;;  %v9062_v34 = vrot.slane %v7912_v51, 6  ;;  %v8018_v43 = vsel %vm3763_vm1, %v9064_v22, %v8913_v28 }
 0xad1   : > { %v7979_v36 = vsel %vm3631_vm14, %v9057_v57, %v9056_v47  ;;  %v3553_v10 = vadd.f32 %v3545_v53, %v3487_v40  ;;  %v3963_v40 = vadd.f32 %v3955_v21, %v3914_v15  ;;  %v4004_v53 = vmul.f32 %v7671_v18, %v7949_v5  ;;  %v5800_v15 = vpop.eup %5799 }
 0xad2   : > { %v8004_v48 = vsel %vm3697_vm15, %v9063_v45, %v9062_v34  ;;  %v4297_v57 = vmul.f32 %v7686_v24, %v7933_v44  ;;  %v3677_v1 = vmul.f32 %v7615_v41, %v7979_v36  ;;  %v3299_v34 = vor.u32 1.1754944e-38, %v3298_v0 }
 0xad3   : > { %v3619_v32 = vadd.f32 %v3611_v30, %v3553_v10  ;;  %v4012_v21 = vadd.f32 %v4004_v53, %v3963_v40  ;;  %v4053_v45 = vmul.f32 %v7673_v7, %v7964_v56  ;;  %v4346_v10 = vmul.f32 %v7688_v33, %v7941_v11  ;;  %v3158_v30 = vpop.f32.mrf.mxu2 }
 0xad4   : > { %v4305_v58 = vadd.f32 %v4297_v57, %v4256_v60  ;;  %v8025_v44 = vperm.slane %v7863_v3, 6  ;;  %v3743_v4 = vmul.f32 %v7637_v52, %v8004_v48  ;;  %v3300_v0 = vsel %vm7994_vm3, %v3299_v34, %v3295_v55 }
 0xad5   : > { %v3685_v46 = vadd.f32 %v3677_v1, %v3619_v32  ;;  %v4061_v22 = vadd.f32 %v4053_v45, %v4012_v21  ;;  %v4102_v40 = vmul.f32 %v7677_v50, %v7979_v36  ;;  %v4395_v60 = vmul.f32 %v7690_v9, %v7949_v5 }
 0xad6   : > { %9065 = vst [vmem:[#allocation43_spill] sm:$0xff] %v8025_v44  ;;  %v4354_v53 = vadd.f32 %v4346_v10, %v4305_v58  ;;  %v3809_v3 = vmul.f32 %v7653_v63, %v8018_v43  ;;  %v8038_v32 = vadd.f32 %v3158_v30, %v7538_v12  ;;  %v8040_v1 = vadd.f32 1.0, %v5800_v15 }
 0xad7   : > { %v3751_v57 = vadd.f32 %v3743_v4, %v3685_v46  ;;  %v4110_v28 = vadd.f32 %v4102_v40, %v4061_v22  ;;  %v4444_v55 = vmul.f32 %v7694_v26, %v7964_v56  ;;  %v8045_v34 = vmul.f32 %v3300_v0, %v7884_v17 }
 0xad8   : > { %v4403_v47 = vadd.f32 %v4395_v60, %v4354_v53  ;;  %v3858_v4 = vmul.f32 %v7631_v37, %v7912_v51  ;;  %v4151_v46 = vmul.f32 %v7682_v62, %v8004_v48  ;;  %v4493_v21 = vmul.f32 %v7696_v31, %v7979_v36 }
 0xad9   : > { %v3817_v58 = vadd.f32 %v3809_v3, %v3751_v57  ;;  %v4542_v45 = vmul.f32 %v7707_v29, %v8004_v48  ;;  %v8915_v10 = vrot.slane %v8045_v34, 1  ;;  %v8914_v30 = vrot.slane %v8045_v34, 2 }
 0xada   : > { %v4452_v15 = vadd.f32 %v4444_v55, %v4403_v47  ;;  %v4159_v0 = vadd.f32 %v4151_v46, %v4110_v28  ;;  %v8918_v22 = vrot.slane %v8045_v34, 3  ;;  %v8919_v40 = vrot.slane %v8045_v34, 4 }
 0xadb   : > { %v3866_v17 = vadd.f32 %v3858_v4, %v3817_v58  ;;  %v9066_v60 = vrot.slane %v7912_v51, 1  ;;  %v9067_v3 = vrot.slane %v7912_v51, 2  ;;  %v4200_v55 = vmul.f32 %v7684_v2, %v8018_v43 }
 0xadc   : > { %v4501_v53 = vadd.f32 %v4493_v21, %v4452_v15  ;;  %v9068_v46 = vrot.slane %v7912_v51, 3  ;;  %v8084_v15 = vmul.f32 %v7686_v24, %v7721_v54  ;;  %5801 = vrcp.f32 %v8040_v1 }
 0xadd   : > { %v3371_v57 = vsel %vm3367_vm10, %v9066_v60, %v8915_v10  ;;  %v3437_v47 = vsel %vm3433_vm11, %v9067_v3, %v8914_v30  ;;  %v8088_v60 = vmul.f32 %v7688_v33, %v7729_v25  ;;  %v9071_v30 = vrot.slane %v7912_v51, 4 }
 0xade   : > { %v3414_v58 = vmul.f32 %v7556_v23, %v3371_v57  ;;  %v3480_v4 = vmul.f32 %v7558_v19, %v3437_v47  ;;  %v3503_v21 = vsel %vm3499_vm12, %v9068_v46, %v8918_v22  ;;  %9069 = vst [vmem:[#allocation44_spill] sm:$0xff] %v8084_v15  ;;  %v4550_v3 = vadd.f32 %v4542_v45, %v4501_v53 }
 0xadf   : > { %9070 = vst [vmem:[#allocation45_spill] sm:$0xff] %v8088_v60  ;;  %v8096_v10 = vsel %vm3565_vm13, %v9071_v30, %v8919_v40  ;;  %v4208_v28 = vadd.f32 %v4200_v55, %v4159_v0  ;;  %v3546_v46 = vmul.f32 %v7583_v59, %v3503_v21  ;;  %v8926_v22 = vrot.slane %v8045_v34, 6 }
 0xae0   : > { %v3488_v12 = vadd.f32 %v3480_v4, %v3414_v58  ;;  %v4591_v15 = vmul.f32 %v7709_v35, %v8018_v43  ;;  %v9072_v60 = vrot.slane %v8045_v34, 5  ;;  %v9073_v45 = vrot.slane %v7912_v51, 5 }
 0xae1   : > { %v3907_v0 = vmul.f32 %v7657_v39, %v3371_v57  ;;  %v4249_v55 = vmul.f32 %v7633_v61, %v7912_v51  ;;  %v3612_v4 = vmul.f32 %v7599_v6, %v8096_v10  ;;  %v9074_v59 = vrot.slane %v7912_v51, 6 }
 0xae2   : > { %v8108_v53 = vsel %vm3631_vm14, %v9073_v45, %v9072_v60  ;;  %v3554_v58 = vadd.f32 %v3546_v46, %v3488_v12  ;;  %v4599_v40 = vadd.f32 %v4591_v15, %v4550_v3  ;;  %v3956_v30 = vmul.f32 %v7659_v14, %v3437_v47 }
 0xae3   : > { %v8123_v60 = vsel %vm3697_vm15, %v9074_v59, %v8926_v22  ;;  %v3915_v45 = vadd.f32 %v3907_v0, %v3866_v17  ;;  %v8128_v12 = vmul.f32 %v7690_v9, %v7737_v8  ;;  %v4257_v46 = vadd.f32 %v4249_v55, %v4208_v28 }
 0xae4   : > { %v3620_v6 = vadd.f32 %v3612_v4, %v3554_v58  ;;  %v3678_v15 = vmul.f32 %v7615_v41, %v8108_v53  ;;  %v4640_v3 = vmul.f32 %v7661_v16, %v7912_v51  ;;  %v9076_v39 = vrot.slane %v8045_v34, 7 }
 0xae5   : > { %9075 = vst [vmem:[#allocation46_spill] sm:$0xff] %v8128_v12  ;;  %v9077_v59 = vrot.slane %v7912_v51, 7  ;;  %v3964_v0 = vadd.f32 %v3956_v30, %v3915_v45  ;;  %v4005_v22 = vmul.f32 %v7671_v18, %v3503_v21  ;;  %v8145_v28 = vmul.f32 %v7694_v26, %v7758_v27  ;;  %v5802_v45 = vpop.eup %5801 }
 0xae6   : > { %v3686_v55 = vadd.f32 %v3678_v15, %v3620_v6  ;;  %v3744_v58 = vmul.f32 %v7637_v52, %v8123_v60  ;;  %v4298_v4 = vmul.f32 %v7686_v24, %v3371_v57  ;;  %v8152_v51 = vmul.f32 %v7696_v31, %v7789_v42 }
 0xae7   : > { %v8140_v17 = vsel %vm3763_vm1, %v9077_v59, %v9076_v39  ;;  %9078 = vst [vmem:[#allocation47_spill] sm:$0xff] %v8145_v28  ;;  %v4648_v12 = vadd.f32 %v4640_v3, %v4599_v40  ;;  %v4013_v39 = vadd.f32 %v4005_v22, %v3964_v0  ;;  %v4054_v30 = vmul.f32 %v7673_v7, %v8096_v10  ;;  %v3190_v3 = vpop.f32.mrf.mxu3 }
 0xae8   : > { %9079 = vst [vmem:[#allocation48_spill] sm:$0xff] %v8152_v51  ;;  %v3752_v59 = vadd.f32 %v3744_v58, %v3686_v55  ;;  %v3810_v28 = vmul.f32 %v7653_v63, %v8140_v17  ;;  %v4306_v6 = vadd.f32 %v4298_v4, %v4257_v46  ;;  %v4347_v15 = vmul.f32 %v7688_v33, %v3437_v47 }
 0xae9   : > { %v8161_v52 = vmul.f32 %v7707_v29, %v7836_v13  ;;  %v4062_v41 = vadd.f32 %v4054_v30, %v4013_v39  ;;  %v4103_v40 = vmul.f32 %v7677_v50, %v8108_v53  ;;  %v4689_v22 = vmul.f32 %v7887_v38, %v3371_v57  ;;  %v9081_v30 = vld [vmem:[#allocation36_spill] sm:$0xff] }
 0xaea   : > { %v3818_v0 = vadd.f32 %v3810_v28, %v3752_v59  ;;  %v3859_v55 = vmul.f32 %v7631_v37, %v8045_v34  ;;  %v4152_v46 = vmul.f32 %v7682_v62, %v8123_v60  ;;  %v4355_v58 = vadd.f32 %v4347_v15, %v4306_v6 }
 0xaeb   : > { %9080 = vst [vmem:[#allocation49_spill] sm:$0xff] %v8161_v52  ;;  %v4111_v4 = vadd.f32 %v4103_v40, %v4062_v41  ;;  %v4396_v51 = vmul.f32 %v7690_v9, %v3503_v21  ;;  %v4697_v63 = vadd.f32 %v4689_v22, %v4648_v12  ;;  %v4738_v39 = vmul.f32 %v7897_v20, %v3437_v47  ;;  %v9083_v41 = vld [vmem:[#allocation38_spill] sm:$0xff]  ;;  %v9084_v40 = vld [vmem:[#allocation17_spill] sm:$0xff] }
 0xaec   : > { %v8174_v52 = vmul.f32 %v7709_v35, %v9081_v30  ;;  %v8176_v57 = vadd.f32 %v3859_v55, %v3818_v0  ;;  %v4201_v28 = vmul.f32 %v7684_v2, %v8140_v17  ;;  %v3303_v59 = vmul.f32 %v5802_v45, %v8040_v1 }
 0xaed   : > { %v4160_v37 = vadd.f32 %v4152_v46, %v4111_v4  ;;  %v4404_v62 = vadd.f32 %v4396_v51, %v4355_v58  ;;  %v4746_v6 = vadd.f32 %v4738_v39, %v4697_v63  ;;  %v4787_v15 = vmul.f32 %v9083_v41, %v3503_v21  ;;  %v9086_v51 = vld [vmem:[#allocation39_spill] sm:$0xff] }
 0xaee   : > { %9082 = vst [vmem:[#allocation36_spill] sm:$0xff] %v8174_v52  ;;  %v8184_v12 = vmul.f32 %v7661_v16, %v9084_v40  ;;  %v4250_v47 = vmul.f32 %v7633_v61, %v8045_v34  ;;  %v3304_v22 = vsub.f32 1.0, %v3303_v59  ;;  %v3313_v0 = vand.u32 2147483648, %v8040_v1 }
 0xaef   : > { %v4209_v55 = vadd.f32 %v4201_v28, %v4160_v37  ;;  %v4445_v52 = vmul.f32 %v7694_v26, %v8096_v10  ;;  %v4795_v2 = vadd.f32 %v4787_v15, %v4746_v6  ;;  %v4836_v63 = vmul.f32 %v9086_v51, %v8096_v10  ;;  %v9088_v37 = vld [vmem:[#allocation40_spill] sm:$0xff] }
 0xaf0   : > { %9085 = vst [vmem:[#allocation17_spill] sm:$0xff] %v8184_v12  ;;  %v8195_v21 = vmul.f32 %v7887_v38, %v7721_v54  ;;  %v3305_v46 = vmul.f32 %v5802_v45, %v3304_v22  ;;  %vm3308_vm4 = vweird.f32 %v5802_v45  ;;  %v3311_v58 = vand.u32 2147483647, %v8040_v1 }
 0xaf1   : > { %v8198_v4 = vadd.f32 %v4250_v47, %v4209_v55  ;;  %v4453_v39 = vadd.f32 %v4445_v52, %v4404_v62  ;;  %v4844_v59 = vadd.f32 %v4836_v63, %v4795_v2  ;;  %v4885_v28 = vmul.f32 %v9088_v37, %v8108_v53  ;;  %v9091_v52 = vld [vmem:[#allocation41_spill] sm:$0xff]  ;;  %v3192_v47 = vpop.f32.mrf.mxu3  ;;  %v8224_v63 = vld [vmem:[%s8871_s16] ss:$0 sm:$0xff] }
 0xaf2   : > { %9087 = vst [vmem:[#allocation50_spill] sm:$0xff] %v8195_v21  ;;  %v8204_v6 = vmul.f32 %v7897_v20, %v7729_v25  ;;  %v8208_v10 = vmul.f32 %v9083_v41, %v7737_v8  ;;  %v3306_v54 = vadd.f32 %v5802_v45, %v3305_v46  ;;  %vm3307_vm5 = vweird.f32 %v8040_v1  ;;  %v3161_v1 = vpop.f32.mrf.mxu2  ;;  %v9094_v46 = vld [vmem:[#allocation6_spill] sm:$0xff] }
 0xaf3   : > { %v4494_v15 = vmul.f32 %v7696_v31, %v8108_v53  ;;  %v4893_v40 = vadd.f32 %v4885_v28, %v4844_v59  ;;  %v4934_v62 = vmul.f32 %v9091_v52, %v8123_v60  ;;  %vm3309_vm6 = vmor %vm3307_vm5, %vm3308_vm4  ;;  %v3314_v2 = vor.u32 1.1754944e-38, %v3313_v0  ;;  %9093 = vst [vmem:[#allocation54_spill] sm:$0xff] %v8224_v63 }
 0xaf4   : > { %9089 = vst [vmem:[#allocation51_spill] sm:$0xff] %v8204_v6  ;;  %v8217_v25 = vmul.f32 %v9086_v51, %v7758_v27  ;;  %v4983_v8 = vmul.f32 %v8025_v44, %v8140_v17  ;;  %v3310_v22 = vsel %vm3309_vm6, %v5802_v45, %v3306_v54  ;;  %vm3312_vm7 = vcmp.eq.f32.partialorder %v3311_v58, 8.507059e+37  ;;  %v9098_v54 = vld [vmem:[#allocation42_spill] sm:$0xff] }
 0xaf5   : > { %9090 = vst [vmem:[#allocation52_spill] sm:$0xff] %v8208_v10  ;;  %v4502_v55 = vadd.f32 %v4494_v15, %v4453_v39  ;;  %v4942_v53 = vadd.f32 %v4934_v62, %v4893_v40  ;;  %v3315_v0 = vsel %vm3312_vm7, %v3314_v2, %v3310_v22  ;;  %v3191_v59 = vadd.f32 %v3190_v3, %v9094_v46 }
 0xaf6   : > { %9092 = vst [vmem:[#allocation53_spill] sm:$0xff] %v8217_v25  ;;  %v8229_v27 = vmul.f32 %v9088_v37, %v7789_v42  ;;  %v8233_v45 = vmul.f32 %v9091_v52, %v7836_v13  ;;  %v8236_v58 = vmul.f32 %v3315_v0, %v8038_v32  ;;  %v3193_v39 = vadd.f32 %v3192_v47, %v9094_v46 }
 0xaf7   : > { %v8241_v28 = vmul.f32 %v8025_v44, %v9081_v30  ;;  %v8245_v3 = vmul.f32 %v7887_v38, %v9098_v54  ;;  %v4543_v42 = vmul.f32 %v7707_v29, %v8123_v60  ;;  %v4991_v15 = vadd.f32 %v4983_v8, %v4942_v53 }
 0xaf8   : > { %9095 = vst [vmem:[#allocation6_spill] sm:$0xff] %v8229_v27  ;;  %v8257_v13 = vmul.f32 %v7897_v20, %v7941_v11  ;;  %v8940_v32 = vrot.slane %v8236_v58, 1  ;;  %v8939_v30 = vrot.slane %v8236_v58, 2  ;;  %v8941_v40 = vrot.slane %v8236_v58, 3 }
 0xaf9   : > { %9096 = vst [vmem:[#allocation55_spill] sm:$0xff] %v8233_v45  ;;  %v8264_v60 = vmul.f32 %v9083_v41, %v7949_v5  ;;  %v4551_v62 = vadd.f32 %v4543_v42, %v4502_v55  ;;  %v8267_v2 = vadd.f32 %v8224_v63, %v4991_v15  ;;  %v5478_v47 = vmul.f32 -1.442695, %v3191_v59  ;;  %v9116_v45 = vld [vmem:[#allocation9_spill] sm:$0xff] }
 0xafa   : > { %9097 = vst [vmem:[#allocation56_spill] sm:$0xff] %v8241_v28  ;;  %v9103_v11 = vrot.slane %v8045_v34, 1  ;;  %v9104_v22 = vrot.slane %v8045_v34, 2  ;;  %v8944_v55 = vrot.slane %v8236_v58, 4  ;;  %v5479_v53 = vmul.f32 -1.442695, %v3193_v39  ;;  %v3163_v15 = vpop.f32.mrf.mxu2 }
 0xafb   : > { %9099 = vst [vmem:[#allocation42_spill] sm:$0xff] %v8245_v3  ;;  %v8284_v0 = vmul.f32 %v9086_v51, %v7964_v56  ;;  %v4592_v46 = vmul.f32 %v7709_v35, %v8140_v17  ;;  %v8294_v42 = vmul.f32 %v9088_v37, %v7979_v36  ;;  %v8298_v39 = vmul.f32 %v9091_v52, %v8004_v48 }
 0xafc   : > { %9100 = vst [vmem:[#allocation57_spill] sm:$0xff] %v8257_v13  ;;  %v3370_v8 = vsel %vm3367_vm10, %v9103_v11, %v8940_v32  ;;  %v3436_v5 = vsel %vm3433_vm11, %v9104_v22, %v8939_v30  ;;  %v9108_v56 = vrot.slane %v8045_v34, 3  ;;  %v8309_v11 = vmul.f32 %v8025_v44, %v8018_v43 }
 0xafd   : > { %9101 = vst [vmem:[#allocation58_spill] sm:$0xff] %v8264_v60  ;;  %v3415_v59 = vmul.f32 %v7556_v23, %v3370_v8  ;;  %v3481_v54 = vmul.f32 %v7558_v19, %v3436_v5  ;;  %v4600_v22 = vadd.f32 %v4592_v46, %v4551_v62  ;;  %5803 = vpow2.f32 %v5478_v47  ;;  %v9113_v46 = vld [vmem:[#allocation2_spill] sm:$0xff] }
 0xafe   : > { %9102 = vst [vmem:[#allocation59_spill] sm:$0xff] %v8267_v2  ;;  %v3502_v17 = vsel %vm3499_vm12, %v9108_v56, %v8941_v40  ;;  %v4641_v48 = vmul.f32 %v7661_v16, %v8045_v34  ;;  %v9110_v30 = vrot.slane %v8045_v34, 4  ;;  %v9111_v56 = vld [vmem:[#allocation14_spill] sm:$0xff]  ;;  %5805 = vpow2.f32 %v5479_v53 }
 0xaff   : > { %9105 = vst [vmem:[#allocation60_spill] sm:$0xff] %v8284_v0  ;;  %v3489_v36 = vadd.f32 %v3481_v54, %v3415_v59  ;;  %v3908_v40 = vmul.f32 %v9111_v56, %v3370_v8  ;;  %v8324_v59 = vadd.f32 %v3161_v1, %v9113_v46  ;;  %v9114_v54 = vrot.slane %v8236_v58, 5 }
 0xb00   : > { %5011 = vst [vmem:[%s8253_s21 + $0x10] sm:$0xff] %v8267_v2  ;;  %v3568_v32 = vsel %vm3565_vm13, %v9110_v30, %v8944_v55  ;;  %v9112_v2 = vld [vmem:[#allocation8_spill] sm:$0xff]  ;;  %v3957_v53 = vmul.f32 %v7659_v14, %v3436_v5  ;;  %v4299_v28 = vmul.f32 %v7686_v24, %v3370_v8  ;;  %v8337_v1 = vadd.f32 %v3163_v15, %v9113_v46 }
 0xb01   : > { %9106 = vst [vmem:[#allocation61_spill] sm:$0xff] %v8294_v42  ;;  %v3547_v43 = vmul.f32 %v9112_v2, %v3502_v17  ;;  %v3916_v55 = vadd.f32 %v3908_v40, %v8176_v57  ;;  %v3613_v47 = vmul.f32 %v9116_v45, %v3568_v32  ;;  %v4006_v27 = vmul.f32 %v7671_v18, %v3502_v17  ;;  %v9117_v57 = vld [vmem:[#allocation10_spill] sm:$0xff] }
 0xb02   : > { %9107 = vst [vmem:[#allocation62_spill] sm:$0xff] %v8298_v39  ;;  %v4649_v39 = vadd.f32 %v4641_v48, %v4600_v22  ;;  %v4307_v0 = vadd.f32 %v4299_v28, %v8198_v4  ;;  %v9118_v25 = vrot.slane %v8236_v58, 6  ;;  %v9119_v22 = vrot.slane %v8045_v34, 6 }
 0xb03   : > { %9109 = vst [vmem:[#allocation63_spill] sm:$0xff] %v8309_v11  ;;  %v9115_v11 = vrot.slane %v8045_v34, 5  ;;  %v3555_v62 = vadd.f32 %v3547_v43, %v3489_v36  ;;  %v3965_v42 = vadd.f32 %v3957_v53, %v3916_v55  ;;  %v9120_v15 = vrot.slane %v8236_v58, 7 }
 0xb04   : > { %v3700_v36 = vsel %vm3697_vm15, %v9119_v22, %v9118_v25  ;;  %v9121_v55 = vrot.slane %v8045_v34, 7  ;;  %v4690_v4 = vmul.f32 %v7887_v38, %v3370_v8  ;;  %v4055_v46 = vmul.f32 %v7673_v7, %v3568_v32  ;;  %v9122_v8 = vld [vmem:[#allocation15_spill] sm:$0xff] }
 0xb05   : > { %v3634_v30 = vsel %vm3631_vm14, %v9115_v11, %v9114_v54  ;;  %v4348_v11 = vmul.f32 %v7688_v33, %v3436_v5  ;;  %v5804_v54 = vpop.eup %5803  ;;  %v4014_v43 = vadd.f32 %v4006_v27, %v3965_v42  ;;  %v4397_v60 = vmul.f32 %v7690_v9, %v3502_v17 }
 0xb06   : > { %v3679_v40 = vmul.f32 %v9117_v57, %v3634_v30  ;;  %v3766_v48 = vsel %vm3763_vm1, %v9121_v55, %v9120_v15  ;;  %v5806_v28 = vpop.eup %5805  ;;  %v3621_v10 = vadd.f32 %v3613_v47, %v3555_v62  ;;  %v4104_v13 = vmul.f32 %v7677_v50, %v3634_v30 }
 0xb07   : > { %v4356_v53 = vadd.f32 %v4348_v11, %v4307_v0  ;;  %v4698_v25 = vadd.f32 %v4690_v4, %v4649_v39  ;;  %v4739_v22 = vmul.f32 %v7897_v20, %v3436_v5  ;;  %v4063_v6 = vadd.f32 %v4055_v46, %v4014_v43  ;;  %v9123_v39 = vld [vmem:[#allocation16_spill] sm:$0xff] }
 0xb08   : > { %v4446_v3 = vmul.f32 %v7694_v26, %v3568_v32  ;;  %v8361_v15 = vadd.f32 1.0, %v5804_v54  ;;  %v4153_v55 = vmul.f32 %v9122_v8, %v3700_v36  ;;  %v4788_v42 = vmul.f32 %v9083_v41, %v3502_v17  ;;  %v9124_v17 = vld [vmem:[#allocation12_spill] sm:$0xff] }
 0xb09   : > { %v4405_v34 = vadd.f32 %v4397_v60, %v4356_v53  ;;  %v4747_v27 = vadd.f32 %v4739_v22, %v4698_v25  ;;  %v8365_v0 = vadd.f32 1.0, %v5806_v28  ;;  %v4112_v11 = vadd.f32 %v4104_v13, %v4063_v6 }
 0xb0a   : > { %v4495_v47 = vmul.f32 %v7696_v31, %v3634_v30  ;;  %5807 = vrcp.f32 %v8361_v15  ;;  %v3687_v5 = vadd.f32 %v3679_v40, %v3621_v10  ;;  %v4202_v60 = vmul.f32 %v9123_v39, %v3766_v48 }
 0xb0b   : > { %v4454_v62 = vadd.f32 %v4446_v3, %v4405_v34  ;;  %v4796_v4 = vadd.f32 %v4788_v42, %v4747_v27  ;;  %v4837_v54 = vmul.f32 %v9086_v51, %v3568_v32  ;;  %v4161_v43 = vadd.f32 %v4153_v55, %v4112_v11  ;;  %v9125_v11 = vld [vmem:[#allocation13_spill] sm:$0xff] }
 0xb0c   : > { %v4544_v53 = vmul.f32 %v7707_v29, %v3700_v36  ;;  %5809 = vrcp.f32 %v8365_v0  ;;  %v3745_v28 = vmul.f32 %v9124_v17, %v3700_v36  ;;  %v4251_v6 = vmul.f32 %v7633_v61, %v8236_v58 }
 0xb0d   : > { %v4503_v46 = vadd.f32 %v4495_v47, %v4454_v62  ;;  %v4845_v3 = vadd.f32 %v4837_v54, %v4796_v4  ;;  %v4886_v13 = vmul.f32 %v9088_v37, %v3634_v30  ;;  %v4210_v10 = vadd.f32 %v4202_v60, %v4161_v43 }
 0xb0e   : > { %v4593_v25 = vmul.f32 %v7709_v35, %v3766_v48  ;;  %v3409_v32 = vmul.f32 0.0, %v7556_v23  ;;  %v3753_v22 = vadd.f32 %v3745_v28, %v3687_v5  ;;  %v4935_v55 = vmul.f32 %v9091_v52, %v3700_v36  ;;  %v9126_v36 = vld [vmem:[#allocation11_spill] sm:$0xff] }
 0xb0f   : > { %v4552_v40 = vadd.f32 %v4544_v53, %v4503_v46  ;;  %v4894_v34 = vadd.f32 %v4886_v13, %v4845_v3  ;;  %v3475_v27 = vmul.f32 0.0, %v7558_v19  ;;  %v3811_v62 = vmul.f32 %v9125_v11, %v3766_v48 }
 0xb10   : > { %v5808_v42 = vpop.eup %5807  ;;  %v8382_v47 = vadd.f32 %v4251_v6, %v4210_v10  ;;  %v4642_v30 = vmul.f32 %v7661_v16, %v8236_v58  ;;  %v4984_v54 = vmul.f32 %v8025_v44, %v3766_v48  ;;  %v3860_v53 = vmul.f32 %v9126_v36, %v8236_v58 }
 0xb11   : > { %v4601_v4 = vadd.f32 %v4593_v25, %v4552_v40  ;;  %v4943_v60 = vadd.f32 %v4935_v55, %v4894_v34  ;;  %v3318_v43 = vmul.f32 %v5808_v42, %v8361_v15  ;;  %v3483_v5 = vadd.f32 %v3475_v27, %v3409_v32 }
 0xb12   : > { %v5810_v46 = vpop.eup %5809  ;;  %v3541_v3 = vmul.f32 0.0, %v9112_v2  ;;  %v3607_v6 = vmul.f32 0.0, %v9116_v45  ;;  %v3819_v13 = vadd.f32 %v3811_v62, %v3753_v22  ;;  %v3326_v48 = vand.u32 2147483647, %v8361_v15 }
 0xb13   : > { %v8390_v28 = vadd.f32 %v4642_v30, %v4601_v4  ;;  %v4992_v10 = vadd.f32 %v4984_v54, %v4943_v60  ;;  %v3319_v40 = vsub.f32 1.0, %v3318_v43  ;;  %v3333_v25 = vmul.f32 %v5810_v46, %v8365_v0 }
 0xb14   : > { %v3328_v32 = vand.u32 2147483648, %v8361_v15  ;;  %v3549_v34 = vadd.f32 %v3541_v3, %v3483_v5  ;;  %v3673_v55 = vmul.f32 0.0, %v9117_v57  ;;  %vm3323_vm8 = vweird.f32 %v5808_v42  ;;  %v9129_v3 = vld [vmem:[#allocation3_spill] sm:$0xff] }
 0xb15   : > { %9127 = vst [vmem:[#allocation14_spill] sm:$0xff] %v8390_v28  ;;  %v8399_v27 = vadd.f32 %v8224_v63, %v4992_v10  ;;  %v3320_v4 = vmul.f32 %v5808_v42, %v3319_v40  ;;  %v3334_v30 = vsub.f32 1.0, %v3333_v25  ;;  %v3341_v22 = vand.u32 2147483647, %v8365_v0 }
 0xb16   : > { %v3343_v62 = vand.u32 2147483648, %v8365_v0  ;;  %v3615_v60 = vadd.f32 %v3607_v6, %v3549_v34  ;;  %v3739_v54 = vmul.f32 0.0, %v9124_v17  ;;  %vm3322_vm9 = vweird.f32 %v8361_v15 }
 0xb17   : > { %9128 = vst [vmem:[#allocation8_spill] sm:$0xff] %v8399_v27  ;;  %v3321_v43 = vadd.f32 %v5808_v42, %v3320_v4  ;;  %v3335_v5 = vmul.f32 %v5810_v46, %v3334_v30  ;;  %vm3338_vm2 = vweird.f32 %v5810_v46  ;;  %vm3377_vm0 = vcmp.ge.s32.totalorder %v9129_v3, 15  ;;  %vm3324_vm3 = vmor %vm3322_vm9, %vm3323_vm8 }
 0xb18   : > { %5012 = vst [vmem:[%s8253_s21 + $0x18] sm:$0xff] %v8399_v27  ;;  %v8408_v10 = vadd.f32 %v3860_v53, %v3819_v13  ;;  %v3329_v40 = vor.u32 1.1754944e-38, %v3328_v32  ;;  %v3681_v25 = vadd.f32 %v3673_v55, %v3615_v60  ;;  %v3805_v63 = vmul.f32 0.0, %v9125_v11 }
 0xb19   : > { %v3325_v44 = vsel %vm3324_vm3, %v5808_v42, %v3321_v43  ;;  %vm3327_vm4 = vcmp.eq.f32.partialorder %v3326_v48, 8.507059e+37  ;;  %v3336_v6 = vadd.f32 %v5810_v46, %v3335_v5  ;;  %vm3337_vm5 = vweird.f32 %v8365_v0 }
 0xb1a   : > { %v3330_v34 = vsel %vm3327_vm4, %v3329_v40, %v3325_v44  ;;  %vm3339_vm6 = vmor %vm3337_vm5, %vm3338_vm2  ;;  %vm3342_vm7 = vcmp.eq.f32.partialorder %v3341_v22, 8.507059e+37  ;;  %v3344_v15 = vor.u32 1.1754944e-38, %v3343_v62  ;;  %v3747_v4 = vadd.f32 %v3739_v54, %v3681_v25 }
 0xb1b   : > { %v8413_v30 = vmul.f32 %v3330_v34, %v8324_v59  ;;  %v3340_v53 = vsel %vm3339_vm6, %v5810_v46, %v3336_v6  ;;  %vm3443_vm8 = vcmp.ge.s32.totalorder %v9129_v3, 14  ;;  %vm3509_vm9 = vcmp.ge.s32.totalorder %v9129_v3, 13 }
 0xb1c   : > { %v3345_v13 = vsel %vm3342_vm7, %v3344_v15, %v3340_v53  ;;  %vm3575_vm3 = vcmp.ge.s32.totalorder %v9129_v3, 12  ;;  %v8418_v42 = vadd.f32 %v3805_v63, %v3747_v4  ;;  %v8421_v0 = vmul.f32 0.0, %v9126_v36  ;;  %v9134_v53 = vld [vmem:[#allocation7_spill] sm:$0xff] }
 0xb1d   : > { %v8425_v44 = vmul.f32 %v9126_v36, %v8413_v30  ;;  %v8429_v59 = vmul.f32 %v7633_v61, %v8413_v30  ;;  %v8433_v46 = vmul.f32 %v7661_v16, %v8413_v30  ;;  %v8436_v48 = vmul.f32 %v3345_v13, %v8337_v1 }
 0xb1e   : > { %v3365_v63 = vrot.slane %v8413_v30, 1  ;;  %v3431_v32 = vrot.slane %v8413_v30, 2  ;;  %v3497_v55 = vrot.slane %v8413_v30, 3  ;;  %v3563_v36 = vrot.slane %v8413_v30, 4 }
 0xb1f   : > { %vm3641_vm2 = vcmp.ge.s32.totalorder %v9129_v3, 11  ;;  %v3366_v22 = vrot.slane %v8436_v48, 1  ;;  %v3432_v62 = vrot.slane %v8436_v48, 2  ;;  %v3498_v60 = vrot.slane %v8436_v48, 3 }
 0xb20   : > { %v3564_v54 = vrot.slane %v8436_v48, 4  ;;  %v9130_v1 = vrot.slane %v8236_v58, 1  ;;  %v9131_v5 = vrot.slane %v8236_v58, 2  ;;  %v9132_v25 = vrot.slane %v8236_v58, 3 }
 0xb21   : > { %v9133_v34 = vrot.slane %v8236_v58, 4  ;;  %vm3707_vm4 = vcmp.ge.s32.totalorder %v9129_v3, 10  ;;  %v8474_v4 = vsel %vm3367_vm10, %v3365_v63, %v3366_v22  ;;  %v9135_v13 = vrot.slane %v9134_v53, 1 }
 0xb22   : > { %v8451_v43 = vsel %vm3367_vm10, %v9130_v1, %v3365_v63  ;;  %v8457_v40 = vsel %vm3433_vm11, %v9131_v5, %v3431_v32  ;;  %v8463_v6 = vsel %vm3499_vm12, %v9132_v25, %v3497_v55  ;;  %v8486_v25 = vsel %vm3433_vm11, %v3431_v32, %v3432_v62 }
 0xb23   : > { %v8469_v15 = vsel %vm3565_vm13, %v9133_v34, %v3563_v36  ;;  %v8480_v1 = vsel %vm3367_vm10, %v3366_v22, %v9135_v13  ;;  %v3416_v5 = vmul.f32 %v7556_v23, %v8451_v43  ;;  %vm3870_vm5 = vcmp.ge.s32.totalorder %v6721_v49, 7 }
 0xb24   : > { %v3401_v63 = vsel %vm3377_vm0, %v8480_v1, 0.0  ;;  %v9136_v34 = vrot.slane %v9134_v53, 2  ;;  %v3482_v22 = vmul.f32 %v7558_v19, %v8457_v40  ;;  %v8502_v13 = vsel %vm3499_vm12, %v3497_v55, %v3498_v60 }
 0xb25   : > { %v3410_v32 = vmul.f32 %v7556_v23, %v3401_v63  ;;  %v9137_v37 = vrot.slane %v9134_v53, 3  ;;  %vm3773_vm10 = vcmp.ge.s32.totalorder %v9129_v3, 9  ;;  %v8523_v63 = vsel %vm3565_vm13, %v3563_v36, %v3564_v54 }
 0xb26   : > { %v8496_v27 = vsel %vm3433_vm11, %v3432_v62, %v9136_v34  ;;  %v3548_v62 = vmul.f32 %v9112_v2, %v8463_v6  ;;  %v3490_v34 = vadd.f32 %v3482_v22, %v3416_v5  ;;  %vm3919_vm11 = vcmp.ge.s32.totalorder %v6721_v49, 6 }
 0xb27   : > { %v3467_v52 = vsel %vm3443_vm8, %v8496_v27, 0.0  ;;  %v8512_v51 = vsel %vm3499_vm12, %v3498_v60, %v9137_v37  ;;  %v9138_v60 = vrot.slane %v9134_v53, 4  ;;  %v3630_v20 = vrot.slane %v8436_v48, 5 }
 0xb28   : > { %v3476_v55 = vmul.f32 %v7558_v19, %v3467_v52  ;;  %v3533_v23 = vsel %vm3509_vm9, %v8512_v51, 0.0  ;;  %v3614_v19 = vmul.f32 %v9116_v45, %v8469_v15  ;;  %v3629_v52 = vrot.slane %v8413_v30, 5 }
 0xb29   : > { %v3542_v37 = vmul.f32 %v9112_v2, %v3533_v23  ;;  %v8531_v41 = vsel %vm3565_vm13, %v3564_v54, %v9138_v60  ;;  %v3556_v22 = vadd.f32 %v3548_v62, %v3490_v34  ;;  %vm3968_vm12 = vcmp.ge.s32.totalorder %v6721_v49, 5 }
 0xb2a   : > { %v3484_v5 = vadd.f32 %v3476_v55, %v3410_v32  ;;  %v3599_v36 = vsel %vm3575_vm3, %v8531_v41, 0.0  ;;  %v9139_v54 = vrot.slane %v8236_v58, 5  ;;  %v3695_v60 = vrot.slane %v8413_v30, 6 }
 0xb2b   : > { %v3608_v2 = vmul.f32 %v9116_v45, %v3599_v36  ;;  %v3696_v32 = vrot.slane %v8436_v48, 6  ;;  %v3622_v55 = vadd.f32 %v3614_v19, %v3556_v22  ;;  %v8552_v34 = vsel %vm3631_vm14, %v3629_v52, %v3630_v20 }
 0xb2c   : > { %v8546_v23 = vsel %vm3631_vm14, %v9139_v54, %v3629_v52  ;;  %v3550_v62 = vadd.f32 %v3542_v37, %v3484_v5  ;;  %v9140_v28 = vrot.slane %v9134_v53, 5  ;;  %vm4017_vm13 = vcmp.ge.s32.totalorder %v6721_v49, 4 }
 0xb2d   : > { %v3680_v37 = vmul.f32 %v9117_v57, %v8546_v23  ;;  %v8568_v19 = vsel %vm3697_vm15, %v3695_v60, %v3696_v32  ;;  %v9141_v52 = vrot.slane %v8236_v58, 6  ;;  %v9142_v22 = vrot.slane %v9134_v53, 6 }
 0xb2e   : > { %v8558_v45 = vsel %vm3631_vm14, %v3630_v20, %v9140_v28  ;;  %v3616_v20 = vadd.f32 %v3608_v2, %v3550_v62  ;;  %vm4066_vm14 = vcmp.ge.s32.totalorder %v6721_v49, 3  ;;  %v3761_v2 = vrot.slane %v8413_v30, 7 }
 0xb2f   : > { %v3665_v36 = vsel %vm3641_vm2, %v8558_v45, 0.0  ;;  %v8574_v5 = vsel %vm3697_vm15, %v9141_v52, %v3695_v60  ;;  %v8581_v54 = vsel %vm3697_vm15, %v3696_v32, %v9142_v22  ;;  %v3688_v12 = vadd.f32 %v3680_v37, %v3622_v55 }
 0xb30   : > { %v3674_v28 = vmul.f32 %v9117_v57, %v3665_v36  ;;  %v3746_v21 = vmul.f32 %v9124_v17, %v8574_v5  ;;  %v3731_v60 = vsel %vm3707_vm4, %v8581_v54, 0.0  ;;  %v3762_v57 = vrot.slane %v8436_v48, 7 }
 0xb31   : > { %v3740_v36 = vmul.f32 %v9124_v17, %v3731_v60  ;;  %v3862_v32 = vadd.f32 %v8421_v0, %v8418_v42  ;;  %v3894_v52 = vsel %vm3870_vm5, %v8480_v1, 0.0  ;;  %v9143_v37 = vrot.slane %v8236_v58, 7 }
 0xb32   : > { %v3682_v62 = vadd.f32 %v3674_v28, %v3616_v20  ;;  %v3754_v22 = vadd.f32 %v3746_v21, %v3688_v12  ;;  %v8599_v55 = vsel %vm3763_vm1, %v3761_v2, %v3762_v57  ;;  %v9144_v17 = vrot.slane %v9134_v53, 7 }
 0xb33   : > { %v8605_v30 = vsel %vm3763_vm1, %v9143_v37, %v3761_v2  ;;  %v3903_v58 = vmul.f32 %v9111_v56, %v3894_v52  ;;  %v3909_v28 = vmul.f32 %v9111_v56, %v8451_v43  ;;  %v3910_v53 = vmul.f32 %v9111_v56, %v8474_v4 }
 0xb34   : > { %v8611_v42 = vsel %vm3763_vm1, %v3762_v57, %v9144_v17  ;;  %v3748_v0 = vadd.f32 %v3740_v36, %v3682_v62  ;;  %v3812_v21 = vmul.f32 %v9125_v11, %v8605_v30  ;;  %v3943_v60 = vsel %vm3919_vm11, %v8496_v27, 0.0 }
 0xb35   : > { %v3797_v12 = vsel %vm3773_vm10, %v8611_v42, 0.0  ;;  %v3911_v3 = vadd.f32 %v3903_v58, %v3862_v32  ;;  %v3952_v57 = vmul.f32 %v7659_v14, %v3943_v60  ;;  %v3958_v62 = vmul.f32 %v7659_v14, %v8457_v40  ;;  %v9146_v60 = vld [vmem:[#allocation20_spill] sm:$0xff] }
 0xb36   : > { %v3806_v20 = vmul.f32 %v9125_v11, %v3797_v12  ;;  %v3820_v2 = vadd.f32 %v3812_v21, %v3754_v22  ;;  %v3917_v11 = vadd.f32 %v3909_v28, %v8408_v10  ;;  %v3959_v52 = vmul.f32 %v7659_v14, %v8486_v25  ;;  %v9145_v12 = vld [vmem:[#allocation18_spill] sm:$0xff] }
 0xb37   : > { %v3992_v56 = vsel %vm3968_vm12, %v8512_v51, 0.0  ;;  %v3960_v17 = vadd.f32 %v3952_v57, %v3911_v3  ;;  %v4007_v22 = vmul.f32 %v7671_v18, %v8463_v6  ;;  %v4008_v10 = vmul.f32 %v7671_v18, %v8502_v13 }
 0xb38   : > { %v3814_v36 = vadd.f32 %v3806_v20, %v3748_v0  ;;  %v3869_v37 = vadd.f32 %v8425_v44, %v3820_v2  ;;  %v4001_v32 = vmul.f32 %v7671_v18, %v3992_v56  ;;  %v3966_v0 = vadd.f32 %v3958_v62, %v3917_v11  ;;  %v9147_v56 = vld [vmem:[#allocation21_spill] sm:$0xff] }
 0xb39   : > { %v4041_v14 = vsel %vm4017_vm13, %v8531_v41, 0.0  ;;  %v4056_v28 = vmul.f32 %v7673_v7, %v8469_v15  ;;  %v4057_v57 = vmul.f32 %v7673_v7, %v8523_v63  ;;  %v4090_v18 = vsel %vm4066_vm14, %v8558_v45, 0.0 }
 0xb3a   : > { %v3863_v21 = vadd.f32 %v9145_v12, %v3814_v36  ;;  %v3918_v58 = vadd.f32 %v3910_v53, %v3869_v37  ;;  %v4009_v20 = vadd.f32 %v4001_v32, %v3960_v17  ;;  %v4050_v44 = vmul.f32 %v7673_v7, %v4041_v14 }
 0xb3b   : > { %v4015_v3 = vadd.f32 %v4007_v22, %v3966_v0  ;;  %v4099_v53 = vmul.f32 %v7677_v50, %v4090_v18  ;;  %v4105_v11 = vmul.f32 %v7677_v50, %v8546_v23  ;;  %v4106_v32 = vmul.f32 %v7677_v50, %v8552_v34 }
 0xb3c   : > { %v3912_v2 = vadd.f32 %v9146_v60, %v3863_v21  ;;  %v3967_v62 = vadd.f32 %v3959_v52, %v3918_v58  ;;  %v4058_v36 = vadd.f32 %v4050_v44, %v4009_v20  ;;  %vm4115_vm15 = vcmp.ge.s32.totalorder %v6721_v49, 2  ;;  %v9148_v21 = vld [vmem:[#allocation22_spill] sm:$0xff] }
 0xb3d   : > { %v4064_v17 = vadd.f32 %v4056_v28, %v4015_v3  ;;  %v4139_v12 = vsel %vm4115_vm15, %v8581_v54, 0.0  ;;  %v4154_v52 = vmul.f32 %v9122_v8, %v8574_v5  ;;  %v4155_v20 = vmul.f32 %v9122_v8, %v8568_v19  ;;  %v9149_v28 = vld [vmem:[#allocation23_spill] sm:$0xff] }
 0xb3e   : > { %v3961_v37 = vadd.f32 %v9147_v56, %v3912_v2  ;;  %v4016_v7 = vadd.f32 %v4008_v10, %v3967_v62  ;;  %v4107_v22 = vadd.f32 %v4099_v53, %v4058_v36  ;;  %v4148_v58 = vmul.f32 %v9122_v8, %v4139_v12 }
 0xb3f   : > { %v4113_v14 = vadd.f32 %v4105_v11, %v4064_v17  ;;  %vm4164_vm1 = vcmp.ge.s32.totalorder %v6721_v49, 1  ;;  %v4203_v50 = vmul.f32 %v9123_v39, %v8605_v30  ;;  %v4204_v10 = vmul.f32 %v9123_v39, %v8599_v55  ;;  %v9151_v49 = vld [vmem:[#allocation24_spill] sm:$0xff] }
 0xb40   : > { %v4010_v0 = vadd.f32 %v9148_v21, %v3961_v37  ;;  %v4065_v44 = vadd.f32 %v4057_v57, %v4016_v7  ;;  %v4156_v2 = vadd.f32 %v4148_v58, %v4107_v22  ;;  %v4188_v18 = vsel %vm4164_vm1, %v8611_v42, 0.0  ;;  %v9150_v57 = vld [vmem:[#allocation5_spill] sm:$0xff] }
 0xb41   : > { %v4162_v3 = vadd.f32 %v4154_v52, %v4113_v14  ;;  %v4197_v36 = vmul.f32 %v9123_v39, %v4188_v18  ;;  %v4253_v8 = vmul.f32 %v7633_v61, %v8436_v48  ;;  %vm4277_vm0 = vcmp.lt.s32.totalorder %v9150_v57, 63  ;;  %v9152_v22 = vld [vmem:[#allocation25_spill] sm:$0xff] }
 0xb42   : > { %v4059_v60 = vadd.f32 %v9149_v28, %v4010_v0  ;;  %v4114_v62 = vadd.f32 %v4106_v32, %v4065_v44  ;;  %v4293_v56 = vsel %vm4277_vm0, %v8480_v1, 0.0  ;;  %v4300_v37 = vmul.f32 %v7686_v24, %v8451_v43  ;;  %v9153_v0 = vld [vmem:[#allocation19_spill] sm:$0xff]  ;;  %v9154_v44 = vld [vmem:[#allocation26_spill] sm:$0xff] }
 0xb43   : > { %v4211_v11 = vadd.f32 %v4203_v50, %v4162_v3  ;;  %v4205_v7 = vadd.f32 %v4197_v36, %v4156_v2  ;;  %v4301_v32 = vmul.f32 %v7686_v24, %v8474_v4  ;;  %v4302_v39 = vmul.f32 %v7686_v24, %v4293_v56 }
 0xb44   : > { %v4108_v53 = vadd.f32 %v9151_v49, %v4059_v60  ;;  %v4163_v17 = vadd.f32 %v4155_v20, %v4114_v62  ;;  %v4308_v52 = vadd.f32 %v4300_v37, %v8382_v47  ;;  %vm4326_vm6 = vcmp.lt.s32.totalorder %v9150_v57, 62  ;;  %v9155_v47 = vld [vmem:[#allocation28_spill] sm:$0xff] }
 0xb45   : > { %v4260_v61 = vadd.f32 %v8429_v59, %v4211_v11  ;;  %v4254_v14 = vadd.f32 %v9153_v0, %v4205_v7  ;;  %v4342_v58 = vsel %vm4326_vm6, %v8496_v27, 0.0  ;;  %v4349_v20 = vmul.f32 %v7688_v33, %v8457_v40  ;;  %v9157_v11 = vld [vmem:[#allocation29_spill] sm:$0xff]  ;;  %v9158_v37 = vld [vmem:[#allocation44_spill] sm:$0xff] }
 0xb46   : > { %v4157_v12 = vadd.f32 %v9152_v22, %v4108_v53  ;;  %v4212_v21 = vadd.f32 %v4204_v10, %v4163_v17  ;;  %v4350_v24 = vmul.f32 %v7688_v33, %v8486_v25  ;;  %v4351_v59 = vmul.f32 %v7688_v33, %v4342_v58  ;;  %v9156_v10 = vld [vmem:[#allocation27_spill] sm:$0xff] }
 0xb47   : > { %v4309_v28 = vadd.f32 %v4301_v32, %v4260_v61  ;;  %v4303_v2 = vadd.f32 %v9155_v47, %v4254_v14  ;;  %v4357_v3 = vadd.f32 %v4349_v20, %v4308_v52  ;;  %vm4375_vm7 = vcmp.lt.s32.totalorder %v9150_v57, 61 }
 0xb48   : > { %v4206_v50 = vadd.f32 %v9154_v44, %v4157_v12  ;;  %v4261_v60 = vadd.f32 %v4253_v8, %v4212_v21  ;;  %v4391_v36 = vsel %vm4375_vm7, %v8512_v51, 0.0  ;;  %v4398_v49 = vmul.f32 %v7690_v9, %v8463_v6  ;;  %v9159_v12 = vld [vmem:[#allocation30_spill] sm:$0xff]  ;;  %v9160_v21 = vld [vmem:[#allocation45_spill] sm:$0xff]  ;;  %v9161_v44 = vld [vmem:[#allocation31_spill] sm:$0xff] }
 0xb49   : > { %v4358_v62 = vadd.f32 %v4350_v24, %v4309_v28  ;;  %v4352_v56 = vadd.f32 %v9157_v11, %v4303_v2  ;;  %v4399_v33 = vmul.f32 %v7690_v9, %v8502_v13  ;;  %v4400_v8 = vmul.f32 %v7690_v9, %v4391_v36  ;;  %v9162_v24 = vld [vmem:[#allocation46_spill] sm:$0xff]  ;;  %v9164_v36 = vld [vmem:[#allocation47_spill] sm:$0xff] }
 0xb4a   : > { %v4255_v18 = vadd.f32 %v9156_v10, %v4206_v50  ;;  %v4310_v53 = vadd.f32 %v4302_v39, %v4261_v60  ;;  %v4406_v7 = vadd.f32 %v4398_v49, %v4357_v3  ;;  %vm4424_vm8 = vcmp.lt.s32.totalorder %v9150_v57, 60  ;;  %v9163_v10 = vld [vmem:[#allocation32_spill] sm:$0xff] }
 0xb4b   : > { %v4447_v32 = vmul.f32 %v7694_v26, %v8469_v15  ;;  %v4401_v61 = vadd.f32 %v9159_v12, %v4352_v56  ;;  %v4407_v52 = vadd.f32 %v4399_v33, %v4358_v62  ;;  %v4440_v39 = vsel %vm4424_vm8, %v8531_v41, 0.0 }
 0xb4c   : > { %v4304_v17 = vadd.f32 %v9158_v37, %v4255_v18  ;;  %v4359_v22 = vadd.f32 %v4351_v59, %v4310_v53  ;;  %v4448_v14 = vmul.f32 %v7694_v26, %v8523_v63  ;;  %v4449_v9 = vmul.f32 %v7694_v26, %v4440_v39  ;;  %v9165_v37 = vld [vmem:[#allocation33_spill] sm:$0xff] }
 0xb4d   : > { %v4455_v58 = vadd.f32 %v4447_v32, %v4406_v7  ;;  %v4450_v50 = vadd.f32 %v9161_v44, %v4401_v61  ;;  %vm4473_vm9 = vcmp.lt.s32.totalorder %v9150_v57, 59  ;;  %v4496_v28 = vmul.f32 %v7696_v31, %v8546_v23 }
 0xb4e   : > { %v4353_v0 = vadd.f32 %v9160_v21, %v4304_v17  ;;  %v4408_v20 = vadd.f32 %v4400_v8, %v4359_v22  ;;  %v4456_v60 = vadd.f32 %v4448_v14, %v4407_v52  ;;  %v4489_v47 = vsel %vm4473_vm9, %v8558_v45, 0.0  ;;  %v9167_v21 = vld [vmem:[#allocation49_spill] sm:$0xff] }
 0xb4f   : > { %v4497_v2 = vmul.f32 %v7696_v31, %v8552_v34  ;;  %v4498_v26 = vmul.f32 %v7696_v31, %v4489_v47  ;;  %v4499_v18 = vadd.f32 %v9163_v10, %v4450_v50  ;;  %v4504_v62 = vadd.f32 %v4496_v28, %v4455_v58  ;;  %v9166_v31 = vld [vmem:[#allocation48_spill] sm:$0xff]  ;;  %v9168_v58 = vld [vmem:[#allocation34_spill] sm:$0xff] }
 0xb50   : > { %v4402_v59 = vadd.f32 %v9162_v24, %v4353_v0  ;;  %v4457_v3 = vadd.f32 %v4449_v9, %v4408_v20  ;;  %vm4522_vm3 = vcmp.lt.s32.totalorder %v9150_v57, 58  ;;  %v4545_v11 = vmul.f32 %v7707_v29, %v8574_v5  ;;  %v9169_v28 = vld [vmem:[#allocation36_spill] sm:$0xff] }
 0xb51   : > { %v4505_v53 = vadd.f32 %v4497_v2, %v4456_v60  ;;  %v4538_v33 = vsel %vm4522_vm3, %v8581_v54, 0.0  ;;  %v4546_v8 = vmul.f32 %v7707_v29, %v8568_v19  ;;  %v4548_v17 = vadd.f32 %v9165_v37, %v4499_v18  ;;  %v9170_v60 = vld [vmem:[#allocation35_spill] sm:$0xff]  ;;  %v9171_v2 = vld [vmem:[#allocation4_spill] sm:$0xff]  ;;  %v9172_v18 = vld [vmem:[#allocation17_spill] sm:$0xff] }
 0xb52   : > { %v4451_v49 = vadd.f32 %v9164_v36, %v4402_v59  ;;  %v4506_v56 = vadd.f32 %v4498_v26, %v4457_v3  ;;  %v4547_v32 = vmul.f32 %v7707_v29, %v4538_v33  ;;  %v4553_v22 = vadd.f32 %v4545_v11, %v4504_v62 }
 0xb53   : > { %vm4571_vm2 = vcmp.lt.s32.totalorder %v9150_v57, 57  ;;  %v4554_v12 = vadd.f32 %v4546_v8, %v4505_v53  ;;  %v4594_v52 = vmul.f32 %v7709_v35, %v8605_v30  ;;  %v4595_v39 = vmul.f32 %v7709_v35, %v8599_v55  ;;  %v9173_v53 = vld [vmem:[#allocation50_spill] sm:$0xff] }
 0xb54   : > { %v4500_v7 = vadd.f32 %v9166_v31, %v4451_v49  ;;  %v4587_v61 = vsel %vm4571_vm2, %v8611_v42, 0.0  ;;  %v4555_v14 = vadd.f32 %v4547_v32, %v4506_v56  ;;  %v4597_v20 = vadd.f32 %v9168_v58, %v4548_v17  ;;  %v9174_v56 = vld [vmem:[#allocation14_spill] sm:$0xff]  ;;  %v9176_v31 = vld [vmem:[#allocation37_spill] sm:$0xff] }
 0xb55   : > { %v4596_v9 = vmul.f32 %v7709_v35, %v4587_v61  ;;  %v4602_v29 = vadd.f32 %v4594_v52, %v4553_v22  ;;  %v4603_v44 = vadd.f32 %v4595_v39, %v4554_v12  ;;  %v4644_v57 = vmul.f32 %v7661_v16, %v8436_v48  ;;  %v9177_v22 = vld [vmem:[#allocation51_spill] sm:$0xff]  ;;  %v9178_v61 = vld [vmem:[#allocation57_spill] sm:$0xff] }
 0xb56   : > { %v4549_v0 = vadd.f32 %v9167_v21, %v4500_v7  ;;  %v4645_v50 = vmul.f32 0.0, %v7661_v16  ;;  %v4646_v47 = vadd.f32 %v9170_v60, %v4597_v20  ;;  %vm4668_vm4 = vcmp.lt.s32.totalorder %v9171_v2, 55 }
 0xb57   : > { %v4604_v59 = vadd.f32 %v4596_v9, %v4555_v14  ;;  %v4651_v3 = vadd.f32 %v8433_v46, %v4602_v29  ;;  %v4652_v26 = vadd.f32 %v4644_v57, %v4603_v44  ;;  %v4684_v35 = vsel %vm4668_vm4, %v8480_v1, 0.0  ;;  %v9175_v1 = vld [vmem:[#allocation42_spill] sm:$0xff]  ;;  %v9180_v29 = vld [vmem:[#allocation52_spill] sm:$0xff] }
 0xb58   : > { %v4598_v24 = vadd.f32 %v9169_v28, %v4549_v0  ;;  %v4691_v10 = vmul.f32 %v7887_v38, %v8451_v43  ;;  %v4692_v16 = vmul.f32 %v7887_v38, %v8474_v4  ;;  %v4693_v36 = vmul.f32 %v7887_v38, %v4684_v35  ;;  %v9181_v57 = vld [vmem:[#allocation58_spill] sm:$0xff]  ;;  %v9183_v35 = vld [vmem:[#allocation53_spill] sm:$0xff] }
 0xb59   : > { %v4653_v48 = vadd.f32 %v4645_v50, %v4604_v59  ;;  %v4694_v49 = vmul.f32 0.0, %v7887_v38  ;;  %v4695_v11 = vadd.f32 %v9173_v53, %v4646_v47  ;;  %vm4717_vm5 = vcmp.lt.s32.totalorder %v9171_v2, 54 }
 0xb5a   : > { %v4647_v62 = vadd.f32 %v9172_v18, %v4598_v24  ;;  %v4699_v46 = vadd.f32 %v4691_v10, %v9174_v56  ;;  %v4700_v8 = vadd.f32 %v4692_v16, %v4651_v3  ;;  %v4701_v43 = vadd.f32 %v4693_v36, %v4652_v26  ;;  %v9184_v18 = vld [vmem:[#allocation60_spill] sm:$0xff] }
 0xb5b   : > { %v4733_v37 = vsel %vm4717_vm5, %v8496_v27, 0.0  ;;  %v4702_v17 = vadd.f32 %v4694_v49, %v4653_v48  ;;  %v4740_v4 = vmul.f32 %v9176_v31, %v8457_v40  ;;  %v4741_v7 = vmul.f32 %v9176_v31, %v8486_v25  ;;  %v9179_v40 = vld [vmem:[#allocation38_spill] sm:$0xff] }
 0xb5c   : > { %v4696_v33 = vadd.f32 %v9175_v1, %v4647_v62  ;;  %v4742_v38 = vmul.f32 %v9176_v31, %v4733_v37  ;;  %v4743_v32 = vmul.f32 0.0, %v9176_v31  ;;  %v4744_v12 = vadd.f32 %v9177_v22, %v4695_v11 }
 0xb5d   : > { %vm4766_vm10 = vcmp.lt.s32.totalorder %v9171_v2, 53  ;;  %v4748_v39 = vadd.f32 %v4740_v4, %v4699_v46  ;;  %v4749_v21 = vadd.f32 %v4741_v7, %v4700_v8  ;;  %v4789_v9 = vmul.f32 %v9179_v40, %v8463_v6  ;;  %v9182_v6 = vld [vmem:[#allocation39_spill] sm:$0xff]  ;;  %v9186_v46 = vld [vmem:[#allocation6_spill] sm:$0xff] }
 0xb5e   : > { %v4745_v52 = vadd.f32 %v9178_v61, %v4696_v33  ;;  %v4750_v27 = vadd.f32 %v4742_v38, %v4701_v43  ;;  %v4782_v0 = vsel %vm4766_vm10, %v8512_v51, 0.0  ;;  %v4751_v14 = vadd.f32 %v4743_v32, %v4702_v17  ;;  %v9187_v33 = vld [vmem:[#allocation61_spill] sm:$0xff]  ;;  %v9189_v32 = vld [vmem:[#allocation55_spill] sm:$0xff] }
 0xb5f   : > { %v4790_v25 = vmul.f32 %v9179_v40, %v8502_v13  ;;  %v4791_v58 = vmul.f32 %v9179_v40, %v4782_v0  ;;  %v4792_v20 = vmul.f32 0.0, %v9179_v40  ;;  %v4793_v44 = vadd.f32 %v9180_v29, %v4744_v12  ;;  %v9190_v12 = vld [vmem:[#allocation62_spill] sm:$0xff] }
 0xb60   : > { %v4794_v50 = vadd.f32 %v9181_v57, %v4745_v52  ;;  %vm4815_vm11 = vcmp.lt.s32.totalorder %v9171_v2, 52  ;;  %v4797_v28 = vadd.f32 %v4789_v9, %v4748_v39  ;;  %v4838_v47 = vmul.f32 %v9182_v6, %v8469_v15  ;;  %v9185_v15 = vld [vmem:[#allocation40_spill] sm:$0xff]  ;;  %v9194_v57 = vld [vmem:[#allocation54_spill] sm:$0xff] }
 0xb61   : > { %v4798_v24 = vadd.f32 %v4790_v25, %v4749_v21  ;;  %v4799_v51 = vadd.f32 %v4791_v58, %v4750_v27  ;;  %v4831_v59 = vsel %vm4815_vm11, %v8531_v41, 0.0  ;;  %v4800_v60 = vadd.f32 %v4792_v20, %v4751_v14  ;;  %v9192_v9 = vld [vmem:[#allocation56_spill] sm:$0xff] }
 0xb62   : > { %v4839_v13 = vmul.f32 %v9182_v6, %v8523_v63  ;;  %v4840_v3 = vmul.f32 %v9182_v6, %v4831_v59  ;;  %v4841_v26 = vmul.f32 0.0, %v9182_v6  ;;  %v4842_v10 = vadd.f32 %v9183_v35, %v4793_v44  ;;  %v9196_v35 = vld [vmem:[#allocation8_spill] sm:$0xff] }
 0xb63   : > { %v4843_v62 = vadd.f32 %v9184_v18, %v4794_v50  ;;  %vm4864_vm12 = vcmp.lt.s32.totalorder %v9171_v2, 51  ;;  %v4846_v48 = vadd.f32 %v4838_v47, %v4797_v28  ;;  %v4887_v53 = vmul.f32 %v9185_v15, %v8546_v23  ;;  %v9188_v23 = vld [vmem:[#allocation41_spill] sm:$0xff]  ;;  %v9195_v47 = vld [vmem:[#allocation59_spill] sm:$0xff] }
 0xb64   : > { %v4847_v16 = vadd.f32 %v4839_v13, %v4798_v24  ;;  %v4848_v41 = vadd.f32 %v4840_v3, %v4799_v51  ;;  %v4880_v36 = vsel %vm4864_vm12, %v8558_v45, 0.0  ;;  %v4849_v49 = vadd.f32 %v4841_v26, %v4800_v60 }
 0xb65   : > { %v4888_v63 = vmul.f32 %v9185_v15, %v8552_v34  ;;  %v4889_v11 = vmul.f32 %v9185_v15, %v4880_v36  ;;  %v4890_v56 = vmul.f32 0.0, %v9185_v15  ;;  %v4891_v1 = vadd.f32 %v9186_v46, %v4842_v10 }
 0xb66   : > { %v4892_v8 = vadd.f32 %v9187_v33, %v4843_v62  ;;  %vm4913_vm13 = vcmp.lt.s32.totalorder %v9171_v2, 50  ;;  %v4895_v43 = vadd.f32 %v4887_v53, %v4846_v48  ;;  %v4936_v4 = vmul.f32 %v9188_v23, %v8574_v5  ;;  %v9191_v5 = vld [vmem:[#allocation43_spill] sm:$0xff] }
 0xb67   : > { %v4896_v37 = vadd.f32 %v4888_v63, %v4847_v16  ;;  %v4897_v45 = vadd.f32 %v4889_v11, %v4848_v41  ;;  %v4929_v17 = vsel %vm4913_vm13, %v8581_v54, 0.0  ;;  %v4898_v31 = vadd.f32 %v4890_v56, %v4849_v49 }
 0xb68   : > { %v4937_v34 = vmul.f32 %v9188_v23, %v8568_v19  ;;  %v4938_v7 = vmul.f32 %v9188_v23, %v4929_v17  ;;  %v4939_v38 = vmul.f32 0.0, %v9188_v23  ;;  %v4940_v22 = vadd.f32 %v9189_v32, %v4891_v1 }
 0xb69   : > { %v4941_v61 = vadd.f32 %v9190_v12, %v4892_v8  ;;  %vm4962_vm14 = vcmp.lt.s32.totalorder %v9171_v2, 49  ;;  %v4944_v52 = vadd.f32 %v4936_v4, %v4895_v43  ;;  %v4985_v19 = vmul.f32 %v9191_v5, %v8605_v30  ;;  %v9193_v2 = vld [vmem:[#allocation63_spill] sm:$0xff] }
 0xb6a   : > { %v4945_v39 = vadd.f32 %v4937_v34, %v4896_v37  ;;  %v4946_v54 = vadd.f32 %v4938_v7, %v4897_v45  ;;  %v4978_v21 = vsel %vm4962_vm14, %v8611_v42, 0.0  ;;  %v4947_v27 = vadd.f32 %v4939_v38, %v4898_v31 }
 0xb6b   : > { %v4986_v0 = vmul.f32 %v9191_v5, %v8599_v55  ;;  %v4987_v14 = vmul.f32 %v9191_v5, %v4978_v21  ;;  %v4988_v40 = vmul.f32 0.0, %v9191_v5  ;;  %v4989_v25 = vadd.f32 %v9192_v9, %v4940_v22 }
 0xb6c   : > { %v4990_v58 = vadd.f32 %v9193_v2, %v4941_v61  ;;  %v4993_v20 = vadd.f32 %v4985_v19, %v4944_v52  ;;  %v5033_v3 = vmul.f32 %v9195_v47, %v9195_v47  ;;  %v5034_v18 = vmul.f32 %v9196_v35, %v9196_v35 }
 0xb6d   : > { %v4994_v42 = vadd.f32 %v4986_v0, %v4945_v39  ;;  %v4995_v29 = vadd.f32 %v4987_v14, %v4946_v54  ;;  %v4996_v44 = vadd.f32 %v4988_v40, %v4947_v27  ;;  %v5001_v30 = vadd.f32 %v9194_v57, %v4989_v25 }
 0xb6e   : > { %v5002_v55 = vadd.f32 %v9194_v57, %v4990_v58  ;;  %v5005_v50 = vadd.f32 %v9194_v57, %v4993_v20 }
 0xb6f   : > { %v5006_v28 = vadd.f32 %v9194_v57, %v4994_v42  ;;  %v5007_v24 = vadd.f32 %v9194_v57, %v4995_v29  ;;  %5009 = vst [vmem:[%s8253_s21] sm:$0xff] %v5001_v30  ;;  %v5031_v59 = vmul.f32 %v5001_v30, %v5001_v30  ;;  %v5008_v6 = vadd.f32 %v9194_v57, %v4996_v44 }
 0xb70   : > { %v5017_v51 = vadd.f32 %v5002_v55, %v5001_v30  ;;  %v5032_v60 = vmul.f32 %v5002_v55, %v5002_v55  ;;  %5010 = vst [vmem:[%s8253_s21 + $0x8] sm:$0xff] %v5002_v55  ;;  %v5035_v16 = vmul.f32 %v5005_v50, %v5005_v50 }
 0xb71   : > { %5013 = vst [vmem:[%s8253_s21 + $0x20] sm:$0xff] %v5005_v50  ;;  %v5036_v49 = vmul.f32 %v5006_v28, %v5006_v28  ;;  %v5037_v63 = vmul.f32 %v5007_v24, %v5007_v24  ;;  %v5038_v46 = vmul.f32 %v5008_v6, %v5008_v6 }
 0xb72   : > { %v5018_v13 = vadd.f32 %v5017_v51, %v9195_v47  ;;  %v5039_v26 = vadd.f32 %v5032_v60, %v5031_v59  ;;  %5014 = vst [vmem:[%s8253_s21 + $0x28] sm:$0xff] %v5006_v28 }
 0xb73   : > { %5015 = vst [vmem:[%s8253_s21 + $0x30] sm:$0xff] %v5007_v24 }
 0xb74   : > { %v5019_v10 = vadd.f32 %v5018_v13, %v9196_v35  ;;  %v5040_v62 = vadd.f32 %v5039_v26, %v5033_v3  ;;  %5016 = vst [vmem:[%s8253_s21 + $0x38] sm:$0xff] %v5008_v6 }
 0xb76   : > { %v5020_v48 = vadd.f32 %v5019_v10, %v5005_v50  ;;  %v5041_v41 = vadd.f32 %v5040_v62, %v5034_v18 }
 0xb78   : > { %v5021_v36 = vadd.f32 %v5020_v48, %v5006_v28  ;;  %v5042_v15 = vadd.f32 %v5041_v41, %v5035_v16 }
 0xb7a   : > { %v5022_v53 = vadd.f32 %v5021_v36, %v5007_v24  ;;  %v5043_v11 = vadd.f32 %v5042_v15, %v5036_v49 }
 0xb7c   : > { %v5023_v56 = vadd.f32 %v5022_v53, %v5008_v6  ;;  %v5044_v1 = vadd.f32 %v5043_v11, %v5037_v63 }
 0xb7e   : > { %v5024_v33 = vrot.slane %v5023_v56, 4  ;;  %v5045_v8 = vadd.f32 %v5044_v1, %v5038_v46 }
 0xb80   : > { %v5025_v43 = vadd.f32 %v5024_v33, %v5023_v56  ;;  %v5046_v37 = vrot.slane %v5045_v8, 4 }
 0xb82   : > { %v5026_v45 = vrot.slane %v5025_v43, 2  ;;  %v5047_v17 = vadd.f32 %v5046_v37, %v5045_v8 }
 0xb84   : > { %v5027_v31 = vadd.f32 %v5026_v45, %v5025_v43  ;;  %v5048_v23 = vrot.slane %v5047_v17, 2 }
 0xb86   : > { %v5028_v4 = vrot.slane %v5027_v31, 1  ;;  %v5049_v34 = vadd.f32 %v5048_v23, %v5047_v17 }
 0xb88   : > { %v5029_v7 = vadd.f32 %v5028_v4, %v5027_v31  ;;  %v5050_v38 = vrot.slane %v5049_v34, 1 }
 0xb8a   : > { %5030 = vst [vmem:[%s655_s2] sm:$0x1] %v5029_v7  ;;  %v5051_v32 = vadd.f32 %v5050_v38, %v5049_v34 }
 0xb8c   : > { %5052 = vst [vmem:[%s658_s3] sm:$0x1] %v5051_v32 }
 0xb8d PF: > { %s31_s1 = sadd.s32 1, %s5826_s1  }
 0xb8e   : > { %p28_p4 = scmp.ge.s32.totalorder %s31_s1, 4  }
 0xb90   :  { %30 = sbr.rel (!%p28_p4) target bundleno = 6 (0x6), region = 157 }

</bundles_post_ra>
